<compile_context>
chip_gen: v7x
topology: tpu7x:2x2x1
jax: 0.10.0
libtpu: 0.0.40
codegen_flags: <defaults>
</compile_context>

<pallas_src>
import math

import jax
import jax.numpy as jnp
from jax import lax
from jax.experimental import pallas as pl
from jax.experimental.pallas import tpu as pltpu

# ---------------- model config (small, consistent with the module) ----------
B = 2                        # batch
N = 32                       # sequence length
D = 32                       # dim_model
H = 2                        # num_heads
DH = 64                      # dim_head (SelfAttention default)
ID = H * DH                  # attention inner dim = 128
M = int(DH * math.log(DH))   # Performer nb_features = 266
MP = 384                     # M padded to a multiple of 128 (lane aligned)
CI = D * 2                   # conformer inner dim (expansion_factor=2) = 64
K = 31                       # conformer depthwise kernel size
PAD_L = K // 2               # same padding (15, 15)
NPAD = 64                    # padded rows per batch for the depthwise conv
Z_OFF = 16                   # sublane-aligned placement of z in the pad buffer
LN_EPS = 1e-5
KERNEL_EPS = 1e-4
BN = B * N                   # 64 rows: batch stacked on the sublane axis


# ---------------- the fused kernel -------------------------------------------
def _encoder_layer_kernel(
    x_ref,                        # (BN, D)            f32
    ln1w_ref, ln1b_ref,           # (1, D)             f32
    wqkv_ref, bqkv_ref,           # (D, 3*ID) bf16 / (1, 3*ID) f32
    projt_ref,                    # (DH, MP)           bf16 (cols >= M are 0)
    wo_ref, bo_ref,               # (ID, D) bf16 / (1, D) f32
    ln2w_ref, ln2b_ref,           # (1, D)             f32
    w1_ref, b1_ref,               # (D, 2*CI) bf16 / (1, 2*CI) f32
    wdw_ref, bdw_ref,             # (K, CI) / (1, CI)  f32
    w2_ref, b2_ref,               # (CI, D) bf16 / (1, D) f32
    o_ref,                        # (BN, D)            f32
    st_ref,                       # (4*BN, DH) f32 scratch: [q_h0;q_h1;k_h0;k_h1]
    attn_ref,                     # (BN, D)    f32 scratch
    conv_ref,                     # (BN, CI)   f32 scratch
    zpad_ref,                     # (B*NPAD, CI) f32 scratch (padded z)
):
    f32, bf16 = jnp.float32, jnp.bfloat16
    x = x_ref[...]                                                  # (BN, D)

    # ---------- SelfAttention block: LN -> qkv -> Performer -> out proj ------
    mu = jnp.mean(x, axis=-1, keepdims=True)
    var = jnp.mean(jnp.square(x - mu), axis=-1, keepdims=True)
    xn = (x - mu) * lax.rsqrt(var + LN_EPS) * ln1w_ref[...] + ln1b_ref[...]

    # fused q/k/v projection: single lane-dense (BN, 384) matmul (bf16 -> f32)
    qkv = jnp.dot(xn.astype(bf16), wqkv_ref[...],
                  preferred_element_type=f32) + bqkv_ref[...]
    q = qkv[:, :ID]
    k = qkv[:, ID:2 * ID]
    v = qkv[:, 2 * ID:]                                             # (BN, 128)

    # stack {q, k} x heads on the sublane axis -> one big feature matmul
    st_ref[pl.ds(0 * BN, BN), :] = q[:, :DH]
    st_ref[pl.ds(1 * BN, BN), :] = q[:, DH:]
    st_ref[pl.ds(2 * BN, BN), :] = k[:, :DH]
    st_ref[pl.ds(3 * BN, BN), :] = k[:, DH:]
    st = st_ref[...]                                                # (256, DH)

    dn = DH ** (-0.25)          # data_normalizer
    ratio = M ** (-0.5)         # uses the REAL feature count, not MP
    dash = jnp.dot((st * dn).astype(bf16), projt_ref[...],
                   preferred_element_type=f32)                      # (256, MP)
    diag = jnp.sum(st * st, axis=-1, keepdims=True) * (0.5 * dn * dn)

    q_dash, k_dash = dash[:2 * BN], dash[2 * BN:]                   # (128, MP)
    q_diag, k_diag = diag[:2 * BN], diag[2 * BN:]

    # mask padded feature columns: exclude from the q row-max and zero in k_feat
    col = lax.broadcasted_iota(jnp.int32, (2 * BN, MP), 1)
    valid = col < M
    q_max = jnp.max(jnp.where(valid, q_dash, -1e30), axis=-1, keepdims=True)
    q_feat = ratio * (jnp.exp(q_dash - q_diag - q_max) + KERNEL_EPS)
    # keys: eps inside exp, no max subtraction -- faithful to the PyTorch
    # _softmax_kernel(is_query=False) in the spec.
    k_feat = jnp.where(valid,
                       ratio * jnp.exp(k_dash - k_diag + KERNEL_EPS), 0.0)

    # non-causal linear attention, per (batch, head); to_out folded into v:
    #   out_h @ Wo_h == d_inv * q_feat @ (k_feat^T @ (v_h @ Wo_h))
    for b in range(B):
        acc_b = None
        for h in range(H):
            r0 = h * BN + b * N
            qf = q_feat[r0:r0 + N]                                  # (N, MP)
            kf = k_feat[r0:r0 + N]                                  # (N, MP)
            vh = v[b * N:(b + 1) * N, h * DH:(h + 1) * DH]          # (N, DH)
            k_sum = jnp.sum(kf, axis=0, keepdims=True)              # (1, MP)
            d_inv = pl.reciprocal(
                jnp.sum(qf * k_sum, axis=-1, keepdims=True), approx=True)
            vproj = jnp.dot(vh.astype(bf16), wo_ref[h * DH:(h + 1) * DH, :],
                            preferred_element_type=f32)             # (N, D)
            # context^T = vproj^T @ kf : the implicit transpose is on (32, 32)
            ctx_t = lax.dot_general(vproj.astype(bf16), kf.astype(bf16),
                                    (((0,), (0,)), ((), ())),
                                    preferred_element_type=f32)     # (D, MP)
            # A @ B^T (contract the lane dims) -> no transpose of a (., MP) tile
            contrib = lax.dot_general(qf.astype(bf16), ctx_t.astype(bf16),
                                      (((1,), (1,)), ((), ())),
                                      preferred_element_type=f32)   # (N, D)
            term = contrib * d_inv
            acc_b = term if acc_b is None else acc_b + term
        attn_ref[pl.ds(b * N, N), :] = acc_b
    y1 = x + attn_ref[...] + bo_ref[...]                            # residual

    # ---------- Conformer conv block ------------------------------------------
    mu2 = jnp.mean(y1, axis=-1, keepdims=True)
    var2 = jnp.mean(jnp.square(y1 - mu2), axis=-1, keepdims=True)
    yn = (y1 - mu2) * lax.rsqrt(var2 + LN_EPS) * ln2w_ref[...] + ln2b_ref[...]

    # pointwise Conv1d(D -> 2*CI, k=1) + GLU
    g = jnp.dot(yn.astype(bf16), w1_ref[...],
                preferred_element_type=f32) + b1_ref[...]           # (BN, 2CI)
    z = g[:, :CI] * jax.nn.sigmoid(g[:, CI:])                       # (BN, CI)

    # depthwise Conv1d(CI, k=31, groups=CI), 'same' padding, per batch.
    # z is pre-padded once; every tap is a plain shifted slice * weight + add.
    zpad_ref[...] = jnp.zeros((B * NPAD, CI), f32)
    for b in range(B):
        zpad_ref[pl.ds(b * NPAD + Z_OFF, N), :] = z[b * N:(b + 1) * N, :]
    wdw = wdw_ref[...]                                              # (K, CI)
    for b in range(B):
        zp_b = zpad_ref[pl.ds(b * NPAD, NPAD), :]                   # (NPAD, CI)
        acc = None
        for j in range(K):
            # output t uses z[t + j - 15]  ->  padded local row t + j + 1
            term = zp_b[j + 1:j + 1 + N, :] * wdw[j:j + 1, :]
            acc = term if acc is None else acc + term
        conv_ref[pl.ds(b * N, N), :] = acc
    c = conv_ref[...] + bdw_ref[...]
    s = c * jax.nn.sigmoid(c)                                       # Swish

    # pointwise Conv1d(CI -> D, k=1) + residual (Dropout p=0 -> identity)
    out = jnp.dot(s.astype(bf16), w2_ref[...],
                  preferred_element_type=f32) + b2_ref[...]
    o_ref[...] = y1 + out


# ---------------- pallas_call wrapper -----------------------------------------
def _pack_params(params):
    """f32 reference params -> kernel operands (fused qkv, padded bf16 projt)."""
    (ln1w, ln1b, wq, bq, wk, bk, wv, bv, projt, wo, bo,
     ln2w, ln2b, w1, b1, wdw, bdw, w2, b2) = params
    bf16 = jnp.bfloat16
    wqkv = jnp.concatenate([wq, wk, wv], axis=1).astype(bf16)       # (D, 3*ID)
    bqkv = jnp.concatenate([bq, bk, bv], axis=1)                    # (1, 3*ID)
    projt_p = jnp.zeros((DH, MP), jnp.float32).at[:, :M].set(projt).astype(bf16)
    return (ln1w, ln1b, wqkv, bqkv, projt_p, wo.astype(bf16), bo,
            ln2w, ln2b, w1.astype(bf16), b1, wdw, bdw, w2.astype(bf16), b2)


@jax.jit
def encoder_layer_pallas(x, params):
    ops = _pack_params(params)
    x2 = x.reshape(BN, D)
    vmem_spec = pl.BlockSpec(memory_space=pltpu.MemorySpace.VMEM)
    out = pl.pallas_call(
        _encoder_layer_kernel,
        out_shape=jax.ShapeDtypeStruct((BN, D), jnp.float32),
        in_specs=[vmem_spec] * (1 + len(ops)),
        out_specs=vmem_spec,
        scratch_shapes=[
            pltpu.VMEM((4 * BN, DH), jnp.float32),   # stacked q/k heads
            pltpu.VMEM((BN, D), jnp.float32),        # attention output
            pltpu.VMEM((BN, CI), jnp.float32),       # depthwise conv output
            pltpu.VMEM((B * NPAD, CI), jnp.float32), # padded z buffer
        ],
    )(x2, *ops)
    return out.reshape(B, N, D)


# ---------------- deterministic parameter construction ------------------------
def _gaussian_orthogonal_random_matrix(key, nb_rows, nb_cols):
    n_blocks = pl.cdiv(nb_rows, nb_cols)
    keys = jax.random.split(key, n_blocks + 1)
    blocks = []
    for i in range(n_blocks):
        g = jax.random.normal(keys[i], (nb_cols, nb_cols), jnp.float32)
        qmat, _ = jnp.linalg.qr(g)
        blocks.append(qmat.T)
    final = jnp.concatenate(blocks, axis=0)[:nb_rows]
    mult = jnp.linalg.norm(
        jax.random.normal(keys[-1], (nb_rows, nb_cols), jnp.float32), axis=1)
    return mult[:, None] * final                                    # (rows, cols)


def init_params(key):
    keys = jax.random.split(key, 8)

    def linear(k, fan_in, fan_out):
        bound = 1.0 / math.sqrt(fan_in)
        kw, kb = jax.random.split(k)
        w = jax.random.uniform(kw, (fan_in, fan_out), jnp.float32, -bound, bound)
        b = jax.random.uniform(kb, (1, fan_out), jnp.float32, -bound, bound)
        return w, b

    ln1w = jnp.ones((1, D), jnp.float32)
    ln1b = jnp.zeros((1, D), jnp.float32)
    wq, bq = linear(keys[0], D, ID)
    wk, bk = linear(keys[1], D, ID)
    wv, bv = linear(keys[2], D, ID)
    wo, bo = linear(keys[3], ID, D)
    projt = _gaussian_orthogonal_random_matrix(keys[4], M, DH).T    # (DH, M)

    ln2w = jnp.ones((1, D), jnp.float32)
    ln2b = jnp.zeros((1, D), jnp.float32)
    w1, b1 = linear(keys[5], D, 2 * CI)
    kd1, kd2 = jax.random.split(keys[6])
    bound = 1.0 / math.sqrt(K)
    wdw = jax.random.uniform(kd1, (K, CI), jnp.float32, -bound, bound)
    bdw = jax.random.uniform(kd2, (1, CI), jnp.float32, -bound, bound)
    w2, b2 = linear(keys[7], CI, D)
    return (ln1w, ln1b, wq, bq, wk, bk, wv, bv, projt, wo, bo,
            ln2w, ln2b, w1, b1, wdw, bdw, w2, b2)


# ---------------- pure-JAX f32 reference (sanity check) -----------------------
def encoder_layer_ref(x, params):
    (ln1w, ln1b, wq, bq, wk, bk, wv, bv, projt, wo, bo,
     ln2w, ln2b, w1, b1, wdw, bdw, w2, b2) = params
    mu = x.mean(-1, keepdims=True)
    var = ((x - mu) ** 2).mean(-1, keepdims=True)
    xn = (x - mu) / jnp.sqrt(var + LN_EPS) * ln1w[0] + ln1b[0]
    q = xn @ wq + bq[0]
    k = xn @ wk + bk[0]
    v = xn @ wv + bv[0]
    split = lambda t: t.reshape(B, N, H, DH).transpose(0, 2, 1, 3)
    q, k, v = map(split, (q, k, v))
    dn, ratio = DH ** (-0.25), M ** (-0.5)
    qd = jnp.einsum('bhnd,dm->bhnm', q * dn, projt)
    kd = jnp.einsum('bhnd,dm->bhnm', k * dn, projt)
    dq = (q ** 2).sum(-1, keepdims=True) * 0.5 * dn * dn
    dk = (k ** 2).sum(-1, keepdims=True) * 0.5 * dn * dn
    qf = ratio * (jnp.exp(qd - dq - qd.max(-1, keepdims=True)) + KERNEL_EPS)
    kf = ratio * jnp.exp(kd - dk + KERNEL_EPS)
    ksum = kf.sum(-2)
    dinv = 1.0 / jnp.einsum('bhnm,bhm->bhn', qf, ksum)
    ctx = jnp.einsum('bhnm,bhnd->bhmd', kf, v)
    o = jnp.einsum('bhmd,bhnm,bhn->bhnd', ctx, qf, dinv)
    o = o.transpose(0, 2, 1, 3).reshape(B, N, ID)
    x = x + o @ wo + bo[0]

    mu = x.mean(-1, keepdims=True)
    var = ((x - mu) ** 2).mean(-1, keepdims=True)
    xn = (x - mu) / jnp.sqrt(var + LN_EPS) * ln2w[0] + ln2b[0]
    y = xn @ w1 + b1[0]
    z = y[..., :CI] * jax.nn.sigmoid(y[..., CI:])
    zp = jnp.pad(z, ((0, 0), (PAD_L, PAD_L), (0, 0)))
    acc = jnp.zeros((B, N, CI), jnp.float32) + bdw[0]
    for j in range(K):
        acc = acc + zp[:, j:j + N, :] * wdw[j]
    s = acc * jax.nn.sigmoid(acc)
    return x + s @ w2 + b2[0]


# ---------------- main ---------------------------------------------------------
if __name__ == "__main__":
    root = jax.random.PRNGKey(0)
    kx, kp = jax.random.split(root)
    phone = jax.random.normal(kx, (B, N, D), jnp.float32)
    params = init_params(kp)

    out = jax.block_until_ready(encoder_layer_pallas(phone, params))
    ref = encoder_layer_ref(phone, params)
    max_err = float(jnp.max(jnp.abs(out - ref)))
    # bf16 MXU inputs (f32 accumulation) -> slightly looser tolerance than f32
    assert out.shape == (B, N, D), out.shape
    assert jnp.allclose(out, ref, atol=5e-2, rtol=5e-2), max_err
    print("KERNEL_OK")
</pallas_src>

<mosaic_0001>
module attributes {stable_mosaic.version = 11 : i64} {
  func.func @_encoder_layer_kernel(%arg0: memref<64x32xf32, #tpu.memory_space<vmem>>, %arg1: memref<1x32xf32, #tpu.memory_space<vmem>>, %arg2: memref<1x32xf32, #tpu.memory_space<vmem>>, %arg3: memref<32x384xbf16, #tpu.memory_space<vmem>>, %arg4: memref<1x384xf32, #tpu.memory_space<vmem>>, %arg5: memref<64x384xbf16, #tpu.memory_space<vmem>>, %arg6: memref<128x32xbf16, #tpu.memory_space<vmem>>, %arg7: memref<1x32xf32, #tpu.memory_space<vmem>>, %arg8: memref<1x32xf32, #tpu.memory_space<vmem>>, %arg9: memref<1x32xf32, #tpu.memory_space<vmem>>, %arg10: memref<32x128xbf16, #tpu.memory_space<vmem>>, %arg11: memref<1x128xf32, #tpu.memory_space<vmem>>, %arg12: memref<31x64xf32, #tpu.memory_space<vmem>>, %arg13: memref<1x64xf32, #tpu.memory_space<vmem>>, %arg14: memref<64x32xbf16, #tpu.memory_space<vmem>>, %arg15: memref<1x32xf32, #tpu.memory_space<vmem>>, %arg16: memref<64x32xf32, #tpu.memory_space<vmem>>, %arg17: memref<256x64xf32, #tpu.memory_space<vmem>>, %arg18: memref<64x32xf32, #tpu.memory_space<vmem>>, %arg19: memref<64x64xf32, #tpu.memory_space<vmem>>, %arg20: memref<128x64xf32, #tpu.memory_space<vmem>>) attributes {dimension_semantics = [], scalar_prefetch = 0 : i64, scratch_operands = 4 : i64, tpu.core_type = #tpu.core_type<tc>} {
    %c0 = arith.constant 0 : index
    %c0_0 = arith.constant 0 : index
    %0 = vector.load %arg0[%c0, %c0_0] : memref<64x32xf32, #tpu.memory_space<vmem>>, vector<64x32xf32>
    %cst = arith.constant dense<0.000000e+00> : vector<64xf32>
    %1 = vector.multi_reduction <add>, %0, %cst [1] : vector<64x32xf32> to vector<64xf32>
    %2 = vector.shape_cast %1 : vector<64xf32> to vector<64x1xf32>
    %cst_1 = arith.constant 3.200000e+01 : f32
    %3 = vector.broadcast %cst_1 : f32 to vector<64x1xf32>
    %4 = arith.divf %2, %3 : vector<64x1xf32>
    %5 = vector.broadcast %4 : vector<64x1xf32> to vector<64x32xf32>
    %6 = arith.subf %0, %5 : vector<64x32xf32>
    %7 = arith.mulf %6, %6 : vector<64x32xf32>
    %cst_2 = arith.constant dense<0.000000e+00> : vector<64xf32>
    %8 = vector.multi_reduction <add>, %7, %cst_2 [1] : vector<64x32xf32> to vector<64xf32>
    %9 = vector.shape_cast %8 : vector<64xf32> to vector<64x1xf32>
    %cst_3 = arith.constant 3.200000e+01 : f32
    %10 = vector.broadcast %cst_3 : f32 to vector<64x1xf32>
    %11 = arith.divf %9, %10 : vector<64x1xf32>
    %12 = vector.broadcast %4 : vector<64x1xf32> to vector<64x32xf32>
    %13 = arith.subf %0, %12 : vector<64x32xf32>
    %cst_4 = arith.constant 9.99999974E-6 : f32
    %14 = vector.broadcast %cst_4 : f32 to vector<64x1xf32>
    %15 = arith.addf %11, %14 : vector<64x1xf32>
    %16 = math.rsqrt %15 : vector<64x1xf32>
    %17 = vector.broadcast %16 : vector<64x1xf32> to vector<64x32xf32>
    %18 = arith.mulf %13, %17 : vector<64x32xf32>
    %c0_5 = arith.constant 0 : index
    %c0_6 = arith.constant 0 : index
    %19 = vector.load %arg1[%c0_5, %c0_6] : memref<1x32xf32, #tpu.memory_space<vmem>>, vector<1x32xf32>
    %20 = vector.broadcast %19 : vector<1x32xf32> to vector<64x32xf32>
    %21 = arith.mulf %18, %20 : vector<64x32xf32>
    %c0_7 = arith.constant 0 : index
    %c0_8 = arith.constant 0 : index
    %22 = vector.load %arg2[%c0_7, %c0_8] : memref<1x32xf32, #tpu.memory_space<vmem>>, vector<1x32xf32>
    %23 = vector.broadcast %22 : vector<1x32xf32> to vector<64x32xf32>
    %24 = arith.addf %21, %23 : vector<64x32xf32>
    %25 = arith.truncf %24 : vector<64x32xf32> to vector<64x32xbf16>
    %c0_9 = arith.constant 0 : index
    %c0_10 = arith.constant 0 : index
    %26 = vector.load %arg3[%c0_9, %c0_10] : memref<32x384xbf16, #tpu.memory_space<vmem>>, vector<32x384xbf16>
    %cst_11 = arith.constant dense<0.000000e+00> : vector<64x384xf32>
    %27 = tpu.matmul %25, %26, %cst_11 {dimension_numbers = #tpu.dot_dimension_numbers<[1], [0], [0], [1], [0, 0, 1, 1], [], []>} : vector<64x32xbf16>, vector<32x384xbf16>, vector<64x384xf32> -> vector<64x384xf32>
    %c0_12 = arith.constant 0 : index
    %c0_13 = arith.constant 0 : index
    %28 = vector.load %arg4[%c0_12, %c0_13] : memref<1x384xf32, #tpu.memory_space<vmem>>, vector<1x384xf32>
    %29 = vector.broadcast %28 : vector<1x384xf32> to vector<64x384xf32>
    %30 = arith.addf %27, %29 : vector<64x384xf32>
    %31 = vector.extract_strided_slice %30 {offsets = [0, 0], sizes = [64, 128], strides = [1, 1]} : vector<64x384xf32> to vector<64x128xf32>
    %32 = vector.extract_strided_slice %30 {offsets = [0, 128], sizes = [64, 128], strides = [1, 1]} : vector<64x384xf32> to vector<64x128xf32>
    %33 = vector.extract_strided_slice %30 {offsets = [0, 256], sizes = [64, 128], strides = [1, 1]} : vector<64x384xf32> to vector<64x128xf32>
    %34 = vector.extract_strided_slice %31 {offsets = [0, 0], sizes = [64, 64], strides = [1, 1]} : vector<64x128xf32> to vector<64x64xf32>
    %c0_14 = arith.constant 0 : index
    %c0_15 = arith.constant 0 : index
    %35 = vector.load %arg17[%c0_14, %c0_15] : memref<256x64xf32, #tpu.memory_space<vmem>>, vector<64x64xf32>
    tpu.vector_store %arg17[%c0_14, %c0_15], %34 {strides = array<i32>} : memref<256x64xf32, #tpu.memory_space<vmem>>, vector<64x64xf32>,
    %36 = vector.extract_strided_slice %31 {offsets = [0, 64], sizes = [64, 64], strides = [1, 1]} : vector<64x128xf32> to vector<64x64xf32>
    %c64 = arith.constant 64 : index
    %c0_16 = arith.constant 0 : index
    %37 = vector.load %arg17[%c64, %c0_16] : memref<256x64xf32, #tpu.memory_space<vmem>>, vector<64x64xf32>
    tpu.vector_store %arg17[%c64, %c0_16], %36 {strides = array<i32>} : memref<256x64xf32, #tpu.memory_space<vmem>>, vector<64x64xf32>,
    %38 = vector.extract_strided_slice %32 {offsets = [0, 0], sizes = [64, 64], strides = [1, 1]} : vector<64x128xf32> to vector<64x64xf32>
    %c128 = arith.constant 128 : index
    %c0_17 = arith.constant 0 : index
    %39 = vector.load %arg17[%c128, %c0_17] : memref<256x64xf32, #tpu.memory_space<vmem>>, vector<64x64xf32>
    tpu.vector_store %arg17[%c128, %c0_17], %38 {strides = array<i32>} : memref<256x64xf32, #tpu.memory_space<vmem>>, vector<64x64xf32>,
    %40 = vector.extract_strided_slice %32 {offsets = [0, 64], sizes = [64, 64], strides = [1, 1]} : vector<64x128xf32> to vector<64x64xf32>
    %c192 = arith.constant 192 : index
    %c0_18 = arith.constant 0 : index
    %41 = vector.load %arg17[%c192, %c0_18] : memref<256x64xf32, #tpu.memory_space<vmem>>, vector<64x64xf32>
    tpu.vector_store %arg17[%c192, %c0_18], %40 {strides = array<i32>} : memref<256x64xf32, #tpu.memory_space<vmem>>, vector<64x64xf32>,
    %c0_19 = arith.constant 0 : index
    %c0_20 = arith.constant 0 : index
    %42 = vector.load %arg17[%c0_19, %c0_20] : memref<256x64xf32, #tpu.memory_space<vmem>>, vector<256x64xf32>
    %cst_21 = arith.constant 0.353553385 : f32
    %43 = vector.broadcast %cst_21 : f32 to vector<256x64xf32>
    %44 = arith.mulf %42, %43 : vector<256x64xf32>
    %45 = arith.truncf %44 : vector<256x64xf32> to vector<256x64xbf16>
    %c0_22 = arith.constant 0 : index
    %c0_23 = arith.constant 0 : index
    %46 = vector.load %arg5[%c0_22, %c0_23] : memref<64x384xbf16, #tpu.memory_space<vmem>>, vector<64x384xbf16>
    %cst_24 = arith.constant dense<0.000000e+00> : vector<256x384xf32>
    %47 = tpu.matmul %45, %46, %cst_24 {dimension_numbers = #tpu.dot_dimension_numbers<[1], [0], [0], [1], [0, 0, 1, 1], [], []>} : vector<256x64xbf16>, vector<64x384xbf16>, vector<256x384xf32> -> vector<256x384xf32>
    %48 = arith.mulf %42, %42 : vector<256x64xf32>
    %cst_25 = arith.constant dense<0.000000e+00> : vector<256xf32>
    %49 = vector.multi_reduction <add>, %48, %cst_25 [1] : vector<256x64xf32> to vector<256xf32>
    %50 = vector.shape_cast %49 : vector<256xf32> to vector<256x1xf32>
    %cst_26 = arith.constant 6.250000e-02 : f32
    %51 = vector.broadcast %cst_26 : f32 to vector<256x1xf32>
    %52 = arith.mulf %50, %51 : vector<256x1xf32>
    %53 = vector.extract_strided_slice %47 {offsets = [0, 0], sizes = [128, 384], strides = [1, 1]} : vector<256x384xf32> to vector<128x384xf32>
    %54 = vector.extract_strided_slice %47 {offsets = [128, 0], sizes = [128, 384], strides = [1, 1]} : vector<256x384xf32> to vector<128x384xf32>
    %55 = vector.extract_strided_slice %52 {offsets = [0, 0], sizes = [128, 1], strides = [1, 1]} : vector<256x1xf32> to vector<128x1xf32>
    %56 = vector.extract_strided_slice %52 {offsets = [128, 0], sizes = [128, 1], strides = [1, 1]} : vector<256x1xf32> to vector<128x1xf32>
    %57 = tpu.iota {dimensions = array<i32: 1>} : vector<128x384xi32>
    %c266_i32 = arith.constant 266 : i32
    %58 = vector.broadcast %c266_i32 : i32 to vector<128x384xi32>
    %59 = arith.cmpi slt, %57, %58 : vector<128x384xi32>
    %cst_27 = arith.constant -1.000000e+30 : f32
    %60 = vector.broadcast %cst_27 : f32 to vector<128x384xf32>
    %61 = arith.select %59, %53, %60 : vector<128x384xi1>, vector<128x384xf32>
    %cst_28 = arith.constant dense<0xFF800000> : vector<128xf32>
    %62 = vector.multi_reduction <maximumf>, %61, %cst_28 [1] : vector<128x384xf32> to vector<128xf32>
    %63 = vector.shape_cast %62 : vector<128xf32> to vector<128x1xf32>
    %64 = vector.broadcast %55 : vector<128x1xf32> to vector<128x384xf32>
    %65 = arith.subf %53, %64 : vector<128x384xf32>
    %66 = vector.broadcast %63 : vector<128x1xf32> to vector<128x384xf32>
    %67 = arith.subf %65, %66 : vector<128x384xf32>
    %68 = math.exp %67 : vector<128x384xf32>
    %cst_29 = arith.constant 9.99999974E-5 : f32
    %69 = vector.broadcast %cst_29 : f32 to vector<128x384xf32>
    %70 = arith.addf %68, %69 : vector<128x384xf32>
    %cst_30 = arith.constant 0.0613139346 : f32
    %71 = vector.broadcast %cst_30 : f32 to vector<128x384xf32>
    %72 = arith.mulf %71, %70 : vector<128x384xf32>
    %73 = vector.broadcast %56 : vector<128x1xf32> to vector<128x384xf32>
    %74 = arith.subf %54, %73 : vector<128x384xf32>
    %cst_31 = arith.constant 9.99999974E-5 : f32
    %75 = vector.broadcast %cst_31 : f32 to vector<128x384xf32>
    %76 = arith.addf %74, %75 : vector<128x384xf32>
    %77 = math.exp %76 : vector<128x384xf32>
    %cst_32 = arith.constant 0.0613139346 : f32
    %78 = vector.broadcast %cst_32 : f32 to vector<128x384xf32>
    %79 = arith.mulf %78, %77 : vector<128x384xf32>
    %cst_33 = arith.constant 0.000000e+00 : f32
    %80 = vector.broadcast %cst_33 : f32 to vector<128x384xf32>
    %81 = arith.select %59, %79, %80 : vector<128x384xi1>, vector<128x384xf32>
    %82 = vector.extract_strided_slice %72 {offsets = [0, 0], sizes = [32, 384], strides = [1, 1]} : vector<128x384xf32> to vector<32x384xf32>
    %83 = vector.extract_strided_slice %81 {offsets = [0, 0], sizes = [32, 384], strides = [1, 1]} : vector<128x384xf32> to vector<32x384xf32>
    %84 = vector.extract_strided_slice %33 {offsets = [0, 0], sizes = [32, 64], strides = [1, 1]} : vector<64x128xf32> to vector<32x64xf32>
    %cst_34 = arith.constant dense<0.000000e+00> : vector<384xf32>
    %85 = vector.multi_reduction <add>, %83, %cst_34 [0] : vector<32x384xf32> to vector<384xf32>
    %86 = vector.shape_cast %85 : vector<384xf32> to vector<1x384xf32>
    %87 = vector.broadcast %86 : vector<1x384xf32> to vector<32x384xf32>
    %88 = arith.mulf %82, %87 : vector<32x384xf32>
    %cst_35 = arith.constant dense<0.000000e+00> : vector<32xf32>
    %89 = vector.multi_reduction <add>, %88, %cst_35 [1] : vector<32x384xf32> to vector<32xf32>
    %90 = vector.shape_cast %89 : vector<32xf32> to vector<32x1xf32>
    %91 = tpu.reciprocal %90 {approx = true} : vector<32x1xf32> -> vector<32x1xf32>
    %92 = arith.truncf %84 : vector<32x64xf32> to vector<32x64xbf16>
    %c0_36 = arith.constant 0 : index
    %c0_37 = arith.constant 0 : index
    %93 = vector.load %arg6[%c0_36, %c0_37] : memref<128x32xbf16, #tpu.memory_space<vmem>>, vector<64x32xbf16>
    %cst_38 = arith.constant dense<0.000000e+00> : vector<32x32xf32>
    %94 = tpu.matmul %92, %93, %cst_38 {dimension_numbers = #tpu.dot_dimension_numbers<[1], [0], [0], [1], [0, 0, 1, 1], [], []>} : vector<32x64xbf16>, vector<64x32xbf16>, vector<32x32xf32> -> vector<32x32xf32>
    %95 = arith.truncf %94 : vector<32x32xf32> to vector<32x32xbf16>
    %96 = arith.truncf %83 : vector<32x384xf32> to vector<32x384xbf16>
    %cst_39 = arith.constant dense<0.000000e+00> : vector<32x384xf32>
    %97 = tpu.matmul %95, %96, %cst_39 {dimension_numbers = #tpu.dot_dimension_numbers<[0], [0], [1], [1], [0, 1, 1, 1], [], []>} : vector<32x32xbf16>, vector<32x384xbf16>, vector<32x384xf32> -> vector<32x384xf32>
    %98 = arith.truncf %82 : vector<32x384xf32> to vector<32x384xbf16>
    %99 = arith.truncf %97 : vector<32x384xf32> to vector<32x384xbf16>
    %cst_40 = arith.constant dense<0.000000e+00> : vector<32x32xf32>
    %100 = tpu.matmul %98, %99, %cst_40 {dimension_numbers = #tpu.dot_dimension_numbers<[1], [1], [0], [0], [0, 0, 1, 0], [], []>} : vector<32x384xbf16>, vector<32x384xbf16>, vector<32x32xf32> -> vector<32x32xf32>
    %101 = vector.broadcast %91 : vector<32x1xf32> to vector<32x32xf32>
    %102 = arith.mulf %100, %101 : vector<32x32xf32>
    %103 = vector.extract_strided_slice %72 {offsets = [64, 0], sizes = [32, 384], strides = [1, 1]} : vector<128x384xf32> to vector<32x384xf32>
    %104 = vector.extract_strided_slice %81 {offsets = [64, 0], sizes = [32, 384], strides = [1, 1]} : vector<128x384xf32> to vector<32x384xf32>
    %105 = vector.extract_strided_slice %33 {offsets = [0, 64], sizes = [32, 64], strides = [1, 1]} : vector<64x128xf32> to vector<32x64xf32>
    %cst_41 = arith.constant dense<0.000000e+00> : vector<384xf32>
    %106 = vector.multi_reduction <add>, %104, %cst_41 [0] : vector<32x384xf32> to vector<384xf32>
    %107 = vector.shape_cast %106 : vector<384xf32> to vector<1x384xf32>
    %108 = vector.broadcast %107 : vector<1x384xf32> to vector<32x384xf32>
    %109 = arith.mulf %103, %108 : vector<32x384xf32>
    %cst_42 = arith.constant dense<0.000000e+00> : vector<32xf32>
    %110 = vector.multi_reduction <add>, %109, %cst_42 [1] : vector<32x384xf32> to vector<32xf32>
    %111 = vector.shape_cast %110 : vector<32xf32> to vector<32x1xf32>
    %112 = tpu.reciprocal %111 {approx = true} : vector<32x1xf32> -> vector<32x1xf32>
    %113 = arith.truncf %105 : vector<32x64xf32> to vector<32x64xbf16>
    %c64_43 = arith.constant 64 : index
    %c0_44 = arith.constant 0 : index
    %114 = vector.load %arg6[%c64_43, %c0_44] : memref<128x32xbf16, #tpu.memory_space<vmem>>, vector<64x32xbf16>
    %cst_45 = arith.constant dense<0.000000e+00> : vector<32x32xf32>
    %115 = tpu.matmul %113, %114, %cst_45 {dimension_numbers = #tpu.dot_dimension_numbers<[1], [0], [0], [1], [0, 0, 1, 1], [], []>} : vector<32x64xbf16>, vector<64x32xbf16>, vector<32x32xf32> -> vector<32x32xf32>
    %116 = arith.truncf %115 : vector<32x32xf32> to vector<32x32xbf16>
    %117 = arith.truncf %104 : vector<32x384xf32> to vector<32x384xbf16>
    %cst_46 = arith.constant dense<0.000000e+00> : vector<32x384xf32>
    %118 = tpu.matmul %116, %117, %cst_46 {dimension_numbers = #tpu.dot_dimension_numbers<[0], [0], [1], [1], [0, 1, 1, 1], [], []>} : vector<32x32xbf16>, vector<32x384xbf16>, vector<32x384xf32> -> vector<32x384xf32>
    %119 = arith.truncf %103 : vector<32x384xf32> to vector<32x384xbf16>
    %120 = arith.truncf %118 : vector<32x384xf32> to vector<32x384xbf16>
    %cst_47 = arith.constant dense<0.000000e+00> : vector<32x32xf32>
    %121 = tpu.matmul %119, %120, %cst_47 {dimension_numbers = #tpu.dot_dimension_numbers<[1], [1], [0], [0], [0, 0, 1, 0], [], []>} : vector<32x384xbf16>, vector<32x384xbf16>, vector<32x32xf32> -> vector<32x32xf32>
    %122 = vector.broadcast %112 : vector<32x1xf32> to vector<32x32xf32>
    %123 = arith.mulf %121, %122 : vector<32x32xf32>
    %124 = arith.addf %102, %123 : vector<32x32xf32>
    %c0_48 = arith.constant 0 : index
    %c0_49 = arith.constant 0 : index
    %125 = vector.load %arg18[%c0_48, %c0_49] : memref<64x32xf32, #tpu.memory_space<vmem>>, vector<32x32xf32>
    tpu.vector_store %arg18[%c0_48, %c0_49], %124 {strides = array<i32>} : memref<64x32xf32, #tpu.memory_space<vmem>>, vector<32x32xf32>,
    %126 = vector.extract_strided_slice %72 {offsets = [32, 0], sizes = [32, 384], strides = [1, 1]} : vector<128x384xf32> to vector<32x384xf32>
    %127 = vector.extract_strided_slice %81 {offsets = [32, 0], sizes = [32, 384], strides = [1, 1]} : vector<128x384xf32> to vector<32x384xf32>
    %128 = vector.extract_strided_slice %33 {offsets = [32, 0], sizes = [32, 64], strides = [1, 1]} : vector<64x128xf32> to vector<32x64xf32>
    %cst_50 = arith.constant dense<0.000000e+00> : vector<384xf32>
    %129 = vector.multi_reduction <add>, %127, %cst_50 [0] : vector<32x384xf32> to vector<384xf32>
    %130 = vector.shape_cast %129 : vector<384xf32> to vector<1x384xf32>
    %131 = vector.broadcast %130 : vector<1x384xf32> to vector<32x384xf32>
    %132 = arith.mulf %126, %131 : vector<32x384xf32>
    %cst_51 = arith.constant dense<0.000000e+00> : vector<32xf32>
    %133 = vector.multi_reduction <add>, %132, %cst_51 [1] : vector<32x384xf32> to vector<32xf32>
    %134 = vector.shape_cast %133 : vector<32xf32> to vector<32x1xf32>
    %135 = tpu.reciprocal %134 {approx = true} : vector<32x1xf32> -> vector<32x1xf32>
    %136 = arith.truncf %128 : vector<32x64xf32> to vector<32x64xbf16>
    %c0_52 = arith.constant 0 : index
    %c0_53 = arith.constant 0 : index
    %137 = vector.load %arg6[%c0_52, %c0_53] : memref<128x32xbf16, #tpu.memory_space<vmem>>, vector<64x32xbf16>
    %cst_54 = arith.constant dense<0.000000e+00> : vector<32x32xf32>
    %138 = tpu.matmul %136, %137, %cst_54 {dimension_numbers = #tpu.dot_dimension_numbers<[1], [0], [0], [1], [0, 0, 1, 1], [], []>} : vector<32x64xbf16>, vector<64x32xbf16>, vector<32x32xf32> -> vector<32x32xf32>
    %139 = arith.truncf %138 : vector<32x32xf32> to vector<32x32xbf16>
    %140 = arith.truncf %127 : vector<32x384xf32> to vector<32x384xbf16>
    %cst_55 = arith.constant dense<0.000000e+00> : vector<32x384xf32>
    %141 = tpu.matmul %139, %140, %cst_55 {dimension_numbers = #tpu.dot_dimension_numbers<[0], [0], [1], [1], [0, 1, 1, 1], [], []>} : vector<32x32xbf16>, vector<32x384xbf16>, vector<32x384xf32> -> vector<32x384xf32>
    %142 = arith.truncf %126 : vector<32x384xf32> to vector<32x384xbf16>
    %143 = arith.truncf %141 : vector<32x384xf32> to vector<32x384xbf16>
    %cst_56 = arith.constant dense<0.000000e+00> : vector<32x32xf32>
    %144 = tpu.matmul %142, %143, %cst_56 {dimension_numbers = #tpu.dot_dimension_numbers<[1], [1], [0], [0], [0, 0, 1, 0], [], []>} : vector<32x384xbf16>, vector<32x384xbf16>, vector<32x32xf32> -> vector<32x32xf32>
    %145 = vector.broadcast %135 : vector<32x1xf32> to vector<32x32xf32>
    %146 = arith.mulf %144, %145 : vector<32x32xf32>
    %147 = vector.extract_strided_slice %72 {offsets = [96, 0], sizes = [32, 384], strides = [1, 1]} : vector<128x384xf32> to vector<32x384xf32>
    %148 = vector.extract_strided_slice %81 {offsets = [96, 0], sizes = [32, 384], strides = [1, 1]} : vector<128x384xf32> to vector<32x384xf32>
    %149 = vector.extract_strided_slice %33 {offsets = [32, 64], sizes = [32, 64], strides = [1, 1]} : vector<64x128xf32> to vector<32x64xf32>
    %cst_57 = arith.constant dense<0.000000e+00> : vector<384xf32>
    %150 = vector.multi_reduction <add>, %148, %cst_57 [0] : vector<32x384xf32> to vector<384xf32>
    %151 = vector.shape_cast %150 : vector<384xf32> to vector<1x384xf32>
    %152 = vector.broadcast %151 : vector<1x384xf32> to vector<32x384xf32>
    %153 = arith.mulf %147, %152 : vector<32x384xf32>
    %cst_58 = arith.constant dense<0.000000e+00> : vector<32xf32>
    %154 = vector.multi_reduction <add>, %153, %cst_58 [1] : vector<32x384xf32> to vector<32xf32>
    %155 = vector.shape_cast %154 : vector<32xf32> to vector<32x1xf32>
    %156 = tpu.reciprocal %155 {approx = true} : vector<32x1xf32> -> vector<32x1xf32>
    %157 = arith.truncf %149 : vector<32x64xf32> to vector<32x64xbf16>
    %c64_59 = arith.constant 64 : index
    %c0_60 = arith.constant 0 : index
    %158 = vector.load %arg6[%c64_59, %c0_60] : memref<128x32xbf16, #tpu.memory_space<vmem>>, vector<64x32xbf16>
    %cst_61 = arith.constant dense<0.000000e+00> : vector<32x32xf32>
    %159 = tpu.matmul %157, %158, %cst_61 {dimension_numbers = #tpu.dot_dimension_numbers<[1], [0], [0], [1], [0, 0, 1, 1], [], []>} : vector<32x64xbf16>, vector<64x32xbf16>, vector<32x32xf32> -> vector<32x32xf32>
    %160 = arith.truncf %159 : vector<32x32xf32> to vector<32x32xbf16>
    %161 = arith.truncf %148 : vector<32x384xf32> to vector<32x384xbf16>
    %cst_62 = arith.constant dense<0.000000e+00> : vector<32x384xf32>
    %162 = tpu.matmul %160, %161, %cst_62 {dimension_numbers = #tpu.dot_dimension_numbers<[0], [0], [1], [1], [0, 1, 1, 1], [], []>} : vector<32x32xbf16>, vector<32x384xbf16>, vector<32x384xf32> -> vector<32x384xf32>
    %163 = arith.truncf %147 : vector<32x384xf32> to vector<32x384xbf16>
    %164 = arith.truncf %162 : vector<32x384xf32> to vector<32x384xbf16>
    %cst_63 = arith.constant dense<0.000000e+00> : vector<32x32xf32>
    %165 = tpu.matmul %163, %164, %cst_63 {dimension_numbers = #tpu.dot_dimension_numbers<[1], [1], [0], [0], [0, 0, 1, 0], [], []>} : vector<32x384xbf16>, vector<32x384xbf16>, vector<32x32xf32> -> vector<32x32xf32>
    %166 = vector.broadcast %156 : vector<32x1xf32> to vector<32x32xf32>
    %167 = arith.mulf %165, %166 : vector<32x32xf32>
    %168 = arith.addf %146, %167 : vector<32x32xf32>
    %c32 = arith.constant 32 : index
    %c0_64 = arith.constant 0 : index
    %169 = vector.load %arg18[%c32, %c0_64] : memref<64x32xf32, #tpu.memory_space<vmem>>, vector<32x32xf32>
    tpu.vector_store %arg18[%c32, %c0_64], %168 {strides = array<i32>} : memref<64x32xf32, #tpu.memory_space<vmem>>, vector<32x32xf32>,
    %c0_65 = arith.constant 0 : index
    %c0_66 = arith.constant 0 : index
    %170 = vector.load %arg18[%c0_65, %c0_66] : memref<64x32xf32, #tpu.memory_space<vmem>>, vector<64x32xf32>
    %171 = arith.addf %0, %170 : vector<64x32xf32>
    %c0_67 = arith.constant 0 : index
    %c0_68 = arith.constant 0 : index
    %172 = vector.load %arg7[%c0_67, %c0_68] : memref<1x32xf32, #tpu.memory_space<vmem>>, vector<1x32xf32>
    %173 = vector.broadcast %172 : vector<1x32xf32> to vector<64x32xf32>
    %174 = arith.addf %171, %173 : vector<64x32xf32>
    %cst_69 = arith.constant dense<0.000000e+00> : vector<64xf32>
    %175 = vector.multi_reduction <add>, %174, %cst_69 [1] : vector<64x32xf32> to vector<64xf32>
    %176 = vector.shape_cast %175 : vector<64xf32> to vector<64x1xf32>
    %cst_70 = arith.constant 3.200000e+01 : f32
    %177 = vector.broadcast %cst_70 : f32 to vector<64x1xf32>
    %178 = arith.divf %176, %177 : vector<64x1xf32>
    %179 = vector.broadcast %178 : vector<64x1xf32> to vector<64x32xf32>
    %180 = arith.subf %174, %179 : vector<64x32xf32>
    %181 = arith.mulf %180, %180 : vector<64x32xf32>
    %cst_71 = arith.constant dense<0.000000e+00> : vector<64xf32>
    %182 = vector.multi_reduction <add>, %181, %cst_71 [1] : vector<64x32xf32> to vector<64xf32>
    %183 = vector.shape_cast %182 : vector<64xf32> to vector<64x1xf32>
    %cst_72 = arith.constant 3.200000e+01 : f32
    %184 = vector.broadcast %cst_72 : f32 to vector<64x1xf32>
    %185 = arith.divf %183, %184 : vector<64x1xf32>
    %186 = vector.broadcast %178 : vector<64x1xf32> to vector<64x32xf32>
    %187 = arith.subf %174, %186 : vector<64x32xf32>
    %cst_73 = arith.constant 9.99999974E-6 : f32
    %188 = vector.broadcast %cst_73 : f32 to vector<64x1xf32>
    %189 = arith.addf %185, %188 : vector<64x1xf32>
    %190 = math.rsqrt %189 : vector<64x1xf32>
    %191 = vector.broadcast %190 : vector<64x1xf32> to vector<64x32xf32>
    %192 = arith.mulf %187, %191 : vector<64x32xf32>
    %c0_74 = arith.constant 0 : index
    %c0_75 = arith.constant 0 : index
    %193 = vector.load %arg8[%c0_74, %c0_75] : memref<1x32xf32, #tpu.memory_space<vmem>>, vector<1x32xf32>
    %194 = vector.broadcast %193 : vector<1x32xf32> to vector<64x32xf32>
    %195 = arith.mulf %192, %194 : vector<64x32xf32>
    %c0_76 = arith.constant 0 : index
    %c0_77 = arith.constant 0 : index
    %196 = vector.load %arg9[%c0_76, %c0_77] : memref<1x32xf32, #tpu.memory_space<vmem>>, vector<1x32xf32>
    %197 = vector.broadcast %196 : vector<1x32xf32> to vector<64x32xf32>
    %198 = arith.addf %195, %197 : vector<64x32xf32>
    %199 = arith.truncf %198 : vector<64x32xf32> to vector<64x32xbf16>
    %c0_78 = arith.constant 0 : index
    %c0_79 = arith.constant 0 : index
    %200 = vector.load %arg10[%c0_78, %c0_79] : memref<32x128xbf16, #tpu.memory_space<vmem>>, vector<32x128xbf16>
    %cst_80 = arith.constant dense<0.000000e+00> : vector<64x128xf32>
    %201 = tpu.matmul %199, %200, %cst_80 {dimension_numbers = #tpu.dot_dimension_numbers<[1], [0], [0], [1], [0, 0, 1, 1], [], []>} : vector<64x32xbf16>, vector<32x128xbf16>, vector<64x128xf32> -> vector<64x128xf32>
    %c0_81 = arith.constant 0 : index
    %c0_82 = arith.constant 0 : index
    %202 = vector.load %arg11[%c0_81, %c0_82] : memref<1x128xf32, #tpu.memory_space<vmem>>, vector<1x128xf32>
    %203 = vector.broadcast %202 : vector<1x128xf32> to vector<64x128xf32>
    %204 = arith.addf %201, %203 : vector<64x128xf32>
    %205 = vector.extract_strided_slice %204 {offsets = [0, 0], sizes = [64, 64], strides = [1, 1]} : vector<64x128xf32> to vector<64x64xf32>
    %206 = vector.extract_strided_slice %204 {offsets = [0, 64], sizes = [64, 64], strides = [1, 1]} : vector<64x128xf32> to vector<64x64xf32>
    %207 = arith.negf %206 : vector<64x64xf32>
    %208 = math.exp %207 : vector<64x64xf32>
    %cst_83 = arith.constant 1.000000e+00 : f32
    %209 = vector.broadcast %cst_83 : f32 to vector<64x64xf32>
    %210 = arith.addf %209, %208 : vector<64x64xf32>
    %211 = arith.divf %209, %210 : vector<64x64xf32>
    %212 = arith.mulf %205, %211 : vector<64x64xf32>
    %cst_84 = arith.constant 0.000000e+00 : f32
    %213 = vector.broadcast %cst_84 : f32 to vector<128x64xf32>
    %c0_85 = arith.constant 0 : index
    %c0_86 = arith.constant 0 : index
    %214 = vector.load %arg20[%c0_85, %c0_86] : memref<128x64xf32, #tpu.memory_space<vmem>>, vector<128x64xf32>
    tpu.vector_store %arg20[%c0_85, %c0_86], %213 {strides = array<i32>} : memref<128x64xf32, #tpu.memory_space<vmem>>, vector<128x64xf32>,
    %215 = vector.extract_strided_slice %212 {offsets = [0, 0], sizes = [32, 64], strides = [1, 1]} : vector<64x64xf32> to vector<32x64xf32>
    %c16 = arith.constant 16 : index
    %c0_87 = arith.constant 0 : index
    %216 = vector.load %arg20[%c16, %c0_87] : memref<128x64xf32, #tpu.memory_space<vmem>>, vector<32x64xf32>
    tpu.vector_store %arg20[%c16, %c0_87], %215 {strides = array<i32>} : memref<128x64xf32, #tpu.memory_space<vmem>>, vector<32x64xf32>,
    %217 = vector.extract_strided_slice %212 {offsets = [32, 0], sizes = [32, 64], strides = [1, 1]} : vector<64x64xf32> to vector<32x64xf32>
    %c80 = arith.constant 80 : index
    %c0_88 = arith.constant 0 : index
    %218 = vector.load %arg20[%c80, %c0_88] : memref<128x64xf32, #tpu.memory_space<vmem>>, vector<32x64xf32>
    tpu.vector_store %arg20[%c80, %c0_88], %217 {strides = array<i32>} : memref<128x64xf32, #tpu.memory_space<vmem>>, vector<32x64xf32>,
    %c0_89 = arith.constant 0 : index
    %c0_90 = arith.constant 0 : index
    %219 = vector.load %arg12[%c0_89, %c0_90] : memref<31x64xf32, #tpu.memory_space<vmem>>, vector<31x64xf32>
    %c0_91 = arith.constant 0 : index
    %c0_92 = arith.constant 0 : index
    %220 = vector.load %arg20[%c0_91, %c0_92] : memref<128x64xf32, #tpu.memory_space<vmem>>, vector<64x64xf32>
    %221 = vector.extract_strided_slice %220 {offsets = [1, 0], sizes = [32, 64], strides = [1, 1]} : vector<64x64xf32> to vector<32x64xf32>
    %222 = vector.extract_strided_slice %219 {offsets = [0, 0], sizes = [1, 64], strides = [1, 1]} : vector<31x64xf32> to vector<1x64xf32>
    %223 = vector.broadcast %222 : vector<1x64xf32> to vector<32x64xf32>
    %224 = arith.mulf %221, %223 : vector<32x64xf32>
    %225 = vector.extract_strided_slice %220 {offsets = [2, 0], sizes = [32, 64], strides = [1, 1]} : vector<64x64xf32> to vector<32x64xf32>
    %226 = vector.extract_strided_slice %219 {offsets = [1, 0], sizes = [1, 64], strides = [1, 1]} : vector<31x64xf32> to vector<1x64xf32>
    %227 = vector.broadcast %226 : vector<1x64xf32> to vector<32x64xf32>
    %228 = arith.mulf %225, %227 : vector<32x64xf32>
    %229 = arith.addf %224, %228 : vector<32x64xf32>
    %230 = vector.extract_strided_slice %220 {offsets = [3, 0], sizes = [32, 64], strides = [1, 1]} : vector<64x64xf32> to vector<32x64xf32>
    %231 = vector.extract_strided_slice %219 {offsets = [2, 0], sizes = [1, 64], strides = [1, 1]} : vector<31x64xf32> to vector<1x64xf32>
    %232 = vector.broadcast %231 : vector<1x64xf32> to vector<32x64xf32>
    %233 = arith.mulf %230, %232 : vector<32x64xf32>
    %234 = arith.addf %229, %233 : vector<32x64xf32>
    %235 = vector.extract_strided_slice %220 {offsets = [4, 0], sizes = [32, 64], strides = [1, 1]} : vector<64x64xf32> to vector<32x64xf32>
    %236 = vector.extract_strided_slice %219 {offsets = [3, 0], sizes = [1, 64], strides = [1, 1]} : vector<31x64xf32> to vector<1x64xf32>
    %237 = vector.broadcast %236 : vector<1x64xf32> to vector<32x64xf32>
    %238 = arith.mulf %235, %237 : vector<32x64xf32>
    %239 = arith.addf %234, %238 : vector<32x64xf32>
    %240 = vector.extract_strided_slice %220 {offsets = [5, 0], sizes = [32, 64], strides = [1, 1]} : vector<64x64xf32> to vector<32x64xf32>
    %241 = vector.extract_strided_slice %219 {offsets = [4, 0], sizes = [1, 64], strides = [1, 1]} : vector<31x64xf32> to vector<1x64xf32>
    %242 = vector.broadcast %241 : vector<1x64xf32> to vector<32x64xf32>
    %243 = arith.mulf %240, %242 : vector<32x64xf32>
    %244 = arith.addf %239, %243 : vector<32x64xf32>
    %245 = vector.extract_strided_slice %220 {offsets = [6, 0], sizes = [32, 64], strides = [1, 1]} : vector<64x64xf32> to vector<32x64xf32>
    %246 = vector.extract_strided_slice %219 {offsets = [5, 0], sizes = [1, 64], strides = [1, 1]} : vector<31x64xf32> to vector<1x64xf32>
    %247 = vector.broadcast %246 : vector<1x64xf32> to vector<32x64xf32>
    %248 = arith.mulf %245, %247 : vector<32x64xf32>
    %249 = arith.addf %244, %248 : vector<32x64xf32>
    %250 = vector.extract_strided_slice %220 {offsets = [7, 0], sizes = [32, 64], strides = [1, 1]} : vector<64x64xf32> to vector<32x64xf32>
    %251 = vector.extract_strided_slice %219 {offsets = [6, 0], sizes = [1, 64], strides = [1, 1]} : vector<31x64xf32> to vector<1x64xf32>
    %252 = vector.broadcast %251 : vector<1x64xf32> to vector<32x64xf32>
    %253 = arith.mulf %250, %252 : vector<32x64xf32>
    %254 = arith.addf %249, %253 : vector<32x64xf32>
    %255 = vector.extract_strided_slice %220 {offsets = [8, 0], sizes = [32, 64], strides = [1, 1]} : vector<64x64xf32> to vector<32x64xf32>
    %256 = vector.extract_strided_slice %219 {offsets = [7, 0], sizes = [1, 64], strides = [1, 1]} : vector<31x64xf32> to vector<1x64xf32>
    %257 = vector.broadcast %256 : vector<1x64xf32> to vector<32x64xf32>
    %258 = arith.mulf %255, %257 : vector<32x64xf32>
    %259 = arith.addf %254, %258 : vector<32x64xf32>
    %260 = vector.extract_strided_slice %220 {offsets = [9, 0], sizes = [32, 64], strides = [1, 1]} : vector<64x64xf32> to vector<32x64xf32>
    %261 = vector.extract_strided_slice %219 {offsets = [8, 0], sizes = [1, 64], strides = [1, 1]} : vector<31x64xf32> to vector<1x64xf32>
    %262 = vector.broadcast %261 : vector<1x64xf32> to vector<32x64xf32>
    %263 = arith.mulf %260, %262 : vector<32x64xf32>
    %264 = arith.addf %259, %263 : vector<32x64xf32>
    %265 = vector.extract_strided_slice %220 {offsets = [10, 0], sizes = [32, 64], strides = [1, 1]} : vector<64x64xf32> to vector<32x64xf32>
    %266 = vector.extract_strided_slice %219 {offsets = [9, 0], sizes = [1, 64], strides = [1, 1]} : vector<31x64xf32> to vector<1x64xf32>
    %267 = vector.broadcast %266 : vector<1x64xf32> to vector<32x64xf32>
    %268 = arith.mulf %265, %267 : vector<32x64xf32>
    %269 = arith.addf %264, %268 : vector<32x64xf32>
    %270 = vector.extract_strided_slice %220 {offsets = [11, 0], sizes = [32, 64], strides = [1, 1]} : vector<64x64xf32> to vector<32x64xf32>
    %271 = vector.extract_strided_slice %219 {offsets = [10, 0], sizes = [1, 64], strides = [1, 1]} : vector<31x64xf32> to vector<1x64xf32>
    %272 = vector.broadcast %271 : vector<1x64xf32> to vector<32x64xf32>
    %273 = arith.mulf %270, %272 : vector<32x64xf32>
    %274 = arith.addf %269, %273 : vector<32x64xf32>
    %275 = vector.extract_strided_slice %220 {offsets = [12, 0], sizes = [32, 64], strides = [1, 1]} : vector<64x64xf32> to vector<32x64xf32>
    %276 = vector.extract_strided_slice %219 {offsets = [11, 0], sizes = [1, 64], strides = [1, 1]} : vector<31x64xf32> to vector<1x64xf32>
    %277 = vector.broadcast %276 : vector<1x64xf32> to vector<32x64xf32>
    %278 = arith.mulf %275, %277 : vector<32x64xf32>
    %279 = arith.addf %274, %278 : vector<32x64xf32>
    %280 = vector.extract_strided_slice %220 {offsets = [13, 0], sizes = [32, 64], strides = [1, 1]} : vector<64x64xf32> to vector<32x64xf32>
    %281 = vector.extract_strided_slice %219 {offsets = [12, 0], sizes = [1, 64], strides = [1, 1]} : vector<31x64xf32> to vector<1x64xf32>
    %282 = vector.broadcast %281 : vector<1x64xf32> to vector<32x64xf32>
    %283 = arith.mulf %280, %282 : vector<32x64xf32>
    %284 = arith.addf %279, %283 : vector<32x64xf32>
    %285 = vector.extract_strided_slice %220 {offsets = [14, 0], sizes = [32, 64], strides = [1, 1]} : vector<64x64xf32> to vector<32x64xf32>
    %286 = vector.extract_strided_slice %219 {offsets = [13, 0], sizes = [1, 64], strides = [1, 1]} : vector<31x64xf32> to vector<1x64xf32>
    %287 = vector.broadcast %286 : vector<1x64xf32> to vector<32x64xf32>
    %288 = arith.mulf %285, %287 : vector<32x64xf32>
    %289 = arith.addf %284, %288 : vector<32x64xf32>
    %290 = vector.extract_strided_slice %220 {offsets = [15, 0], sizes = [32, 64], strides = [1, 1]} : vector<64x64xf32> to vector<32x64xf32>
    %291 = vector.extract_strided_slice %219 {offsets = [14, 0], sizes = [1, 64], strides = [1, 1]} : vector<31x64xf32> to vector<1x64xf32>
    %292 = vector.broadcast %291 : vector<1x64xf32> to vector<32x64xf32>
    %293 = arith.mulf %290, %292 : vector<32x64xf32>
    %294 = arith.addf %289, %293 : vector<32x64xf32>
    %295 = vector.extract_strided_slice %220 {offsets = [16, 0], sizes = [32, 64], strides = [1, 1]} : vector<64x64xf32> to vector<32x64xf32>
    %296 = vector.extract_strided_slice %219 {offsets = [15, 0], sizes = [1, 64], strides = [1, 1]} : vector<31x64xf32> to vector<1x64xf32>
    %297 = vector.broadcast %296 : vector<1x64xf32> to vector<32x64xf32>
    %298 = arith.mulf %295, %297 : vector<32x64xf32>
    %299 = arith.addf %294, %298 : vector<32x64xf32>
    %300 = vector.extract_strided_slice %220 {offsets = [17, 0], sizes = [32, 64], strides = [1, 1]} : vector<64x64xf32> to vector<32x64xf32>
    %301 = vector.extract_strided_slice %219 {offsets = [16, 0], sizes = [1, 64], strides = [1, 1]} : vector<31x64xf32> to vector<1x64xf32>
    %302 = vector.broadcast %301 : vector<1x64xf32> to vector<32x64xf32>
    %303 = arith.mulf %300, %302 : vector<32x64xf32>
    %304 = arith.addf %299, %303 : vector<32x64xf32>
    %305 = vector.extract_strided_slice %220 {offsets = [18, 0], sizes = [32, 64], strides = [1, 1]} : vector<64x64xf32> to vector<32x64xf32>
    %306 = vector.extract_strided_slice %219 {offsets = [17, 0], sizes = [1, 64], strides = [1, 1]} : vector<31x64xf32> to vector<1x64xf32>
    %307 = vector.broadcast %306 : vector<1x64xf32> to vector<32x64xf32>
    %308 = arith.mulf %305, %307 : vector<32x64xf32>
    %309 = arith.addf %304, %308 : vector<32x64xf32>
    %310 = vector.extract_strided_slice %220 {offsets = [19, 0], sizes = [32, 64], strides = [1, 1]} : vector<64x64xf32> to vector<32x64xf32>
    %311 = vector.extract_strided_slice %219 {offsets = [18, 0], sizes = [1, 64], strides = [1, 1]} : vector<31x64xf32> to vector<1x64xf32>
    %312 = vector.broadcast %311 : vector<1x64xf32> to vector<32x64xf32>
    %313 = arith.mulf %310, %312 : vector<32x64xf32>
    %314 = arith.addf %309, %313 : vector<32x64xf32>
    %315 = vector.extract_strided_slice %220 {offsets = [20, 0], sizes = [32, 64], strides = [1, 1]} : vector<64x64xf32> to vector<32x64xf32>
    %316 = vector.extract_strided_slice %219 {offsets = [19, 0], sizes = [1, 64], strides = [1, 1]} : vector<31x64xf32> to vector<1x64xf32>
    %317 = vector.broadcast %316 : vector<1x64xf32> to vector<32x64xf32>
    %318 = arith.mulf %315, %317 : vector<32x64xf32>
    %319 = arith.addf %314, %318 : vector<32x64xf32>
    %320 = vector.extract_strided_slice %220 {offsets = [21, 0], sizes = [32, 64], strides = [1, 1]} : vector<64x64xf32> to vector<32x64xf32>
    %321 = vector.extract_strided_slice %219 {offsets = [20, 0], sizes = [1, 64], strides = [1, 1]} : vector<31x64xf32> to vector<1x64xf32>
    %322 = vector.broadcast %321 : vector<1x64xf32> to vector<32x64xf32>
    %323 = arith.mulf %320, %322 : vector<32x64xf32>
    %324 = arith.addf %319, %323 : vector<32x64xf32>
    %325 = vector.extract_strided_slice %220 {offsets = [22, 0], sizes = [32, 64], strides = [1, 1]} : vector<64x64xf32> to vector<32x64xf32>
    %326 = vector.extract_strided_slice %219 {offsets = [21, 0], sizes = [1, 64], strides = [1, 1]} : vector<31x64xf32> to vector<1x64xf32>
    %327 = vector.broadcast %326 : vector<1x64xf32> to vector<32x64xf32>
    %328 = arith.mulf %325, %327 : vector<32x64xf32>
    %329 = arith.addf %324, %328 : vector<32x64xf32>
    %330 = vector.extract_strided_slice %220 {offsets = [23, 0], sizes = [32, 64], strides = [1, 1]} : vector<64x64xf32> to vector<32x64xf32>
    %331 = vector.extract_strided_slice %219 {offsets = [22, 0], sizes = [1, 64], strides = [1, 1]} : vector<31x64xf32> to vector<1x64xf32>
    %332 = vector.broadcast %331 : vector<1x64xf32> to vector<32x64xf32>
    %333 = arith.mulf %330, %332 : vector<32x64xf32>
    %334 = arith.addf %329, %333 : vector<32x64xf32>
    %335 = vector.extract_strided_slice %220 {offsets = [24, 0], sizes = [32, 64], strides = [1, 1]} : vector<64x64xf32> to vector<32x64xf32>
    %336 = vector.extract_strided_slice %219 {offsets = [23, 0], sizes = [1, 64], strides = [1, 1]} : vector<31x64xf32> to vector<1x64xf32>
    %337 = vector.broadcast %336 : vector<1x64xf32> to vector<32x64xf32>
    %338 = arith.mulf %335, %337 : vector<32x64xf32>
    %339 = arith.addf %334, %338 : vector<32x64xf32>
    %340 = vector.extract_strided_slice %220 {offsets = [25, 0], sizes = [32, 64], strides = [1, 1]} : vector<64x64xf32> to vector<32x64xf32>
    %341 = vector.extract_strided_slice %219 {offsets = [24, 0], sizes = [1, 64], strides = [1, 1]} : vector<31x64xf32> to vector<1x64xf32>
    %342 = vector.broadcast %341 : vector<1x64xf32> to vector<32x64xf32>
    %343 = arith.mulf %340, %342 : vector<32x64xf32>
    %344 = arith.addf %339, %343 : vector<32x64xf32>
    %345 = vector.extract_strided_slice %220 {offsets = [26, 0], sizes = [32, 64], strides = [1, 1]} : vector<64x64xf32> to vector<32x64xf32>
    %346 = vector.extract_strided_slice %219 {offsets = [25, 0], sizes = [1, 64], strides = [1, 1]} : vector<31x64xf32> to vector<1x64xf32>
    %347 = vector.broadcast %346 : vector<1x64xf32> to vector<32x64xf32>
    %348 = arith.mulf %345, %347 : vector<32x64xf32>
    %349 = arith.addf %344, %348 : vector<32x64xf32>
    %350 = vector.extract_strided_slice %220 {offsets = [27, 0], sizes = [32, 64], strides = [1, 1]} : vector<64x64xf32> to vector<32x64xf32>
    %351 = vector.extract_strided_slice %219 {offsets = [26, 0], sizes = [1, 64], strides = [1, 1]} : vector<31x64xf32> to vector<1x64xf32>
    %352 = vector.broadcast %351 : vector<1x64xf32> to vector<32x64xf32>
    %353 = arith.mulf %350, %352 : vector<32x64xf32>
    %354 = arith.addf %349, %353 : vector<32x64xf32>
    %355 = vector.extract_strided_slice %220 {offsets = [28, 0], sizes = [32, 64], strides = [1, 1]} : vector<64x64xf32> to vector<32x64xf32>
    %356 = vector.extract_strided_slice %219 {offsets = [27, 0], sizes = [1, 64], strides = [1, 1]} : vector<31x64xf32> to vector<1x64xf32>
    %357 = vector.broadcast %356 : vector<1x64xf32> to vector<32x64xf32>
    %358 = arith.mulf %355, %357 : vector<32x64xf32>
    %359 = arith.addf %354, %358 : vector<32x64xf32>
    %360 = vector.extract_strided_slice %220 {offsets = [29, 0], sizes = [32, 64], strides = [1, 1]} : vector<64x64xf32> to vector<32x64xf32>
    %361 = vector.extract_strided_slice %219 {offsets = [28, 0], sizes = [1, 64], strides = [1, 1]} : vector<31x64xf32> to vector<1x64xf32>
    %362 = vector.broadcast %361 : vector<1x64xf32> to vector<32x64xf32>
    %363 = arith.mulf %360, %362 : vector<32x64xf32>
    %364 = arith.addf %359, %363 : vector<32x64xf32>
    %365 = vector.extract_strided_slice %220 {offsets = [30, 0], sizes = [32, 64], strides = [1, 1]} : vector<64x64xf32> to vector<32x64xf32>
    %366 = vector.extract_strided_slice %219 {offsets = [29, 0], sizes = [1, 64], strides = [1, 1]} : vector<31x64xf32> to vector<1x64xf32>
    %367 = vector.broadcast %366 : vector<1x64xf32> to vector<32x64xf32>
    %368 = arith.mulf %365, %367 : vector<32x64xf32>
    %369 = arith.addf %364, %368 : vector<32x64xf32>
    %370 = vector.extract_strided_slice %220 {offsets = [31, 0], sizes = [32, 64], strides = [1, 1]} : vector<64x64xf32> to vector<32x64xf32>
    %371 = vector.extract_strided_slice %219 {offsets = [30, 0], sizes = [1, 64], strides = [1, 1]} : vector<31x64xf32> to vector<1x64xf32>
    %372 = vector.broadcast %371 : vector<1x64xf32> to vector<32x64xf32>
    %373 = arith.mulf %370, %372 : vector<32x64xf32>
    %374 = arith.addf %369, %373 : vector<32x64xf32>
    %c0_93 = arith.constant 0 : index
    %c0_94 = arith.constant 0 : index
    %375 = vector.load %arg19[%c0_93, %c0_94] : memref<64x64xf32, #tpu.memory_space<vmem>>, vector<32x64xf32>
    tpu.vector_store %arg19[%c0_93, %c0_94], %374 {strides = array<i32>} : memref<64x64xf32, #tpu.memory_space<vmem>>, vector<32x64xf32>,
    %c64_95 = arith.constant 64 : index
    %c0_96 = arith.constant 0 : index
    %376 = vector.load %arg20[%c64_95, %c0_96] : memref<128x64xf32, #tpu.memory_space<vmem>>, vector<64x64xf32>
    %377 = vector.extract_strided_slice %376 {offsets = [1, 0], sizes = [32, 64], strides = [1, 1]} : vector<64x64xf32> to vector<32x64xf32>
    %378 = vector.extract_strided_slice %219 {offsets = [0, 0], sizes = [1, 64], strides = [1, 1]} : vector<31x64xf32> to vector<1x64xf32>
    %379 = vector.broadcast %378 : vector<1x64xf32> to vector<32x64xf32>
    %380 = arith.mulf %377, %379 : vector<32x64xf32>
    %381 = vector.extract_strided_slice %376 {offsets = [2, 0], sizes = [32, 64], strides = [1, 1]} : vector<64x64xf32> to vector<32x64xf32>
    %382 = vector.extract_strided_slice %219 {offsets = [1, 0], sizes = [1, 64], strides = [1, 1]} : vector<31x64xf32> to vector<1x64xf32>
    %383 = vector.broadcast %382 : vector<1x64xf32> to vector<32x64xf32>
    %384 = arith.mulf %381, %383 : vector<32x64xf32>
    %385 = arith.addf %380, %384 : vector<32x64xf32>
    %386 = vector.extract_strided_slice %376 {offsets = [3, 0], sizes = [32, 64], strides = [1, 1]} : vector<64x64xf32> to vector<32x64xf32>
    %387 = vector.extract_strided_slice %219 {offsets = [2, 0], sizes = [1, 64], strides = [1, 1]} : vector<31x64xf32> to vector<1x64xf32>
    %388 = vector.broadcast %387 : vector<1x64xf32> to vector<32x64xf32>
    %389 = arith.mulf %386, %388 : vector<32x64xf32>
    %390 = arith.addf %385, %389 : vector<32x64xf32>
    %391 = vector.extract_strided_slice %376 {offsets = [4, 0], sizes = [32, 64], strides = [1, 1]} : vector<64x64xf32> to vector<32x64xf32>
    %392 = vector.extract_strided_slice %219 {offsets = [3, 0], sizes = [1, 64], strides = [1, 1]} : vector<31x64xf32> to vector<1x64xf32>
    %393 = vector.broadcast %392 : vector<1x64xf32> to vector<32x64xf32>
    %394 = arith.mulf %391, %393 : vector<32x64xf32>
    %395 = arith.addf %390, %394 : vector<32x64xf32>
    %396 = vector.extract_strided_slice %376 {offsets = [5, 0], sizes = [32, 64], strides = [1, 1]} : vector<64x64xf32> to vector<32x64xf32>
    %397 = vector.extract_strided_slice %219 {offsets = [4, 0], sizes = [1, 64], strides = [1, 1]} : vector<31x64xf32> to vector<1x64xf32>
    %398 = vector.broadcast %397 : vector<1x64xf32> to vector<32x64xf32>
    %399 = arith.mulf %396, %398 : vector<32x64xf32>
    %400 = arith.addf %395, %399 : vector<32x64xf32>
    %401 = vector.extract_strided_slice %376 {offsets = [6, 0], sizes = [32, 64], strides = [1, 1]} : vector<64x64xf32> to vector<32x64xf32>
    %402 = vector.extract_strided_slice %219 {offsets = [5, 0], sizes = [1, 64], strides = [1, 1]} : vector<31x64xf32> to vector<1x64xf32>
    %403 = vector.broadcast %402 : vector<1x64xf32> to vector<32x64xf32>
    %404 = arith.mulf %401, %403 : vector<32x64xf32>
    %405 = arith.addf %400, %404 : vector<32x64xf32>
    %406 = vector.extract_strided_slice %376 {offsets = [7, 0], sizes = [32, 64], strides = [1, 1]} : vector<64x64xf32> to vector<32x64xf32>
    %407 = vector.extract_strided_slice %219 {offsets = [6, 0], sizes = [1, 64], strides = [1, 1]} : vector<31x64xf32> to vector<1x64xf32>
    %408 = vector.broadcast %407 : vector<1x64xf32> to vector<32x64xf32>
    %409 = arith.mulf %406, %408 : vector<32x64xf32>
    %410 = arith.addf %405, %409 : vector<32x64xf32>
    %411 = vector.extract_strided_slice %376 {offsets = [8, 0], sizes = [32, 64], strides = [1, 1]} : vector<64x64xf32> to vector<32x64xf32>
    %412 = vector.extract_strided_slice %219 {offsets = [7, 0], sizes = [1, 64], strides = [1, 1]} : vector<31x64xf32> to vector<1x64xf32>
    %413 = vector.broadcast %412 : vector<1x64xf32> to vector<32x64xf32>
    %414 = arith.mulf %411, %413 : vector<32x64xf32>
    %415 = arith.addf %410, %414 : vector<32x64xf32>
    %416 = vector.extract_strided_slice %376 {offsets = [9, 0], sizes = [32, 64], strides = [1, 1]} : vector<64x64xf32> to vector<32x64xf32>
    %417 = vector.extract_strided_slice %219 {offsets = [8, 0], sizes = [1, 64], strides = [1, 1]} : vector<31x64xf32> to vector<1x64xf32>
    %418 = vector.broadcast %417 : vector<1x64xf32> to vector<32x64xf32>
    %419 = arith.mulf %416, %418 : vector<32x64xf32>
    %420 = arith.addf %415, %419 : vector<32x64xf32>
    %421 = vector.extract_strided_slice %376 {offsets = [10, 0], sizes = [32, 64], strides = [1, 1]} : vector<64x64xf32> to vector<32x64xf32>
    %422 = vector.extract_strided_slice %219 {offsets = [9, 0], sizes = [1, 64], strides = [1, 1]} : vector<31x64xf32> to vector<1x64xf32>
    %423 = vector.broadcast %422 : vector<1x64xf32> to vector<32x64xf32>
    %424 = arith.mulf %421, %423 : vector<32x64xf32>
    %425 = arith.addf %420, %424 : vector<32x64xf32>
    %426 = vector.extract_strided_slice %376 {offsets = [11, 0], sizes = [32, 64], strides = [1, 1]} : vector<64x64xf32> to vector<32x64xf32>
    %427 = vector.extract_strided_slice %219 {offsets = [10, 0], sizes = [1, 64], strides = [1, 1]} : vector<31x64xf32> to vector<1x64xf32>
    %428 = vector.broadcast %427 : vector<1x64xf32> to vector<32x64xf32>
    %429 = arith.mulf %426, %428 : vector<32x64xf32>
    %430 = arith.addf %425, %429 : vector<32x64xf32>
    %431 = vector.extract_strided_slice %376 {offsets = [12, 0], sizes = [32, 64], strides = [1, 1]} : vector<64x64xf32> to vector<32x64xf32>
    %432 = vector.extract_strided_slice %219 {offsets = [11, 0], sizes = [1, 64], strides = [1, 1]} : vector<31x64xf32> to vector<1x64xf32>
    %433 = vector.broadcast %432 : vector<1x64xf32> to vector<32x64xf32>
    %434 = arith.mulf %431, %433 : vector<32x64xf32>
    %435 = arith.addf %430, %434 : vector<32x64xf32>
    %436 = vector.extract_strided_slice %376 {offsets = [13, 0], sizes = [32, 64], strides = [1, 1]} : vector<64x64xf32> to vector<32x64xf32>
    %437 = vector.extract_strided_slice %219 {offsets = [12, 0], sizes = [1, 64], strides = [1, 1]} : vector<31x64xf32> to vector<1x64xf32>
    %438 = vector.broadcast %437 : vector<1x64xf32> to vector<32x64xf32>
    %439 = arith.mulf %436, %438 : vector<32x64xf32>
    %440 = arith.addf %435, %439 : vector<32x64xf32>
    %441 = vector.extract_strided_slice %376 {offsets = [14, 0], sizes = [32, 64], strides = [1, 1]} : vector<64x64xf32> to vector<32x64xf32>
    %442 = vector.extract_strided_slice %219 {offsets = [13, 0], sizes = [1, 64], strides = [1, 1]} : vector<31x64xf32> to vector<1x64xf32>
    %443 = vector.broadcast %442 : vector<1x64xf32> to vector<32x64xf32>
    %444 = arith.mulf %441, %443 : vector<32x64xf32>
    %445 = arith.addf %440, %444 : vector<32x64xf32>
    %446 = vector.extract_strided_slice %376 {offsets = [15, 0], sizes = [32, 64], strides = [1, 1]} : vector<64x64xf32> to vector<32x64xf32>
    %447 = vector.extract_strided_slice %219 {offsets = [14, 0], sizes = [1, 64], strides = [1, 1]} : vector<31x64xf32> to vector<1x64xf32>
    %448 = vector.broadcast %447 : vector<1x64xf32> to vector<32x64xf32>
    %449 = arith.mulf %446, %448 : vector<32x64xf32>
    %450 = arith.addf %445, %449 : vector<32x64xf32>
    %451 = vector.extract_strided_slice %376 {offsets = [16, 0], sizes = [32, 64], strides = [1, 1]} : vector<64x64xf32> to vector<32x64xf32>
    %452 = vector.extract_strided_slice %219 {offsets = [15, 0], sizes = [1, 64], strides = [1, 1]} : vector<31x64xf32> to vector<1x64xf32>
    %453 = vector.broadcast %452 : vector<1x64xf32> to vector<32x64xf32>
    %454 = arith.mulf %451, %453 : vector<32x64xf32>
    %455 = arith.addf %450, %454 : vector<32x64xf32>
    %456 = vector.extract_strided_slice %376 {offsets = [17, 0], sizes = [32, 64], strides = [1, 1]} : vector<64x64xf32> to vector<32x64xf32>
    %457 = vector.extract_strided_slice %219 {offsets = [16, 0], sizes = [1, 64], strides = [1, 1]} : vector<31x64xf32> to vector<1x64xf32>
    %458 = vector.broadcast %457 : vector<1x64xf32> to vector<32x64xf32>
    %459 = arith.mulf %456, %458 : vector<32x64xf32>
    %460 = arith.addf %455, %459 : vector<32x64xf32>
    %461 = vector.extract_strided_slice %376 {offsets = [18, 0], sizes = [32, 64], strides = [1, 1]} : vector<64x64xf32> to vector<32x64xf32>
    %462 = vector.extract_strided_slice %219 {offsets = [17, 0], sizes = [1, 64], strides = [1, 1]} : vector<31x64xf32> to vector<1x64xf32>
    %463 = vector.broadcast %462 : vector<1x64xf32> to vector<32x64xf32>
    %464 = arith.mulf %461, %463 : vector<32x64xf32>
    %465 = arith.addf %460, %464 : vector<32x64xf32>
    %466 = vector.extract_strided_slice %376 {offsets = [19, 0], sizes = [32, 64], strides = [1, 1]} : vector<64x64xf32> to vector<32x64xf32>
    %467 = vector.extract_strided_slice %219 {offsets = [18, 0], sizes = [1, 64], strides = [1, 1]} : vector<31x64xf32> to vector<1x64xf32>
    %468 = vector.broadcast %467 : vector<1x64xf32> to vector<32x64xf32>
    %469 = arith.mulf %466, %468 : vector<32x64xf32>
    %470 = arith.addf %465, %469 : vector<32x64xf32>
    %471 = vector.extract_strided_slice %376 {offsets = [20, 0], sizes = [32, 64], strides = [1, 1]} : vector<64x64xf32> to vector<32x64xf32>
    %472 = vector.extract_strided_slice %219 {offsets = [19, 0], sizes = [1, 64], strides = [1, 1]} : vector<31x64xf32> to vector<1x64xf32>
    %473 = vector.broadcast %472 : vector<1x64xf32> to vector<32x64xf32>
    %474 = arith.mulf %471, %473 : vector<32x64xf32>
    %475 = arith.addf %470, %474 : vector<32x64xf32>
    %476 = vector.extract_strided_slice %376 {offsets = [21, 0], sizes = [32, 64], strides = [1, 1]} : vector<64x64xf32> to vector<32x64xf32>
    %477 = vector.extract_strided_slice %219 {offsets = [20, 0], sizes = [1, 64], strides = [1, 1]} : vector<31x64xf32> to vector<1x64xf32>
    %478 = vector.broadcast %477 : vector<1x64xf32> to vector<32x64xf32>
    %479 = arith.mulf %476, %478 : vector<32x64xf32>
    %480 = arith.addf %475, %479 : vector<32x64xf32>
    %481 = vector.extract_strided_slice %376 {offsets = [22, 0], sizes = [32, 64], strides = [1, 1]} : vector<64x64xf32> to vector<32x64xf32>
    %482 = vector.extract_strided_slice %219 {offsets = [21, 0], sizes = [1, 64], strides = [1, 1]} : vector<31x64xf32> to vector<1x64xf32>
    %483 = vector.broadcast %482 : vector<1x64xf32> to vector<32x64xf32>
    %484 = arith.mulf %481, %483 : vector<32x64xf32>
    %485 = arith.addf %480, %484 : vector<32x64xf32>
    %486 = vector.extract_strided_slice %376 {offsets = [23, 0], sizes = [32, 64], strides = [1, 1]} : vector<64x64xf32> to vector<32x64xf32>
    %487 = vector.extract_strided_slice %219 {offsets = [22, 0], sizes = [1, 64], strides = [1, 1]} : vector<31x64xf32> to vector<1x64xf32>
    %488 = vector.broadcast %487 : vector<1x64xf32> to vector<32x64xf32>
    %489 = arith.mulf %486, %488 : vector<32x64xf32>
    %490 = arith.addf %485, %489 : vector<32x64xf32>
    %491 = vector.extract_strided_slice %376 {offsets = [24, 0], sizes = [32, 64], strides = [1, 1]} : vector<64x64xf32> to vector<32x64xf32>
    %492 = vector.extract_strided_slice %219 {offsets = [23, 0], sizes = [1, 64], strides = [1, 1]} : vector<31x64xf32> to vector<1x64xf32>
    %493 = vector.broadcast %492 : vector<1x64xf32> to vector<32x64xf32>
    %494 = arith.mulf %491, %493 : vector<32x64xf32>
    %495 = arith.addf %490, %494 : vector<32x64xf32>
    %496 = vector.extract_strided_slice %376 {offsets = [25, 0], sizes = [32, 64], strides = [1, 1]} : vector<64x64xf32> to vector<32x64xf32>
    %497 = vector.extract_strided_slice %219 {offsets = [24, 0], sizes = [1, 64], strides = [1, 1]} : vector<31x64xf32> to vector<1x64xf32>
    %498 = vector.broadcast %497 : vector<1x64xf32> to vector<32x64xf32>
    %499 = arith.mulf %496, %498 : vector<32x64xf32>
    %500 = arith.addf %495, %499 : vector<32x64xf32>
    %501 = vector.extract_strided_slice %376 {offsets = [26, 0], sizes = [32, 64], strides = [1, 1]} : vector<64x64xf32> to vector<32x64xf32>
    %502 = vector.extract_strided_slice %219 {offsets = [25, 0], sizes = [1, 64], strides = [1, 1]} : vector<31x64xf32> to vector<1x64xf32>
    %503 = vector.broadcast %502 : vector<1x64xf32> to vector<32x64xf32>
    %504 = arith.mulf %501, %503 : vector<32x64xf32>
    %505 = arith.addf %500, %504 : vector<32x64xf32>
    %506 = vector.extract_strided_slice %376 {offsets = [27, 0], sizes = [32, 64], strides = [1, 1]} : vector<64x64xf32> to vector<32x64xf32>
    %507 = vector.extract_strided_slice %219 {offsets = [26, 0], sizes = [1, 64], strides = [1, 1]} : vector<31x64xf32> to vector<1x64xf32>
    %508 = vector.broadcast %507 : vector<1x64xf32> to vector<32x64xf32>
    %509 = arith.mulf %506, %508 : vector<32x64xf32>
    %510 = arith.addf %505, %509 : vector<32x64xf32>
    %511 = vector.extract_strided_slice %376 {offsets = [28, 0], sizes = [32, 64], strides = [1, 1]} : vector<64x64xf32> to vector<32x64xf32>
    %512 = vector.extract_strided_slice %219 {offsets = [27, 0], sizes = [1, 64], strides = [1, 1]} : vector<31x64xf32> to vector<1x64xf32>
    %513 = vector.broadcast %512 : vector<1x64xf32> to vector<32x64xf32>
    %514 = arith.mulf %511, %513 : vector<32x64xf32>
    %515 = arith.addf %510, %514 : vector<32x64xf32>
    %516 = vector.extract_strided_slice %376 {offsets = [29, 0], sizes = [32, 64], strides = [1, 1]} : vector<64x64xf32> to vector<32x64xf32>
    %517 = vector.extract_strided_slice %219 {offsets = [28, 0], sizes = [1, 64], strides = [1, 1]} : vector<31x64xf32> to vector<1x64xf32>
    %518 = vector.broadcast %517 : vector<1x64xf32> to vector<32x64xf32>
    %519 = arith.mulf %516, %518 : vector<32x64xf32>
    %520 = arith.addf %515, %519 : vector<32x64xf32>
    %521 = vector.extract_strided_slice %376 {offsets = [30, 0], sizes = [32, 64], strides = [1, 1]} : vector<64x64xf32> to vector<32x64xf32>
    %522 = vector.extract_strided_slice %219 {offsets = [29, 0], sizes = [1, 64], strides = [1, 1]} : vector<31x64xf32> to vector<1x64xf32>
    %523 = vector.broadcast %522 : vector<1x64xf32> to vector<32x64xf32>
    %524 = arith.mulf %521, %523 : vector<32x64xf32>
    %525 = arith.addf %520, %524 : vector<32x64xf32>
    %526 = vector.extract_strided_slice %376 {offsets = [31, 0], sizes = [32, 64], strides = [1, 1]} : vector<64x64xf32> to vector<32x64xf32>
    %527 = vector.extract_strided_slice %219 {offsets = [30, 0], sizes = [1, 64], strides = [1, 1]} : vector<31x64xf32> to vector<1x64xf32>
    %528 = vector.broadcast %527 : vector<1x64xf32> to vector<32x64xf32>
    %529 = arith.mulf %526, %528 : vector<32x64xf32>
    %530 = arith.addf %525, %529 : vector<32x64xf32>
    %c32_97 = arith.constant 32 : index
    %c0_98 = arith.constant 0 : index
    %531 = vector.load %arg19[%c32_97, %c0_98] : memref<64x64xf32, #tpu.memory_space<vmem>>, vector<32x64xf32>
    tpu.vector_store %arg19[%c32_97, %c0_98], %530 {strides = array<i32>} : memref<64x64xf32, #tpu.memory_space<vmem>>, vector<32x64xf32>,
    %c0_99 = arith.constant 0 : index
    %c0_100 = arith.constant 0 : index
    %532 = vector.load %arg19[%c0_99, %c0_100] : memref<64x64xf32, #tpu.memory_space<vmem>>, vector<64x64xf32>
    %c0_101 = arith.constant 0 : index
    %c0_102 = arith.constant 0 : index
    %533 = vector.load %arg13[%c0_101, %c0_102] : memref<1x64xf32, #tpu.memory_space<vmem>>, vector<1x64xf32>
    %534 = vector.broadcast %533 : vector<1x64xf32> to vector<64x64xf32>
    %535 = arith.addf %532, %534 : vector<64x64xf32>
    %536 = arith.negf %535 : vector<64x64xf32>
    %537 = math.exp %536 : vector<64x64xf32>
    %cst_103 = arith.constant 1.000000e+00 : f32
    %538 = vector.broadcast %cst_103 : f32 to vector<64x64xf32>
    %539 = arith.addf %538, %537 : vector<64x64xf32>
    %540 = arith.divf %538, %539 : vector<64x64xf32>
    %541 = arith.mulf %535, %540 : vector<64x64xf32>
    %542 = arith.truncf %541 : vector<64x64xf32> to vector<64x64xbf16>
    %c0_104 = arith.constant 0 : index
    %c0_105 = arith.constant 0 : index
    %543 = vector.load %arg14[%c0_104, %c0_105] : memref<64x32xbf16, #tpu.memory_space<vmem>>, vector<64x32xbf16>
    %cst_106 = arith.constant dense<0.000000e+00> : vector<64x32xf32>
    %544 = tpu.matmul %542, %543, %cst_106 {dimension_numbers = #tpu.dot_dimension_numbers<[1], [0], [0], [1], [0, 0, 1, 1], [], []>} : vector<64x64xbf16>, vector<64x32xbf16>, vector<64x32xf32> -> vector<64x32xf32>
    %c0_107 = arith.constant 0 : index
    %c0_108 = arith.constant 0 : index
    %545 = vector.load %arg15[%c0_107, %c0_108] : memref<1x32xf32, #tpu.memory_space<vmem>>, vector<1x32xf32>
    %546 = vector.broadcast %545 : vector<1x32xf32> to vector<64x32xf32>
    %547 = arith.addf %544, %546 : vector<64x32xf32>
    %548 = arith.addf %174, %547 : vector<64x32xf32>
    %c0_109 = arith.constant 0 : index
    %c0_110 = arith.constant 0 : index
    %549 = vector.load %arg16[%c0_109, %c0_110] : memref<64x32xf32, #tpu.memory_space<vmem>>, vector<64x32xf32>
    tpu.vector_store %arg16[%c0_109, %c0_110], %548 {strides = array<i32>} : memref<64x32xf32, #tpu.memory_space<vmem>>, vector<64x32xf32>,
    return
  }
}

</mosaic_0001>

<bundles_post_ra>
// kernel: encoder_layer_pallas.1
= control target key start
LH: loop header
LB: loop body
LE: loop exit
PB: predicated region body
PF: predicated region fallthrough
CT: control target
= control target key end

     0   :  { %s10733_s0 = inlined_call_operand.vmem [shape: f32[64,32], index: 0, kind: input, shape index: {}]   ;;  %s10734_s1 = inlined_call_operand.vmem [shape: f32[1,32], index: 1, kind: input, shape index: {}]   ;;  %s10735_s2 = inlined_call_operand.vmem [shape: f32[1,32], index: 2, kind: input, shape index: {}]   ;;  %s10736_s3 = inlined_call_operand.vmem [shape: bf16[32,384], index: 3, kind: input, shape index: {}]   ;;  %s10737_s4 = inlined_call_operand.vmem [shape: f32[1,384], index: 4, kind: input, shape index: {}]   ;;  %s10738_s5 = inlined_call_operand.vmem [shape: bf16[64,384], index: 5, kind: input, shape index: {}]   ;;  %s10739_s6 = inlined_call_operand.vmem [shape: bf16[128,32], index: 6, kind: input, shape index: {}]   ;;  %s10740_s7 = inlined_call_operand.vmem [shape: f32[1,32], index: 7, kind: input, shape index: {}]   ;;  %s10741_s8 = inlined_call_operand.vmem [shape: f32[1,32], index: 8, kind: input, shape index: {}]   ;;  %s10742_s9 = inlined_call_operand.vmem [shape: f32[1,32], index: 9, kind: input, shape index: {}]   ;;  %s10743_s10 = inlined_call_operand.vmem [shape: bf16[32,128], index: 10, kind: input, shape index: {}]   ;;  %s10744_s11 = inlined_call_operand.vmem [shape: f32[1,128], index: 11, kind: input, shape index: {}]   ;;  %s10745_s12 = inlined_call_operand.vmem [shape: f32[31,64], index: 12, kind: input, shape index: {}]   ;;  %s10746_s13 = inlined_call_operand.vmem [shape: f32[1,64], index: 13, kind: input, shape index: {}]   ;;  %s10747_s14 = inlined_call_operand.vmem [shape: bf16[64,32], index: 14, kind: input, shape index: {}]   ;;  %s10748_s15 = inlined_call_operand.vmem [shape: f32[1,32], index: 15, kind: input, shape index: {}]   ;;  %s10749_s16 = inlined_call_operand.hbm [shape: f32[64,32], index: 16, kind: output, shape index: {}]  }
   0x1   :  { %11054 = sst [smem:[#allocation112_spill]] %s10733_s0 }
   0x2   :  { %s11055_s23 = sld [smem:[#allocation112_spill]]  ;;  %vm63_vm0 = vcmask 261120  }
   0x8   :  { %v55_v0 = vld [vmem:[%s11055_s23] sm:$0xff]  ;;  %v57_v1 = vld [vmem:[%s11055_s23 + $0x10] sm:$0xff]  ;;  %v56_v2 = vld [vmem:[%s11055_s23 + $0x8] sm:$0xff] }
   0x9   :  { %v64_v3 = vsel %vm63_vm0, %v55_v0, 0.0  ;;  %v70_v4 = vsel %vm63_vm0, %v57_v1, 0.0  ;;  %v58_v5 = vld [vmem:[%s11055_s23 + $0x18] sm:$0xff]  ;;  %v59_v6 = vld [vmem:[%s11055_s23 + $0x20] sm:$0xff]  ;;  %v60_v7 = vld [vmem:[%s11055_s23 + $0x28] sm:$0xff]  ;;  %v67_v8 = vsel %vm63_vm0, %v56_v2, 0.0 }
   0xa   :  { %65 = vadd.xlane.f32.xlu0 %v64_v3  ;;  %71 = vadd.xlane.f32.xlu1 %v70_v4  ;;  %v73_v9 = vsel %vm63_vm0, %v58_v5, 0.0  ;;  %v61_v10 = vld [vmem:[%s11055_s23 + $0x30] sm:$0xff]  ;;  %v62_v11 = vld [vmem:[%s11055_s23 + $0x38] sm:$0xff]  ;;  %v76_v12 = vsel %vm63_vm0, %v59_v6, 0.0  ;;  %v79_v13 = vsel %vm63_vm0, %v60_v7, 0.0 }
   0xb   :  { %v82_v14 = vsel %vm63_vm0, %v61_v10, 0.0  ;;  %v85_v15 = vsel %vm63_vm0, %v62_v11, 0.0 }
   0xe   :  { %68 = vadd.xlane.f32.xlu0 %v67_v8  ;;  %74 = vadd.xlane.f32.xlu1 %v73_v9 }
  0x12   :  { %77 = vadd.xlane.f32.xlu0 %v76_v12  ;;  %80 = vadd.xlane.f32.xlu1 %v79_v13 }
  0x16   :  { %83 = vadd.xlane.f32.xlu0 %v82_v14  ;;  %86 = vadd.xlane.f32.xlu1 %v85_v15 }
  0x17   :  { %21 = vsyncpa [#allocation7], 0  ;;  %v6365_v56 = vld [vmem:[%s10736_s3 + $0x4] ss:$12 sps:$4 sm:$0xff]   ;;  %v6367_v57 = vld [vmem:[%s10736_s3] ss:$12 sps:$4 sm:$0xff]  }
  0x18   :  { %272 = vmatprep.subr.bf16.mxu0 %v6365_v56  ;;  %v6368_v58 = vld [vmem:[%s10736_s3 + $0x1c] ss:$12 sps:$4 sm:$0xff]   ;;  %v6371_v60 = vld [vmem:[%s10736_s3 + $0x18] ss:$12 sps:$4 sm:$0xff]   ;;  %v10751_v61 = vmov 0   ;;  %vm410_vm1 = vcmask 523264  }
  0x19   :  { %v6370_v59 = vld [vmem:[%s10736_s3 + $0x8] ss:$12 sps:$4 sm:$0xff]   ;;  %273 = vmatpush1.bf16.msra.mxu0 %v6367_v57  ;;  %304 = vmatprep.mubr.bf16.mxu0 %v10751_v61  ;;  %v6372_v62 = vld [vmem:[%s10736_s3 + $0x20] ss:$12 sps:$4 sm:$0xff]   ;;  %vm3940_vm4 = vcmask 1046528   ;;  %vm3974_vm5 = vcmask 1045504  }
  0x1a   :  { %274 = vmatprep.subr.bf16.mxu0 %v6368_v58  ;;  %6167 = vmatprep.subr.bf16.mxu1 %v6370_v59  ;;  %vm4008_vm6 = vcmask 1044480   ;;  %vm4042_vm7 = vcmask 1043456   ;;  %vm4076_vm8 = vcmask 1042432   ;;  %vm4110_vm9 = vcmask 1041408  }
  0x1b   :  { %6168 = vmatpush3.bf16.msra.mxu1 %v6370_v59  ;;  %vm4142_vm10 = vcmask 1040384   ;;  %vm4854_vm11 = vcmask 523265   ;;  %vm4859_vm12 = vcmask 516096  }
  0x1c   :  { %6169 = vmatprep.subr.bf16.mxu1 %v6372_v62 }
  0x1d   :  { %275 = vmatpush1.bf16.msra.mxu0 %v6371_v60 }
  0x1f   :  { %6170 = vmatpush3.bf16.msra.mxu1 %v6372_v62 }
  0x97   :  { %v66_v16 = vpop.xlane.xlu0 %65  ;;  %v72_v17 = vpop.xlane.xlu1 %71 }
  0x98   :  { %v89_v18 = vmul.f32 0.03125, %v66_v16  ;;  %v91_v19 = vmul.f32 0.03125, %v72_v17 }
  0x9a   :  { %v6903_v20 = vsub.f32 %v55_v0, %v89_v18  ;;  %v6905_v21 = vsub.f32 %v57_v1, %v91_v19 }
  0x9b   :  { %v69_v22 = vpop.xlane.xlu0 %68  ;;  %v75_v23 = vpop.xlane.xlu1 %74 }
  0x9c   :  { %v90_v24 = vmul.f32 0.03125, %v69_v22  ;;  %v92_v25 = vmul.f32 0.03125, %v75_v23  ;;  %v105_v26 = vmul.f32 %v6903_v20, %v6903_v20  ;;  %v107_v27 = vmul.f32 %v6905_v21, %v6905_v21 }
  0x9e   :  { %v6911_v28 = vsub.f32 %v56_v2, %v90_v24  ;;  %v6913_v29 = vsub.f32 %v58_v5, %v92_v25  ;;  %v113_v30 = vsel %vm63_vm0, %v105_v26, 0.0  ;;  %v119_v33 = vsel %vm63_vm0, %v107_v27, 0.0  ;;  %v5911_v26 = vld [vmem:[%s10734_s1] ss:$0 sm:$0xff] }
  0x9f   :  { %114 = vadd.xlane.f32.xlu0 %v113_v30  ;;  %v78_v31 = vpop.xlane.xlu0 %77  ;;  %v81_v32 = vpop.xlane.xlu1 %80 }
  0xa0   :  { %v93_v34 = vmul.f32 0.03125, %v78_v31  ;;  %v94_v35 = vmul.f32 0.03125, %v81_v32  ;;  %v106_v36 = vmul.f32 %v6911_v28, %v6911_v28  ;;  %v108_v37 = vmul.f32 %v6913_v29, %v6913_v29 }
  0xa2   :  { %v6921_v38 = vsub.f32 %v59_v6, %v93_v34  ;;  %v6923_v39 = vsub.f32 %v60_v7, %v94_v35  ;;  %v116_v40 = vsel %vm63_vm0, %v106_v36, 0.0  ;;  %v122_v43 = vsel %vm63_vm0, %v108_v37, 0.0  ;;  %v5912_v34 = vld [vmem:[%s10735_s2] ss:$0 sm:$0xff] }
  0xa3   :  { %120 = vadd.xlane.f32.xlu0 %v119_v33  ;;  %117 = vadd.xlane.f32.xlu1 %v116_v40  ;;  %v84_v41 = vpop.xlane.xlu0 %83  ;;  %v87_v42 = vpop.xlane.xlu1 %86 }
  0xa4   :  { %v95_v44 = vmul.f32 0.03125, %v84_v41  ;;  %v96_v45 = vmul.f32 0.03125, %v87_v42  ;;  %v109_v46 = vmul.f32 %v6921_v38, %v6921_v38  ;;  %v110_v47 = vmul.f32 %v6923_v39, %v6923_v39 }
  0xa6   :  { %v6931_v48 = vsub.f32 %v61_v10, %v95_v44  ;;  %v6933_v49 = vsub.f32 %v62_v11, %v96_v45  ;;  %v125_v50 = vsel %vm63_vm0, %v109_v46, 0.0  ;;  %v128_v51 = vsel %vm63_vm0, %v110_v47, 0.0 }
  0xa7   :  { %123 = vadd.xlane.f32.xlu1 %v122_v43  ;;  %126 = vadd.xlane.f32.xlu0 %v125_v50 }
  0xa8   :  { %v111_v52 = vmul.f32 %v6931_v48, %v6931_v48  ;;  %v112_v53 = vmul.f32 %v6933_v49, %v6933_v49 }
  0xaa   :  { %v131_v54 = vsel %vm63_vm0, %v111_v52, 0.0  ;;  %v134_v55 = vsel %vm63_vm0, %v112_v53, 0.0 }
  0xab   :  { %129 = vadd.xlane.f32.xlu1 %v128_v51  ;;  %132 = vadd.xlane.f32.xlu0 %v131_v54 }
  0xaf   :  { %135 = vadd.xlane.f32.xlu1 %v134_v55 }
 0x12c   :  { %v115_v63 = vpop.xlane.xlu0 %114 }
 0x12d   :  { %v137_v0 = vmul.f32 0.03125, %v115_v63  ;;  %v6373_v63 = vld [vmem:[%s10738_s5] ss:$12 sps:$4 sm:$0xff]  }
 0x12f   :  { %v145_v1 = vadd.f32 1e-05, %v137_v0  ;;  %v6376_v0 = vld [vmem:[%s10738_s5 + $0x18] ss:$12 sps:$4 sm:$0xff]  }
 0x130   :  { %v118_v2 = vpop.xlane.xlu1 %117  ;;  %v121_v3 = vpop.xlane.xlu0 %120 }
 0x131   :  { %6411 = vrsqrt.f32 %v145_v1  ;;  %v138_v4 = vmul.f32 0.03125, %v118_v2  ;;  %v139_v5 = vmul.f32 0.03125, %v121_v3  ;;  %v6378_v1 = vld [vmem:[%s10738_s5 + $0x1c] ss:$12 sps:$4 sm:$0xff]   ;;  %v6381_v2 = vld [vmem:[%s10738_s5 + $0x34] ss:$12 sps:$4 sm:$0xff]  }
 0x132   :  { %v6382_v3 = vld [vmem:[%s10738_s5 + $0x8] ss:$12 sps:$4 sm:$0xff]  }
 0x133   :  { %v146_v6 = vadd.f32 1e-05, %v138_v4  ;;  %v147_v7 = vadd.f32 1e-05, %v139_v5  ;;  %v6379_v4 = vld [vmem:[%s10738_s5 + $0x30] ss:$12 sps:$4 sm:$0xff]   ;;  %6179 = vmatprep.subr.bf16.mxu0 %v6382_v3 }
 0x134   :  { %v124_v8 = vpop.xlane.xlu1 %123  ;;  %v127_v9 = vpop.xlane.xlu0 %126  ;;  %v6385_v5 = vld [vmem:[%s10738_s5 + $0x4c] ss:$12 sps:$4 sm:$0xff]  }
 0x135   :  { %6413 = vrsqrt.f32 %v146_v6  ;;  %v140_v10 = vmul.f32 0.03125, %v124_v8  ;;  %v141_v11 = vmul.f32 0.03125, %v127_v9  ;;  %v6386_v6 = vld [vmem:[%s10738_s5 + $0x20] ss:$12 sps:$4 sm:$0xff]   ;;  %v6387_v8 = vld [vmem:[%s10738_s5 + $0x38] ss:$12 sps:$4 sm:$0xff]  }
 0x136   :  { %6415 = vrsqrt.f32 %v147_v7  ;;  %v6383_v7 = vld [vmem:[%s10738_s5 + $0x48] ss:$12 sps:$4 sm:$0xff]   ;;  %v6388_v9 = vld [vmem:[%s10738_s5 + $0x50] ss:$12 sps:$4 sm:$0xff]  }
 0x137   :  { %v148_v12 = vadd.f32 1e-05, %v140_v10  ;;  %v149_v13 = vadd.f32 1e-05, %v141_v11  ;;  %v213_v10 = vlaneseq }
 0x138   :  { %v130_v14 = vpop.xlane.xlu1 %129  ;;  %v133_v15 = vpop.xlane.xlu0 %132 }
 0x139   :  { %6417 = vrsqrt.f32 %v148_v12  ;;  %v142_v16 = vmul.f32 0.03125, %v130_v14  ;;  %v143_v17 = vmul.f32 0.03125, %v133_v15  ;;  %v7025_v11 = vshrl.u32 %v213_v10, 7 }
 0x13a   :  { %6419 = vrsqrt.f32 %v149_v13  ;;  %v211_v13 = vld [vmem:[%s10737_s4] sm:$0x7]  ;;  %s6781_s4 = smov 64  }
 0x13b   :  { %v6412_v18 = vpop.eup %6411  ;;  %v150_v19 = vadd.f32 1e-05, %v142_v16  ;;  %v151_v22 = vadd.f32 1e-05, %v143_v17  ;;  %11056 = vst [vmem:[#allocation9_spill] sm:$0xff] %v7025_v11  ;;  %v7028_v12 = vsub.s32 0, %v7025_v11 }
 0x13c   :  { %v136_v23 = vpop.xlane.xlu1 %135  ;;  %v161_v24 = vmul.f32 %v6412_v18, %v6903_v20  ;;  %v7034_v14 = vsub.s32 1, %v7025_v11  ;;  %v7043_v17 = vsub.s32 2, %v7025_v11 }
 0x13d   :  { %6421 = vrsqrt.f32 %v150_v19  ;;  %v144_v25 = vmul.f32 0.03125, %v136_v23  ;;  %11057 = vst [vmem:[#allocation10_spill] sm:$0xff] %v7028_v12  ;;  %v7037_v15 = vrot.slane %v211_v13, %v7028_v12 }
 0x13e   :  { %6423 = vrsqrt.f32 %v151_v22  ;;  %v176_v33 = vmul.f32 %v5911_v26, %v161_v24  ;;  %11058 = vst [vmem:[#allocation11_spill] sm:$0xff] %v7034_v14  ;;  %v7040_v16 = vrot.slane %v211_v13, %v7034_v14  ;;  %11059 = vst [vmem:[#allocation12_spill] sm:$0xff] %v7043_v17 }
 0x13f   :  { %v6414_v27 = vpop.eup %6413  ;;  %v152_v30 = vadd.f32 1e-05, %v144_v25 }
 0x140   :  { %v6416_v31 = vpop.eup %6415  ;;  %v162_v32 = vmul.f32 %v6414_v27, %v6911_v28  ;;  %v191_v41 = vadd.f32 %v5912_v34, %v176_v33  ;;  %v224_v27 = vrot.slane %v211_v13, %v7043_v17 }
 0x141   :  { %6425 = vrsqrt.f32 %v152_v30  ;;  %v163_v20 = vmul.f32 %v6416_v31, %v6905_v21 }
 0x142   :  { %v177_v35 = vmul.f32 %v5911_v26, %v162_v32  ;;  %v7061_v32 = vld [vmem:[%s10739_s6] sm:$0xff]  }
 0x143   :  { %v6418_v36 = vpop.eup %6417  ;;  %v178_v37 = vmul.f32 %v5911_v26, %v163_v20 }
 0x144   :  { %v6420_v40 = vpop.eup %6419  ;;  %v192_v42 = vadd.f32 %v5912_v34, %v177_v35  ;;  %v164_v43 = vmul.f32 %v6418_v36, %v6913_v29 }
 0x145   :  { %v165_v44 = vmul.f32 %v6420_v40, %v6921_v38  ;;  %v193_v47 = vadd.f32 %v5912_v34, %v178_v37 }
 0x146   :  { %v199_v45 = vpack.c.bf16 %v192_v42, %v191_v41  ;;  %v179_v28 = vmul.f32 %v5911_v26, %v164_v43 }
 0x147   :  { %v6422_v46 = vpop.eup %6421  ;;  %v180_v52 = vmul.f32 %v5911_v26, %v165_v44 }
 0x148   :  { %v6424_v50 = vpop.eup %6423  ;;  %5919 = vmatmul.mubr.msk.bf16.vlgmr.msra.gmra.mrb[0].mxu0 %vm63_vm0, %v199_v45  ;;  %6171 = vmatprep.mubr.msk.bf16.mxu1 %vm63_vm0, %v199_v45  ;;  %v194_v21 = vadd.f32 %v5912_v34, %v179_v28  ;;  %v166_v51 = vmul.f32 %v6422_v46, %v6923_v39 }
 0x149   :  { %314 = vmatprep.mubr.bf16.mxu0 %v10751_v61  ;;  %v167_v53 = vmul.f32 %v6424_v50, %v6931_v48  ;;  %v195_v55 = vadd.f32 %v5912_v34, %v180_v52  ;;  %6180 = vmatpush3.bf16.msra.mxu0 %v6382_v3 }
 0x14a   :  { %v200_v29 = vpack.c.bf16 %v194_v21, %v193_v47  ;;  %v181_v54 = vmul.f32 %v5911_v26, %v166_v51  ;;  %6181 = vmatprep.subr.bf16.mxu0 %v6386_v6 }
 0x14b   :  { %v6426_v38 = vpop.eup %6425  ;;  %v182_v58 = vmul.f32 %v5911_v26, %v167_v53 }
 0x14c   :  { %6172 = vmatmul.mubr.msk.bf16.vlgmr.msra.gmra.mrb[0].mxu1 %vm63_vm0, %v200_v29  ;;  %v196_v56 = vadd.f32 %v5912_v34, %v181_v54  ;;  %v168_v57 = vmul.f32 %v6426_v38, %v6933_v49  ;;  %v6375_v49 = vld [vmem:[%s10738_s5 + $0x4] ss:$12 sps:$4 sm:$0xff]  }
 0x14d   :  { %v197_v39 = vadd.f32 %v5912_v34, %v182_v58  ;;  %715 = vmatprep.subr.bf16.mxu1 %v6375_v49  ;;  %6182 = vmatpush3.bf16.msra.mxu0 %v6386_v6 }
 0x14e   :  { %v201_v59 = vpack.c.bf16 %v196_v56, %v195_v55  ;;  %v183_v60 = vmul.f32 %v5911_v26, %v168_v57  ;;  %716 = vmatpush1.bf16.msra.mxu1 %v6373_v63  ;;  %6183 = vmatprep.subr.bf16.mxu0 %v6387_v8 }
 0x14f   :  { %717 = vmatprep.subr.bf16.mxu1 %v6378_v1 }
 0x150   :  { %5920 = vmatmul.mubr.msk.bf16.gmra.mrb[4].mxu0 %vm63_vm0, %v200_v29  ;;  %6175 = vmatprep.mubr.msk.bf16.mxu1 %vm63_vm0, %v201_v59  ;;  %v198_v62 = vadd.f32 %v5912_v34, %v183_v60 }
 0x151   :  { %324 = vmatprep.mubr.bf16.mxu0 %v10751_v61  ;;  %6184 = vmatpush3.bf16.msra.mxu0 %v6387_v8 }
 0x152   :  { %v202_v48 = vpack.c.bf16 %v198_v62, %v197_v39  ;;  %718 = vmatpush1.bf16.msra.mxu1 %v6376_v0  ;;  %6185 = vmatprep.subr.bf16.mxu0 %v6388_v9 }
 0x153   :  { %719 = vmatprep.subr.bf16.mxu1 %v6381_v2 }
 0x154   :  { %6176 = vmatmul.mubr.msk.bf16.gmra.mrb[4].mxu1 %vm63_vm0, %v202_v48 }
 0x155   :  { %747 = vmatprep.mubr.bf16.mxu1 %v10751_v61  ;;  %6186 = vmatpush3.bf16.msra.mxu0 %v6388_v9 }
 0x156   :  { %720 = vmatpush1.bf16.msra.mxu1 %v6379_v4  ;;  %6219 = vmatprep.subr.bf16.mxu0 %v7061_v32 }
 0x157   :  { %721 = vmatprep.subr.bf16.mxu1 %v6385_v5 }
 0x158   :  { %5921 = vmatmul.mubr.msk.bf16.gmra.mrb[8].mxu0 %vm63_vm0, %v201_v59 }
 0x159   :  { %334 = vmatprep.mubr.bf16.mxu0 %v10751_v61 }
 0x15a   :  { %722 = vmatpush1.bf16.msra.mxu1 %v6383_v7 }
 0x160   :  { %5922 = vmatmul.mubr.msk.bf16.gmra.mrb[12].mxu0 %vm63_vm0, %v202_v48 }
 0x21b   :  { %v306_v18 = vpop.f32.mrb[0].mxu0 }
 0x21c   :  { %v307_v19 = vadd.f32 %v306_v18, %v7037_v15  ;;  %v308_v22 = vpop.f32.mrb[1].mxu0 }
 0x21d   :  { %v7047_v23 = vadd.f32 %v308_v22, %v7040_v16  ;;  %v310_v24 = vpop.f32.mrb[2].mxu0 }
 0x21e   :  { %411 = vst.msk [vmem:[#allocation2] sm:$0xff] %vm410_vm1, %v307_v19  ;;  %v311_v25 = vadd.f32 %v310_v24, %v7037_v15  ;;  %v312_v26 = vpop.f32.mrb[3].mxu0  ;;  %427 = vrot.lane.b32.xlu0 %v307_v19, %s6781_s4 }
 0x21f   :  { %459 = vst.msk [vmem:[#allocation2 + $0x80] sm:$0xff] %vm410_vm1, %v7047_v23  ;;  %v7056_v30 = vadd.f32 %v312_v26, %v7040_v16  ;;  %v6173_v31 = vpop.f32.mrb[0].mxu1 }
 0x220   :  { %412 = vst.msk [vmem:[#allocation2 + $0x8] sm:$0xff] %vm410_vm1, %v311_v25  ;;  %429 = vrot.lane.b32.xlu1 %v311_v25, %s6781_s4  ;;  %v379_v33 = vpop.f32.mrb[1].mxu1  ;;  %v388_v20 = vadd.f32 %v6173_v31, %v224_v27 }
 0x221   :  { %460 = vst.msk [vmem:[#allocation2 + $0x88] sm:$0xff] %vm410_vm1, %v7056_v30  ;;  %v6174_v34 = vpop.f32.mrb[2].mxu1  ;;  %v380_v37 = vadd.f32 %v379_v33, %v224_v27 }
 0x222   :  { %v391_v35 = vadd.f32 %v6174_v34, %v224_v27  ;;  %v382_v36 = vpop.f32.mrb[3].mxu1  ;;  %v6390_v34 = vld [vmem:[%s10739_s6 + $0x8] sm:$0xff]  }
 0x223   :  { %v383_v40 = vadd.f32 %v382_v36, %v224_v27  ;;  %v316_v41 = vpop.f32.mrb[4].mxu0 }
 0x224   :  { %v7068_v42 = vpack.c.bf16 %v391_v35, %v388_v20  ;;  %v317_v43 = vadd.f32 %v316_v41, %v7037_v15  ;;  %v318_v44 = vpop.f32.mrb[5].mxu0 }
 0x225   :  { %v7071_v45 = vpack.c.bf16 %v383_v40, %v380_v37  ;;  %v7074_v28 = vadd.f32 %v318_v44, %v7040_v16  ;;  %v320_v46 = vpop.f32.mrb[6].mxu0  ;;  %v7076_v47 = vld [vmem:[#allocation2] sm:$0xff] }
 0x226   :  { %413 = vst.msk [vmem:[#allocation2 + $0x10] sm:$0xff] %vm410_vm1, %v317_v43  ;;  %v321_v50 = vadd.f32 %v320_v46, %v7037_v15  ;;  %v322_v21 = vpop.f32.mrb[7].mxu0  ;;  %431 = vrot.lane.b32.xlu1 %v317_v43, %s6781_s4  ;;  %v7081_v51 = vld [vmem:[#allocation2 + $0x80] sm:$0xff]  ;;  %v539_v55 = vmul.f32 0.35355338, %v7076_v47 }
 0x227   :  { %461 = vst.msk [vmem:[#allocation2 + $0x90] sm:$0xff] %vm410_vm1, %v7074_v28  ;;  %v7086_v52 = vadd.f32 %v322_v21, %v7040_v16  ;;  %v6177_v53 = vpop.f32.mrb[4].mxu1  ;;  %v7088_v29 = vld [vmem:[#allocation2 + $0x8] sm:$0xff]  ;;  %v555_v60 = vmul.f32 0.35355338, %v7081_v51 }
 0x228   :  { %414 = vst.msk [vmem:[#allocation2 + $0x18] sm:$0xff] %vm410_vm1, %v321_v50  ;;  %v404_v54 = vadd.f32 %v6177_v53, %v224_v27  ;;  %v395_v38 = vpop.f32.mrb[5].mxu1  ;;  %v540_v56 = vmul.f32 0.35355338, %v7088_v29  ;;  %v7093_v57 = vld [vmem:[#allocation2 + $0x88] sm:$0xff] }
 0x229   :  { %462 = vst.msk [vmem:[#allocation2 + $0x98] sm:$0xff] %vm410_vm1, %v7086_v52  ;;  %v396_v58 = vadd.f32 %v395_v38, %v224_v27  ;;  %v6178_v59 = vpop.f32.mrb[6].mxu1  ;;  %v556_v39 = vmul.f32 0.35355338, %v7093_v57  ;;  %v6391_v38 = vld [vmem:[%s10739_s6 + $0x10] sm:$0xff]  }
 0x22a   :  { %v407_v62 = vadd.f32 %v6178_v59, %v224_v27  ;;  %433 = vrot.lane.b32.xlu1 %v321_v50, %s6781_s4  ;;  %v398_v48 = vpop.f32.mrb[7].mxu1  ;;  %v571_v49 = vpack.c.bf16 %v540_v56, %v539_v55 }
 0x22b   :  { %v399_v63 = vadd.f32 %v398_v48, %v224_v27  ;;  %v326_v0 = vpop.f32.mrb[8].mxu0  ;;  %v7100_v1 = vpack.c.bf16 %v556_v39, %v555_v60  ;;  %v1086_v60 = vmul.f32 %v7093_v57, %v7093_v57 }
 0x22c   :  { %v7102_v2 = vpack.c.bf16 %v407_v62, %v404_v54  ;;  %v327_v3 = vadd.f32 %v326_v0, %v7037_v15  ;;  %v328_v4 = vpop.f32.mrb[9].mxu0  ;;  %5939 = vmatmul.mubr.msk.bf16.vlgmr.msra.gmra.mrb[8].mxu1 %vm410_vm1, %v571_v49  ;;  %6187 = vmatprep.mubr.msk.bf16.mxu0 %vm410_vm1, %v571_v49 }
 0x22d   :  { %v7107_v5 = vpack.c.bf16 %v399_v63, %v396_v58  ;;  %v329_v6 = vadd.f32 %v328_v4, %v7040_v16  ;;  %v330_v7 = vpop.f32.mrb[10].mxu0  ;;  %757 = vmatprep.mubr.bf16.mxu1 %v10751_v61  ;;  %v7111_v8 = vld [vmem:[#allocation2 + $0x10] sm:$0xff]  ;;  %v1152_v62 = vsel %vm410_vm1, %v1086_v60, 0.0  ;;  %v1070_v63 = vmul.f32 %v7088_v29, %v7088_v29 }
 0x22e   :  { %11060 = vst [vmem:[#allocation13_spill] sm:$0xff] %v7102_v2  ;;  %415 = vst.msk [vmem:[#allocation2 + $0x20] sm:$0xff] %vm410_vm1, %v327_v3  ;;  %v331_v9 = vadd.f32 %v330_v7, %v7037_v15  ;;  %v332_v13 = vpop.f32.mrb[11].mxu0  ;;  %435 = vrot.lane.b32.xlu0 %v327_v3, %s6781_s4  ;;  %v7116_v18 = vld [vmem:[#allocation2 + $0x90] sm:$0xff]  ;;  %v541_v24 = vmul.f32 0.35355338, %v7111_v8 }
 0x22f   :  { %11061 = vst [vmem:[#allocation14_spill] sm:$0xff] %v7107_v5  ;;  %463 = vst.msk [vmem:[#allocation2 + $0xa0] sm:$0xff] %vm410_vm1, %v329_v6  ;;  %v333_v19 = vadd.f32 %v332_v13, %v7040_v16  ;;  %v7120_v22 = vld [vmem:[#allocation2 + $0x18] sm:$0xff]  ;;  %v557_v27 = vmul.f32 0.35355338, %v7116_v18  ;;  %v1087_v58 = vmul.f32 %v7116_v18, %v7116_v18  ;;  %v1104_v57 = vsel %vm410_vm1, %v1070_v63, 0.0 }
 0x230   :  { %416 = vst.msk [vmem:[#allocation2 + $0x28] sm:$0xff] %vm410_vm1, %v331_v9  ;;  %437 = vrot.lane.b32.xlu1 %v331_v9, %s6781_s4  ;;  %v542_v25 = vmul.f32 0.35355338, %v7120_v22  ;;  %v7126_v26 = vld [vmem:[#allocation2 + $0x98] sm:$0xff] }
 0x231   :  { %464 = vst.msk [vmem:[#allocation2 + $0xa8] sm:$0xff] %vm410_vm1, %v333_v19  ;;  %v558_v31 = vmul.f32 0.35355338, %v7126_v26  ;;  %v1155_v59 = vsel %vm410_vm1, %v1087_v58, 0.0  ;;  %v1088_v39 = vmul.f32 %v7126_v26, %v7126_v26 }
 0x232   :  { %v572_v33 = vpack.c.bf16 %v542_v25, %v541_v24 }
 0x233   :  { %v336_v20 = vpop.f32.mrb[12].mxu0  ;;  %v7134_v35 = vpack.c.bf16 %v558_v31, %v557_v27  ;;  %v1158_v48 = vsel %vm410_vm1, %v1088_v39, 0.0 }
 0x234   :  { %v337_v36 = vadd.f32 %v336_v20, %v7037_v15  ;;  %v338_v37 = vpop.f32.mrb[13].mxu0  ;;  %5940 = vmatmul.mubr.msk.bf16.gmra.mrb[12].mxu1 %vm410_vm1, %v572_v33  ;;  %6188 = vmatmul.mubr.msk.bf16.vlgmr.msra.gmra.mrb[16].mxu0 %vm410_vm1, %v572_v33 }
 0x235   :  { %v339_v40 = vadd.f32 %v338_v37, %v7040_v16  ;;  %v340_v41 = vpop.f32.mrb[14].mxu0  ;;  %767 = vmatprep.mubr.bf16.mxu1 %v10751_v61  ;;  %v511_v43 = vld [vmem:[#allocation2 + $0x20] sm:$0xff]  ;;  %6220 = vmatpush3.bf16.msra.mxu0 %v7061_v32 }
 0x236   :  { %417 = vst.msk [vmem:[#allocation2 + $0x30] sm:$0xff] %vm410_vm1, %v337_v36  ;;  %v341_v44 = vadd.f32 %v340_v41, %v7037_v15  ;;  %v342_v46 = vpop.f32.mrb[15].mxu0  ;;  %439 = vrot.lane.b32.xlu0 %v337_v36, %s6781_s4  ;;  %6221 = vmatprep.subr.bf16.mxu0 %v6390_v34  ;;  %v543_v53 = vmul.f32 0.35355338, %v511_v43 }
 0x237   :  { %465 = vst.msk [vmem:[#allocation2 + $0xb0] sm:$0xff] %vm410_vm1, %v339_v40  ;;  %v343_v50 = vadd.f32 %v342_v46, %v7040_v16  ;;  %v512_v21 = vld [vmem:[#allocation2 + $0x28] sm:$0xff] }
 0x238   :  { %418 = vst.msk [vmem:[#allocation2 + $0x38] sm:$0xff] %vm410_vm1, %v341_v44  ;;  %441 = vrot.lane.b32.xlu1 %v341_v44, %s6781_s4  ;;  %v544_v54 = vmul.f32 0.35355338, %v512_v21 }
 0x239   :  { %466 = vst.msk [vmem:[#allocation2 + $0xb8] sm:$0xff] %vm410_vm1, %v343_v50  ;;  %6222 = vmatpush3.bf16.msra.mxu0 %v6390_v34 }
 0x23a   :  { %475 = vrot.lane.b32.xlu0 %v7047_v23, %s6781_s4  ;;  %v573_v15 = vpack.c.bf16 %v544_v54, %v543_v53  ;;  %6223 = vmatprep.subr.bf16.mxu0 %v6391_v38 }
 0x23c   :  { %5941 = vmatmul.mubr.msk.bf16.gmra.mrb[16].mxu1 %vm410_vm1, %v573_v15  ;;  %6191 = vmatprep.mubr.msk.bf16.mxu0 %vm410_vm1, %v573_v15 }
 0x23d   :  { %477 = vrot.lane.b32.xlu1 %v7056_v30, %s6781_s4  ;;  %777 = vmatprep.mubr.bf16.mxu1 %v10751_v61  ;;  %v513_v16 = vld [vmem:[#allocation2 + $0x30] sm:$0xff] }
 0x23e   :  { %479 = vrot.lane.b32.xlu0 %v7074_v28, %s6781_s4  ;;  %v545_v23 = vmul.f32 0.35355338, %v513_v16  ;;  %6224 = vmatpush3.bf16.msra.mxu0 %v6391_v38  ;;  %v6392_v28 = vld [vmem:[%s10739_s6 + $0x18] sm:$0xff]   ;;  %v7235_v39 = vld [vmem:[#allocation2 + $0xb0] sm:$0xff] }
 0x23f   :  { %v514_v32 = vld [vmem:[#allocation2 + $0x38] sm:$0xff]  ;;  %6225 = vmatprep.subr.bf16.mxu0 %v6392_v28 }
 0x240   :  { %v546_v55 = vmul.f32 0.35355338, %v514_v32 }
 0x241   :  { %481 = vrot.lane.b32.xlu1 %v7086_v52, %s6781_s4  ;;  %v1085_v52 = vmul.f32 %v7081_v51, %v7081_v51  ;;  %v1069_v51 = vmul.f32 %v7076_v47, %v7076_v47 }
 0x242   :  { %483 = vrot.lane.b32.xlu0 %v329_v6, %s6781_s4  ;;  %v574_v30 = vpack.c.bf16 %v546_v55, %v545_v23  ;;  %6226 = vmatpush3.bf16.msra.mxu0 %v6392_v28  ;;  %v7215_v23 = vld [vmem:[#allocation2 + $0xa8] sm:$0xff] }
 0x243   :  { %v1149_v56 = vsel %vm410_vm1, %v1085_v52, 0.0  ;;  %v1101_v49 = vsel %vm410_vm1, %v1069_v51, 0.0  ;;  %v560_v28 = vmul.f32 0.35355338, %v7215_v23 }
 0x244   :  { %5942 = vmatmul.mubr.msk.bf16.gmra.mrb[20].mxu1 %vm410_vm1, %v574_v30  ;;  %6192 = vmatmul.mubr.msk.bf16.gmra.mrb[20].mxu0 %vm410_vm1, %v574_v30  ;;  %v7222_v30 = vld [vmem:[#allocation2 + $0xa0] sm:$0xff] }
 0x245   :  { %485 = vrot.lane.b32.xlu1 %v333_v19, %s6781_s4  ;;  %787 = vmatprep.mubr.bf16.mxu1 %v10751_v61 }
 0x246   :  { %487 = vrot.lane.b32.xlu0 %v339_v40, %s6781_s4 }
 0x249   :  { %489 = vrot.lane.b32.xlu1 %v343_v50, %s6781_s4 }
 0x265   :  { %1150 = vadd.xlane.f32.xlu0 %v1149_v56  ;;  %v559_v56 = vmul.f32 0.35355338, %v7222_v30 }
 0x267   :  { %v581_v58 = vpack.c.bf16 %v560_v28, %v559_v56 }
 0x269   :  { %1156 = vadd.xlane.f32.xlu0 %v1155_v59  ;;  %v7228_v59 = vld [vmem:[#allocation2 + $0xb8] sm:$0xff] }
 0x26d   :  { %1153 = vadd.xlane.f32.xlu1 %v1152_v62  ;;  %1159 = vadd.xlane.f32.xlu0 %v1158_v48  ;;  %v562_v62 = vmul.f32 0.35355338, %v7228_v59 }
 0x271   :  { %1102 = vadd.xlane.f32.xlu1 %v1101_v49  ;;  %v561_v49 = vmul.f32 0.35355338, %v7235_v39 }
 0x275   :  { %1105 = vadd.xlane.f32.xlu1 %v1104_v57  ;;  %v582_v57 = vpack.c.bf16 %v562_v62, %v561_v49 }
 0x290   :  { %v428_v0 = vpop.permute.xlu0 %427 }
 0x291   :  { %451 = vst.msk [vmem:[#allocation2 + $0x40] sm:$0xff] %vm410_vm1, %v428_v0 }
 0x292   :  { %v430_v3 = vpop.permute.xlu1 %429 }
 0x293   :  { %452 = vst.msk [vmem:[#allocation2 + $0x48] sm:$0xff] %vm410_vm1, %v430_v3 }
 0x298   :  { %v432_v4 = vpop.permute.xlu1 %431  ;;  %v515_v6 = vld [vmem:[#allocation2 + $0x40] sm:$0xff] }
 0x299   :  { %453 = vst.msk [vmem:[#allocation2 + $0x50] sm:$0xff] %vm410_vm1, %v432_v4  ;;  %v547_v7 = vmul.f32 0.35355338, %v515_v6 }
 0x29a   :  { %v516_v47 = vld [vmem:[#allocation2 + $0x48] sm:$0xff] }
 0x29b   :  { %v548_v9 = vmul.f32 0.35355338, %v516_v47 }
 0x29c   :  { %v434_v13 = vpop.permute.xlu1 %433 }
 0x29d   :  { %454 = vst.msk [vmem:[#allocation2 + $0x58] sm:$0xff] %vm410_vm1, %v434_v13  ;;  %v575_v29 = vpack.c.bf16 %v548_v9, %v547_v7 }
 0x29f   :  { %5943 = vmatmul.mubr.msk.bf16.gmra.mrb[24].mxu1 %vm410_vm1, %v575_v29  ;;  %6195 = vmatprep.mubr.msk.bf16.mxu0 %vm410_vm1, %v575_v29 }
 0x2a0   :  { %v436_v18 = vpop.permute.xlu0 %435  ;;  %797 = vmatprep.mubr.bf16.mxu1 %v10751_v61  ;;  %v517_v24 = vld [vmem:[#allocation2 + $0x50] sm:$0xff] }
 0x2a1   :  { %455 = vst.msk [vmem:[#allocation2 + $0x60] sm:$0xff] %vm410_vm1, %v436_v18  ;;  %v549_v26 = vmul.f32 0.35355338, %v517_v24 }
 0x2a2   :  { %v438_v19 = vpop.permute.xlu1 %437 }
 0x2a3   :  { %456 = vst.msk [vmem:[#allocation2 + $0x68] sm:$0xff] %vm410_vm1, %v438_v19 }
 0x2a4   :  { %v518_v25 = vld [vmem:[#allocation2 + $0x58] sm:$0xff] }
 0x2a5   :  { %v550_v27 = vmul.f32 0.35355338, %v518_v25 }
 0x2a7   :  { %v576_v31 = vpack.c.bf16 %v550_v27, %v549_v26 }
 0x2a8   :  { %v440_v33 = vpop.permute.xlu0 %439  ;;  %v519_v34 = vld [vmem:[#allocation2 + $0x60] sm:$0xff] }
 0x2a9   :  { %457 = vst.msk [vmem:[#allocation2 + $0x70] sm:$0xff] %vm410_vm1, %v440_v33  ;;  %5944 = vmatmul.mubr.msk.bf16.gmra.mrb[28].mxu1 %vm410_vm1, %v576_v31  ;;  %6196 = vmatmul.mubr.msk.bf16.gmra.mrb[24].mxu0 %vm410_vm1, %v576_v31  ;;  %v551_v37 = vmul.f32 0.35355338, %v519_v34  ;;  %v1230_v31 = vand.u32 127, %v213_v10 }
 0x2aa   :  { %v442_v20 = vpop.permute.xlu1 %441  ;;  %v520_v36 = vld [vmem:[#allocation2 + $0x68] sm:$0xff]  ;;  %807 = vmatprep.mubr.bf16.mxu1 %v10751_v61 }
 0x2ab   :  { %458 = vst.msk [vmem:[#allocation2 + $0x78] sm:$0xff] %vm410_vm1, %v442_v20  ;;  %v552_v40 = vmul.f32 0.35355338, %v520_v36 }
 0x2ac   :  { %v476_v41 = vpop.permute.xlu0 %475 }
 0x2ad   :  { %499 = vst.msk [vmem:[#allocation2 + $0xc0] sm:$0xff] %vm410_vm1, %v476_v41  ;;  %v577_v43 = vpack.c.bf16 %v552_v40, %v551_v37 }
 0x2af   :  { %v478_v44 = vpop.permute.xlu1 %477  ;;  %6199 = vmatprep.mubr.msk.bf16.mxu0 %vm410_vm1, %v577_v43 }
 0x2b0   :  { %500 = vst.msk [vmem:[#allocation2 + $0xc8] sm:$0xff] %vm410_vm1, %v478_v44  ;;  %v480_v46 = vpop.permute.xlu0 %479  ;;  %v521_v50 = vld [vmem:[#allocation2 + $0x70] sm:$0xff]  ;;  %v7296_v44 = vadd.s32 256, %v1230_v31 }
 0x2b1   :  { %501 = vst.msk [vmem:[#allocation2 + $0xd0] sm:$0xff] %vm410_vm1, %v480_v46  ;;  %5945 = vmatmul.mubr.msk.bf16.gmra.mrb[32].mxu1 %vm410_vm1, %v577_v43  ;;  %v553_v54 = vmul.f32 0.35355338, %v521_v50 }
 0x2b2   :  { %v522_v21 = vld [vmem:[#allocation2 + $0x78] sm:$0xff]  ;;  %817 = vmatprep.mubr.bf16.mxu1 %v10751_v61  ;;  %11062 = vst [vmem:[#allocation15_spill] sm:$0xff] %v7296_v44  ;;  %vm1235_vm2 = vcmp.lt.s32.totalorder %v7296_v44, 266 }
 0x2b3   :  { %v482_v53 = vpop.permute.xlu1 %481  ;;  %v554_v15 = vmul.f32 0.35355338, %v522_v21  ;;  %vm7627_vm3 = vmpackc.low %vm1235_vm2, %vm1235_vm2 }
 0x2b4   :  { %502 = vst.msk [vmem:[#allocation2 + $0xd8] sm:$0xff] %vm410_vm1, %v482_v53  ;;  %v484_v16 = vpop.permute.xlu0 %483  ;;  %v7240_v48 = vld [vmem:[#allocation2 + $0xc0] sm:$0xff] }
 0x2b5   :  { %503 = vst.msk [vmem:[#allocation2 + $0xe0] sm:$0xff] %vm410_vm1, %v484_v16  ;;  %v578_v32 = vpack.c.bf16 %v554_v15, %v553_v54  ;;  %v563_v63 = vmul.f32 0.35355338, %v7240_v48 }
 0x2b7   :  { %v486_v38 = vpop.permute.xlu1 %485  ;;  %6200 = vmatmul.mubr.msk.bf16.gmra.mrb[28].mxu0 %vm410_vm1, %v578_v32  ;;  %v7232_v60 = vld [vmem:[#allocation2 + $0xc8] sm:$0xff] }
 0x2b8   :  { %504 = vst.msk [vmem:[#allocation2 + $0xe8] sm:$0xff] %vm410_vm1, %v486_v38  ;;  %6203 = vmatprep.mubr.msk.bf16.mxu0 %vm410_vm1, %v7100_v1  ;;  %v488_v55 = vpop.permute.xlu0 %487  ;;  %v564_v51 = vmul.f32 0.35355338, %v7232_v60 }
 0x2b9   :  { %505 = vst.msk [vmem:[#allocation2 + $0xf0] sm:$0xff] %vm410_vm1, %v488_v55  ;;  %5946 = vmatmul.mubr.msk.bf16.gmra.mrb[36].mxu1 %vm410_vm1, %v578_v32 }
 0x2ba   :  { %827 = vmatprep.mubr.bf16.mxu1 %v10751_v61  ;;  %v583_v0 = vpack.c.bf16 %v564_v51, %v563_v63 }
 0x2bb   :  { %v490_v52 = vpop.permute.xlu1 %489  ;;  %v7246_v3 = vld [vmem:[#allocation2 + $0xd8] sm:$0xff] }
 0x2bc   :  { %506 = vst.msk [vmem:[#allocation2 + $0xf8] sm:$0xff] %vm410_vm1, %v490_v52  ;;  %v566_v6 = vmul.f32 0.35355338, %v7246_v3  ;;  %v535_v47 = vld [vmem:[#allocation2 + $0xe0] sm:$0xff] }
 0x2bd   :  { %v567_v13 = vmul.f32 0.35355338, %v535_v47 }
 0x2bf   :  { %6204 = vmatmul.mubr.msk.bf16.gmra.mrb[32].mxu0 %vm410_vm1, %v7134_v35  ;;  %v536_v4 = vld [vmem:[#allocation2 + $0xe8] sm:$0xff] }
 0x2c0   :  { %6207 = vmatprep.mubr.msk.bf16.mxu0 %vm410_vm1, %v581_v58  ;;  %v568_v7 = vmul.f32 0.35355338, %v536_v4  ;;  %v537_v24 = vld [vmem:[#allocation2 + $0xf0] sm:$0xff] }
 0x2c1   :  { %5947 = vmatmul.mubr.msk.bf16.gmra.mrb[40].mxu1 %vm410_vm1, %v7100_v1  ;;  %v7250_v1 = vld [vmem:[#allocation2 + $0xd0] sm:$0xff]  ;;  %v569_v25 = vmul.f32 0.35355338, %v537_v24 }
 0x2c2   :  { %837 = vmatprep.mubr.bf16.mxu1 %v10751_v61  ;;  %v565_v9 = vmul.f32 0.35355338, %v7250_v1  ;;  %v585_v18 = vpack.c.bf16 %v568_v7, %v567_v13 }
 0x2c3   :  { %v7257_v19 = vld [vmem:[#allocation2 + $0xf8] sm:$0xff] }
 0x2c4   :  { %v584_v29 = vpack.c.bf16 %v566_v6, %v565_v9  ;;  %v1071_v9 = vmul.f32 %v7111_v8, %v7111_v8 }
 0x2c7   :  { %6208 = vmatmul.mubr.msk.bf16.gmra.mrb[36].mxu0 %vm410_vm1, %v582_v57 }
 0x2c8   :  { %6211 = vmatprep.mubr.msk.bf16.mxu0 %vm410_vm1, %v583_v0 }
 0x2c9   :  { %5948 = vmatmul.mubr.msk.bf16.gmra.mrb[44].mxu1 %vm410_vm1, %v7134_v35  ;;  %v570_v35 = vmul.f32 0.35355338, %v7257_v19 }
 0x2ca   :  { %847 = vmatprep.mubr.bf16.mxu1 %v10751_v61 }
 0x2cb   :  { %v586_v26 = vpack.c.bf16 %v570_v35, %v569_v25  ;;  %v1107_v25 = vsel %vm410_vm1, %v1071_v9, 0.0 }
 0x2cf   :  { %6212 = vmatmul.mubr.msk.bf16.gmra.mrb[40].mxu0 %vm410_vm1, %v584_v29 }
 0x2d0   :  { %6215 = vmatprep.mubr.msk.bf16.mxu0 %vm410_vm1, %v585_v18 }
 0x2d1   :  { %5949 = vmatmul.mubr.msk.bf16.gmra.mrb[48].mxu1 %vm410_vm1, %v581_v58 }
 0x2d2   :  { %857 = vmatprep.mubr.bf16.mxu1 %v10751_v61 }
 0x2d7   :  { %6216 = vmatmul.mubr.msk.bf16.gmra.mrb[44].mxu0 %vm410_vm1, %v586_v26 }
 0x2d8   :  { %6227 = vmatprep.mubr.msk.bf16.mxu0 %vm410_vm1, %v7071_v45 }
 0x2d9   :  { %5950 = vmatmul.mubr.msk.bf16.gmra.mrb[52].mxu1 %vm410_vm1, %v582_v57 }
 0x2da   :  { %867 = vmatprep.mubr.bf16.mxu1 %v10751_v61 }
 0x2df   :  { %6228 = vmatmul.mubr.msk.bf16.vlgmr.msra.gmra.mrb[48].mxu0 %vm410_vm1, %v7068_v42 }
 0x2e0   :  { %2134 = vmatprep.mubr.bf16.mxu0 %v10751_v61 }
 0x2e1   :  { %5951 = vmatmul.mubr.msk.bf16.gmra.mrb[56].mxu1 %vm410_vm1, %v583_v0 }
 0x2e2   :  { %877 = vmatprep.mubr.bf16.mxu1 %v10751_v61 }
 0x2e9   :  { %5952 = vmatmul.mubr.msk.bf16.gmra.mrb[60].mxu1 %vm410_vm1, %v584_v29 }
 0x2ea   :  { %887 = vmatprep.mubr.bf16.mxu1 %v10751_v61 }
 0x2f1   :  { %5953 = vmatmul.mubr.msk.bf16.gmra.mrb[64].mxu1 %vm410_vm1, %v585_v18 }
 0x2f2   :  { %897 = vmatprep.mubr.bf16.mxu1 %v10751_v61  ;;  %v1151_v5 = vpop.xlane.xlu0 %1150 }
 0x2f9   :  { %5954 = vmatmul.mubr.msk.bf16.gmra.mrb[68].mxu1 %vm410_vm1, %v586_v26  ;;  %v1072_v26 = vmul.f32 %v7120_v22, %v7120_v22 }
 0x2fa   :  { %v7279_v27 = vpop.xlane.xlu1 %1153 }
 0x2fe   :  { %v1103_v33 = vpop.xlane.xlu1 %1102 }
 0x2ff   :  { %v7282_v34 = vmul.f32 0.0625, %v1103_v33  ;;  %v7284_v20 = vpop.f32.mrb[8].mxu1  ;;  %v1110_v33 = vsel %vm410_vm1, %v1072_v26, 0.0 }
 0x300   :  { %v7286_v36 = vpop.f32.mrb[9].mxu1 }
 0x301   :  { %v1284_v40 = vmax.f32 %v7284_v20, %v7286_v36  ;;  %v7294_v43 = vpop.f32.mrb[10].mxu1 }
 0x302   :  { %v1106_v10 = vpop.xlane.xlu1 %1105  ;;  %v7298_v46 = vpop.f32.mrb[11].mxu1 }
 0x303   :  { %v7300_v50 = vmul.f32 0.0625, %v1106_v10  ;;  %v1288_v21 = vmax.f32 %v7294_v43, %v7298_v46 }
 0x307   :  { %v7309_v15 = vpop.f32.mrb[12].mxu1  ;;  %v7311_v16 = vpop.f32.mrb[16].mxu0 }
 0x308   :  { %v7313_v32 = vpop.f32.mrb[13].mxu1  ;;  %v7315_v38 = vpop.f32.mrb[17].mxu0  ;;  %v1244_v58 = vsel %vm1235_vm2, %v7311_v16, -1e+30 }
 0x309   :  { %v1292_v55 = vmax.f32 %v7309_v15, %v7313_v32  ;;  %v1238_v28 = vsel %vm1235_vm2, %v7315_v38, -1e+30  ;;  %v7322_v52 = vpop.f32.mrb[14].mxu1  ;;  %v7324_v56 = vpop.f32.mrb[18].mxu0 }
 0x30a   :  { %v7329_v62 = vpop.f32.mrb[15].mxu1  ;;  %v7331_v51 = vpop.f32.mrb[19].mxu0  ;;  %v1285_v49 = vmax.f32 %v1284_v40, %v1238_v28  ;;  %v1247_v4 = vsel %vm1235_vm2, %v7324_v56, -1e+30 }
 0x30b   :  { %v1296_v63 = vmax.f32 %v7322_v52, %v7329_v62  ;;  %v1241_v57 = vsel %vm1235_vm2, %v7331_v51, -1e+30  ;;  %v1293_v0 = vmax.f32 %v1292_v55, %v1244_v58 }
 0x30c   :  { %1286 = vmax.xlane.f32.xlu1 %v1285_v49  ;;  %v1289_v6 = vmax.f32 %v1288_v21, %v1241_v57 }
 0x30d   :  { %v1297_v47 = vmax.f32 %v1296_v63, %v1247_v4 }
 0x30f   :  { %v7341_v7 = vpop.f32.mrb[16].mxu1 }
 0x310   :  { %11063 = vst [vmem:[#allocation16_spill] sm:$0xff] %v7341_v7  ;;  %v7345_v13 = vpop.f32.mrb[17].mxu1  ;;  %1290 = vmax.xlane.f32.xlu1 %v1289_v6 }
 0x311   :  { %11064 = vst [vmem:[#allocation17_spill] sm:$0xff] %v7345_v13  ;;  %v1300_v29 = vmax.f32 %v7341_v7, %v7345_v13  ;;  %v7349_v18 = vpop.f32.mrb[18].mxu1 }
 0x312   :  { %11065 = vst [vmem:[#allocation18_spill] sm:$0xff] %v7349_v18  ;;  %v7351_v24 = vpop.f32.mrb[19].mxu1 }
 0x313   :  { %11066 = vst [vmem:[#allocation19_spill] sm:$0xff] %v7351_v24  ;;  %v1304_v35 = vmax.f32 %v7349_v18, %v7351_v24 }
 0x314   :  { %1108 = vadd.xlane.f32.xlu1 %v1107_v25 }
 0x317   :  { %v7358_v8 = vpop.f32.mrb[20].mxu1  ;;  %v7360_v31 = vpop.f32.mrb[20].mxu0 }
 0x318   :  { %11067 = vst [vmem:[#allocation20_spill] sm:$0xff] %v7358_v8  ;;  %11068 = vst [vmem:[#allocation21_spill] sm:$0xff] %v7360_v31  ;;  %1111 = vadd.xlane.f32.xlu1 %v1110_v33  ;;  %v7363_v40 = vpop.f32.mrb[21].mxu1  ;;  %v7365_v10 = vpop.f32.mrb[21].mxu0  ;;  %v1256_v58 = vsel %vm1235_vm2, %v7360_v31, -1e+30 }
 0x319   :  { %11069 = vst [vmem:[#allocation22_spill] sm:$0xff] %v7363_v40  ;;  %11070 = vst [vmem:[#allocation23_spill] sm:$0xff] %v7365_v10  ;;  %v1308_v21 = vmax.f32 %v7358_v8, %v7363_v40  ;;  %v1250_v55 = vsel %vm1235_vm2, %v7365_v10, -1e+30  ;;  %v7372_v22 = vpop.f32.mrb[22].mxu1  ;;  %v7374_v28 = vpop.f32.mrb[22].mxu0 }
 0x31a   :  { %11071 = vst [vmem:[#allocation24_spill] sm:$0xff] %v7372_v22  ;;  %11072 = vst [vmem:[#allocation25_spill] sm:$0xff] %v7374_v28  ;;  %v7379_v49 = vpop.f32.mrb[23].mxu1  ;;  %v7381_v63 = vpop.f32.mrb[23].mxu0  ;;  %v7383_v57 = vmax.f32 %v1300_v29, %v1250_v55  ;;  %v1259_v25 = vsel %vm1235_vm2, %v7374_v28, -1e+30  ;;  %v1093_v29 = vmul.f32 %v7240_v48, %v7240_v48 }
 0x31b   :  { %11073 = vst [vmem:[#allocation26_spill] sm:$0xff] %v7379_v49  ;;  %11074 = vst [vmem:[#allocation27_spill] sm:$0xff] %v7381_v63  ;;  %v1312_v4 = vmax.f32 %v7372_v22, %v7379_v49  ;;  %v1253_v6 = vsel %vm1235_vm2, %v7381_v63, -1e+30  ;;  %v7390_v9 = vmax.f32 %v1308_v21, %v1256_v58  ;;  %v1095_v21 = vmul.f32 %v7250_v1, %v7250_v1  ;;  %v1157_v22 = vpop.xlane.xlu0 %1156 }
 0x31c   :  { %11075 = vst [vmem:[#allocation28_spill] sm:$0xff] %v7383_v57  ;;  %1294 = vmax.xlane.f32.xlu1 %v1293_v0  ;;  %v7395_v26 = vmax.f32 %v1304_v35, %v1253_v6  ;;  %v1173_v55 = vsel %vm410_vm1, %v1093_v29, 0.0 }
 0x31d   :  { %11076 = vst [vmem:[#allocation29_spill] sm:$0xff] %v7390_v9  ;;  %v7397_v33 = vmax.f32 %v1312_v4, %v1259_v25  ;;  %v1179_v58 = vsel %vm410_vm1, %v1095_v21, 0.0 }
 0x31f   :  { %v1160_v18 = vpop.xlane.xlu0 %1159 }
 0x320   :  { %1298 = vmax.xlane.f32.xlu1 %v1297_v47  ;;  %v7513_v13 = vmul.f32 0.0625, %v1160_v18 }
 0x331   :  { %2387 = vrot.lane.b32.xlu1 %v7071_v45, %s6781_s4 }
 0x355   :  { %1174 = vadd.xlane.f32.xlu1 %v1173_v55 }
 0x359   :  { %1180 = vadd.xlane.f32.xlu1 %v1179_v58 }
 0x372   :  { %v7407_v0 = vpop.f32.mrb[24].mxu1 }
 0x373   :  { %v7409_v35 = vpop.f32.mrb[25].mxu1 }
 0x374   :  { %v1316_v47 = vmax.f32 %v7407_v0, %v7409_v35  ;;  %v7413_v45 = vpop.f32.mrb[26].mxu1 }
 0x375   :  { %11077 = vst [vmem:[#allocation30_spill] sm:$0xff] %v7413_v45  ;;  %v7415_v4 = vpop.f32.mrb[27].mxu1 }
 0x376   :  { %11078 = vst [vmem:[#allocation31_spill] sm:$0xff] %v7415_v4  ;;  %v1320_v48 = vmax.f32 %v7413_v45, %v7415_v4 }
 0x37c   :  { %v7419_v6 = vpop.f32.mrb[28].mxu1  ;;  %v7421_v1 = vpop.f32.mrb[24].mxu0 }
 0x37d   :  { %11079 = vst [vmem:[#allocation32_spill] sm:$0xff] %v7419_v6  ;;  %11080 = vst [vmem:[#allocation33_spill] sm:$0xff] %v7421_v1  ;;  %v7423_v25 = vpop.f32.mrb[29].mxu1  ;;  %v7425_v29 = vpop.f32.mrb[25].mxu0  ;;  %v1268_v54 = vsel %vm1235_vm2, %v7421_v1, -1e+30 }
 0x37e   :  { %11081 = vst [vmem:[#allocation34_spill] sm:$0xff] %v7423_v25  ;;  %11082 = vst [vmem:[#allocation35_spill] sm:$0xff] %v7425_v29  ;;  %v1324_v55 = vmax.f32 %v7419_v6, %v7423_v25  ;;  %v1262_v21 = vsel %vm1235_vm2, %v7425_v29, -1e+30  ;;  %v7432_v58 = vpop.f32.mrb[30].mxu1  ;;  %v7434_v61 = vpop.f32.mrb[26].mxu0 }
 0x37f   :  { %11083 = vst [vmem:[#allocation36_spill] sm:$0xff] %v7432_v58  ;;  %11084 = vst [vmem:[#allocation37_spill] sm:$0xff] %v7434_v61  ;;  %v7439_v53 = vpop.f32.mrb[31].mxu1  ;;  %v7441_v41 = vpop.f32.mrb[27].mxu0  ;;  %v7443_v37 = vmax.f32 %v1316_v47, %v1262_v21  ;;  %v1271_v14 = vsel %vm1235_vm2, %v7434_v61, -1e+30 }
 0x380   :  { %11085 = vst [vmem:[#allocation38_spill] sm:$0xff] %v7439_v53  ;;  %11086 = vst [vmem:[#allocation39_spill] sm:$0xff] %v7441_v41  ;;  %v1328_v12 = vmax.f32 %v7432_v58, %v7439_v53  ;;  %v1265_v11 = vsel %vm1235_vm2, %v7441_v41, -1e+30  ;;  %v7450_v17 = vmax.f32 %v1324_v55, %v1268_v54 }
 0x381   :  { %v7455_v9 = vmax.f32 %v1320_v48, %v1265_v11 }
 0x382   :  { %v7457_v57 = vmax.f32 %v1328_v12, %v1271_v14 }
 0x384   :  { %v7459_v47 = vpop.f32.mrb[32].mxu1 }
 0x385   :  { %11087 = vst [vmem:[#allocation40_spill] sm:$0xff] %v7459_v47  ;;  %v7461_v21 = vpop.f32.mrb[33].mxu1 }
 0x386   :  { %11088 = vst [vmem:[#allocation41_spill] sm:$0xff] %v7461_v21  ;;  %v1332_v28 = vmax.f32 %v7459_v47, %v7461_v21  ;;  %v7465_v49 = vpop.f32.mrb[34].mxu1 }
 0x387   :  { %11089 = vst [vmem:[#allocation42_spill] sm:$0xff] %v7465_v49  ;;  %v7467_v54 = vpop.f32.mrb[35].mxu1 }
 0x388   :  { %11090 = vst [vmem:[#allocation43_spill] sm:$0xff] %v7467_v54  ;;  %v1336_v55 = vmax.f32 %v7465_v49, %v7467_v54 }
 0x38a   :  { %v7471_v11 = vpop.f32.mrb[28].mxu0 }
 0x38b   :  { %11091 = vst [vmem:[#allocation44_spill] sm:$0xff] %v7471_v11  ;;  %v7473_v12 = vpop.f32.mrb[29].mxu0 }
 0x38c   :  { %11092 = vst [vmem:[#allocation45_spill] sm:$0xff] %v7473_v12  ;;  %v1274_v14 = vsel %vm1235_vm2, %v7473_v12, -1e+30  ;;  %v7478_v48 = vpop.f32.mrb[36].mxu1  ;;  %v7480_v31 = vpop.f32.mrb[30].mxu0 }
 0x38d   :  { %11093 = vst [vmem:[#allocation46_spill] sm:$0xff] %v7478_v48  ;;  %11094 = vst [vmem:[#allocation47_spill] sm:$0xff] %v7480_v31  ;;  %v7482_v21 = vpop.f32.mrb[37].mxu1  ;;  %v7484_v47 = vpop.f32.mrb[31].mxu0  ;;  %v7486_v40 = vmax.f32 %v1332_v28, %v1274_v14  ;;  %v1280_v12 = vsel %vm1235_vm2, %v7471_v11, -1e+30 }
 0x38e   :  { %11095 = vst [vmem:[#allocation48_spill] sm:$0xff] %v7482_v21  ;;  %11096 = vst [vmem:[#allocation49_spill] sm:$0xff] %v7484_v47  ;;  %v1340_v54 = vmax.f32 %v7478_v48, %v7482_v21  ;;  %v1277_v49 = vsel %vm1235_vm2, %v7484_v47, -1e+30  ;;  %v7493_v8 = vpop.f32.mrb[38].mxu1  ;;  %v7506_v21 = vmul.f32 0.0625, %v1157_v22 }
 0x38f   :  { %11097 = vst [vmem:[#allocation50_spill] sm:$0xff] %v7493_v8  ;;  %v7498_v63 = vpop.f32.mrb[39].mxu1  ;;  %v7500_v24 = vmax.f32 %v1336_v55, %v1277_v49  ;;  %v1283_v48 = vsel %vm1235_vm2, %v7480_v31, -1e+30  ;;  %v1213_v47 = vmul.f32 0.0625, %v1151_v5 }
 0x390   :  { %11098 = vst [vmem:[#allocation51_spill] sm:$0xff] %v7498_v63  ;;  %v7502_v28 = vmax.f32 %v1340_v54, %v1280_v12  ;;  %v1344_v14 = vmax.f32 %v7493_v8, %v7498_v63  ;;  %v1214_v54 = vmul.f32 0.0625, %v7279_v27  ;;  %v1350_v27 = vsub.f32 %v7315_v38, %v7282_v34 }
 0x392   :  { %11099 = vst [vmem:[#allocation52_spill] sm:$0xff] %v7502_v28  ;;  %v7511_v10 = vmax.f32 %v1344_v14, %v1283_v48  ;;  %v6205_v11 = vpop.f32.mrb[32].mxu0 }
 0x393   :  { %v1644_v49 = vsub.f32 %v6205_v11, %v7506_v21  ;;  %v1006_v55 = vpop.f32.mrb[33].mxu0 }
 0x394   :  { %11100 = vst [vmem:[#allocation53_spill] sm:$0xff] %v7511_v10  ;;  %v1638_v12 = vsub.f32 %v1006_v55, %v1213_v47  ;;  %v829_v7 = vpop.f32.mrb[40].mxu1  ;;  %v6206_v63 = vpop.f32.mrb[34].mxu0 }
 0x395   :  { %v1692_v22 = vadd.f32 0.0001, %v1644_v49  ;;  %v1636_v8 = vsub.f32 %v829_v7, %v1213_v47  ;;  %v1647_v61 = vsub.f32 %v6206_v63, %v7513_v13  ;;  %v831_v53 = vpop.f32.mrb[41].mxu1  ;;  %v1009_v31 = vpop.f32.mrb[35].mxu0 }
 0x396   :  { %v1686_v5 = vadd.f32 0.0001, %v1638_v12  ;;  %v1637_v48 = vsub.f32 %v831_v53, %v1213_v47  ;;  %v1641_v14 = vsub.f32 %v1009_v31, %v1214_v54  ;;  %v833_v58 = vpop.f32.mrb[42].mxu1 }
 0x397   :  { %v1748_v18 = vmul.f32 1.442695, %v1692_v22  ;;  %v1684_v1 = vadd.f32 0.0001, %v1636_v8  ;;  %v1695_v25 = vadd.f32 0.0001, %v1647_v61  ;;  %v1639_v11 = vsub.f32 %v833_v58, %v1214_v54 }
 0x398   :  { %v1736_v55 = vmul.f32 1.442695, %v1686_v5  ;;  %v1685_v6 = vadd.f32 0.0001, %v1637_v48  ;;  %v1689_v10 = vadd.f32 0.0001, %v1641_v14  ;;  %v11101_v8 = vsub.f32 %v7284_v20, %v7282_v34 }
 0x399   :  { %6427 = vpow2.f32 %v1748_v18  ;;  %v1732_v7 = vmul.f32 1.442695, %v1684_v1  ;;  %v1754_v49 = vmul.f32 1.442695, %v1695_v25  ;;  %v1687_v63 = vadd.f32 0.0001, %v1639_v11  ;;  %v1287_v41 = vpop.xlane.xlu1 %1286 }
 0x39a   :  { %6429 = vpow2.f32 %v1736_v55  ;;  %v1734_v12 = vmul.f32 1.442695, %v1685_v6  ;;  %v1742_v53 = vmul.f32 1.442695, %v1689_v10  ;;  %v835_v31 = vpop.f32.mrb[43].mxu1  ;;  %v1396_v61 = vsub.f32 %v11101_v8, %v1287_v41  ;;  %v7523_v58 = vpop.f32.mrb[36].mxu0 }
 0x39b   :  { %11102 = vst [vmem:[#allocation54_spill] sm:$0xff] %v7523_v58  ;;  %6431 = vpow2.f32 %v1732_v7  ;;  %v1738_v38 = vmul.f32 1.442695, %v1687_v63  ;;  %v1640_v47 = vsub.f32 %v835_v31, %v1214_v54  ;;  %v11103_v22 = vsub.f32 %v7286_v36, %v7282_v34  ;;  %v7528_v25 = vpop.f32.mrb[37].mxu0 }
 0x39c   :  { %11104 = vst [vmem:[#allocation55_spill] sm:$0xff] %v7528_v25  ;;  %v1353_v6 = vsub.f32 %v7331_v51, %v7300_v50  ;;  %6433 = vpow2.f32 %v1754_v49  ;;  %v1398_v10 = vsub.f32 %v1350_v27, %v1287_v41  ;;  %v1444_v5 = vmul.f32 1.442695, %v1396_v61  ;;  %v839_v48 = vpop.f32.mrb[44].mxu1  ;;  %v7532_v20 = vpop.f32.mrb[38].mxu0 }
 0x39d   :  { %v1397_v1 = vsub.f32 %v11103_v22, %v1287_v41  ;;  %11105 = vst [vmem:[#allocation56_spill] sm:$0xff] %v7532_v20  ;;  %6435 = vpow2.f32 %v1734_v12  ;;  %v1688_v14 = vadd.f32 0.0001, %v1640_v47  ;;  %v1642_v54 = vsub.f32 %v839_v48, %v7506_v21  ;;  %v1291_v11 = vpop.xlane.xlu1 %1290  ;;  %v841_v55 = vpop.f32.mrb[45].mxu1 }
 0x39e   :  { %6437 = vpow2.f32 %v1742_v53  ;;  %v1448_v34 = vmul.f32 1.442695, %v1398_v10  ;;  %v11106_v36 = vsub.f32 %v7294_v43, %v7300_v50  ;;  %v11107_v41 = vsub.f32 %v7298_v46, %v7300_v50  ;;  %v7541_v27 = vpop.f32.mrb[39].mxu0  ;;  %v843_v49 = vpop.f32.mrb[46].mxu1 }
 0x39f   :  { %v1446_v18 = vmul.f32 1.442695, %v1397_v1  ;;  %11108 = vst [vmem:[#allocation57_spill] sm:$0xff] %v7541_v27  ;;  %6439 = vpow2.f32 %v1738_v38  ;;  %v1740_v63 = vmul.f32 1.442695, %v1688_v14  ;;  %v1401_v31 = vsub.f32 %v1353_v6, %v1291_v11  ;;  %v845_v8 = vpop.f32.mrb[47].mxu1 }
 0x3a0   :  { %v1399_v7 = vsub.f32 %v11106_v36, %v1291_v11  ;;  %v1400_v51 = vsub.f32 %v11107_v41, %v1291_v11  ;;  %v1690_v12 = vadd.f32 0.0001, %v1642_v54  ;;  %6441 = vpow2.f32 %v1444_v5 }
 0x3a1   :  { %v1643_v53 = vsub.f32 %v841_v55, %v7506_v21  ;;  %6443 = vpow2.f32 %v1740_v63  ;;  %v1645_v22 = vsub.f32 %v843_v49, %v7513_v13  ;;  %v1109_v1 = vpop.xlane.xlu1 %1108  ;;  %v1646_v50 = vsub.f32 %v845_v8, %v7513_v13 }
 0x3a2   :  { %v1450_v61 = vmul.f32 1.442695, %v1399_v7  ;;  %v1744_v47 = vmul.f32 1.442695, %v1690_v12  ;;  %v1452_v43 = vmul.f32 1.442695, %v1400_v51  ;;  %6445 = vpow2.f32 %v1446_v18 }
 0x3a3   :  { %v1691_v46 = vadd.f32 0.0001, %v1643_v53  ;;  %v7546_v10 = vmul.f32 0.0625, %v1109_v1  ;;  %v7548_v38 = vpop.f32.mrb[40].mxu0  ;;  %v6428_v6 = vpop.eup %6427  ;;  %6447 = vpow2.f32 %v1448_v34  ;;  %v1454_v5 = vmul.f32 1.442695, %v1401_v31 }
 0x3a4   :  { %v1693_v48 = vadd.f32 0.0001, %v1645_v22  ;;  %v7550_v14 = vpop.f32.mrb[41].mxu0  ;;  %v6430_v21 = vpop.eup %6429  ;;  %v1836_v54 = vmul.f32 0.061313935, %v6428_v6  ;;  %6449 = vpow2.f32 %v1744_v47 }
 0x3a5   :  { %v1746_v11 = vmul.f32 1.442695, %v1691_v46  ;;  %v1694_v55 = vadd.f32 0.0001, %v1646_v50  ;;  %v6432_v36 = vpop.eup %6431  ;;  %v1830_v18 = vmul.f32 0.061313935, %v6430_v21  ;;  %6451 = vpow2.f32 %v1450_v61  ;;  %v1112_v31 = vpop.xlane.xlu1 %1111 }
 0x3a6   :  { %v1750_v7 = vmul.f32 1.442695, %v1693_v48  ;;  %v1354_v13 = vsub.f32 %v7309_v15, %v7546_v10  ;;  %v7554_v41 = vpop.f32.mrb[48].mxu1  ;;  %v7556_v51 = vpop.f32.mrb[42].mxu0  ;;  %v1884_v49 = vsel %vm1235_vm2, %v1836_v54, 0.0  ;;  %6453 = vpow2.f32 %v1452_v43 }
 0x3a7   :  { %11109 = vst [vmem:[#allocation58_spill] sm:$0xff] %v7554_v41  ;;  %v6434_v34 = vpop.eup %6433  ;;  %v7560_v63 = vmul.f32 0.061313935, %v6432_v36  ;;  %v1752_v12 = vmul.f32 1.442695, %v1694_v55  ;;  %v7562_v8 = vpop.f32.mrb[49].mxu1  ;;  %6455 = vpow2.f32 %v1454_v5  ;;  %v1355_v47 = vsub.f32 %v7313_v32, %v7546_v10 }
 0x3a8   :  { %11110 = vst [vmem:[#allocation59_spill] sm:$0xff] %v7562_v8  ;;  %v6436_v61 = vpop.eup %6435  ;;  %v1878_v53 = vsel %vm1235_vm2, %v1830_v18, 0.0  ;;  %v1839_v15 = vmul.f32 0.061313935, %v6434_v34  ;;  %v7568_v22 = vpop.f32.mrb[43].mxu0  ;;  %6457 = vpow2.f32 %v1746_v11  ;;  %v1356_v43 = vsub.f32 %v7311_v16, %v7546_v10 }
 0x3a9   :  { %v7570_v1 = vpop.f32.mrb[50].mxu1  ;;  %v6438_v46 = vpop.eup %6437  ;;  %v1829_v50 = vmul.f32 0.061313935, %v6436_v61  ;;  %v1200_v6 = vmul.f32 0.0625, %v1112_v31  ;;  %6459 = vpow2.f32 %v1750_v7 }
 0x3aa   :  { %11111 = vst [vmem:[#allocation60_spill] sm:$0xff] %v7570_v1  ;;  %v7574_v48 = vpop.f32.mrb[51].mxu1  ;;  %v6440_v21 = vpop.eup %6439  ;;  %v1887_v5 = vsel %vm1235_vm2, %v1839_v15, 0.0  ;;  %v7578_v55 = vpack.c.bf16 %v1839_v15, %v1836_v54  ;;  %v1833_v32 = vmul.f32 0.061313935, %v6438_v46  ;;  %6461 = vpow2.f32 %v1752_v12 }
 0x3ab   :  { %11112 = vst [vmem:[#allocation61_spill] sm:$0xff] %v7574_v48  ;;  %v6442_v36 = vpop.eup %6441  ;;  %v1831_v34 = vmul.f32 0.061313935, %v6440_v21  ;;  %v1357_v61 = vsub.f32 %v7322_v52, %v1200_v6  ;;  %v1358_v11 = vsub.f32 %v7329_v62, %v1200_v6  ;;  %v1295_v20 = vpop.xlane.xlu1 %1294  ;;  %v1359_v15 = vsub.f32 %v7324_v56, %v1200_v6 }
 0x3ac   :  { %v7582_v16 = vpop.f32.mrb[44].mxu0  ;;  %v6444_v10 = vpop.eup %6443  ;;  %v1881_v31 = vsel %vm1235_vm2, %v1833_v32, 0.0  ;;  %v7586_v58 = vpack.c.bf16 %v1833_v32, %v1830_v18  ;;  %v1540_v54 = vadd.f32 0.0001, %v6442_v36  ;;  %v1402_v32 = vsub.f32 %v1354_v13, %v1295_v20 }
 0x3ad   :  { %11113 = vst [vmem:[#allocation62_spill] sm:$0xff] %v7582_v16  ;;  %v7589_v7 = vpop.f32.mrb[45].mxu0  ;;  %v7591_v46 = vpop.eup %6445  ;;  %v1942_v12 = vadd.f32 %v1881_v31, %v1878_v53  ;;  %v1924_v52 = vadd.f32 %v1831_v34, %v7560_v63  ;;  %v2074_v62 = vpack.c.bf16 %v1831_v34, %v7560_v63  ;;  %v1832_v21 = vmul.f32 0.061313935, %v6444_v10 }
 0x3ae   :  { %11114 = vst [vmem:[#allocation63_spill] sm:$0xff] %v7589_v7  ;;  %v7595_v16 = vpop.f32.mrb[52].mxu1  ;;  %v7597_v27 = vpop.f32.mrb[46].mxu0  ;;  %v7599_v18 = vmul.f32 0.061313935, %v1540_v54  ;;  %v1403_v36 = vsub.f32 %v1355_v47, %v1295_v20  ;;  %v1404_v56 = vsub.f32 %v1356_v43, %v1295_v20 }
 0x3af   :  { %11115 = vst [vmem:[#allocation64_spill] sm:$0xff] %v7595_v16  ;;  %11116 = vst [vmem:[#allocation65_spill] sm:$0xff] %v7597_v27  ;;  %v6448_v48 = vpop.eup %6447  ;;  %v7601_v6 = vpop.f32.mrb[53].mxu1  ;;  %v1943_v31 = vadd.f32 %v1942_v12, %v1884_v49  ;;  %v1933_v1 = vadd.f32 %v1832_v21, %v1829_v50  ;;  %v2075_v63 = vpack.c.bf16 %v1832_v21, %v1829_v50  ;;  %v1456_v54 = vmul.f32 1.442695, %v1402_v32 }
 0x3b0   :  { %11117 = vst [vmem:[#allocation66_spill] sm:$0xff] %v7599_v18  ;;  %11118 = vst [vmem:[#allocation67_spill] sm:$0xff] %v7601_v6  ;;  %v7603_v7 = vpop.f32.mrb[47].mxu0  ;;  %v6450_v53 = vpop.eup %6449  ;;  %v1542_v10 = vadd.f32 0.0001, %v6448_v48 }
 0x3b1   :  { %11119 = vst [vmem:[#allocation68_spill] sm:$0xff] %v7603_v7  ;;  %v1299_v25 = vpop.xlane.xlu1 %1298  ;;  %v7605_v34 = vpop.f32.mrb[54].mxu1  ;;  %v7607_v27 = vmul.f32 0.061313935, %v6450_v53  ;;  %v1458_v8 = vmul.f32 1.442695, %v1403_v36  ;;  %v1944_v20 = vadd.f32 %v1943_v31, %v1887_v5  ;;  %2102 = vmatprep.subr.bf16.mxu0 %v2075_v63  ;;  %6463 = vpow2.f32 %v1456_v54 }
 0x3b2   :  { %11120 = vst [vmem:[#allocation69_spill] sm:$0xff] %v7605_v34  ;;  %v6452_v16 = vpop.eup %6451  ;;  %v1405_v13 = vsub.f32 %v1357_v61, %v1299_v25  ;;  %v1460_v6 = vmul.f32 1.442695, %v1404_v56  ;;  %v1406_v41 = vsub.f32 %v1358_v11, %v1299_v25  ;;  %v7609_v7 = vpop.f32.mrb[55].mxu1  ;;  %v1407_v12 = vsub.f32 %v1359_v15, %v1299_v25  ;;  %2103 = vmatpush1.bf16.msra.mxu0 %v2074_v62 }
 0x3b3   :  { %v6454_v47 = vpop.eup %6453  ;;  %v1543_v43 = vadd.f32 0.0001, %v6452_v16  ;;  %11121 = vst [vmem:[#allocation70_spill] sm:$0xff] %v7609_v7  ;;  %v1925_v50 = vadd.f32 %v1924_v52, %v7607_v27  ;;  %v1945_v53 = vrot.slane %v1944_v20, 4  ;;  %6465 = vpow2.f32 %v1458_v8  ;;  %v6229_v5 = vpop.f32.mrb[48].mxu0 }
 0x3b4   :  { %v6456_v49 = vpop.eup %6455  ;;  %v1462_v48 = vmul.f32 1.442695, %v1405_v13  ;;  %v1464_v61 = vmul.f32 1.442695, %v1406_v41  ;;  %6467 = vpow2.f32 %v1460_v6  ;;  %v1466_v11 = vmul.f32 1.442695, %v1407_v12 }
 0x3b5   :  { %v6458_v21 = vpop.eup %6457  ;;  %v7612_v32 = vmul.f32 0.061313935, %v1543_v43  ;;  %v2057_v56 = vpop.f32.mrb[49].mxu0  ;;  %v1946_v63 = vadd.f32 %v1945_v53, %v1944_v20  ;;  %v1545_v52 = vadd.f32 0.0001, %v6456_v49 }
 0x3b6   :  { %v6460_v16 = vpop.eup %6459  ;;  %v1835_v36 = vmul.f32 0.061313935, %v6458_v21  ;;  %6469 = vpow2.f32 %v1462_v48  ;;  %v7614_v25 = vpop.f32.mrb[56].mxu1  ;;  %v1590_v13 = vmul.f32 0.061313935, %v1542_v10 }
 0x3b7   :  { %11122 = vst [vmem:[#allocation71_spill] sm:$0xff] %v7612_v32  ;;  %v6462_v31 = vpop.eup %6461  ;;  %v1837_v7 = vmul.f32 0.061313935, %v6460_v16  ;;  %v6230_v15 = vpop.f32.mrb[50].mxu0  ;;  %6471 = vpow2.f32 %v1464_v61  ;;  %v1947_v43 = vrot.slane %v1946_v63, 2 }
 0x3b8   :  { %v1934_v62 = vadd.f32 %v1933_v1, %v1835_v36  ;;  %v1838_v54 = vmul.f32 0.061313935, %v6462_v31  ;;  %v7616_v8 = vpop.f32.mrb[57].mxu1  ;;  %v2060_v41 = vpop.f32.mrb[51].mxu0  ;;  %6473 = vpow2.f32 %v1466_v11  ;;  %v1593_v48 = vmul.f32 0.061313935, %v1545_v52 }
 0x3b9   :  { %v1926_v21 = vadd.f32 %v1925_v50, %v1837_v7  ;;  %v2077_v6 = vpack.c.bf16 %v1837_v7, %v7607_v27  ;;  %v7619_v12 = vpop.f32.mrb[58].mxu1  ;;  %v2073_v49 = vpack.c.bf16 %v6230_v15, %v6229_v5  ;;  %v2072_v53 = vpack.c.bf16 %v2060_v41, %v2057_v56 }
 0x3ba   :  { %v1935_v20 = vadd.f32 %v1934_v62, %v1838_v54  ;;  %v7621_v16 = vpop.f32.mrb[59].mxu1  ;;  %v1948_v1 = vadd.f32 %v1947_v43, %v1946_v63  ;;  %v2078_v61 = vpack.c.bf16 %v1838_v54, %v1835_v36  ;;  %v1541_v10 = vadd.f32 0.0001, %v7591_v46 }
 0x3bb   :  { %v1927_v31 = vrot.slane %v1926_v21, 4  ;;  %v2206_v28 = vpack.c.bf16 %v1593_v48, %v1590_v13  ;;  %2080 = vxpose.xlu0.c.b16.start [1/2] (short) (narrow) %v2072_v53, 32  ;;  %v1544_v7 = vadd.f32 0.0001, %v6454_v47  ;;  %v6464_v36 = vpop.eup %6463 }
 0x3bc   :  { %v1936_v34 = vrot.slane %v1935_v20, 4  ;;  %2104 = vmatprep.subr.bf16.mxu0 %v2078_v61  ;;  %v1949_v11 = vrot.slane %v1948_v1, 1  ;;  %v7633_v46 = vmul.f32 0.061313935, %v1541_v10  ;;  %v7640_v47 = vpop.f32.mrb[60].mxu1 }
 0x3bd   :  { %v1928_v5 = vadd.f32 %v1927_v31, %v1926_v21  ;;  %6243 = vmatprep.mubr.bf16.mxu1 %v2206_v28  ;;  %2105 = vmatpush1.bf16.msra.mxu0 %v2077_v6  ;;  %v7635_v63 = vmul.f32 0.061313935, %v1544_v7  ;;  %v6466_v52 = vpop.eup %6465  ;;  %v7642_v43 = vpop.f32.mrb[61].mxu1 }
 0x3be   :  { %v1937_v56 = vadd.f32 %v1936_v34, %v1935_v20  ;;  %6231 = vmatprep.subr.msk.bf16.mxu0 %vm7627_vm3, %v7586_v58  ;;  %v1950_v62 = vadd.f32 %v1949_v11, %v1948_v1  ;;  %v6468_v54 = vpop.eup %6467  ;;  %v1547_v34 = vadd.f32 0.0001, %v6466_v52  ;;  %v7646_v53 = vpop.f32.mrb[62].mxu1  ;;  %v1546_v11 = vadd.f32 0.0001, %v6464_v36 }
 0x3bf   :  { %v1929_v15 = vrot.slane %v1928_v5, 2  ;;  %2081 = vxpose.xlu0.c.b16.end [2/2] (short) (narrow) %v2073_v49, 32  ;;  %v1548_v20 = vadd.f32 0.0001, %v6468_v54  ;;  %v7648_v1 = vpop.f32.mrb[63].mxu1 }
 0x3c0   :  { %v1938_v41 = vrot.slane %v1937_v56, 2  ;;  %v6470_v21 = vpop.eup %6469  ;;  %v1953_v31 = vmul.f32 %v1950_v62, %v1590_v13  ;;  %v1956_v61 = vmul.f32 %v1950_v62, %v1593_v48  ;;  %v7656_v13 = vmul.f32 0.061313935, %v1547_v34 }
 0x3c1   :  { %v1930_v6 = vadd.f32 %v1929_v15, %v1928_v5  ;;  %v6472_v10 = vpop.eup %6471  ;;  %v1549_v50 = vadd.f32 0.0001, %v6470_v21  ;;  %v7650_v45 = vmul.f32 0.061313935, %v1548_v20  ;;  %v7661_v36 = vmul.f32 0.061313935, %v1546_v11 }
 0x3c2   :  { %v1939_v7 = vadd.f32 %v1938_v41, %v1937_v56  ;;  %v6474_v49 = vpop.eup %6473  ;;  %v1550_v44 = vadd.f32 0.0001, %v6472_v10 }
 0x3c3   :  { %v1931_v4 = vrot.slane %v1930_v6, 1  ;;  %11125 = vst [vmem:[#allocation72_spill] sm:$0xff] %v7650_v45  ;;  %v1551_v52 = vadd.f32 0.0001, %v6474_v49  ;;  %v7652_v29 = vmul.f32 0.061313935, %v1549_v50  ;;  %v1959_v48 = vmul.f32 %v1950_v62, %v7650_v45 }
 0x3c4   :  { %v1940_v28 = vrot.slane %v1939_v7, 1  ;;  %v7654_v15 = vmul.f32 0.061313935, %v1550_v44  ;;  %v7663_v41 = vpop.f32.mrb[64].mxu1 }
 0x3c5   :  { %v1932_v5 = vadd.f32 %v1931_v4, %v1930_v6  ;;  %v7659_v54 = vmul.f32 0.061313935, %v1551_v52  ;;  %11128 = vst [vmem:[#allocation75_spill] sm:$0xff] %v7663_v41  ;;  %v7672_v34 = vpop.f32.mrb[65].mxu1 }
 0x3c6   :  { %11126 = vst [vmem:[#allocation73_spill] sm:$0xff] %v7654_v15  ;;  %v1941_v56 = vadd.f32 %v1940_v28, %v1939_v7  ;;  %11129 = vst [vmem:[#allocation76_spill] sm:$0xff] %v7672_v34  ;;  %v7679_v7 = vpop.f32.mrb[66].mxu1 }
 0x3c7   :  { %11127 = vst [vmem:[#allocation74_spill] sm:$0xff] %v7659_v54  ;;  %v1951_v21 = vmul.f32 %v1932_v5, %v7599_v18  ;;  %v1954_v20 = vmul.f32 %v1932_v5, %v7612_v32  ;;  %v1960_v50 = vmul.f32 %v1932_v5, %v7652_v29  ;;  %11130 = vst [vmem:[#allocation77_spill] sm:$0xff] %v7679_v7  ;;  %v7686_v44 = vpop.f32.mrb[67].mxu1 }
 0x3c8   :  { %v1952_v28 = vmul.f32 %v1941_v56, %v7633_v46  ;;  %v1955_v6 = vmul.f32 %v1941_v56, %v7635_v63  ;;  %v1961_v10 = vmul.f32 %v1941_v56, %v7654_v15  ;;  %2389 = vrot.lane.b32.xlu0 %v7068_v42, %s6781_s4  ;;  %v1962_v11 = vmul.f32 %v1950_v62, %v7659_v54 }
 0x3c9   :  { %v1957_v52 = vmul.f32 %v1932_v5, %v7661_v36  ;;  %v1958_v4 = vmul.f32 %v1941_v56, %v7656_v13  ;;  %11131 = vst [vmem:[#allocation78_spill] sm:$0xff] %v7686_v44 }
 0x3ca   :  { %v1963_v34 = vadd.f32 %v1952_v28, %v1951_v21  ;;  %v1967_v41 = vadd.f32 %v1955_v6, %v1954_v20  ;;  %v1975_v45 = vadd.f32 %v1961_v10, %v1960_v50  ;;  %v1094_v21 = vmul.f32 %v7232_v60, %v7232_v60  ;;  %v6732_v20 = vld [vmem:[#allocation2 + $0x48] sm:$0xff]  ;;  %v6733_v60 = vld [vmem:[#allocation2 + $0x50] sm:$0xff]  ;;  %v6734_v28 = vld [vmem:[#allocation2 + $0x58] sm:$0xff] }
 0x3cb   :  { %v1971_v15 = vadd.f32 %v1958_v4, %v1957_v52  ;;  %v1078_v50 = vmul.f32 %v6732_v20, %v6732_v20  ;;  %v1080_v6 = vmul.f32 %v6734_v28, %v6734_v28  ;;  %v6739_v28 = vld [vmem:[#allocation2 + $0xe8] sm:$0xff] }
 0x3cc   :  { %v7688_v18 = vadd.f32 %v1963_v34, %v1953_v31  ;;  %v7690_v42 = vadd.f32 %v1967_v41, %v1956_v61  ;;  %v7692_v32 = vadd.f32 %v1975_v45, %v1962_v11  ;;  %v7696_v54 = vpop.f32.mrb[68].mxu1  ;;  %v1176_v31 = vsel %vm410_vm1, %v1094_v21, 0.0 }
 0x3cd   :  { %v7694_v62 = vadd.f32 %v1971_v15, %v1959_v48  ;;  %11133 = vst [vmem:[#allocation80_spill] sm:$0xff] %v7696_v54  ;;  %v7698_v49 = vpop.f32.mrb[69].mxu1  ;;  %v1096_v61 = vmul.f32 %v7246_v3, %v7246_v3  ;;  %v6731_v15 = vld [vmem:[#allocation2 + $0x40] sm:$0xff]  ;;  %v1128_v4 = vsel %vm410_vm1, %v1078_v50, 0.0  ;;  %v1079_v34 = vmul.f32 %v6733_v60, %v6733_v60 }
 0x3ce   :  { %11134 = vst [vmem:[#allocation81_spill] sm:$0xff] %v7698_v49  ;;  %v7700_v5 = vpop.f32.mrb[70].mxu1  ;;  %v1077_v48 = vmul.f32 %v6731_v15, %v6731_v15  ;;  %v1134_v10 = vsel %vm410_vm1, %v1080_v6, 0.0  ;;  %v1089_v11 = vmul.f32 %v7222_v30, %v7222_v30  ;;  %v1091_v21 = vmul.f32 %v7235_v39, %v7235_v39 }
 0x3cf   :  { %11132 = vst [vmem:[#allocation79_spill] sm:$0xff] %v7694_v62  ;;  %11135 = vst [vmem:[#allocation82_spill] sm:$0xff] %v7700_v5  ;;  %v7702_v56 = vpop.f32.mrb[71].mxu1  ;;  %v1182_v45 = vsel %vm410_vm1, %v1096_v61, 0.0  ;;  %v1131_v3 = vsel %vm410_vm1, %v1079_v34, 0.0  ;;  %v1098_v6 = vmul.f32 %v6739_v28, %v6739_v28  ;;  %v11159_v62 = vld [vmem:[#allocation64_spill] sm:$0xff] }
 0x3d0   :  { %11136 = vst [vmem:[#allocation83_spill] sm:$0xff] %v7702_v56  ;;  %v1125_v41 = vsel %vm410_vm1, %v1077_v48, 0.0 }
 0x3e7   :  { %1177 = vadd.xlane.f32.xlu0 %v1176_v31  ;;  %v1167_v31 = vsel %vm410_vm1, %v1091_v21, 0.0  ;;  %v6740_v21 = vld [vmem:[#allocation2 + $0x60] sm:$0xff] }
 0x3eb   :  { %1183 = vadd.xlane.f32.xlu0 %v1182_v45  ;;  %v6736_v45 = vld [vmem:[#allocation2 + $0x28] sm:$0xff] }
 0x3ec   :  { %v1074_v15 = vmul.f32 %v6736_v45, %v6736_v45  ;;  %v6741_v45 = vld [vmem:[#allocation2 + $0x68] sm:$0xff] }
 0x3ee   :  { %v1116_v39 = vsel %vm410_vm1, %v1074_v15, 0.0  ;;  %v1082_v15 = vmul.f32 %v6741_v45, %v6741_v45 }
 0x3ef   :  { %1126 = vadd.xlane.f32.xlu0 %v1125_v41  ;;  %v6737_v41 = vld [vmem:[#allocation2 + $0x30] sm:$0xff] }
 0x3f0   :  { %v1075_v20 = vmul.f32 %v6737_v41, %v6737_v41 }
 0x3f3   :  { %1129 = vadd.xlane.f32.xlu0 %v1128_v4  ;;  %v6738_v4 = vld [vmem:[#allocation2 + $0x38] sm:$0xff] }
 0x3f4   :  { %v1076_v60 = vmul.f32 %v6738_v4, %v6738_v4 }
 0x3f6   :  { %v1122_v34 = vsel %vm410_vm1, %v1076_v60, 0.0 }
 0x3f7   :  { %1318 = vmax.xlane.f32.xlu0 %v7443_v37  ;;  %v1161_v37 = vsel %vm410_vm1, %v1089_v11, 0.0 }
 0x3fb   :  { %1322 = vmax.xlane.f32.xlu0 %v7455_v9  ;;  %v1090_v9 = vmul.f32 %v7215_v23, %v7215_v23 }
 0x3fd   :  { %v1164_v52 = vsel %vm410_vm1, %v1090_v9, 0.0  ;;  %v1100_v9 = vmul.f32 %v7257_v19, %v7257_v19 }
 0x3ff   :  { %1132 = vadd.xlane.f32.xlu0 %v1131_v3 }
 0x403   :  { %1135 = vadd.xlane.f32.xlu0 %v1134_v10 }
 0x407   :  { %1326 = vmax.xlane.f32.xlu0 %v7450_v17  ;;  %v1092_v17 = vmul.f32 %v7228_v59, %v7228_v59  ;;  %v11137_v59 = vmov 0  }
 0x409   :  { %v1170_v30 = vsel %vm410_vm1, %v1092_v17, 0.0 }
 0x40b   :  { %1330 = vmax.xlane.f32.xlu0 %v7457_v57  ;;  %v6735_v57 = vld [vmem:[#allocation2 + $0x20] sm:$0xff] }
 0x40c   :  { %v1073_v61 = vmul.f32 %v6735_v57, %v6735_v57 }
 0x40e   :  { %v1113_v23 = vsel %vm410_vm1, %v1073_v61, 0.0 }
 0x40f   :  { %1162 = vadd.xlane.f32.xlu0 %v1161_v37  ;;  %v1188_v37 = vsel %vm410_vm1, %v1098_v6, 0.0 }
 0x413   :  { %1165 = vadd.xlane.f32.xlu0 %v1164_v52  ;;  %v1194_v52 = vsel %vm410_vm1, %v1100_v9, 0.0 }
 0x417   :  { %1168 = vadd.xlane.f32.xlu0 %v1167_v31  ;;  %v1081_v31 = vmul.f32 %v6740_v21, %v6740_v21 }
 0x41b   :  { %1171 = vadd.xlane.f32.xlu0 %v1170_v30 }
 0x41f   :  { %1114 = vadd.xlane.f32.xlu0 %v1113_v23 }
 0x421   :  { %v2088_v48 = vpop.trf.xlu0 }
 0x422   :  { %5977 = vmatmul.mubr.msk.bf16.vlgmr.msra.gmra.mrb[52].mxu0 %vm63_vm0, %v2088_v48 }
 0x423   :  { %6232 = vmatpush3.bf16.msk.msra.mxu0 %vm7627_vm3, %v7586_v58  ;;  %1117 = vadd.xlane.f32.xlu0 %v1116_v39  ;;  %v1119_v58 = vsel %vm410_vm1, %v1075_v20, 0.0 }
 0x424   :  { %6233 = vmatprep.subr.msk.bf16.mxu0 %vm7627_vm3, %v7578_v55  ;;  %2144 = vmatprep.mubr.bf16.mxu0 %v11137_v59 }
 0x425   :  { %v2089_v50 = vpop.trf.xlu0 }
 0x427   :  { %6234 = vmatpush3.bf16.msk.msra.mxu0 %vm7627_vm3, %v7578_v55  ;;  %1306 = vmax.xlane.f32.xlu0 %v7395_v26  ;;  %v11138_v26 = vpack.c.bf16 %v7635_v63, %v7633_v46  ;;  %v7755_v55 = vpop.permute.xlu1 %2387 }
 0x42a   :  { %5978 = vmatmul.mubr.msk.bf16.gmra.mrb[56].mxu0 %vm63_vm0, %v2089_v50 }
 0x42b   :  { %1120 = vadd.xlane.f32.xlu0 %v1119_v58  ;;  %6235 = vmatprep.mubr.msk.bf16.mxu0 %vm63_vm0, %v2088_v48  ;;  %v1175_v3 = vpop.xlane.xlu1 %1174 }
 0x42c   :  { %v1221_v10 = vmul.f32 0.0625, %v1175_v3 }
 0x42e   :  { %v1660_v63 = vsub.f32 %v7614_v25, %v1221_v10  ;;  %v1661_v17 = vsub.f32 %v7616_v8, %v1221_v10 }
 0x42f   :  { %1123 = vadd.xlane.f32.xlu0 %v1122_v34  ;;  %v1181_v11 = vpop.xlane.xlu1 %1180 }
 0x430   :  { %v1223_v46 = vmul.f32 0.0625, %v1181_v11  ;;  %v1708_v61 = vadd.f32 0.0001, %v1660_v63  ;;  %v1709_v25 = vadd.f32 0.0001, %v1661_v17 }
 0x432   :  { %6236 = vmatmul.mubr.msk.bf16.vlgmr.msra.gmra.mrb[60].mxu0 %vm63_vm0, %v2089_v50  ;;  %v1666_v57 = vsub.f32 %v7640_v47, %v1223_v46  ;;  %v1667_v23 = vsub.f32 %v7642_v43, %v1223_v46  ;;  %v1668_v19 = vsub.f32 %v7548_v38, %v1223_v46  ;;  %v1780_v8 = vmul.f32 1.442695, %v1708_v61 }
 0x433   :  { %1314 = vmax.xlane.f32.xlu0 %v7397_v33  ;;  %2248 = vmatprep.mubr.bf16.mxu0 %v11138_v26  ;;  %v1662_v33 = vsub.f32 %v7550_v14, %v1221_v10  ;;  %v1137_v14 = vsel %vm410_vm1, %v1081_v31, 0.0  ;;  %v1140_v47 = vsel %vm410_vm1, %v1082_v15, 0.0  ;;  %v1782_v58 = vmul.f32 1.442695, %v1709_v25  ;;  %v6743_v31 = vld [vmem:[#allocation2 + $0x78] sm:$0xff] }
 0x434   :  { %v1714_v41 = vadd.f32 0.0001, %v1666_v57  ;;  %v1715_v20 = vadd.f32 0.0001, %v1667_v23  ;;  %v1716_v50 = vadd.f32 0.0001, %v1668_v19  ;;  %v1084_v17 = vmul.f32 %v6743_v31, %v6743_v31 }
 0x435   :  { %v1710_v30 = vadd.f32 0.0001, %v1662_v33  ;;  %v6742_v33 = vld [vmem:[#allocation2 + $0x70] sm:$0xff] }
 0x436   :  { %v1792_v38 = vmul.f32 1.442695, %v1714_v41  ;;  %v1794_v60 = vmul.f32 1.442695, %v1715_v20  ;;  %v1796_v34 = vmul.f32 1.442695, %v1716_v50  ;;  %v1083_v46 = vmul.f32 %v6742_v33, %v6742_v33 }
 0x437   :  { %v1784_v39 = vmul.f32 1.442695, %v1710_v30  ;;  %v1146_v41 = vsel %vm410_vm1, %v1084_v17, 0.0  ;;  %v11144_v31 = vld [vmem:[#allocation39_spill] sm:$0xff] }
 0x439   :  { %6475 = vpow2.f32 %v1784_v39 }
 0x43a   :  { %v7768_v48 = vpop.permute.xlu0 %2389  ;;  %6477 = vpow2.f32 %v1780_v8 }
 0x43b   :  { %6479 = vpow2.f32 %v1782_v58 }
 0x43c   :  { %6481 = vpow2.f32 %v1792_v38 }
 0x43d   :  { %6483 = vpow2.f32 %v1794_v60 }
 0x43e   :  { %6485 = vpow2.f32 %v1796_v34 }
 0x443   :  { %v6476_v23 = vpop.eup %6475 }
 0x444   :  { %v7780_v25 = vmul.f32 0.061313935, %v6476_v23 }
 0x449   :  { %3189 = vrot.lane.b32.xlu0 %v7102_v2, %s6781_s4 }
 0x468   :  { %1189 = vadd.xlane.f32.xlu0 %v1188_v37 }
 0x46c   :  { %1195 = vadd.xlane.f32.xlu0 %v1194_v52 }
 0x470   :  { %1138 = vadd.xlane.f32.xlu0 %v1137_v14  ;;  %v1143_v14 = vsel %vm410_vm1, %v1083_v46, 0.0 }
 0x474   :  { %1141 = vadd.xlane.f32.xlu0 %v1140_v47  ;;  %v1178_v43 = vpop.xlane.xlu0 %1177  ;;  %v11139_v47 = vld [vmem:[#allocation35_spill] sm:$0xff] }
 0x475   :  { %v1222_v4 = vmul.f32 0.0625, %v1178_v43 }
 0x477   :  { %v1663_v26 = vsub.f32 %v7619_v12, %v1222_v4  ;;  %v1664_v3 = vsub.f32 %v7621_v16, %v1222_v4  ;;  %v1665_v28 = vsub.f32 %v7568_v22, %v1222_v4 }
 0x478   :  { %1334 = vmax.xlane.f32.xlu0 %v7486_v40  ;;  %v1184_v6 = vpop.xlane.xlu0 %1183 }
 0x479   :  { %v1711_v10 = vadd.f32 0.0001, %v1663_v26  ;;  %v1712_v11 = vadd.f32 0.0001, %v1664_v3  ;;  %v1713_v37 = vadd.f32 0.0001, %v1665_v28 }
 0x47a   :  { %v1224_v9 = vmul.f32 0.0625, %v1184_v6 }
 0x47b   :  { %v1786_v63 = vmul.f32 1.442695, %v1711_v10  ;;  %v1788_v52 = vmul.f32 1.442695, %v1712_v11  ;;  %v1790_v12 = vmul.f32 1.442695, %v1713_v37 }
 0x47c   :  { %v1669_v16 = vsub.f32 %v7646_v53, %v1224_v9  ;;  %v1670_v22 = vsub.f32 %v7648_v1, %v1224_v9  ;;  %v1671_v21 = vsub.f32 %v7556_v51, %v1224_v9  ;;  %1338 = vmax.xlane.f32.xlu0 %v7500_v24  ;;  %v1127_v40 = vpop.xlane.xlu0 %1126  ;;  %v6478_v53 = vpop.eup %6477 }
 0x47d   :  { %6487 = vpow2.f32 %v1786_v63  ;;  %v1205_v19 = vmul.f32 0.0625, %v1127_v40  ;;  %v6480_v24 = vpop.eup %6479  ;;  %v7786_v60 = vmul.f32 0.061313935, %v6478_v53  ;;  %v11142_v63 = vld [vmem:[#allocation31_spill] sm:$0xff]  ;;  %v11143_v40 = vld [vmem:[#allocation52_spill] sm:$0xff] }
 0x47e   :  { %6489 = vpow2.f32 %v1788_v52  ;;  %v1717_v30 = vadd.f32 0.0001, %v1669_v16  ;;  %v1718_v57 = vadd.f32 0.0001, %v1670_v22  ;;  %v1719_v61 = vadd.f32 0.0001, %v1671_v21  ;;  %v6482_v8 = vpop.eup %6481 }
 0x47f   :  { %6491 = vpow2.f32 %v1790_v12  ;;  %v1372_v20 = vsub.f32 %v7407_v0, %v1205_v19  ;;  %v1373_v50 = vsub.f32 %v7409_v35, %v1205_v19  ;;  %v1374_v58 = vsub.f32 %v11139_v47, %v1205_v19  ;;  %v6484_v43 = vpop.eup %6483  ;;  %v11141_v35 = vld [vmem:[#allocation30_spill] sm:$0xff] }
 0x480   :  { %v1798_v45 = vmul.f32 1.442695, %v1717_v30  ;;  %v1800_v1 = vmul.f32 1.442695, %v1718_v57  ;;  %v1802_v15 = vmul.f32 1.442695, %v1719_v61  ;;  %1144 = vadd.xlane.f32.xlu0 %v1143_v14  ;;  %v1130_v51 = vpop.xlane.xlu0 %1129  ;;  %v6486_v4 = vpop.eup %6485 }
 0x481   :  { %v1206_v39 = vmul.f32 0.0625, %v1130_v51  ;;  %v7788_v28 = vmul.f32 0.061313935, %v6480_v24  ;;  %v1902_v0 = vsel %vm1235_vm2, %v7780_v25, 0.0  ;;  %v7793_v10 = vmul.f32 0.061313935, %v6482_v8 }
 0x482   :  { %6493 = vpow2.f32 %v1798_v45  ;;  %v7797_v16 = vmul.f32 0.061313935, %v6484_v43  ;;  %v7799_v22 = vmul.f32 0.061313935, %v6486_v4 }
 0x483   :  { %6495 = vpow2.f32 %v1800_v1  ;;  %v1375_v11 = vsub.f32 %v11141_v35, %v1206_v39  ;;  %v1376_v52 = vsub.f32 %v11142_v63, %v1206_v39  ;;  %v1377_v17 = vsub.f32 %v11144_v31, %v1206_v39  ;;  %v11147_v63 = vld [vmem:[#allocation34_spill] sm:$0xff] }
 0x484   :  { %6497 = vpow2.f32 %v1802_v15  ;;  %1147 = vadd.xlane.f32.xlu0 %v1146_v41  ;;  %v1319_v38 = vpop.xlane.xlu0 %1318 }
 0x485   :  { %v1420_v34 = vsub.f32 %v1372_v20, %v1319_v38  ;;  %v1421_v26 = vsub.f32 %v1373_v50, %v1319_v38  ;;  %v1422_v3 = vsub.f32 %v1374_v58, %v1319_v38  ;;  %v11145_v20 = vld [vmem:[#allocation53_spill] sm:$0xff] }
 0x487   :  { %v6488_v37 = vpop.eup %6487  ;;  %v1492_v9 = vmul.f32 1.442695, %v1420_v34  ;;  %v1494_v33 = vmul.f32 1.442695, %v1421_v26  ;;  %v1496_v46 = vmul.f32 1.442695, %v1422_v3 }
 0x488   :  { %v6490_v12 = vpop.eup %6489  ;;  %v7801_v21 = vmul.f32 0.061313935, %v6488_v37  ;;  %1342 = vmax.xlane.f32.xlu0 %v11143_v40  ;;  %v1323_v30 = vpop.xlane.xlu0 %1322  ;;  %v1908_v26 = vsel %vm1235_vm2, %v7799_v22, 0.0 }
 0x489   :  { %v6492_v57 = vpop.eup %6491  ;;  %v7805_v61 = vmul.f32 0.061313935, %v6490_v12  ;;  %6499 = vpow2.f32 %v1492_v9  ;;  %v1423_v23 = vsub.f32 %v1375_v11, %v1323_v30  ;;  %v1424_v19 = vsub.f32 %v1376_v52, %v1323_v30 }
 0x48a   :  { %v7807_v14 = vmul.f32 0.061313935, %v6492_v57  ;;  %v2318_v53 = vadd.f32 %v7801_v21, %v7786_v60  ;;  %6501 = vpow2.f32 %v1494_v33  ;;  %v1425_v45 = vsub.f32 %v1377_v17, %v1323_v30  ;;  %v11146_v33 = vld [vmem:[#allocation32_spill] sm:$0xff] }
 0x48b   :  { %v2327_v1 = vadd.f32 %v7805_v61, %v7788_v28  ;;  %6503 = vpow2.f32 %v1496_v46  ;;  %v1498_v15 = vmul.f32 1.442695, %v1423_v23  ;;  %v1500_v51 = vmul.f32 1.442695, %v1424_v19  ;;  %v11148_v19 = vld [vmem:[#allocation33_spill] sm:$0xff] }
 0x48c   :  { %v6494_v24 = vpop.eup %6493  ;;  %v1905_v39 = vsel %vm1235_vm2, %v7807_v14, 0.0  ;;  %v2319_v41 = vadd.f32 %v2318_v53, %v7793_v10  ;;  %v1502_v8 = vmul.f32 1.442695, %v1425_v45  ;;  %1346 = vmax.xlane.f32.xlu0 %v11145_v20  ;;  %v1133_v50 = vpop.xlane.xlu0 %1132 }
 0x48d   :  { %v6496_v58 = vpop.eup %6495  ;;  %v2336_v43 = vadd.f32 %v1905_v39, %v1902_v0  ;;  %v2328_v38 = vadd.f32 %v2327_v1, %v7797_v16  ;;  %v7821_v4 = vmul.f32 0.061313935, %v6494_v24  ;;  %6505 = vpow2.f32 %v1498_v15  ;;  %v11150_v24 = vld [vmem:[#allocation38_spill] sm:$0xff] }
 0x48e   :  { %v6498_v34 = vpop.eup %6497  ;;  %v7826_v3 = vmul.f32 0.061313935, %v6496_v58  ;;  %6507 = vpow2.f32 %v1500_v51  ;;  %v1207_v35 = vmul.f32 0.0625, %v1133_v50 }
 0x48f   :  { %v2337_v11 = vadd.f32 %v2336_v43, %v1908_v26  ;;  %v7828_v37 = vmul.f32 0.061313935, %v6498_v34  ;;  %v2320_v9 = vadd.f32 %v2319_v41, %v7821_v4  ;;  %6509 = vpow2.f32 %v1502_v8  ;;  %v11151_v41 = vld [vmem:[#allocation37_spill] sm:$0xff] }
 0x490   :  { %v2329_v0 = vadd.f32 %v2328_v38, %v7826_v3  ;;  %v1378_v46 = vsub.f32 %v11146_v33, %v1207_v35  ;;  %v1379_v52 = vsub.f32 %v11147_v63, %v1207_v35  ;;  %1965 = vadd.xlane.f32.xlu0 %v7688_v18  ;;  %v1136_v12 = vpop.xlane.xlu0 %1135  ;;  %v1380_v53 = vsub.f32 %v11148_v19, %v1207_v35  ;;  %v11149_v18 = vld [vmem:[#allocation36_spill] sm:$0xff] }
 0x491   :  { %v1911_v40 = vsel %vm1235_vm2, %v7828_v37, 0.0  ;;  %v2321_v31 = vrot.slane %v2320_v9, 4  ;;  %v1208_v17 = vmul.f32 0.0625, %v1136_v12 }
 0x492   :  { %v2330_v57 = vrot.slane %v2329_v0, 4  ;;  %v2338_v23 = vadd.f32 %v2337_v11, %v1911_v40 }
 0x493   :  { %v6500_v1 = vpop.eup %6499  ;;  %v2322_v15 = vadd.f32 %v2321_v31, %v2320_v9  ;;  %v1381_v51 = vsub.f32 %v11149_v18, %v1208_v17  ;;  %v1382_v39 = vsub.f32 %v11150_v24, %v1208_v17  ;;  %v1383_v8 = vsub.f32 %v11151_v41, %v1208_v17 }
 0x494   :  { %v6502_v20 = vpop.eup %6501  ;;  %v2331_v50 = vadd.f32 %v2330_v57, %v2329_v0  ;;  %v2339_v58 = vrot.slane %v2338_v23, 4  ;;  %v1564_v43 = vadd.f32 0.0001, %v6500_v1  ;;  %1969 = vadd.xlane.f32.xlu0 %v7690_v42  ;;  %v1327_v38 = vpop.xlane.xlu0 %1326 }
 0x495   :  { %v6504_v26 = vpop.eup %6503  ;;  %v2323_v35 = vrot.slane %v2322_v15, 2  ;;  %v1565_v11 = vadd.f32 0.0001, %v6502_v20  ;;  %v1426_v9 = vsub.f32 %v1378_v46, %v1327_v38  ;;  %v1427_v33 = vsub.f32 %v1379_v52, %v1327_v38 }
 0x496   :  { %v2332_v63 = vrot.slane %v2331_v50, 2  ;;  %v2340_v12 = vadd.f32 %v2339_v58, %v2338_v23  ;;  %v1566_v40 = vadd.f32 0.0001, %v6504_v26  ;;  %v7849_v31 = vmul.f32 0.061313935, %v1564_v43 }
 0x497   :  { %v6506_v17 = vpop.eup %6505  ;;  %v2324_v0 = vadd.f32 %v2323_v35, %v2322_v15  ;;  %v7851_v57 = vmul.f32 0.061313935, %v1565_v11  ;;  %v1428_v19 = vsub.f32 %v1380_v53, %v1327_v38  ;;  %v1504_v42 = vmul.f32 1.442695, %v1426_v9 }
 0x498   :  { %11152 = vst [vmem:[#allocation35_spill] sm:$0xff] %v7849_v31  ;;  %v6508_v1 = vpop.eup %6507  ;;  %v2333_v18 = vadd.f32 %v2332_v63, %v2331_v50  ;;  %v2341_v24 = vrot.slane %v2340_v12, 2  ;;  %v7853_v41 = vmul.f32 0.061313935, %v1566_v40  ;;  %v1567_v34 = vadd.f32 0.0001, %v6506_v17  ;;  %v1331_v20 = vpop.xlane.xlu0 %1330 }
 0x499   :  { %v6510_v46 = vpop.eup %6509  ;;  %v1568_v52 = vadd.f32 0.0001, %v6508_v1  ;;  %6511 = vpow2.f32 %v1504_v42  ;;  %v1506_v23 = vmul.f32 1.442695, %v1427_v33  ;;  %v1508_v58 = vmul.f32 1.442695, %v1428_v19 }
 0x49a   :  { %v1569_v43 = vadd.f32 0.0001, %v6510_v46  ;;  %v7855_v26 = vmul.f32 0.061313935, %v1567_v34  ;;  %v1429_v15 = vsub.f32 %v1381_v51, %v1331_v20  ;;  %v1430_v35 = vsub.f32 %v1382_v39, %v1331_v20  ;;  %v11153_v42 = vld [vmem:[#allocation58_spill] sm:$0xff] }
 0x49b   :  { %v7857_v11 = vmul.f32 0.061313935, %v1568_v52  ;;  %6513 = vpow2.f32 %v1506_v23  ;;  %v1431_v53 = vsub.f32 %v1383_v8, %v1331_v20  ;;  %v2325_v50 = vrot.slane %v2324_v0, 1  ;;  %v11154_v20 = vld [vmem:[#allocation59_spill] sm:$0xff] }
 0x49c   :  { %v7859_v38 = vmul.f32 0.061313935, %v1569_v43  ;;  %6515 = vpow2.f32 %v1508_v58  ;;  %v1510_v63 = vmul.f32 1.442695, %v1429_v15  ;;  %v1163_v40 = vpop.xlane.xlu0 %1162  ;;  %v1512_v33 = vmul.f32 1.442695, %v1430_v35 }
 0x49d   :  { %v1514_v17 = vmul.f32 1.442695, %v1431_v53  ;;  %v1217_v19 = vmul.f32 0.0625, %v1163_v40  ;;  %v7863_v34 = vadd.f32 %v2325_v50, %v2324_v0  ;;  %v2334_v51 = vrot.slane %v2333_v18, 1  ;;  %v11155_v52 = vld [vmem:[#allocation55_spill] sm:$0xff] }
 0x49e   :  { %6517 = vpow2.f32 %v1510_v63  ;;  %v2342_v39 = vadd.f32 %v2341_v24, %v2340_v12 }
 0x49f   :  { %6519 = vpow2.f32 %v1512_v33  ;;  %v1648_v1 = vsub.f32 %v11153_v42, %v1217_v19  ;;  %v1649_v46 = vsub.f32 %v11154_v20, %v1217_v19  ;;  %v1650_v23 = vsub.f32 %v11155_v52, %v1217_v19  ;;  %v11156_v20 = vld [vmem:[#allocation60_spill] sm:$0xff]  ;;  %v11157_v52 = vld [vmem:[#allocation61_spill] sm:$0xff] }
 0x4a0   :  { %6521 = vpow2.f32 %v1514_v17  ;;  %v1166_v58 = vpop.xlane.xlu0 %1165  ;;  %v7870_v43 = vadd.f32 %v2334_v51, %v2333_v18  ;;  %v2343_v15 = vrot.slane %v2342_v39, 1  ;;  %v2345_v0 = vmul.f32 %v7863_v34, %v7849_v31 }
 0x4a1   :  { %v1696_v35 = vadd.f32 0.0001, %v1648_v1  ;;  %v1697_v12 = vadd.f32 0.0001, %v1649_v46  ;;  %v1698_v24 = vadd.f32 0.0001, %v1650_v23  ;;  %v2348_v53 = vmul.f32 %v7863_v34, %v7855_v26 }
 0x4a2   :  { %v1218_v50 = vmul.f32 0.0625, %v1166_v58  ;;  %v7876_v63 = vadd.f32 %v2343_v15, %v2342_v39  ;;  %v2346_v40 = vmul.f32 %v7870_v43, %v7851_v57  ;;  %v2349_v18 = vmul.f32 %v7870_v43, %v7857_v11  ;;  %v11158_v39 = vld [vmem:[#allocation57_spill] sm:$0xff] }
 0x4a3   :  { %v6512_v33 = vpop.eup %6511  ;;  %v1756_v17 = vmul.f32 1.442695, %v1696_v35  ;;  %v1758_v19 = vmul.f32 1.442695, %v1697_v12  ;;  %v1760_v51 = vmul.f32 1.442695, %v1698_v24 }
 0x4a4   :  { %v1570_v1 = vadd.f32 0.0001, %v6512_v33  ;;  %v1651_v46 = vsub.f32 %v11156_v20, %v1218_v50  ;;  %v1652_v23 = vsub.f32 %v11157_v52, %v1218_v50  ;;  %v1653_v58 = vsub.f32 %v11158_v39, %v1218_v50  ;;  %v1169_v15 = vpop.xlane.xlu0 %1168 }
 0x4a5   :  { %v6514_v9 = vpop.eup %6513  ;;  %6523 = vpow2.f32 %v1756_v17  ;;  %v2347_v8 = vmul.f32 %v7876_v63, %v7853_v41  ;;  %v2357_v45 = vadd.f32 %v2346_v40, %v2345_v0  ;;  %v1219_v35 = vmul.f32 0.0625, %v1169_v15 }
 0x4a6   :  { %v6516_v12 = vpop.eup %6515  ;;  %v1571_v24 = vadd.f32 0.0001, %v6514_v9  ;;  %v7889_v30 = vmul.f32 0.061313935, %v1570_v1  ;;  %v1699_v42 = vadd.f32 0.0001, %v1651_v46  ;;  %6525 = vpow2.f32 %v1760_v51 }
 0x4a7   :  { %v1572_v33 = vadd.f32 0.0001, %v6516_v12  ;;  %v1700_v20 = vadd.f32 0.0001, %v1652_v23  ;;  %v1701_v47 = vadd.f32 0.0001, %v1653_v58  ;;  %6527 = vpow2.f32 %v1758_v19 }
 0x4a8   :  { %v6518_v52 = vpop.eup %6517  ;;  %v1762_v50 = vmul.f32 1.442695, %v1699_v42  ;;  %v2358_v39 = vadd.f32 %v2357_v45, %v2347_v8  ;;  %v1654_v17 = vsub.f32 %v11159_v62, %v1219_v35  ;;  %v1172_v49 = vpop.xlane.xlu0 %1171  ;;  %v7892_v2 = vmul.f32 0.061313935, %v1571_v24  ;;  %v11160_v9 = vld [vmem:[#allocation67_spill] sm:$0xff]  ;;  %v11161_v23 = vld [vmem:[#allocation54_spill] sm:$0xff] }
 0x4a9   :  { %v6520_v54 = vpop.eup %6519  ;;  %v1573_v0 = vadd.f32 0.0001, %v6518_v52  ;;  %v1764_v40 = vmul.f32 1.442695, %v1700_v20  ;;  %v1655_v1 = vsub.f32 %v11160_v9, %v1219_v35  ;;  %v1766_v51 = vmul.f32 1.442695, %v1701_v47 }
 0x4aa   :  { %v6522_v15 = vpop.eup %6521  ;;  %v1574_v46 = vadd.f32 0.0001, %v6520_v54  ;;  %6529 = vpow2.f32 %v1762_v50  ;;  %2359 = vadd.xlane.f32.xlu0 %v2358_v39  ;;  %v1656_v58 = vsub.f32 %v11161_v23, %v1219_v35  ;;  %v7896_v19 = vmul.f32 0.061313935, %v1572_v33 }
 0x4ab   :  { %v1575_v45 = vadd.f32 0.0001, %v6522_v15  ;;  %6531 = vpow2.f32 %v1764_v40  ;;  %v1702_v62 = vadd.f32 0.0001, %v1654_v17  ;;  %v7898_v8 = vmul.f32 0.061313935, %v1573_v0 }
 0x4ac   :  { %6533 = vpow2.f32 %v1766_v51  ;;  %v1703_v42 = vadd.f32 0.0001, %v1655_v1  ;;  %v1704_v12 = vadd.f32 0.0001, %v1656_v58  ;;  %v1115_v24 = vpop.xlane.xlu0 %1114  ;;  %v7900_v20 = vmul.f32 0.061313935, %v1574_v46 }
 0x4ad   :  { %v1768_v52 = vmul.f32 1.442695, %v1702_v62  ;;  %v2350_v54 = vmul.f32 %v7876_v63, %v7859_v38  ;;  %v2361_v47 = vadd.f32 %v2349_v18, %v2348_v53  ;;  %v1220_v33 = vmul.f32 0.0625, %v1172_v49  ;;  %v11163_v46 = vld [vmem:[#allocation69_spill] sm:$0xff]  ;;  %v11164_v18 = vld [vmem:[#allocation70_spill] sm:$0xff]  ;;  %v11165_v58 = vld [vmem:[#allocation56_spill] sm:$0xff] }
 0x4ae   :  { %v1770_v50 = vmul.f32 1.442695, %v1703_v42  ;;  %v1772_v35 = vmul.f32 1.442695, %v1704_v12  ;;  %v7904_v39 = vmul.f32 0.0625, %v1115_v24  ;;  %v2351_v0 = vmul.f32 %v7863_v34, %v7889_v30 }
 0x4af   :  { %v6524_v40 = vpop.eup %6523  ;;  %6535 = vpow2.f32 %v1768_v52  ;;  %v2362_v17 = vadd.f32 %v2361_v47, %v2350_v54  ;;  %v2352_v9 = vmul.f32 %v7870_v43, %v7892_v2  ;;  %v7910_v1 = vmul.f32 0.061313935, %v1575_v45 }
 0x4b0   :  { %11162 = vst [vmem:[#allocation30_spill] sm:$0xff] %v7904_v39  ;;  %v7912_v15 = vmul.f32 0.061313935, %v6524_v40  ;;  %v1657_v53 = vsub.f32 %v11163_v46, %v1220_v33  ;;  %v1658_v51 = vsub.f32 %v11164_v18, %v1220_v33  ;;  %v1118_v49 = vpop.xlane.xlu0 %1117  ;;  %v6526_v23 = vpop.eup %6525  ;;  %6537 = vpow2.f32 %v1772_v35  ;;  %v11169_v46 = vld [vmem:[#allocation18_spill] sm:$0xff] }
 0x4b1   :  { %2363 = vadd.xlane.f32.xlu0 %v2362_v17  ;;  %v1659_v62 = vsub.f32 %v11165_v58, %v1220_v33  ;;  %v6528_v45 = vpop.eup %6527  ;;  %6539 = vpow2.f32 %v1770_v50  ;;  %v2353_v35 = vmul.f32 %v7876_v63, %v7896_v19  ;;  %v2365_v17 = vadd.f32 %v2352_v9, %v2351_v0  ;;  %v11170_v9 = vld [vmem:[#allocation19_spill] sm:$0xff] }
 0x4b2   :  { %v1705_v54 = vadd.f32 0.0001, %v1657_v53  ;;  %v1706_v47 = vadd.f32 0.0001, %v1658_v51  ;;  %v1202_v31 = vmul.f32 0.0625, %v1118_v49  ;;  %v2354_v52 = vmul.f32 %v7863_v34, %v7898_v8 }
 0x4b3   :  { %v1707_v18 = vadd.f32 0.0001, %v1659_v62  ;;  %v7925_v58 = vmul.f32 0.061313935, %v6526_v23  ;;  %v2366_v62 = vadd.f32 %v2365_v17, %v2353_v35  ;;  %v11171_v23 = vld [vmem:[#allocation27_spill] sm:$0xff] }
 0x4b4   :  { %v6530_v33 = vpop.eup %6529  ;;  %v1774_v12 = vmul.f32 1.442695, %v1705_v54  ;;  %v1776_v42 = vmul.f32 1.442695, %v1706_v47  ;;  %v1307_v50 = vpop.xlane.xlu0 %1306  ;;  %v1363_v40 = vsub.f32 %v11169_v46, %v1202_v31  ;;  %v1364_v49 = vsub.f32 %v11170_v9, %v1202_v31 }
 0x4b5   :  { %v6532_v53 = vpop.eup %6531  ;;  %v7929_v51 = vmul.f32 0.061313935, %v6530_v33  ;;  %v1778_v24 = vmul.f32 1.442695, %v1707_v18  ;;  %1977 = vadd.xlane.f32.xlu0 %v7692_v32  ;;  %v1365_v54 = vsub.f32 %v11171_v23, %v1202_v31  ;;  %v2355_v47 = vmul.f32 %v7870_v43, %v7900_v20 }
 0x4b6   :  { %v6534_v0 = vpop.eup %6533  ;;  %6541 = vpow2.f32 %v1774_v12  ;;  %v2356_v32 = vmul.f32 %v7876_v63, %v7910_v1  ;;  %v7941_v46 = vsub.f32 %v1363_v40, %v1307_v50  ;;  %v7943_v12 = vsub.f32 %v1364_v49, %v1307_v50 }
 0x4b7   :  { %v1845_v34 = vmul.f32 0.061313935, %v6534_v0  ;;  %v2724_v33 = vadd.f32 %v7929_v51, %v7912_v15  ;;  %6543 = vpow2.f32 %v1776_v42  ;;  %v2369_v18 = vadd.f32 %v2355_v47, %v2354_v52  ;;  %v11181_v47 = vld [vmem:[#allocation25_spill] sm:$0xff] }
 0x4b8   :  { %6545 = vpow2.f32 %v1778_v24  ;;  %11172 = vst [vmem:[#allocation31_spill] sm:$0xff] %v7941_v46  ;;  %11173 = vst [vmem:[#allocation52_spill] sm:$0xff] %v7943_v12  ;;  %v1121_v35 = vpop.xlane.xlu0 %1120  ;;  %v1890_v31 = vsel %vm1235_vm2, %v7925_v58, 0.0  ;;  %v7950_v42 = vsub.f32 %v1365_v54, %v1307_v50 }
 0x4b9   :  { %v6536_v17 = vpop.eup %6535  ;;  %v1893_v43 = vsel %vm1235_vm2, %v1845_v34, 0.0  ;;  %2367 = vadd.xlane.f32.xlu0 %v2366_v62  ;;  %v7952_v0 = vmul.f32 0.0625, %v1121_v35  ;;  %v2370_v52 = vadd.f32 %v2369_v18, %v2356_v32  ;;  %v11179_v62 = vld [vmem:[#allocation24_spill] sm:$0xff] }
 0x4ba   :  { %11174 = vst [vmem:[#allocation39_spill] sm:$0xff] %v7950_v42  ;;  %v2742_v63 = vadd.f32 %v1893_v43, %v1890_v31  ;;  %v7954_v24 = vmul.f32 0.061313935, %v6536_v17  ;;  %v6538_v40 = vpop.eup %6537  ;;  %v7963_v17 = vmul.f32 0.061313935, %v6532_v53 }
 0x4bb   :  { %11175 = vst [vmem:[#allocation53_spill] sm:$0xff] %v7952_v0  ;;  %v6540_v46 = vpop.eup %6539  ;;  %v1848_v39 = vmul.f32 0.061313935, %v6538_v40  ;;  %v7969_v31 = vmul.f32 0.061313935, %v6528_v45 }
 0x4bc   :  { %v2725_v12 = vadd.f32 %v2724_v33, %v7954_v24  ;;  %v1124_v54 = vpop.xlane.xlu0 %1123  ;;  %v7982_v0 = vmul.f32 0.061313935, %v6540_v46  ;;  %v7998_v46 = vpack.c.bf16 %v1845_v34, %v7925_v58 }
 0x4bd   :  { %2371 = vadd.xlane.f32.xlu0 %v2370_v52  ;;  %v1204_v35 = vmul.f32 0.0625, %v1124_v54  ;;  %v1896_v18 = vsel %vm1235_vm2, %v1848_v39, 0.0  ;;  %v11180_v54 = vld [vmem:[#allocation26_spill] sm:$0xff]  ;;  %v2733_v23 = vadd.f32 %v7963_v17, %v7969_v31 }
 0x4be   :  { %v2743_v40 = vadd.f32 %v2742_v63, %v1896_v18 }
 0x4bf   :  { %v1369_v52 = vsub.f32 %v11179_v62, %v1204_v35  ;;  %v1370_v53 = vsub.f32 %v11180_v54, %v1204_v35  ;;  %v1371_v49 = vsub.f32 %v11181_v47, %v1204_v35  ;;  %v2734_v9 = vadd.f32 %v2733_v23, %v7982_v0 }
 0x4c0   :  { %v6542_v50 = vpop.eup %6541  ;;  %v1315_v32 = vpop.xlane.xlu0 %1314 }
 0x4c1   :  { %v6544_v63 = vpop.eup %6543  ;;  %v7986_v18 = vmul.f32 0.061313935, %v6542_v50  ;;  %v7988_v62 = vsub.f32 %v1369_v52, %v1315_v32  ;;  %v7990_v54 = vsub.f32 %v1370_v53, %v1315_v32  ;;  %v7992_v47 = vsub.f32 %v1371_v49, %v1315_v32  ;;  %v6393_v49 = vld [vmem:[%s10739_s6 + $0x20] sm:$0xff]   ;;  %v11195_v52 = vld [vmem:[#allocation42_spill] sm:$0xff] }
 0x4c2   :  { %v6546_v35 = vpop.eup %6545  ;;  %v7994_v43 = vmul.f32 0.061313935, %v6544_v63 }
 0x4c3   :  { %11182 = vst [vmem:[#allocation32_spill] sm:$0xff] %v7988_v62  ;;  %11183 = vst [vmem:[#allocation34_spill] sm:$0xff] %v7990_v54  ;;  %v1851_v45 = vmul.f32 0.061313935, %v6546_v35  ;;  %v8001_v33 = vadd.f32 %v2725_v12, %v7986_v18  ;;  %v11194_v62 = vld [vmem:[#allocation45_spill] sm:$0xff] }
 0x4c4   :  { %11184 = vst [vmem:[#allocation33_spill] sm:$0xff] %v7992_v47  ;;  %v8004_v50 = vadd.f32 %v2734_v9, %v7994_v43  ;;  %v8016_v34 = vpop.permute.xlu0 %3189 }
 0x4c5   :  { %v1899_v32 = vsel %vm1235_vm2, %v1851_v45, 0.0  ;;  %v8012_v23 = vpack.c.bf16 %v1851_v45, %v1848_v39  ;;  %11187 = vst [vmem:[#allocation37_spill] sm:$0xff] %v8016_v34 }
 0x4c6   :  { %11185 = vst [vmem:[#allocation36_spill] sm:$0xff] %v8004_v50  ;;  %v8014_v58 = vadd.f32 %v2743_v40, %v1899_v32 }
 0x4c8   :  { %11186 = vst [vmem:[#allocation38_spill] sm:$0xff] %v8014_v58 }
 0x4f5   :  { %v2136_v12 = vpop.f32.mrb[52].mxu0  ;;  %v1190_v53 = vpop.xlane.xlu0 %1189 }
 0x4f6   :  { %v8018_v63 = vmul.f32 0.0625, %v1190_v53  ;;  %v2138_v9 = vpop.f32.mrb[53].mxu0 }
 0x4f7   :  { %v2140_v35 = vpop.f32.mrb[54].mxu0 }
 0x4f8   :  { %11188 = vst [vmem:[#allocation58_spill] sm:$0xff] %v8018_v63  ;;  %v2210_v45 = vpack.c.bf16 %v2140_v35, %v2136_v12  ;;  %v2142_v40 = vpop.f32.mrb[55].mxu0  ;;  %v11192_v35 = vld [vmem:[#allocation40_spill] sm:$0xff] }
 0x4f9   :  { %v2211_v32 = vpack.c.bf16 %v2142_v40, %v2138_v9  ;;  %v1196_v47 = vpop.xlane.xlu0 %1195  ;;  %v11193_v40 = vld [vmem:[#allocation41_spill] sm:$0xff] }
 0x4fa   :  { %v8026_v34 = vmul.f32 0.0625, %v1196_v47 }
 0x4fb   :  { %2216 = vmatprep.subr.bf16.mxu0 %v2211_v32 }
 0x4fc   :  { %11190 = vst [vmem:[#allocation59_spill] sm:$0xff] %v8026_v34  ;;  %2217 = vmatpush1.bf16.xpose.msra.mxu0 %v2210_v45  ;;  %v11197_v34 = vld [vmem:[#allocation49_spill] sm:$0xff] }
 0x4fd   :  { %v2146_v6 = vpop.f32.mrb[56].mxu0  ;;  %v1139_v44 = vpop.xlane.xlu0 %1138 }
 0x4fe   :  { %v1209_v39 = vmul.f32 0.0625, %v1139_v44  ;;  %v2148_v12 = vpop.f32.mrb[57].mxu0  ;;  %v11196_v44 = vld [vmem:[#allocation43_spill] sm:$0xff] }
 0x4ff   :  { %v2150_v45 = vpop.f32.mrb[58].mxu0 }
 0x500   :  { %v1384_v9 = vsub.f32 %v11192_v35, %v1209_v39  ;;  %v1385_v47 = vsub.f32 %v11193_v40, %v1209_v39  ;;  %v1386_v32 = vsub.f32 %v11194_v62, %v1209_v39  ;;  %v2213_v63 = vpack.c.bf16 %v2150_v45, %v2146_v6  ;;  %v2152_v53 = vpop.f32.mrb[59].mxu0 }
 0x501   :  { %v1142_v7 = vpop.xlane.xlu0 %1141  ;;  %v2214_v58 = vpack.c.bf16 %v2152_v53, %v2148_v12 }
 0x502   :  { %v1210_v5 = vmul.f32 0.0625, %v1142_v7 }
 0x503   :  { %2218 = vmatprep.subr.bf16.mxu0 %v2214_v58 }
 0x504   :  { %v1387_v54 = vsub.f32 %v11195_v52, %v1210_v5  ;;  %v1388_v56 = vsub.f32 %v11196_v44, %v1210_v5  ;;  %v1389_v35 = vsub.f32 %v11197_v34, %v1210_v5  ;;  %2219 = vmatpush1.bf16.xpose.msra.mxu0 %v2213_v63  ;;  %v6394_v34 = vld [vmem:[%s10739_s6 + $0x28] sm:$0xff]  }
 0x505   :  { %v6237_v40 = vpop.f32.mrb[60].mxu0  ;;  %v1335_v42 = vpop.xlane.xlu0 %1334  ;;  %6247 = vmatprep.subr.bf16.mxu0 %v6393_v49  ;;  %v11200_v63 = vld [vmem:[#allocation66_spill] sm:$0xff] }
 0x506   :  { %v8043_v62 = vsub.f32 %v1384_v9, %v1335_v42  ;;  %v8045_v6 = vsub.f32 %v1385_v47, %v1335_v42  ;;  %v8047_v7 = vsub.f32 %v1386_v32, %v1335_v42  ;;  %v2189_v39 = vpop.f32.mrb[61].mxu0  ;;  %v11199_v42 = vld [vmem:[#allocation71_spill] sm:$0xff]  ;;  %v11202_v32 = vld [vmem:[#allocation73_spill] sm:$0xff] }
 0x507   :  { %v6238_v53 = vpop.f32.mrb[62].mxu0  ;;  %v11201_v9 = vpack.c.bf16 %v11199_v42, %v11200_v63 }
 0x508   :  { %v2215_v12 = vpack.c.bf16 %v6238_v53, %v6237_v40  ;;  %v2192_v45 = vpop.f32.mrb[63].mxu0  ;;  %v11203_v40 = vpack.c.bf16 %v11202_v32, %v7656_v13  ;;  %v11205_v53 = vld [vmem:[#allocation48_spill] sm:$0xff] }
 0x509   :  { %v1339_v52 = vpop.xlane.xlu0 %1338  ;;  %v2212_v50 = vpack.c.bf16 %v2192_v45, %v2189_v39  ;;  %v6396_v13 = vld [vmem:[%s10739_s6 + $0x38] sm:$0xff]  }
 0x50a   :  { %v8049_v44 = vsub.f32 %v1387_v54, %v1339_v52  ;;  %v8051_v5 = vsub.f32 %v1388_v56, %v1339_v52  ;;  %v8053_v58 = vsub.f32 %v1389_v35, %v1339_v52  ;;  %v6395_v54 = vld [vmem:[%s10739_s6 + $0x30] sm:$0xff]   ;;  %v11204_v35 = vld [vmem:[#allocation46_spill] sm:$0xff]  ;;  %v11206_v52 = vld [vmem:[#allocation44_spill] sm:$0xff] }
 0x50b   :  { %6239 = vmatprep.subr.bf16.mxu1 %v2212_v50  ;;  %2249 = vmatmul.mubr.bf16.vlgmr.msra.gmra.mrb[64].mxu0 %v11201_v9 }
 0x50c   :  { %11198 = vst [vmem:[#allocation55_spill] sm:$0xff] %v8053_v58  ;;  %6240 = vmatpush3.bf16.xpose.msra.mxu1 %v2212_v50  ;;  %2256 = vmatprep.mubr.bf16.mxu0 %v11203_v40  ;;  %v11209_v40 = vld [vmem:[#allocation47_spill] sm:$0xff] }
 0x50d   :  { %v1145_v47 = vpop.xlane.xlu0 %1144  ;;  %6248 = vmatpush3.bf16.msra.mxu0 %v6393_v49  ;;  %6241 = vmatprep.subr.bf16.mxu1 %v2215_v12  ;;  %v11207_v49 = vld [vmem:[#allocation50_spill] sm:$0xff] }
 0x50e   :  { %v1211_v56 = vmul.f32 0.0625, %v1145_v47  ;;  %6249 = vmatprep.subr.bf16.mxu0 %v6394_v34  ;;  %v11208_v47 = vld [vmem:[#allocation51_spill] sm:$0xff] }
 0x510   :  { %v1390_v39 = vsub.f32 %v11204_v35, %v1211_v56  ;;  %v1391_v45 = vsub.f32 %v11205_v53, %v1211_v56  ;;  %v1392_v42 = vsub.f32 %v11206_v52, %v1211_v56  ;;  %v11210_v35 = vpack.c.bf16 %v7652_v29, %v7661_v36 }
 0x511   :  { %v1148_v50 = vpop.xlane.xlu0 %1147  ;;  %6250 = vmatpush3.bf16.msra.mxu0 %v6394_v34  ;;  %v5996_v29 = vpack.c.bf16 %v7807_v14, %v7780_v25  ;;  %v11215_v25 = vpack.c.bf16 %v7801_v21, %v7786_v60 }
 0x512   :  { %v1212_v63 = vmul.f32 0.0625, %v1148_v50  ;;  %6251 = vmatprep.subr.bf16.mxu0 %v6395_v54  ;;  %v11211_v50 = vpack.c.bf16 %v7805_v61, %v7788_v28  ;;  %v5999_v28 = vpack.c.bf16 %v7828_v37, %v7799_v22  ;;  %v11216_v61 = vpack.c.bf16 %v7826_v3, %v7797_v16 }
 0x513   :  { %2257 = vmatmul.mubr.bf16.gmra.mrb[68].mxu0 %v11210_v35 }
 0x514   :  { %v1393_v9 = vsub.f32 %v11207_v49, %v1212_v63  ;;  %v1394_v32 = vsub.f32 %v11208_v47, %v1212_v63  ;;  %v1395_v58 = vsub.f32 %v11209_v40, %v1212_v63  ;;  %6242 = vmatpush3.bf16.xpose.msra.mxu1 %v2215_v12  ;;  %6255 = vmatprep.mubr.msk.bf16.mxu0 %vm410_vm1, %v7755_v55 }
 0x515   :  { %v1343_v56 = vpop.xlane.xlu0 %1342  ;;  %6252 = vmatpush3.bf16.msra.mxu0 %v6395_v54  ;;  %2500 = vmatprep.subr.bf16.mxu1 %v11211_v50 }
 0x516   :  { %v8081_v34 = vsub.f32 %v1390_v39, %v1343_v56  ;;  %v8083_v53 = vsub.f32 %v1391_v45, %v1343_v56  ;;  %v8085_v52 = vsub.f32 %v1392_v42, %v1343_v56  ;;  %6253 = vmatprep.subr.bf16.mxu0 %v6396_v13  ;;  %v11212_v39 = vld [vmem:[#allocation74_spill] sm:$0xff]  ;;  %v11213_v45 = vld [vmem:[#allocation72_spill] sm:$0xff] }
 0x517   :  { %v11214_v42 = vpack.c.bf16 %v11212_v39, %v11213_v45 }
 0x519   :  { %v1347_v36 = vpop.xlane.xlu0 %1346  ;;  %6254 = vmatpush3.bf16.msra.mxu0 %v6396_v13 }
 0x51a   :  { %v8092_v12 = vsub.f32 %v1393_v9, %v1347_v36  ;;  %v8094_v54 = vsub.f32 %v1394_v32, %v1347_v36  ;;  %6259 = vmatprep.subr.msk.bf16.mxu0 %vm7627_vm3, %v5996_v29  ;;  %v8098_v55 = vsub.f32 %v1395_v58, %v1347_v36 }
 0x51b   :  { %6244 = vmatmul.mubr.bf16.vlgmr.msra.gmra.mrb[72].mxu1 %v11214_v42  ;;  %v11218_v42 = vpack.c.bf16 %v7859_v38, %v7853_v41 }
 0x51c   :  { %6256 = vmatmul.mubr.msk.bf16.vlgmr.msra.gmra.mrb[72].mxu0 %vm410_vm1, %v7768_v48  ;;  %2501 = vmatpush1.bf16.msra.mxu1 %v11215_v25  ;;  %v11217_v48 = vpack.c.bf16 %v7821_v4, %v7793_v10  ;;  %v11219_v25 = vpack.c.bf16 %v7857_v11, %v7851_v57 }
 0x51d   :  { %6260 = vmatpush3.bf16.msk.msra.mxu0 %vm7627_vm3, %v5996_v29  ;;  %2502 = vmatprep.subr.bf16.mxu1 %v11216_v61 }
 0x51e   :  { %6261 = vmatprep.subr.msk.bf16.mxu0 %vm7627_vm3, %v5999_v28  ;;  %2532 = vmatprep.mubr.bf16.mxu1 %v11137_v59 }
 0x520   :  { %2503 = vmatpush1.bf16.msra.mxu1 %v11217_v48 }
 0x521   :  { %6262 = vmatpush3.bf16.msk.msra.mxu0 %vm7627_vm3, %v5999_v28 }
 0x5de   :  { %v2250_v60 = vpop.f32.mrb[64].mxu0 }
 0x5df   :  { %v2252_v22 = vpop.f32.mrb[65].mxu0 }
 0x5e0   :  { %v2253_v21 = vpop.f32.mrb[66].mxu0 }
 0x5e1   :  { %v2255_v14 = vpop.f32.mrb[67].mxu0 }
 0x5e6   :  { %v2258_v37 = vpop.f32.mrb[68].mxu0 }
 0x5e7   :  { %v2260_v58 = vpop.f32.mrb[69].mxu0 }
 0x5e8   :  { %v2261_v16 = vpop.f32.mrb[70].mxu0 }
 0x5e9   :  { %v2263_v3 = vpop.f32.mrb[71].mxu0 }
 0x5ee   :  { %v6245_v63 = vpop.f32.mrb[72].mxu1 }
 0x5ef   :  { %v8123_v13 = vadd.f32 %v6245_v63, %v2258_v37  ;;  %v6257_v49 = vpop.f32.mrb[72].mxu0  ;;  %v2299_v9 = vpop.f32.mrb[73].mxu1 }
 0x5f0   :  { %v8125_v47 = vadd.f32 %v2299_v9, %v2250_v60  ;;  %v2455_v10 = vpop.f32.mrb[73].mxu0  ;;  %v6246_v4 = vpop.f32.mrb[74].mxu1 }
 0x5f1   :  { %v8127_v32 = vadd.f32 %v6246_v4, %v2261_v16  ;;  %v6258_v40 = vpop.f32.mrb[74].mxu0  ;;  %v2302_v35 = vpop.f32.mrb[75].mxu1  ;;  %v11220_v4 = vpack.c.bf16 %v7963_v17, %v7969_v31  ;;  %v11224_v17 = vpack.c.bf16 %v7910_v1, %v7896_v19  ;;  %v11225_v31 = vpack.c.bf16 %v7929_v51, %v7912_v15  ;;  %v11230_v15 = vld [vmem:[#allocation13_spill] sm:$0xff] }
 0x5f2   :  { %v2471_v56 = vpack.c.bf16 %v6258_v40, %v6257_v49  ;;  %v8129_v50 = vadd.f32 %v2302_v35, %v2253_v21  ;;  %v2458_v29 = vpop.f32.mrb[75].mxu0  ;;  %v6398_v40 = vld [vmem:[%s10739_s6 + $0x8] sm:$0xff]   ;;  %v11221_v35 = vld [vmem:[#allocation35_spill] sm:$0xff]  ;;  %v11227_v19 = vpack.c.bf16 %v7898_v8, %v7889_v30  ;;  %v11229_v1 = vpack.c.bf16 %v7986_v18, %v7954_v24  ;;  %v1966_v30 = vpop.xlane.xlu0 %1965 }
 0x5f3   :  { %v2470_v36 = vpack.c.bf16 %v2458_v29, %v2455_v10  ;;  %v6397_v10 = vld [vmem:[%s10739_s6] sm:$0xff]   ;;  %v11223_v29 = vpack.c.bf16 %v7900_v20, %v7892_v2  ;;  %v6400_v2 = vld [vmem:[%s10739_s6 + $0x18] sm:$0xff]   ;;  %v11228_v20 = vld [vmem:[#allocation14_spill] sm:$0xff]  ;;  %6547 = vrcp.f32 %v1966_v30 }
 0x5f4   :  { %v11232_v30 = vld [vmem:[#allocation29_spill] sm:$0xff] }
 0x5f5   :  { %2478 = vxpose.xlu1.c.b16.start [1/2] (short) (narrow) %v2470_v36, 32  ;;  %v6399_v36 = vld [vmem:[%s10739_s6 + $0x10] sm:$0xff]  }
 0x5f6   :  { %v1970_v8 = vpop.xlane.xlu0 %1969 }
 0x5f9   :  { %2479 = vxpose.xlu1.c.b16.end [2/2] (short) (narrow) %v2471_v56, 32  ;;  %v11222_v56 = vpack.c.bf16 %v7855_v26, %v11221_v35  ;;  %v11226_v26 = vpack.c.bf16 %v7994_v43, %v7982_v0 }
 0x5fa   :  { %v2360_v51 = vpop.xlane.xlu0 %2359 }
 0x5fb   :  { %6549 = vrcp.f32 %v2360_v51 }
 0x5fc   :  { %6551 = vrcp.f32 %v1970_v8 }
 0x5fe   :  { %v2364_v0 = vpop.xlane.xlu0 %2363 }
 0x5ff   :  { %6553 = vrcp.f32 %v2364_v0  ;;  %v6745_v0 = vld [vmem:[#allocation2 + $0xf0] sm:$0xff] }
 0x602   :  { %v1978_v24 = vpop.xlane.xlu0 %1977 }
 0x606   :  { %v2368_v43 = vpop.xlane.xlu0 %2367 }
 0x607   :  { %6555 = vrcp.f32 %v2368_v43 }
 0x608   :  { %6557 = vrcp.f32 %v1978_v24  ;;  %v1099_v24 = vmul.f32 %v6745_v0, %v6745_v0 }
 0x60a   :  { %v2372_v18 = vpop.xlane.xlu0 %2371  ;;  %v1191_v43 = vsel %vm410_vm1, %v1099_v24, 0.0 }
 0x60b   :  { %6559 = vrcp.f32 %v2372_v18 }
 0x65b   :  { %v2486_v39 = vpop.trf.xlu1 }
 0x65c   :  { %5993 = vmatmul.mubr.msk.bf16.vlgmr.msra.gmra.mrb[76].mxu1 %vm63_vm0, %v2486_v39  ;;  %6263 = vmatprep.mubr.msk.bf16.mxu0 %vm63_vm0, %v2486_v39 }
 0x65d   :  { %2542 = vmatprep.mubr.bf16.mxu1 %v11137_v59 }
 0x65f   :  { %v2487_v45 = vpop.trf.xlu1 }
 0x660   :  { %6264 = vmatmul.mubr.msk.bf16.vlgmr.msra.gmra.mrb[76].mxu0 %vm63_vm0, %v2487_v45 }
 0x661   :  { %6271 = vmatprep.mubr.bf16.mxu0 %v11218_v42 }
 0x664   :  { %5994 = vmatmul.mubr.msk.bf16.gmra.mrb[80].mxu1 %vm63_vm0, %v2487_v45 }
 0x665   :  { %2646 = vmatprep.mubr.bf16.mxu1 %v11219_v25 }
 0x72f   :  { %v2534_v28 = vpop.f32.mrb[76].mxu1 }
 0x730   :  { %v2536_v61 = vpop.f32.mrb[77].mxu1 }
 0x731   :  { %v2538_v48 = vpop.f32.mrb[78].mxu1 }
 0x732   :  { %v2608_v60 = vpack.c.bf16 %v2538_v48, %v2534_v28  ;;  %v2540_v22 = vpop.f32.mrb[79].mxu1  ;;  %v6548_v28 = vpop.eup %6547 }
 0x733   :  { %v2609_v21 = vpack.c.bf16 %v2540_v22, %v2536_v61  ;;  %v6265_v14 = vpop.f32.mrb[76].mxu0 }
 0x734   :  { %v2587_v37 = vpop.f32.mrb[77].mxu0 }
 0x735   :  { %v6266_v58 = vpop.f32.mrb[78].mxu0  ;;  %2614 = vmatprep.subr.bf16.mxu1 %v2609_v21 }
 0x736   :  { %v2613_v16 = vpack.c.bf16 %v6266_v58, %v6265_v14  ;;  %v2590_v3 = vpop.f32.mrb[79].mxu0  ;;  %2615 = vmatpush1.bf16.xpose.msra.mxu1 %v2608_v60  ;;  %v6550_v60 = vpop.eup %6549  ;;  %v2314_v14 = vmul.f32 %v6548_v28, %v8125_v47 }
 0x737   :  { %v2610_v41 = vpack.c.bf16 %v2590_v3, %v2587_v37  ;;  %v2544_v38 = vpop.f32.mrb[80].mxu1  ;;  %v6552_v21 = vpop.eup %6551 }
 0x738   :  { %v2546_v63 = vpop.f32.mrb[81].mxu1  ;;  %v6554_v3 = vpop.eup %6553 }
 0x739   :  { %v2548_v49 = vpop.f32.mrb[82].mxu1  ;;  %6267 = vmatprep.subr.bf16.mxu0 %v2610_v41 }
 0x73a   :  { %v2611_v57 = vpack.c.bf16 %v2548_v49, %v2544_v38  ;;  %v2550_v11 = vpop.f32.mrb[83].mxu1  ;;  %6268 = vmatpush3.bf16.xpose.msra.mxu0 %v2610_v41  ;;  %v2315_v49 = vmul.f32 %v6552_v21, %v8129_v50  ;;  %v11238_v21 = vld [vmem:[#allocation30_spill] sm:$0xff] }
 0x73b   :  { %v2612_v9 = vpack.c.bf16 %v2550_v11, %v2546_v63  ;;  %6269 = vmatprep.subr.bf16.mxu0 %v2613_v16  ;;  %v6556_v63 = vpop.eup %6555 }
 0x73d   :  { %2616 = vmatprep.subr.bf16.mxu1 %v2612_v9 }
 0x73e   :  { %2617 = vmatpush1.bf16.xpose.msra.mxu1 %v2611_v57 }
 0x73f   :  { %6275 = vmatprep.subr.bf16.mxu1 %v6397_v10 }
 0x742   :  { %6270 = vmatpush3.bf16.xpose.msra.mxu0 %v2613_v16 }
 0x743   :  { %2902 = vmatprep.subr.bf16.mxu0 %v11220_v4 }
 0x745   :  { %2647 = vmatmul.mubr.bf16.vlgmr.msra.gmra.mrb[84].mxu1 %v11222_v56 }
 0x746   :  { %2654 = vmatprep.mubr.bf16.mxu1 %v11223_v29  ;;  %6276 = vmatpush3.bf16.msra.mxu1 %v6397_v10  ;;  %v6558_v10 = vpop.eup %6557 }
 0x747   :  { %6277 = vmatprep.subr.bf16.mxu1 %v6398_v40  ;;  %v6560_v56 = vpop.eup %6559  ;;  %v2317_v29 = vmul.f32 %v6558_v10, %v8127_v32  ;;  %v6744_v32 = vld [vmem:[#allocation2 + $0xe0] sm:$0xff] }
 0x748   :  { %v1097_v8 = vmul.f32 %v6744_v32, %v6744_v32 }
 0x749   :  { %6272 = vmatmul.mubr.bf16.vlgmr.msra.gmra.mrb[80].mxu0 %v11224_v17 }
 0x74a   :  { %6278 = vmatpush3.bf16.msra.mxu1 %v6398_v40  ;;  %2903 = vmatpush1.bf16.msra.mxu0 %v11225_v31  ;;  %v1185_v51 = vsel %vm410_vm1, %v1097_v8, 0.0 }
 0x74b   :  { %2904 = vmatprep.subr.bf16.mxu0 %v11226_v26  ;;  %6279 = vmatprep.subr.bf16.mxu1 %v6399_v36 }
 0x74c   :  { %2934 = vmatprep.mubr.bf16.mxu0 %v11137_v59 }
 0x74d   :  { %2655 = vmatmul.mubr.bf16.gmra.mrb[88].mxu1 %v11227_v19 }
 0x74e   :  { %6280 = vmatpush3.bf16.msra.mxu1 %v6399_v36  ;;  %6283 = vmatprep.mubr.msk.bf16.mxu1 %vm410_vm1, %v11228_v20 }
 0x74f   :  { %2905 = vmatpush1.bf16.msra.mxu0 %v11229_v1  ;;  %6281 = vmatprep.subr.bf16.mxu1 %v6400_v2 }
 0x752   :  { %6282 = vmatpush3.bf16.msra.mxu1 %v6400_v2 }
 0x753   :  { %6287 = vmatprep.subr.msk.bf16.mxu1 %vm7627_vm3, %v7998_v46 }
 0x755   :  { %6284 = vmatmul.mubr.msk.bf16.vlgmr.msra.gmra.mrb[92].mxu1 %vm410_vm1, %v11230_v15  ;;  %v11231_v15 = vld [vmem:[#allocation28_spill] sm:$0xff] }
 0x756   :  { %6288 = vmatpush3.bf16.msk.msra.mxu1 %vm7627_vm3, %v7998_v46 }
 0x757   :  { %6289 = vmatprep.subr.msk.bf16.mxu1 %vm7627_vm3, %v8012_v23 }
 0x75a   :  { %6290 = vmatpush3.bf16.msk.msra.mxu1 %vm7627_vm3, %v8012_v23 }
 0x818   :  { %v2648_v46 = vpop.f32.mrb[84].mxu1 }
 0x819   :  { %v2650_v39 = vpop.f32.mrb[85].mxu1 }
 0x81a   :  { %v2651_v45 = vpop.f32.mrb[86].mxu1  ;;  %v11233_v39 = vld [vmem:[#allocation52_spill] sm:$0xff] }
 0x81b   :  { %v2653_v42 = vpop.f32.mrb[87].mxu1 }
 0x81c   :  { %v6273_v25 = vpop.f32.mrb[80].mxu0  ;;  %v11234_v42 = vld [vmem:[#allocation36_spill] sm:$0xff] }
 0x81d   :  { %v2697_v23 = vpop.f32.mrb[81].mxu0 }
 0x81e   :  { %v2698_v61 = vadd.f32 %v2697_v23, %v2648_v46  ;;  %v6274_v48 = vpop.f32.mrb[82].mxu0  ;;  %v11235_v23 = vld [vmem:[#allocation39_spill] sm:$0xff] }
 0x81f   :  { %v2700_v22 = vpop.f32.mrb[83].mxu0  ;;  %v1478_v28 = vmul.f32 1.442695, %v11235_v23 }
 0x820   :  { %v2712_v37 = vmul.f32 %v6550_v60, %v2698_v61  ;;  %v2701_v58 = vadd.f32 %v2700_v22, %v2651_v45  ;;  %v2656_v16 = vpop.f32.mrb[88].mxu1  ;;  %v1476_v45 = vmul.f32 1.442695, %v11233_v39  ;;  %v11236_v61 = vld [vmem:[#allocation38_spill] sm:$0xff]  ;;  %v11237_v22 = vld [vmem:[#allocation16_spill] sm:$0xff] }
 0x821   :  { %v2706_v41 = vadd.f32 %v6273_v25, %v2656_v16  ;;  %v2658_v38 = vpop.f32.mrb[89].mxu1  ;;  %v2736_v25 = vrot.slane %v11234_v42, 4 }
 0x822   :  { %v2716_v57 = vadd.f32 %v2712_v37, %v2314_v14  ;;  %v2713_v11 = vmul.f32 %v6554_v3, %v2701_v58  ;;  %v2659_v9 = vpop.f32.mrb[90].mxu1  ;;  %v11239_v14 = vsub.f32 %v11237_v22, %v11238_v21  ;;  %v11240_v58 = vld [vmem:[#allocation17_spill] sm:$0xff]  ;;  %6561 = vpow2.f32 %v1476_v45 }
 0x823   :  { %v8197_v4 = vmul.f32 %v6556_v63, %v2706_v41  ;;  %v2709_v40 = vadd.f32 %v6274_v48, %v2659_v9  ;;  %v2661_v35 = vpop.f32.mrb[91].mxu1  ;;  %v2745_v48 = vrot.slane %v11236_v61, 4  ;;  %v11241_v16 = vsub.f32 %v11240_v58, %v11238_v21  ;;  %v11242_v41 = vld [vmem:[#allocation23_spill] sm:$0xff] }
 0x824   :  { %2720 = vst.msk [vmem:[#allocation3] sm:$0xff] %vm63_vm0, %v2716_v57  ;;  %v2717_v47 = vadd.f32 %v2713_v11, %v2315_v49  ;;  %v11243_v38 = vsub.f32 %v11242_v41, %v11238_v21  ;;  %v2737_v57 = vadd.f32 %v2736_v25, %v11234_v42  ;;  %6563 = vpow2.f32 %v1478_v28 }
 0x825   :  { %v2715_v36 = vmul.f32 %v6560_v56, %v2709_v40  ;;  %v2746_v40 = vadd.f32 %v2745_v48, %v11236_v61  ;;  %v11244_v56 = vld [vmem:[#allocation20_spill] sm:$0xff] }
 0x826   :  { %2721 = vst.msk [vmem:[#allocation3 + $0x8] sm:$0xff] %vm63_vm0, %v2717_v47  ;;  %v11245_v47 = vld [vmem:[#allocation53_spill] sm:$0xff] }
 0x827   :  { %v2719_v17 = vadd.f32 %v2715_v36, %v2317_v29  ;;  %v11246_v29 = vsub.f32 %v11244_v56, %v11245_v47  ;;  %v2747_v8 = vrot.slane %v2746_v40, 2 }
 0x828   :  { %v6285_v31 = vpop.f32.mrb[92].mxu1 }
 0x829   :  { %2723 = vst.msk [vmem:[#allocation3 + $0x18] sm:$0xff] %vm63_vm0, %v2719_v17  ;;  %v2857_v50 = vpop.f32.mrb[93].mxu1  ;;  %v11247_v17 = vld [vmem:[#allocation22_spill] sm:$0xff] }
 0x82a   :  { %v6286_v26 = vpop.f32.mrb[94].mxu1 }
 0x82b   :  { %v2873_v2 = vpack.c.bf16 %v6286_v26, %v6285_v31  ;;  %v2860_v19 = vpop.f32.mrb[95].mxu1  ;;  %v11248_v31 = vsub.f32 %v11247_v17, %v11245_v47 }
 0x82c   :  { %v2872_v1 = vpack.c.bf16 %v2860_v19, %v2857_v50  ;;  %v6562_v24 = vpop.eup %6561 }
 0x82d   :  { %v1556_v45 = vadd.f32 0.0001, %v6562_v24 }
 0x82e   :  { %2880 = vxpose.xlu1.c.b16.start [1/2] (short) (narrow) %v2872_v1, 32  ;;  %v2738_v1 = vrot.slane %v2737_v57, 2 }
 0x830   :  { %v2739_v0 = vadd.f32 %v2738_v1, %v2737_v57 }
 0x832   :  { %2881 = vxpose.xlu1.c.b16.end [2/2] (short) (narrow) %v2873_v2, 32  ;;  %v2740_v39 = vrot.slane %v2739_v0, 1 }
 0x83f   :  { %1302 = vmax.xlane.f32.xlu1 %v11231_v15 }
 0x843   :  { %1310 = vmax.xlane.f32.xlu1 %v11232_v30 }
 0x854   :  { %3187 = vrot.lane.b32.xlu1 %v11228_v20, %s6781_s4  ;;  %v2727_v20 = vrot.slane %v8001_v33, 4 }
 0x856   :  { %v2728_v49 = vadd.f32 %v2727_v20, %v8001_v33  ;;  %v11249_v33 = vld [vmem:[#allocation21_spill] sm:$0xff] }
 0x857   :  { %v11250_v26 = vsub.f32 %v11249_v33, %v11245_v47 }
 0x858   :  { %v2729_v19 = vrot.slane %v2728_v49, 2 }
 0x878   :  { %1186 = vadd.xlane.f32.xlu1 %v1185_v51  ;;  %v2730_v51 = vadd.f32 %v2729_v19, %v2728_v49 }
 0x87c   :  { %1192 = vadd.xlane.f32.xlu1 %v1191_v43  ;;  %v6564_v43 = vpop.eup %6563 }
 0x87d   :  { %v1557_v23 = vadd.f32 0.0001, %v6564_v43 }
 0x894   :  { %v2888_v18 = vpop.trf.xlu1 }
 0x895   :  { %6009 = vmatmul.mubr.msk.bf16.vlgmr.msra.gmra.mrb[84].mxu0 %vm63_vm0, %v2888_v18  ;;  %6291 = vmatprep.mubr.msk.bf16.mxu1 %vm63_vm0, %v2888_v18  ;;  %v2748_v18 = vadd.f32 %v2747_v8, %v2746_v40 }
 0x896   :  { %2944 = vmatprep.mubr.bf16.mxu0 %v11137_v59 }
 0x897   :  { %v2749_v48 = vrot.slane %v2748_v18, 1 }
 0x898   :  { %v2889_v46 = vpop.trf.xlu1 }
 0x899   :  { %6292 = vmatmul.mubr.msk.bf16.vlgmr.msra.gmra.mrb[96].mxu1 %vm63_vm0, %v2889_v46 }
 0x89d   :  { %6010 = vmatmul.mubr.msk.bf16.gmra.mrb[88].mxu0 %vm63_vm0, %v2889_v46  ;;  %v2731_v46 = vrot.slane %v2730_v51, 1 }
 0x89f   :  { %v8242_v21 = vadd.f32 %v2731_v46, %v2730_v51 }
 0x8cc   :  { %v1303_v60 = vpop.xlane.xlu1 %1302 }
 0x8cd   :  { %v1408_v37 = vsub.f32 %v11239_v14, %v1303_v60  ;;  %v1409_v3 = vsub.f32 %v11241_v16, %v1303_v60  ;;  %v1410_v63 = vsub.f32 %v11243_v38, %v1303_v60  ;;  %v8246_v16 = vmul.f32 0.061313935, %v1556_v45  ;;  %v11259_v45 = vld [vmem:[#allocation59_spill] sm:$0xff] }
 0x8cf   :  { %v1468_v11 = vmul.f32 1.442695, %v1408_v37  ;;  %v1470_v9 = vmul.f32 1.442695, %v1409_v3  ;;  %v1472_v10 = vmul.f32 1.442695, %v1410_v63  ;;  %v8244_v37 = vadd.f32 %v2740_v39, %v2739_v0 }
 0x8d0   :  { %v1311_v35 = vpop.xlane.xlu1 %1310  ;;  %v8248_v63 = vmul.f32 0.061313935, %v1557_v23  ;;  %v11254_v0 = vld [vmem:[#allocation78_spill] sm:$0xff] }
 0x8d1   :  { %6565 = vpow2.f32 %v1468_v11  ;;  %v1414_v36 = vsub.f32 %v11246_v29, %v1311_v35  ;;  %v1415_v50 = vsub.f32 %v11248_v31, %v1311_v35  ;;  %v1416_v2 = vsub.f32 %v11250_v26, %v1311_v35  ;;  %v11258_v39 = vld [vmem:[#allocation82_spill] sm:$0xff] }
 0x8d2   :  { %6567 = vpow2.f32 %v1470_v9 }
 0x8d3   :  { %6569 = vpow2.f32 %v1472_v10  ;;  %v1480_v15 = vmul.f32 1.442695, %v1414_v36  ;;  %v1482_v30 = vmul.f32 1.442695, %v1415_v50  ;;  %v1484_v32 = vmul.f32 1.442695, %v1416_v2 }
 0x8d4   :  { %v8253_v10 = vadd.f32 %v2749_v48, %v2748_v18  ;;  %v8275_v51 = vpop.permute.xlu1 %3187  ;;  %v11256_v18 = vld [vmem:[#allocation68_spill] sm:$0xff] }
 0x8d5   :  { %6571 = vpow2.f32 %v1480_v15  ;;  %v11251_v15 = vld [vmem:[#allocation77_spill] sm:$0xff] }
 0x8d6   :  { %6573 = vpow2.f32 %v1482_v30  ;;  %v11252_v30 = vld [vmem:[#allocation58_spill] sm:$0xff] }
 0x8d7   :  { %6575 = vpow2.f32 %v1484_v32  ;;  %v11253_v32 = vsub.f32 %v11251_v15, %v11252_v30  ;;  %v11255_v24 = vsub.f32 %v11254_v0, %v11252_v30  ;;  %v11257_v46 = vsub.f32 %v11256_v18, %v11252_v30  ;;  %v11268_v0 = vld [vmem:[#allocation80_spill] sm:$0xff] }
 0x8d9   :  { %v1723_v8 = vadd.f32 0.0001, %v11253_v32  ;;  %v1724_v43 = vadd.f32 0.0001, %v11255_v24 }
 0x8db   :  { %v6566_v20 = vpop.eup %6565  ;;  %v1810_v23 = vmul.f32 1.442695, %v1723_v8 }
 0x8dc   :  { %v6568_v42 = vpop.eup %6567  ;;  %v1552_v25 = vadd.f32 0.0001, %v6566_v20  ;;  %v1725_v20 = vadd.f32 0.0001, %v11257_v46  ;;  %v11270_v46 = vld [vmem:[#allocation62_spill] sm:$0xff] }
 0x8dd   :  { %v6570_v28 = vpop.eup %6569  ;;  %v1553_v61 = vadd.f32 0.0001, %v6568_v42  ;;  %v11260_v42 = vsub.f32 %v11258_v39, %v11259_v45  ;;  %6577 = vpow2.f32 %v1810_v23  ;;  %v1516_v39 = vmul.f32 1.442695, %v8043_v62 }
 0x8de   :  { %v8240_v60 = vmul.f32 0.061313935, %v1552_v25  ;;  %v1554_v22 = vadd.f32 0.0001, %v6570_v28  ;;  %v11261_v28 = vld [vmem:[#allocation83_spill] sm:$0xff] }
 0x8df   :  { %v6572_v14 = vpop.eup %6571  ;;  %v1601_v58 = vmul.f32 0.061313935, %v1553_v61  ;;  %v1729_v25 = vadd.f32 0.0001, %v11260_v42  ;;  %v11262_v61 = vsub.f32 %v11261_v28, %v11259_v45  ;;  %v1522_v62 = vmul.f32 1.442695, %v8049_v44 }
 0x8e0   :  { %v6574_v3 = vpop.eup %6573  ;;  %v1558_v41 = vadd.f32 0.0001, %v6572_v14  ;;  %v1602_v38 = vmul.f32 0.061313935, %v1554_v22  ;;  %v2751_v49 = vmul.f32 %v8242_v21, %v8240_v60  ;;  %v1812_v14 = vmul.f32 1.442695, %v1724_v43 }
 0x8e1   :  { %v6576_v57 = vpop.eup %6575  ;;  %v1559_v11 = vadd.f32 0.0001, %v6574_v3  ;;  %v3005_v9 = vpack.c.bf16 %v8246_v16, %v1601_v58  ;;  %v2752_v40 = vmul.f32 %v8244_v37, %v1601_v58  ;;  %v1730_v48 = vadd.f32 0.0001, %v11262_v61  ;;  %v11269_v43 = vld [vmem:[#allocation81_spill] sm:$0xff] }
 0x8e2   :  { %v1560_v35 = vadd.f32 0.0001, %v6576_v57  ;;  %v8256_v56 = vmul.f32 0.061313935, %v1558_v41  ;;  %v3006_v47 = vpack.c.bf16 %v8248_v63, %v1602_v38  ;;  %v2753_v36 = vmul.f32 %v8253_v10, %v1602_v38  ;;  %v11263_v41 = vld [vmem:[#allocation65_spill] sm:$0xff] }
 0x8e3   :  { %v8259_v29 = vmul.f32 0.061313935, %v1559_v11  ;;  %3048 = vmatprep.mubr.bf16.mxu0 %v3005_v9  ;;  %v2763_v17 = vadd.f32 %v2752_v40, %v2751_v49  ;;  %v1814_v3 = vmul.f32 1.442695, %v1725_v20  ;;  %v11264_v38 = vsub.f32 %v11263_v41, %v11259_v45  ;;  %v11265_v11 = vld [vmem:[#allocation75_spill] sm:$0xff]  ;;  %v11266_v40 = vld [vmem:[#allocation76_spill] sm:$0xff] }
 0x8e4   :  { %v8262_v31 = vmul.f32 0.061313935, %v1560_v35  ;;  %6299 = vmatprep.mubr.bf16.mxu1 %v3006_v47  ;;  %v2757_v50 = vmul.f32 %v8242_v21, %v8256_v56  ;;  %v1822_v57 = vmul.f32 1.442695, %v1729_v25  ;;  %v11267_v47 = vld [vmem:[#allocation63_spill] sm:$0xff]  ;;  %6579 = vpow2.f32 %v1812_v14 }
 0x8e5   :  { %v2764_v33 = vadd.f32 %v2763_v17, %v2753_v36  ;;  %v2758_v26 = vmul.f32 %v8244_v37, %v8259_v29  ;;  %v1731_v49 = vadd.f32 0.0001, %v11264_v38  ;;  %v1824_v17 = vmul.f32 1.442695, %v1730_v48 }
 0x8e6   :  { %v2759_v2 = vmul.f32 %v8253_v10, %v8262_v31  ;;  %6581 = vpow2.f32 %v1814_v3  ;;  %v1518_v48 = vmul.f32 1.442695, %v8045_v6  ;;  %v1520_v14 = vmul.f32 1.442695, %v8047_v7 }
 0x8e7   :  { %2765 = vadd.xlane.f32.xlu0 %v2764_v33  ;;  %v2771_v19 = vadd.f32 %v2758_v26, %v2757_v50  ;;  %6583 = vpow2.f32 %v1822_v57  ;;  %v1524_v41 = vmul.f32 1.442695, %v8051_v5  ;;  %v1530_v6 = vmul.f32 1.442695, %v8083_v53 }
 0x8e8   :  { %6585 = vpow2.f32 %v1824_v17  ;;  %v1532_v44 = vmul.f32 1.442695, %v8085_v52  ;;  %v1534_v5 = vmul.f32 1.442695, %v8092_v12  ;;  %v1536_v53 = vmul.f32 1.442695, %v8094_v54 }
 0x8e9   :  { %v8270_v1 = vadd.f32 %v2771_v19, %v2759_v2  ;;  %v1826_v19 = vmul.f32 1.442695, %v1731_v49  ;;  %v1528_v49 = vmul.f32 1.442695, %v8081_v34 }
 0x905   :  { %v1187_v22 = vpop.xlane.xlu1 %1186 }
 0x906   :  { %v1225_v58 = vmul.f32 0.0625, %v1187_v22  ;;  %v6578_v22 = vpop.eup %6577 }
 0x908   :  { %v1672_v9 = vsub.f32 %v11265_v11, %v1225_v58  ;;  %v1673_v35 = vsub.f32 %v11266_v40, %v1225_v58  ;;  %v1674_v36 = vsub.f32 %v11267_v47, %v1225_v58  ;;  %v6580_v58 = vpop.eup %6579 }
 0x909   :  { %v1193_v50 = vpop.xlane.xlu1 %1192  ;;  %v6582_v3 = vpop.eup %6581  ;;  %v8307_v7 = vmul.f32 0.061313935, %v6580_v58 }
 0x90a   :  { %v1720_v33 = vadd.f32 0.0001, %v1672_v9  ;;  %v1721_v26 = vadd.f32 0.0001, %v1673_v35  ;;  %v1722_v2 = vadd.f32 0.0001, %v1674_v36  ;;  %v6584_v38 = vpop.eup %6583 }
 0x90b   :  { %v1227_v15 = vmul.f32 0.0625, %v1193_v50  ;;  %v6586_v57 = vpop.eup %6585  ;;  %v8305_v9 = vmul.f32 0.061313935, %v6578_v22  ;;  %v8310_v35 = vmul.f32 0.061313935, %v6582_v3  ;;  %v11271_v36 = vld [vmem:[#allocation55_spill] sm:$0xff] }
 0x90c   :  { %v1804_v30 = vmul.f32 1.442695, %v1720_v33  ;;  %v1806_v32 = vmul.f32 1.442695, %v1721_v26  ;;  %v1808_v8 = vmul.f32 1.442695, %v1722_v2 }
 0x90d   :  { %v1678_v24 = vsub.f32 %v11268_v0, %v1227_v15  ;;  %v1679_v18 = vsub.f32 %v11269_v43, %v1227_v15  ;;  %v1680_v20 = vsub.f32 %v11270_v46, %v1227_v15  ;;  %v1526_v17 = vmul.f32 1.442695, %v11271_v36 }
 0x90e   :  { %6587 = vpow2.f32 %v1804_v30  ;;  %v1538_v30 = vmul.f32 1.442695, %v8098_v55  ;;  %v1917_v46 = vsel %vm1235_vm2, %v8310_v35, 0.0 }
 0x90f   :  { %6589 = vpow2.f32 %v1806_v32  ;;  %v1726_v45 = vadd.f32 0.0001, %v1678_v24  ;;  %v1727_v42 = vadd.f32 0.0001, %v1679_v18  ;;  %v1728_v25 = vadd.f32 0.0001, %v1680_v20 }
 0x910   :  { %6591 = vpow2.f32 %v1808_v8  ;;  %v8330_v8 = vmul.f32 0.061313935, %v6584_v38  ;;  %v8340_v20 = vmul.f32 0.061313935, %v6586_v57 }
 0x911   :  { %6593 = vpow2.f32 %v1826_v19  ;;  %v1816_v23 = vmul.f32 1.442695, %v1726_v45  ;;  %v1818_v28 = vmul.f32 1.442695, %v1727_v42  ;;  %v1820_v61 = vmul.f32 1.442695, %v1728_v25 }
 0x912   :  { %6595 = vpow2.f32 %v1516_v39 }
 0x913   :  { %6597 = vpow2.f32 %v1816_v23 }
 0x914   :  { %6599 = vpow2.f32 %v1818_v28 }
 0x915   :  { %6601 = vpow2.f32 %v1820_v61 }
 0x916   :  { %6603 = vpow2.f32 %v1518_v48 }
 0x917   :  { %6605 = vpow2.f32 %v1520_v14 }
 0x918   :  { %v6588_v11 = vpop.eup %6587  ;;  %6607 = vpow2.f32 %v1522_v62 }
 0x919   :  { %v6590_v40 = vpop.eup %6589  ;;  %6609 = vpow2.f32 %v1524_v41  ;;  %v8313_v47 = vmul.f32 0.061313935, %v6588_v11 }
 0x91a   :  { %v6592_v34 = vpop.eup %6591  ;;  %6611 = vpow2.f32 %v1528_v49  ;;  %v8317_v50 = vmul.f32 0.061313935, %v6590_v40 }
 0x91b   :  { %v6594_v33 = vpop.eup %6593  ;;  %6613 = vpow2.f32 %v1530_v6  ;;  %v8319_v26 = vmul.f32 0.061313935, %v6592_v34  ;;  %v3118_v52 = vadd.f32 %v8305_v9, %v8313_v47  ;;  %v3272_v12 = vpack.c.bf16 %v8305_v9, %v8313_v47  ;;  %v11279_v47 = vld [vmem:[#allocation37_spill] sm:$0xff] }
 0x91c   :  { %v6596_v2 = vpop.eup %6595  ;;  %6615 = vpow2.f32 %v1532_v44  ;;  %v3127_v19 = vadd.f32 %v8307_v7, %v8317_v50  ;;  %v3273_v54 = vpack.c.bf16 %v8307_v7, %v8317_v50  ;;  %v8344_v45 = vmul.f32 0.061313935, %v6594_v33  ;;  %v6403_v7 = vld [vmem:[%s10739_s6 + $0x30] sm:$0xff]  }
 0x91d   :  { %v6598_v15 = vpop.eup %6597  ;;  %6617 = vpow2.f32 %v1534_v5  ;;  %v1914_v24 = vsel %vm1235_vm2, %v8319_v26, 0.0  ;;  %v1576_v41 = vadd.f32 0.0001, %v6596_v2 }
 0x91e   :  { %v6600_v32 = vpop.eup %6599  ;;  %6619 = vpow2.f32 %v1536_v53  ;;  %v8335_v43 = vmul.f32 0.061313935, %v6598_v15  ;;  %v3136_v61 = vadd.f32 %v1917_v46, %v1914_v24  ;;  %v1923_v6 = vsel %vm1235_vm2, %v8344_v45, 0.0 }
 0x91f   :  { %v6602_v18 = vpop.eup %6601  ;;  %6621 = vpow2.f32 %v1526_v17  ;;  %v8342_v39 = vmul.f32 0.061313935, %v6600_v32 }
 0x920   :  { %v6604_v55 = vpop.eup %6603  ;;  %v8346_v42 = vmul.f32 0.061313935, %v6602_v18  ;;  %v3119_v25 = vadd.f32 %v3118_v52, %v8335_v43  ;;  %6623 = vpow2.f32 %v1538_v30  ;;  %v8362_v52 = vmul.f32 0.061313935, %v1576_v41 }
 0x921   :  { %v6606_v28 = vpop.eup %6605  ;;  %v3128_v48 = vadd.f32 %v3127_v19, %v8342_v39  ;;  %v3276_v22 = vpack.c.bf16 %v8340_v20, %v8342_v39  ;;  %v1577_v11 = vadd.f32 0.0001, %v6604_v55  ;;  %v11278_v9 = vpack.c.bf16 %v8330_v8, %v8335_v43 }
 0x922   :  { %v6608_v14 = vpop.eup %6607  ;;  %v1920_v58 = vsel %vm1235_vm2, %v8346_v42, 0.0  ;;  %v3120_v62 = vadd.f32 %v3119_v25, %v8330_v8  ;;  %v1578_v17 = vadd.f32 0.0001, %v6606_v28 }
 0x923   :  { %v6610_v3 = vpop.eup %6609  ;;  %v3129_v38 = vadd.f32 %v3128_v48, %v8340_v20  ;;  %v3137_v49 = vadd.f32 %v3136_v61, %v1920_v58  ;;  %v8364_v30 = vmul.f32 0.061313935, %v1577_v11  ;;  %v1579_v32 = vadd.f32 0.0001, %v6608_v14 }
 0x924   :  { %v6612_v57 = vpop.eup %6611  ;;  %v3121_v44 = vrot.slane %v3120_v62, 4  ;;  %v1580_v18 = vadd.f32 0.0001, %v6610_v3  ;;  %v8366_v61 = vmul.f32 0.061313935, %v1578_v17 }
 0x925   :  { %v6614_v40 = vpop.eup %6613  ;;  %v3130_v5 = vrot.slane %v3129_v38, 4  ;;  %v3138_v34 = vadd.f32 %v3137_v49, %v1923_v6  ;;  %v1582_v46 = vadd.f32 0.0001, %v6612_v57 }
 0x926   :  { %v6616_v36 = vpop.eup %6615  ;;  %v3122_v53 = vadd.f32 %v3121_v44, %v3120_v62  ;;  %v1583_v48 = vadd.f32 0.0001, %v6614_v40  ;;  %v8372_v23 = vmul.f32 0.061313935, %v1580_v18 }
 0x927   :  { %v6618_v33 = vpop.eup %6617  ;;  %v3131_v2 = vadd.f32 %v3130_v5, %v3129_v38  ;;  %v3139_v19 = vrot.slane %v3138_v34, 4  ;;  %v1584_v41 = vadd.f32 0.0001, %v6616_v36  ;;  %v8368_v5 = vmul.f32 0.061313935, %v1579_v32 }
 0x928   :  { %v6620_v15 = vpop.eup %6619  ;;  %v3123_v24 = vrot.slane %v3122_v53, 2  ;;  %v1585_v28 = vadd.f32 0.0001, %v6618_v33  ;;  %v8370_v14 = vmul.f32 0.061313935, %v1582_v46 }
 0x929   :  { %v6622_v0 = vpop.eup %6621  ;;  %v3132_v55 = vrot.slane %v3131_v2, 2  ;;  %v3140_v25 = vadd.f32 %v3139_v19, %v3138_v34  ;;  %v1586_v49 = vadd.f32 0.0001, %v6620_v15  ;;  %v8374_v34 = vmul.f32 0.061313935, %v1583_v48 }
 0x92a   :  { %v3124_v58 = vadd.f32 %v3123_v24, %v3122_v53  ;;  %v6624_v62 = vpop.eup %6623  ;;  %v1581_v11 = vadd.f32 0.0001, %v6622_v0  ;;  %v8376_v53 = vmul.f32 0.061313935, %v1585_v28  ;;  %v8378_v36 = vmul.f32 0.061313935, %v1584_v41 }
 0x92b   :  { %v3133_v38 = vadd.f32 %v3132_v55, %v3131_v2  ;;  %v3141_v6 = vrot.slane %v3140_v25, 2  ;;  %v1587_v17 = vadd.f32 0.0001, %v6624_v62  ;;  %v8380_v19 = vmul.f32 0.061313935, %v1586_v49 }
 0x92c   :  { %v3125_v44 = vrot.slane %v3124_v58, 1  ;;  %v8389_v48 = vmul.f32 0.061313935, %v1581_v11 }
 0x92d   :  { %v3134_v3 = vrot.slane %v3133_v38, 1  ;;  %v3142_v57 = vadd.f32 %v3141_v6, %v3140_v25  ;;  %v8391_v28 = vmul.f32 0.061313935, %v1587_v17 }
 0x92e   :  { %v3126_v40 = vadd.f32 %v3125_v44, %v3124_v58 }
 0x92f   :  { %v3135_v33 = vadd.f32 %v3134_v3, %v3133_v38  ;;  %v3143_v2 = vrot.slane %v3142_v57, 1 }
 0x930   :  { %v3145_v15 = vmul.f32 %v3126_v40, %v8362_v52  ;;  %v3151_v32 = vmul.f32 %v3126_v40, %v8370_v14  ;;  %v3148_v24 = vmul.f32 %v3126_v40, %v8368_v5  ;;  %v3154_v0 = vmul.f32 %v3126_v40, %v8376_v53 }
 0x931   :  { %v3144_v18 = vadd.f32 %v3143_v2, %v3142_v57  ;;  %v3146_v46 = vmul.f32 %v3135_v33, %v8364_v30  ;;  %v3152_v55 = vmul.f32 %v3135_v33, %v8374_v34  ;;  %v3149_v25 = vmul.f32 %v3135_v33, %v8372_v23 }
 0x932   :  { %v3155_v58 = vmul.f32 %v3135_v33, %v8380_v19  ;;  %v3524_v33 = vld [vmem:[#allocation3] sm:$0xff] }
 0x933   :  { %v3147_v62 = vmul.f32 %v3144_v18, %v8366_v61  ;;  %v3157_v41 = vadd.f32 %v3146_v46, %v3145_v15  ;;  %v3153_v49 = vmul.f32 %v3144_v18, %v8378_v36  ;;  %v3165_v38 = vadd.f32 %v3152_v55, %v3151_v32  ;;  %v6746_v15 = vld [vmem:[%s11055_s23] sm:$0xff] }
 0x934   :  { %v3150_v6 = vmul.f32 %v3144_v18, %v8389_v48  ;;  %v3161_v44 = vadd.f32 %v3149_v25, %v3148_v24  ;;  %v3156_v3 = vmul.f32 %v3144_v18, %v8391_v28  ;;  %v3169_v57 = vadd.f32 %v3155_v58, %v3154_v0  ;;  %v8409_v32 = vld [vmem:[%s10740_s7] ss:$0 sm:$0xff]  ;;  %v11274_v18 = vld [vmem:[#allocation31_spill] sm:$0xff]  ;;  %v11275_v25 = vld [vmem:[#allocation34_spill] sm:$0xff] }
 0x935   :  { %v3158_v40 = vadd.f32 %v3157_v41, %v3147_v62  ;;  %v3166_v2 = vadd.f32 %v3165_v38, %v3153_v49  ;;  %v3532_v46 = vadd.f32 %v6746_v15, %v3524_v33  ;;  %v1474_v55 = vmul.f32 1.442695, %v11274_v18 }
 0x936   :  { %v8398_v11 = vadd.f32 %v3161_v44, %v3150_v6  ;;  %v8400_v17 = vadd.f32 %v3169_v57, %v3156_v3  ;;  %v1488_v58 = vmul.f32 1.442695, %v11275_v25 }
 0x937   :  { %3159 = vadd.xlane.f32.xlu0 %v3158_v40  ;;  %v8412_v24 = vadd.f32 %v8409_v32, %v3532_v46  ;;  %6625 = vpow2.f32 %v1474_v55  ;;  %v11277_v40 = vld [vmem:[#allocation32_spill] sm:$0xff] }
 0x938   :  { %6627 = vpow2.f32 %v1488_v58 }
 0x939   :  { %11273 = vst [vmem:[#allocation60_spill] sm:$0xff] %v8412_v24  ;;  %v3555_v0 = vsel %vm63_vm0, %v8412_v24, 0.0 }
 0x93b   :  { %2773 = vadd.xlane.f32.xlu0 %v8270_v1  ;;  %v11276_v1 = vld [vmem:[#allocation33_spill] sm:$0xff] }
 0x93c   :  { %v1490_v41 = vmul.f32 1.442695, %v11276_v1 }
 0x93e   :  { %6629 = vpow2.f32 %v1490_v41  ;;  %v6401_v41 = vld [vmem:[%s10739_s6 + $0x20] sm:$0xff]  }
 0x93f   :  { %3167 = vadd.xlane.f32.xlu0 %v3166_v2  ;;  %v1486_v2 = vmul.f32 1.442695, %v11277_v40 }
 0x941   :  { %6631 = vpow2.f32 %v1486_v2  ;;  %v6626_v58 = vpop.eup %6625 }
 0x943   :  { %3556 = vadd.xlane.f32.xlu0 %v3555_v0 }
 0x968   :  { %v2936_v62 = vpop.f32.mrb[84].mxu0 }
 0x969   :  { %v2938_v49 = vpop.f32.mrb[85].mxu0 }
 0x96a   :  { %v2940_v38 = vpop.f32.mrb[86].mxu0 }
 0x96b   :  { %v3010_v6 = vpack.c.bf16 %v2940_v38, %v2936_v62  ;;  %v2942_v44 = vpop.f32.mrb[87].mxu0 }
 0x96c   :  { %v3011_v3 = vpack.c.bf16 %v2942_v44, %v2938_v49  ;;  %v6293_v57 = vpop.f32.mrb[96].mxu1  ;;  %v6628_v49 = vpop.eup %6627 }
 0x96d   :  { %v2989_v33 = vpop.f32.mrb[97].mxu1 }
 0x96e   :  { %v6294_v15 = vpop.f32.mrb[98].mxu1  ;;  %3016 = vmatprep.subr.bf16.mxu0 %v3011_v3  ;;  %v1555_v3 = vadd.f32 0.0001, %v6626_v58 }
 0x96f   :  { %v3015_v46 = vpack.c.bf16 %v6294_v15, %v6293_v57  ;;  %v2992_v0 = vpop.f32.mrb[99].mxu1  ;;  %3017 = vmatpush1.bf16.xpose.msra.mxu0 %v3010_v6  ;;  %v6630_v6 = vpop.eup %6629  ;;  %v1562_v57 = vadd.f32 0.0001, %v6628_v49 }
 0x970   :  { %v3012_v18 = vpack.c.bf16 %v2992_v0, %v2989_v33  ;;  %v2946_v55 = vpop.f32.mrb[88].mxu0  ;;  %v8423_v40 = vmul.f32 0.061313935, %v1555_v3  ;;  %v1563_v2 = vadd.f32 0.0001, %v6630_v6  ;;  %v6632_v33 = vpop.eup %6631 }
 0x971   :  { %v2948_v25 = vpop.f32.mrb[89].mxu0  ;;  %v8425_v15 = vmul.f32 0.061313935, %v1562_v57 }
 0x972   :  { %v2950_v1 = vpop.f32.mrb[90].mxu0  ;;  %6295 = vmatprep.subr.bf16.mxu1 %v3012_v18  ;;  %v3004_v0 = vpack.c.bf16 %v8423_v40, %v8240_v60 }
 0x973   :  { %v3013_v62 = vpack.c.bf16 %v2950_v1, %v2946_v55  ;;  %v2952_v38 = vpop.f32.mrb[91].mxu0  ;;  %6296 = vmatpush3.bf16.xpose.msra.mxu1 %v3012_v18  ;;  %v6402_v18 = vld [vmem:[%s10739_s6 + $0x28] sm:$0xff]   ;;  %v3008_v55 = vpack.c.bf16 %v8425_v15, %v8259_v29 }
 0x974   :  { %v3014_v44 = vpack.c.bf16 %v2952_v38, %v2948_v25  ;;  %6297 = vmatprep.subr.bf16.mxu1 %v3015_v46  ;;  %v8437_v25 = vmul.f32 0.061313935, %v1563_v2  ;;  %v2754_v2 = vmul.f32 %v8242_v21, %v8423_v40 }
 0x976   :  { %3018 = vmatprep.subr.bf16.mxu0 %v3014_v44  ;;  %v3009_v60 = vpack.c.bf16 %v8437_v25, %v8262_v31  ;;  %v6404_v31 = vld [vmem:[%s10739_s6 + $0x38] sm:$0xff]   ;;  %v2762_v40 = vmul.f32 %v8253_v10, %v8437_v25 }
 0x977   :  { %3019 = vmatpush1.bf16.xpose.msra.mxu0 %v3013_v62 }
 0x978   :  { %6303 = vmatprep.subr.bf16.mxu0 %v6401_v41 }
 0x97b   :  { %6298 = vmatpush3.bf16.xpose.msra.mxu1 %v3015_v46  ;;  %v1561_v46 = vadd.f32 0.0001, %v6632_v33  ;;  %v2755_v33 = vmul.f32 %v8244_v37, %v8246_v16  ;;  %v3525_v16 = vld [vmem:[#allocation3 + $0x8] sm:$0xff] }
 0x97c   :  { %3300 = vmatprep.subr.bf16.mxu1 %v3273_v54 }
 0x97d   :  { %v1609_v50 = vmul.f32 0.061313935, %v1561_v46 }
 0x97e   :  { %3049 = vmatmul.mubr.bf16.vlgmr.msra.gmra.mrb[92].mxu0 %v3004_v0  ;;  %v2756_v0 = vmul.f32 %v8253_v10, %v8248_v63  ;;  %v6747_v63 = vld [vmem:[%s11055_s23 + $0x8] sm:$0xff] }
 0x97f   :  { %3056 = vmatprep.mubr.bf16.mxu0 %v3008_v55  ;;  %6304 = vmatpush3.bf16.msra.mxu0 %v6401_v41  ;;  %v3007_v29 = vpack.c.bf16 %v1609_v50, %v8256_v56  ;;  %v6028_v56 = vpack.c.bf16 %v8310_v35, %v8319_v26  ;;  %v11280_v55 = vld [vmem:[#allocation79_spill] sm:$0xff] }
 0x980   :  { %6305 = vmatprep.subr.bf16.mxu0 %v6402_v18 }
 0x982   :  { %6300 = vmatmul.mubr.bf16.vlgmr.msra.gmra.mrb[100].mxu1 %v3009_v60  ;;  %v2760_v60 = vmul.f32 %v8242_v21, %v1609_v50 }
 0x983   :  { %6306 = vmatpush3.bf16.msra.mxu0 %v6402_v18  ;;  %3301 = vmatpush1.bf16.msra.mxu1 %v3272_v12  ;;  %v6031_v12 = vpack.c.bf16 %v8344_v45, %v8346_v42  ;;  %v2767_v18 = vadd.f32 %v2755_v33, %v2754_v2 }
 0x984   :  { %3302 = vmatprep.subr.bf16.mxu1 %v3276_v22  ;;  %6307 = vmatprep.subr.bf16.mxu0 %v6403_v7 }
 0x985   :  { %3332 = vmatprep.mubr.bf16.mxu1 %v11137_v59  ;;  %v2768_v46 = vadd.f32 %v2767_v18, %v2756_v0  ;;  %v3402_v0 = vpack.c.bf16 %v8368_v5, %v8362_v52  ;;  %v3406_v18 = vpack.c.bf16 %v8380_v19, %v8374_v34 }
 0x986   :  { %3057 = vmatmul.mubr.bf16.gmra.mrb[96].mxu0 %v3007_v29 }
 0x987   :  { %6308 = vmatpush3.bf16.msra.mxu0 %v6403_v7  ;;  %6311 = vmatprep.mubr.msk.bf16.mxu0 %vm410_vm1, %v8275_v51  ;;  %v2761_v7 = vmul.f32 %v8244_v37, %v8425_v15  ;;  %v6748_v37 = vld [vmem:[%s11055_s23 + $0x18] sm:$0xff] }
 0x988   :  { %3303 = vmatpush1.bf16.msra.mxu1 %v11278_v9  ;;  %6309 = vmatprep.subr.bf16.mxu0 %v6404_v31  ;;  %v3533_v9 = vadd.f32 %v6747_v63, %v3525_v16 }
 0x989   :  { %v2775_v29 = vadd.f32 %v2761_v7, %v2760_v60  ;;  %v2766_v60 = vpop.xlane.xlu0 %2765 }
 0x98a   :  { %v8499_v21 = vadd.f32 %v8409_v32, %v3533_v9 }
 0x98b   :  { %6310 = vmatpush3.bf16.msra.mxu0 %v6404_v31  ;;  %v2776_v31 = vadd.f32 %v2775_v29, %v2762_v40 }
 0x98c   :  { %6315 = vmatprep.subr.msk.bf16.mxu0 %vm7627_vm3, %v6028_v56  ;;  %11281 = vst [vmem:[#allocation61_spill] sm:$0xff] %v8499_v21  ;;  %v3558_v10 = vsel %vm63_vm0, %v8499_v21, 0.0 }
 0x98e   :  { %6312 = vmatmul.mubr.msk.bf16.vlgmr.msra.gmra.mrb[100].mxu0 %vm410_vm1, %v11279_v47 }
 0x98f   :  { %6316 = vmatpush3.bf16.msk.msra.mxu0 %vm7627_vm3, %v6028_v56  ;;  %v3527_v56 = vld [vmem:[#allocation3 + $0x18] sm:$0xff] }
 0x990   :  { %6317 = vmatprep.subr.msk.bf16.mxu0 %vm7627_vm3, %v6031_v12 }
 0x993   :  { %6318 = vmatpush3.bf16.msk.msra.mxu0 %vm7627_vm3, %v6031_v12  ;;  %v3403_v12 = vpack.c.bf16 %v8372_v23, %v8364_v30 }
 0x9c4   :  { %v3160_v29 = vpop.xlane.xlu0 %3159 }
 0x9c8   :  { %v2774_v16 = vpop.xlane.xlu0 %2773 }
 0x9cc   :  { %v3168_v52 = vpop.xlane.xlu0 %3167 }
 0xa51   :  { %v3050_v51 = vpop.f32.mrb[92].mxu0 }
 0xa52   :  { %v3052_v35 = vpop.f32.mrb[93].mxu0 }
 0xa53   :  { %v3053_v26 = vpop.f32.mrb[94].mxu0 }
 0xa54   :  { %v3055_v54 = vpop.f32.mrb[95].mxu0 }
 0xa55   :  { %v6301_v8 = vpop.f32.mrb[100].mxu1 }
 0xa56   :  { %v3099_v43 = vpop.f32.mrb[101].mxu1 }
 0xa57   :  { %v8474_v20 = vadd.f32 %v3099_v43, %v3050_v51  ;;  %v6302_v39 = vpop.f32.mrb[102].mxu1 }
 0xa58   :  { %v3102_v22 = vpop.f32.mrb[103].mxu1 }
 0xa59   :  { %v8476_v45 = vadd.f32 %v3102_v22, %v3053_v26  ;;  %v3058_v42 = vpop.f32.mrb[96].mxu0 }
 0xa5a   :  { %v8478_v1 = vadd.f32 %v6301_v8, %v3058_v42  ;;  %v3060_v58 = vpop.f32.mrb[97].mxu0 }
 0xa5b   :  { %v3061_v62 = vpop.f32.mrb[98].mxu0 }
 0xa5c   :  { %v8480_v38 = vadd.f32 %v6302_v39, %v3061_v62  ;;  %v3063_v27 = vpop.f32.mrb[99].mxu0 }
 0xa61   :  { %v6313_v49 = vpop.f32.mrb[100].mxu0 }
 0xa62   :  { %v3255_v44 = vpop.f32.mrb[101].mxu0 }
 0xa63   :  { %v6314_v41 = vpop.f32.mrb[102].mxu0 }
 0xa64   :  { %v3271_v3 = vpack.c.bf16 %v6314_v41, %v6313_v49  ;;  %v3258_v6 = vpop.f32.mrb[103].mxu0 }
 0xa65   :  { %v3270_v57 = vpack.c.bf16 %v3258_v6, %v3255_v44 }
 0xa67   :  { %3278 = vxpose.xlu1.c.b16.start [1/2] (short) (narrow) %v3270_v57, 32 }
 0xa6b   :  { %3279 = vxpose.xlu1.c.b16.end [2/2] (short) (narrow) %v3271_v3, 32 }
 0xa78   :  { %1973 = vadd.xlane.f32.xlu1 %v11280_v55  ;;  %v3407_v55 = vpack.c.bf16 %v8391_v28, %v8378_v36 }
 0xa7c   :  { %2769 = vadd.xlane.f32.xlu1 %v2768_v46  ;;  %v3405_v46 = vpack.c.bf16 %v8376_v53, %v8370_v14 }
 0xa80   :  { %3163 = vadd.xlane.f32.xlu1 %v8398_v11  ;;  %v3535_v11 = vadd.f32 %v6748_v37, %v3527_v56 }
 0xa82   :  { %v8508_v15 = vadd.f32 %v8409_v32, %v3535_v11 }
 0xa84   :  { %2777 = vadd.xlane.f32.xlu1 %v2776_v31  ;;  %11282 = vst [vmem:[#allocation57_spill] sm:$0xff] %v8508_v15  ;;  %v3564_v25 = vsel %vm63_vm0, %v8508_v15, 0.0 }
 0xa88   :  { %3171 = vadd.xlane.f32.xlu1 %v8400_v17  ;;  %v3404_v17 = vpack.c.bf16 %v8389_v48, %v8366_v61  ;;  %v6749_v61 = vld [vmem:[%s11055_s23 + $0x10] sm:$0xff] }
 0xa8c   :  { %3559 = vadd.xlane.f32.xlu1 %v3558_v10 }
 0xa90   :  { %3565 = vadd.xlane.f32.xlu1 %v3564_v25 }
 0xacd   :  { %v3286_v50 = vpop.trf.xlu1 }
 0xace   :  { %6025 = vmatmul.mubr.msk.bf16.vlgmr.msra.gmra.mrb[104].mxu1 %vm63_vm0, %v3286_v50  ;;  %6319 = vmatprep.mubr.msk.bf16.mxu0 %vm63_vm0, %v3286_v50 }
 0xacf   :  { %3342 = vmatprep.mubr.bf16.mxu1 %v11137_v59 }
 0xad1   :  { %v3287_v47 = vpop.trf.xlu1 }
 0xad2   :  { %6320 = vmatmul.mubr.msk.bf16.vlgmr.msra.gmra.mrb[104].mxu0 %vm63_vm0, %v3287_v47 }
 0xad3   :  { %6327 = vmatprep.mubr.bf16.mxu0 %v3404_v17 }
 0xad6   :  { %6026 = vmatmul.mubr.msk.bf16.gmra.mrb[108].mxu1 %vm63_vm0, %v3287_v47 }
 0xad7   :  { %3446 = vmatprep.mubr.bf16.mxu1 %v3403_v12 }
 0xb05   :  { %v1974_v51 = vpop.xlane.xlu1 %1973 }
 0xb06   :  { %6633 = vrcp.f32 %v1974_v51 }
 0xb07   :  { %6635 = vrcp.f32 %v2766_v60 }
 0xb08   :  { %6637 = vrcp.f32 %v3160_v29 }
 0xb09   :  { %v2770_v7 = vpop.xlane.xlu1 %2769  ;;  %6639 = vrcp.f32 %v2774_v16 }
 0xb0a   :  { %6641 = vrcp.f32 %v2770_v7 }
 0xb0b   :  { %6643 = vrcp.f32 %v3168_v52 }
 0xb0d   :  { %v3164_v40 = vpop.xlane.xlu1 %3163 }
 0xb0e   :  { %6645 = vrcp.f32 %v3164_v40 }
 0xb10   :  { %v6634_v35 = vpop.eup %6633 }
 0xb11   :  { %v2316_v26 = vmul.f32 %v6634_v35, %v8123_v13  ;;  %v2778_v31 = vpop.xlane.xlu1 %2777  ;;  %v6636_v19 = vpop.eup %6635 }
 0xb12   :  { %6647 = vrcp.f32 %v2778_v31  ;;  %v6638_v63 = vpop.eup %6637  ;;  %v3114_v47 = vmul.f32 %v6636_v19, %v8474_v20 }
 0xb13   :  { %v2718_v59 = vadd.f32 %v8197_v4, %v2316_v26  ;;  %v6640_v56 = vpop.eup %6639 }
 0xb14   :  { %v6642_v10 = vpop.eup %6641 }
 0xb15   :  { %2722 = vst.msk [vmem:[#allocation3 + $0x10] sm:$0xff] %vm63_vm0, %v2718_v59  ;;  %v3172_v5 = vpop.xlane.xlu1 %3171  ;;  %v6644_v50 = vpop.eup %6643 }
 0xb16   :  { %6649 = vrcp.f32 %v3172_v5  ;;  %v6753_v5 = vld [vmem:[%s11055_s23 + $0x38] sm:$0xff] }
 0xb18   :  { %v6646_v35 = vpop.eup %6645 }
 0xb1c   :  { %v3526_v54 = vld [vmem:[#allocation3 + $0x10] sm:$0xff] }
 0xb1d   :  { %v3534_v48 = vadd.f32 %v6749_v61, %v3526_v54  ;;  %v6648_v54 = vpop.eup %6647 }
 0xb1f   :  { %v8528_v23 = vadd.f32 %v8409_v32, %v3534_v48  ;;  %v3115_v48 = vmul.f32 %v6642_v10, %v8476_v45 }
 0xb21   :  { %11283 = vst [vmem:[#allocation64_spill] sm:$0xff] %v8528_v23  ;;  %v3561_v30 = vsel %vm63_vm0, %v8528_v23, 0.0 }
 0xb22   :  { %3562 = vadd.xlane.f32.xlu0 %v3561_v30 }
 0xba1   :  { %v3334_v8 = vpop.f32.mrb[104].mxu1 }
 0xba2   :  { %v3336_v43 = vpop.f32.mrb[105].mxu1 }
 0xba3   :  { %v3338_v13 = vpop.f32.mrb[106].mxu1 }
 0xba4   :  { %v3408_v39 = vpack.c.bf16 %v3338_v13, %v3334_v8  ;;  %v3340_v4 = vpop.f32.mrb[107].mxu1 }
 0xba5   :  { %v3409_v22 = vpack.c.bf16 %v3340_v4, %v3336_v43  ;;  %v6321_v42 = vpop.f32.mrb[104].mxu0  ;;  %v3116_v43 = vmul.f32 %v6640_v56, %v8478_v1 }
 0xba6   :  { %v3387_v58 = vpop.f32.mrb[105].mxu0 }
 0xba7   :  { %v6322_v62 = vpop.f32.mrb[106].mxu0  ;;  %3414 = vmatprep.subr.bf16.mxu1 %v3409_v22  ;;  %v6650_v22 = vpop.eup %6649 }
 0xba8   :  { %v3413_v27 = vpack.c.bf16 %v6322_v62, %v6321_v42  ;;  %v3390_v49 = vpop.f32.mrb[107].mxu0  ;;  %3415 = vmatpush1.bf16.xpose.msra.mxu1 %v3408_v39 }
 0xba9   :  { %v3410_v44 = vpack.c.bf16 %v3390_v49, %v3387_v58  ;;  %v3344_v41 = vpop.f32.mrb[108].mxu1  ;;  %v3117_v58 = vmul.f32 %v6648_v54, %v8480_v38  ;;  %v3560_v49 = vpop.xlane.xlu1 %3559 }
 0xbaa   :  { %v3346_v3 = vpop.f32.mrb[109].mxu1  ;;  %v3580_v38 = vmul.f32 0.03125, %v3560_v49 }
 0xbab   :  { %v3348_v6 = vpop.f32.mrb[110].mxu1  ;;  %6323 = vmatprep.subr.bf16.mxu0 %v3410_v44 }
 0xbac   :  { %v3411_v57 = vpack.c.bf16 %v3348_v6, %v3344_v41  ;;  %v3350_v2 = vpop.f32.mrb[111].mxu1  ;;  %6324 = vmatpush3.bf16.xpose.msra.mxu0 %v3410_v44  ;;  %v6750_v41 = vld [vmem:[%s11055_s23 + $0x20] sm:$0xff] }
 0xbad   :  { %v3412_v33 = vpack.c.bf16 %v3350_v2, %v3346_v3  ;;  %6325 = vmatprep.subr.bf16.mxu0 %v3413_v27 }
 0xbaf   :  { %3416 = vmatprep.subr.bf16.mxu1 %v3412_v33  ;;  %v6751_v33 = vld [vmem:[%s11055_s23 + $0x28] sm:$0xff] }
 0xbb0   :  { %3417 = vmatpush1.bf16.xpose.msra.mxu1 %v3411_v57 }
 0xbb4   :  { %6326 = vmatpush3.bf16.xpose.msra.mxu0 %v3413_v27  ;;  %v3557_v27 = vpop.xlane.xlu0 %3556 }
 0xbb5   :  { %v3579_v44 = vmul.f32 0.03125, %v3557_v27 }
 0xbb7   :  { %3447 = vmatmul.mubr.bf16.vlgmr.msra.gmra.mrb[112].mxu1 %v3402_v0  ;;  %v8561_v7 = vsub.f32 %v8412_v24, %v3579_v44 }
 0xbb8   :  { %3454 = vmatprep.mubr.bf16.mxu1 %v3406_v18  ;;  %v3563_v6 = vpop.xlane.xlu0 %3562 }
 0xbb9   :  { %v3581_v29 = vmul.f32 0.03125, %v3563_v6 }
 0xbbb   :  { %6328 = vmatmul.mubr.bf16.vlgmr.msra.gmra.mrb[108].mxu0 %v3407_v55  ;;  %v3566_v55 = vpop.xlane.xlu1 %3565 }
 0xbbf   :  { %3455 = vmatmul.mubr.bf16.gmra.mrb[116].mxu1 %v3405_v46  ;;  %v6752_v46 = vld [vmem:[%s11055_s23 + $0x30] sm:$0xff] }
 0xc8a   :  { %v3448_v34 = vpop.f32.mrb[112].mxu1 }
 0xc8b   :  { %v3450_v36 = vpop.f32.mrb[113].mxu1 }
 0xc8c   :  { %v3451_v14 = vpop.f32.mrb[114].mxu1  ;;  %v8575_v36 = vsub.f32 %v8499_v21, %v3580_v38 }
 0xc8d   :  { %v3453_v53 = vpop.f32.mrb[115].mxu1 }
 0xc8e   :  { %v6329_v28 = vpop.f32.mrb[108].mxu0 }
 0xc8f   :  { %v3497_v9 = vpop.f32.mrb[109].mxu0 }
 0xc90   :  { %v3498_v37 = vadd.f32 %v3497_v9, %v3448_v34  ;;  %v6330_v11 = vpop.f32.mrb[110].mxu0  ;;  %v3595_v9 = vmul.f32 %v8561_v7, %v8561_v7 }
 0xc91   :  { %v3500_v25 = vpop.f32.mrb[111].mxu0 }
 0xc92   :  { %v3512_v17 = vmul.f32 %v6638_v63, %v3498_v37  ;;  %v3501_v12 = vadd.f32 %v3500_v25, %v3451_v14  ;;  %v3456_v51 = vpop.f32.mrb[116].mxu1  ;;  %v3582_v14 = vmul.f32 0.03125, %v3566_v55  ;;  %v8585_v63 = vsub.f32 %v8528_v23, %v3581_v29  ;;  %v6036_v29 = vld [vmem:[%s10741_s8] ss:$0 sm:$0xff] }
 0xc93   :  { %v3506_v26 = vadd.f32 %v6329_v28, %v3456_v51  ;;  %v3458_v59 = vpop.f32.mrb[117].mxu1  ;;  %v6406_v51 = vld [vmem:[%s10743_s10 + $0x8] sm:$0xff]  }
 0xc94   :  { %v3516_v61 = vadd.f32 %v3512_v17, %v3114_v47  ;;  %v3513_v30 = vmul.f32 %v6646_v35, %v3501_v12  ;;  %v3459_v8 = vpop.f32.mrb[118].mxu1  ;;  %v8592_v37 = vsub.f32 %v8508_v15, %v3582_v14  ;;  %v3597_v10 = vmul.f32 %v8585_v63, %v8585_v63  ;;  %v6405_v12 = vld [vmem:[%s10743_s10] sm:$0xff]  }
 0xc95   :  { %v3514_v13 = vmul.f32 %v6644_v50, %v3506_v26  ;;  %v3509_v39 = vadd.f32 %v6330_v11, %v3459_v8  ;;  %v3461_v4 = vpop.f32.mrb[119].mxu1  ;;  %v3596_v11 = vmul.f32 %v8575_v36, %v8575_v36  ;;  %6331 = vmatprep.subr.bf16.mxu0 %v6405_v12 }
 0xc96   :  { %3520 = vst.msk [vmem:[#allocation3 + $0x20] sm:$0xff] %vm63_vm0, %v3516_v61  ;;  %v3517_v20 = vadd.f32 %v3513_v30, %v3115_v48  ;;  %v3598_v50 = vmul.f32 %v8592_v37, %v8592_v37  ;;  %v3609_v47 = vsel %vm63_vm0, %v3597_v10, 0.0  ;;  %6332 = vmatpush3.bf16.msra.mxu0 %v6405_v12 }
 0xc97   :  { %v3518_v42 = vadd.f32 %v3514_v13, %v3116_v43  ;;  %v3515_v62 = vmul.f32 %v6650_v22, %v3509_v39  ;;  %v3606_v25 = vsel %vm63_vm0, %v3596_v11, 0.0  ;;  %6333 = vmatprep.subr.bf16.mxu0 %v6406_v51 }
 0xc98   :  { %3521 = vst.msk [vmem:[#allocation3 + $0x28] sm:$0xff] %vm63_vm0, %v3517_v20  ;;  %v3612_v17 = vsel %vm63_vm0, %v3598_v50, 0.0 }
 0xc99   :  { %3522 = vst.msk [vmem:[#allocation3 + $0x30] sm:$0xff] %vm63_vm0, %v3518_v42  ;;  %v3519_v45 = vadd.f32 %v3515_v62, %v3117_v58 }
 0xc9a   :  { %6334 = vmatpush3.bf16.msra.mxu0 %v6406_v51 }
 0xc9b   :  { %3523 = vst.msk [vmem:[#allocation3 + $0x38] sm:$0xff] %vm63_vm0, %v3519_v45 }
 0xc9d   :  { %v3528_v1 = vld [vmem:[#allocation3 + $0x20] sm:$0xff] }
 0xc9e   :  { %v3536_v3 = vadd.f32 %v6750_v41, %v3528_v1 }
 0xc9f   :  { %v3529_v57 = vld [vmem:[#allocation3 + $0x28] sm:$0xff] }
 0xca0   :  { %v8552_v2 = vadd.f32 %v8409_v32, %v3536_v3  ;;  %v3537_v0 = vadd.f32 %v6751_v33, %v3529_v57  ;;  %v3530_v18 = vld [vmem:[#allocation3 + $0x30] sm:$0xff] }
 0xca1   :  { %v3538_v60 = vadd.f32 %v6752_v46, %v3530_v18 }
 0xca2   :  { %11284 = vst [vmem:[#allocation67_spill] sm:$0xff] %v8552_v2  ;;  %v3567_v40 = vsel %vm63_vm0, %v8552_v2, 0.0  ;;  %v8566_v16 = vadd.f32 %v8409_v32, %v3537_v0  ;;  %v3531_v31 = vld [vmem:[#allocation3 + $0x38] sm:$0xff] }
 0xca3   :  { %3568 = vadd.xlane.f32.xlu0 %v3567_v40  ;;  %v8569_v52 = vadd.f32 %v8409_v32, %v3538_v60  ;;  %v3539_v34 = vadd.f32 %v6753_v5, %v3531_v31 }
 0xca4   :  { %11285 = vst [vmem:[#allocation54_spill] sm:$0xff] %v8566_v16  ;;  %v3570_v53 = vsel %vm63_vm0, %v8566_v16, 0.0 }
 0xca5   :  { %11286 = vst [vmem:[#allocation69_spill] sm:$0xff] %v8569_v52  ;;  %3571 = vadd.xlane.f32.xlu1 %v3570_v53  ;;  %v3573_v19 = vsel %vm63_vm0, %v8569_v52, 0.0  ;;  %v8582_v28 = vadd.f32 %v8409_v32, %v3539_v34  ;;  %v3603_v32 = vsel %vm63_vm0, %v3595_v9, 0.0  ;;  %v6037_v53 = vld [vmem:[%s10742_s9] ss:$0 sm:$0xff] }
 0xca7   :  { %11287 = vst [vmem:[#allocation70_spill] sm:$0xff] %v8582_v28  ;;  %3574 = vadd.xlane.f32.xlu0 %v3573_v19  ;;  %v3576_v56 = vsel %vm63_vm0, %v8582_v28, 0.0 }
 0xca9   :  { %3577 = vadd.xlane.f32.xlu1 %v3576_v56 }
 0xcab   :  { %3604 = vadd.xlane.f32.xlu0 %v3603_v32 }
 0xcad   :  { %3607 = vadd.xlane.f32.xlu1 %v3606_v25 }
 0xcaf   :  { %3610 = vadd.xlane.f32.xlu0 %v3609_v47 }
 0xcb1   :  { %3613 = vadd.xlane.f32.xlu1 %v3612_v17 }
 0xd30   :  { %v3569_v35 = vpop.xlane.xlu0 %3568 }
 0xd31   :  { %v3583_v26 = vmul.f32 0.03125, %v3569_v35 }
 0xd32   :  { %v3572_v59 = vpop.xlane.xlu1 %3571 }
 0xd33   :  { %v8611_v54 = vsub.f32 %v8552_v2, %v3583_v26  ;;  %v3584_v61 = vmul.f32 0.03125, %v3572_v59 }
 0xd34   :  { %v3575_v48 = vpop.xlane.xlu0 %3574 }
 0xd35   :  { %v8614_v30 = vsub.f32 %v8566_v16, %v3584_v61  ;;  %v3585_v8 = vmul.f32 0.03125, %v3575_v48  ;;  %v3599_v43 = vmul.f32 %v8611_v54, %v8611_v54 }
 0xd36   :  { %v3578_v13 = vpop.xlane.xlu1 %3577 }
 0xd37   :  { %v8619_v39 = vsub.f32 %v8569_v52, %v3585_v8  ;;  %v3586_v4 = vmul.f32 0.03125, %v3578_v13  ;;  %v3615_v22 = vsel %vm63_vm0, %v3599_v43, 0.0  ;;  %v3600_v20 = vmul.f32 %v8614_v30, %v8614_v30 }
 0xd38   :  { %3616 = vadd.xlane.f32.xlu0 %v3615_v22  ;;  %v3605_v42 = vpop.xlane.xlu0 %3604 }
 0xd39   :  { %v8625_v58 = vsub.f32 %v8582_v28, %v3586_v4  ;;  %v3627_v62 = vmul.f32 0.03125, %v3605_v42  ;;  %v3618_v45 = vsel %vm63_vm0, %v3600_v20, 0.0  ;;  %v3601_v27 = vmul.f32 %v8619_v39, %v8619_v39 }
 0xd3a   :  { %3619 = vadd.xlane.f32.xlu1 %v3618_v45  ;;  %v3608_v49 = vpop.xlane.xlu1 %3607 }
 0xd3b   :  { %v3635_v1 = vadd.f32 1e-05, %v3627_v62  ;;  %v3628_v44 = vmul.f32 0.03125, %v3608_v49  ;;  %v3621_v41 = vsel %vm63_vm0, %v3601_v27, 0.0  ;;  %v3602_v3 = vmul.f32 %v8625_v58, %v8625_v58 }
 0xd3c   :  { %3622 = vadd.xlane.f32.xlu0 %v3621_v41  ;;  %v3611_v6 = vpop.xlane.xlu0 %3610 }
 0xd3d   :  { %6651 = vrsqrt.f32 %v3635_v1  ;;  %v3636_v57 = vadd.f32 1e-05, %v3628_v44  ;;  %v3629_v38 = vmul.f32 0.03125, %v3611_v6  ;;  %v3624_v33 = vsel %vm63_vm0, %v3602_v3, 0.0 }
 0xd3e   :  { %3625 = vadd.xlane.f32.xlu1 %v3624_v33  ;;  %v3614_v0 = vpop.xlane.xlu1 %3613 }
 0xd3f   :  { %6653 = vrsqrt.f32 %v3636_v57  ;;  %v3637_v18 = vadd.f32 1e-05, %v3629_v38  ;;  %v3630_v55 = vmul.f32 0.03125, %v3614_v0 }
 0xd41   :  { %6655 = vrsqrt.f32 %v3637_v18  ;;  %v3638_v46 = vadd.f32 1e-05, %v3630_v55 }
 0xd43   :  { %6657 = vrsqrt.f32 %v3638_v46 }
 0xd47   :  { %v6652_v60 = vpop.eup %6651 }
 0xd48   :  { %v3651_v40 = vmul.f32 %v6652_v60, %v8561_v7 }
 0xd49   :  { %v6654_v31 = vpop.eup %6653 }
 0xd4a   :  { %v3652_v5 = vmul.f32 %v6654_v31, %v8575_v36  ;;  %v3666_v34 = vmul.f32 %v6036_v29, %v3651_v40 }
 0xd4b   :  { %v6656_v14 = vpop.eup %6655 }
 0xd4c   :  { %v3653_v19 = vmul.f32 %v6656_v14, %v8585_v63  ;;  %v3667_v9 = vmul.f32 %v6036_v29, %v3652_v5  ;;  %v3681_v10 = vadd.f32 %v6037_v53, %v3666_v34 }
 0xd4d   :  { %v6658_v56 = vpop.eup %6657 }
 0xd4e   :  { %v3668_v11 = vmul.f32 %v6036_v29, %v3653_v19  ;;  %v3654_v32 = vmul.f32 %v6658_v56, %v8592_v37  ;;  %v3682_v25 = vadd.f32 %v6037_v53, %v3667_v9 }
 0xd50   :  { %v3669_v50 = vmul.f32 %v6036_v29, %v3654_v32  ;;  %v3689_v7 = vpack.c.bf16 %v3682_v25, %v3681_v10  ;;  %v3683_v36 = vadd.f32 %v6037_v53, %v3668_v11  ;;  %v6782_v11 = vmov 0.0  }
 0xd51   :  { %3881 = vst.msk [vmem:[#allocation5] sm:$0xff] %vm410_vm1, %v6782_v11  ;;  %3882 = vst.msk [vmem:[#allocation5 + $0x8] sm:$0xff] %vm410_vm1, %v6782_v11 }
 0xd52   :  { %6335 = vmatprep.mubr.msk.bf16.mxu0 %vm63_vm0, %v3689_v7  ;;  %v3684_v47 = vadd.f32 %v6037_v53, %v3669_v50  ;;  %3883 = vst.msk [vmem:[#allocation5 + $0x10] sm:$0xff] %vm410_vm1, %v6782_v11  ;;  %3887 = vst.msk [vmem:[#allocation5 + $0x30] sm:$0xff] %vm410_vm1, %v6782_v11  ;;  %v8691_v50 = vld [vmem:[%s10745_s12] sm:$0xff]  ;;  %v11288_v7 = vld [vmem:[#allocation11_spill] sm:$0xff] }
 0xd53   :  { %3889 = vst.msk [vmem:[#allocation5 + $0x40] sm:$0xff] %vm410_vm1, %v6782_v11  ;;  %3890 = vst.msk [vmem:[#allocation5 + $0x48] sm:$0xff] %vm410_vm1, %v6782_v11 }
 0xd54   :  { %v3690_v17 = vpack.c.bf16 %v3684_v47, %v3683_v36  ;;  %3895 = vst.msk [vmem:[#allocation5 + $0x70] sm:$0xff] %vm410_vm1, %v6782_v11  ;;  %3884 = vst.msk [vmem:[#allocation5 + $0x18] sm:$0xff] %vm410_vm1, %v6782_v11  ;;  %v8695_v36 = vrot.slane %v8691_v50, %v11288_v7 }
 0xd55   :  { %3885 = vst.msk [vmem:[#allocation5 + $0x20] sm:$0xff] %vm410_vm1, %v6782_v11  ;;  %3886 = vst.msk [vmem:[#allocation5 + $0x28] sm:$0xff] %vm410_vm1, %v6782_v11 }
 0xd56   :  { %6336 = vmatmul.mubr.msk.bf16.vlgmr.msra.gmra.mrb[112].mxu0 %vm63_vm0, %v3690_v17  ;;  %3888 = vst.msk [vmem:[#allocation5 + $0x38] sm:$0xff] %vm410_vm1, %v6782_v11  ;;  %3891 = vst.msk [vmem:[#allocation5 + $0x50] sm:$0xff] %vm410_vm1, %v6782_v11 }
 0xd57   :  { %3892 = vst.msk [vmem:[#allocation5 + $0x58] sm:$0xff] %vm410_vm1, %v6782_v11  ;;  %3893 = vst.msk [vmem:[#allocation5 + $0x60] sm:$0xff] %vm410_vm1, %v6782_v11 }
 0xd58   :  { %3894 = vst.msk [vmem:[#allocation5 + $0x68] sm:$0xff] %vm410_vm1, %v6782_v11  ;;  %3896 = vst.msk [vmem:[#allocation5 + $0x78] sm:$0xff] %vm410_vm1, %v6782_v11  ;;  %v8697_v47 = vld [vmem:[#allocation5] sm:$0xff]  ;;  %v8699_v17 = vld [vmem:[#allocation5 + $0x8] sm:$0xff] }
 0xd59   :  { %11289 = vst [vmem:[#allocation56_spill] sm:$0xff] %v8695_v36 }
 0xdc5   :  { %v3617_v12 = vpop.xlane.xlu0 %3616 }
 0xdc6   :  { %v3631_v51 = vmul.f32 0.03125, %v3617_v12 }
 0xdc7   :  { %v3620_v35 = vpop.xlane.xlu1 %3619 }
 0xdc8   :  { %v3639_v63 = vadd.f32 1e-05, %v3631_v51  ;;  %v3632_v26 = vmul.f32 0.03125, %v3620_v35  ;;  %v11291_v51 = vld [vmem:[#allocation12_spill] sm:$0xff] }
 0xdc9   :  { %v3623_v59 = vpop.xlane.xlu0 %3622  ;;  %v8706_v35 = vrot.slane %v8691_v50, %v11291_v51 }
 0xdca   :  { %6659 = vrsqrt.f32 %v3639_v63  ;;  %v3640_v61 = vadd.f32 1e-05, %v3632_v26  ;;  %v3633_v37 = vmul.f32 0.03125, %v3623_v59  ;;  %v3930_v63 = vmul.f32 %v8695_v36, %v8697_v47  ;;  %v11293_v59 = vld [vmem:[#allocation9_spill] sm:$0xff] }
 0xdcb   :  { %v3626_v48 = vpop.xlane.xlu1 %3625  ;;  %11292 = vst [vmem:[#allocation19_spill] sm:$0xff] %v8706_v35  ;;  %v8712_v26 = vmul.f32 %v8695_v36, %v8699_v17 }
 0xdcc   :  { %6661 = vrsqrt.f32 %v3640_v61  ;;  %v3641_v8 = vadd.f32 1e-05, %v3633_v37  ;;  %v3634_v43 = vmul.f32 0.03125, %v3626_v48  ;;  %v8715_v61 = vsub.s32 3, %v11293_v59 }
 0xdcd   :  { %v8718_v37 = vsub.s32 4, %v11293_v59 }
 0xdce   :  { %6663 = vrsqrt.f32 %v3641_v8  ;;  %v3642_v13 = vadd.f32 1e-05, %v3634_v43  ;;  %v11294_v8 = vld [vmem:[#allocation10_spill] sm:$0xff] }
 0xdcf   :  { %v8723_v43 = vrot.slane %v8691_v50, %v11294_v8 }
 0xdd0   :  { %6665 = vrsqrt.f32 %v3642_v13  ;;  %v3941_v13 = vrot.slane %v3930_v63, 1 }
 0xdd1   :  { %11295 = vst [vmem:[#allocation27_spill] sm:$0xff] %v8723_v43 }
 0xdd4   :  { %v6660_v4 = vpop.eup %6659 }
 0xdd5   :  { %v3655_v22 = vmul.f32 %v6660_v4, %v8611_v54  ;;  %v3942_v4 = vrot.slane %v8712_v26, 1 }
 0xdd6   :  { %v6662_v20 = vpop.eup %6661 }
 0xdd7   :  { %v3656_v42 = vmul.f32 %v6662_v20, %v8614_v30  ;;  %v3670_v62 = vmul.f32 %v6036_v29, %v3655_v22  ;;  %v8655_v30 = vld [vmem:[%s10744_s11] ss:$0 sm:$0xff]  ;;  %v3964_v22 = vmul.f32 %v8706_v35, %v8697_v47  ;;  %v8730_v20 = vrot.slane %v8691_v50, %v8715_v61 }
 0xdd8   :  { %v6664_v45 = vpop.eup %6663 }
 0xdd9   :  { %v3657_v27 = vmul.f32 %v6664_v45, %v8619_v39  ;;  %v3671_v49 = vmul.f32 %v6036_v29, %v3656_v42  ;;  %v3685_v41 = vadd.f32 %v6037_v53, %v3670_v62  ;;  %11296 = vst [vmem:[#allocation24_spill] sm:$0xff] %v8730_v20  ;;  %v8734_v42 = vmul.f32 %v8706_v35, %v8699_v17 }
 0xdda   :  { %v6666_v1 = vpop.eup %6665  ;;  %v8738_v45 = vrot.slane %v8691_v50, %v8718_v37 }
 0xddb   :  { %v3658_v44 = vmul.f32 %v6666_v1, %v8625_v58  ;;  %v3686_v3 = vadd.f32 %v6037_v53, %v3671_v49  ;;  %v3672_v6 = vmul.f32 %v6036_v29, %v3657_v27  ;;  %v8741_v27 = vsub.s32 5, %v11293_v59 }
 0xddc   :  { %11297 = vst [vmem:[#allocation26_spill] sm:$0xff] %v8738_v45 }
 0xddd   :  { %v3691_v57 = vpack.c.bf16 %v3686_v3, %v3685_v41  ;;  %v3673_v38 = vmul.f32 %v6036_v29, %v3658_v44  ;;  %v3687_v33 = vadd.f32 %v6037_v53, %v3672_v6  ;;  %v3921_v3 = vmul.f32 %v8723_v43, %v8697_v47 }
 0xdde   :  { %v3943_v6 = vsel %vm3940_vm4, %v3941_v13, %v3942_v4 }
 0xddf   :  { %6339 = vmatprep.mubr.msk.bf16.mxu0 %vm63_vm0, %v3691_v57  ;;  %v3688_v54 = vadd.f32 %v6037_v53, %v3673_v38  ;;  %v3975_v57 = vrot.slane %v3964_v22, 2 }
 0xde1   :  { %v3692_v0 = vpack.c.bf16 %v3688_v54, %v3687_v33 }
 0xde3   :  { %6340 = vmatmul.mubr.msk.bf16.gmra.mrb[116].mxu0 %vm63_vm0, %v3692_v0 }
 0xe29   :  { %v6337_v39 = vpop.f32.mrb[112].mxu0 }
 0xe2a   :  { %v8658_v58 = vadd.f32 %v6337_v39, %v8655_v30  ;;  %v3762_v18 = vpop.f32.mrb[113].mxu0  ;;  %v3976_v39 = vrot.slane %v8734_v42, 2  ;;  %v8859_v42 = vld [vmem:[%s10745_s12 + $0x8] sm:$0xff] }
 0xe2b   :  { %v8661_v55 = vadd.f32 %v8655_v30, %v3762_v18  ;;  %v6338_v46 = vpop.f32.mrb[114].mxu0  ;;  %v3998_v18 = vmul.f32 %v8730_v20, %v8697_v47 }
 0xe2c   :  { %v6047_v60 = vmul.f32 -1.442695, %v8658_v58  ;;  %v3765_v29 = vpop.f32.mrb[115].mxu0  ;;  %v8702_v12 = vadd.f32 %v6338_v46, %v8655_v30  ;;  %v3977_v11 = vsel %vm3974_vm5, %v3975_v57, %v3976_v39 }
 0xe2d   :  { %v6045_v40 = vmul.f32 -1.442695, %v8661_v55  ;;  %v8666_v31 = vadd.f32 %v8655_v30, %v3765_v29 }
 0xe2e   :  { %11290 = vst [vmem:[#allocation18_spill] sm:$0xff] %v8702_v12  ;;  %v6048_v48 = vmul.f32 -1.442695, %v8702_v12 }
 0xe2f   :  { %6667 = vpow2.f32 %v6045_v40  ;;  %v6046_v5 = vmul.f32 -1.442695, %v8666_v31  ;;  %v8768_v40 = vmul.f32 %v8730_v20, %v8699_v17 }
 0xe30   :  { %6669 = vpow2.f32 %v6047_v60 }
 0xe31   :  { %6671 = vpow2.f32 %v6046_v5  ;;  %v8771_v5 = vsub.s32 6, %v11293_v59 }
 0xe33   :  { %v8960_v28 = vrot.slane %v8859_v42, %v8771_v5 }
 0xe35   :  { %11309 = vst [vmem:[#allocation48_spill] sm:$0xff] %v8960_v28 }
 0xe39   :  { %v6668_v34 = vpop.eup %6667 }
 0xe3a   :  { %v6670_v14 = vpop.eup %6669  ;;  %v3817_v53 = vadd.f32 1.0, %v6668_v34 }
 0xe3b   :  { %v6672_v19 = vpop.eup %6671  ;;  %v3819_v56 = vadd.f32 1.0, %v6670_v14 }
 0xe3c   :  { %6673 = vrcp.f32 %v3817_v53  ;;  %v3818_v9 = vadd.f32 1.0, %v6672_v19  ;;  %v3955_v19 = vadd.f32 %v3943_v6, %v3921_v3  ;;  %v8809_v6 = vsub.s32 7, %v11293_v59 }
 0xe3e   :  { %6675 = vrcp.f32 %v3818_v9  ;;  %v4032_v9 = vmul.f32 %v8738_v45, %v8697_v47  ;;  %v3989_v13 = vadd.f32 %v3977_v11, %v3955_v19  ;;  %v8835_v11 = vrot.slane %v8691_v50, %v8809_v6 }
 0xe3f   :  { %6677 = vrcp.f32 %v3819_v56  ;;  %v8785_v56 = vmul.f32 %v8738_v45, %v8699_v17  ;;  %v8993_v21 = vrot.slane %v8859_v42, %v8809_v6 }
 0xe40   :  { %6679 = vpow2.f32 %v6048_v48  ;;  %v8795_v48 = vrot.slane %v8691_v50, %v8771_v5  ;;  %v4043_v22 = vrot.slane %v4032_v9, 4  ;;  %11303 = vst [vmem:[#allocation43_spill] sm:$0xff] %v8835_v11 }
 0xe41   :  { %11310 = vst [vmem:[#allocation44_spill] sm:$0xff] %v8993_v21 }
 0xe42   :  { %11302 = vst [vmem:[#allocation42_spill] sm:$0xff] %v8795_v48  ;;  %v4101_v9 = vmul.f32 %v8795_v48, %v8699_v17 }
 0xe46   :  { %v6674_v32 = vpop.eup %6673 }
 0xe47   :  { %3849 = vrot.lane.b32.xlu0 %v6674_v32, %s6781_s4  ;;  %v4010_v32 = vrot.slane %v8768_v40, 3 }
 0xe48   :  { %v6676_v10 = vpop.eup %6675 }
 0xe49   :  { %3851 = vrot.lane.b32.xlu1 %v6676_v10, %s6781_s4  ;;  %v6678_v25 = vpop.eup %6677 }
 0xe4a   :  { %v6680_v63 = vpop.eup %6679 }
 0xe4d   :  { %3853 = vrot.lane.b32.xlu1 %v6678_v25, %s6781_s4 }
 0xeb6   :  { %v6341_v62 = vpop.f32.mrb[116].mxu0 }
 0xeb7   :  { %v8744_v49 = vadd.f32 %v6341_v62, %v8655_v30  ;;  %v3778_v1 = vpop.f32.mrb[117].mxu0  ;;  %v4044_v62 = vrot.slane %v8785_v56, 4 }
 0xeb8   :  { %v8747_v44 = vadd.f32 %v8655_v30, %v3778_v1  ;;  %v6342_v41 = vpop.f32.mrb[118].mxu0 }
 0xeb9   :  { %11298 = vst [vmem:[#allocation25_spill] sm:$0xff] %v8744_v49  ;;  %v6051_v38 = vmul.f32 -1.442695, %v8744_v49  ;;  %v8756_v33 = vadd.f32 %v6342_v41, %v8655_v30  ;;  %v3781_v54 = vpop.f32.mrb[119].mxu0  ;;  %v3850_v0 = vpop.permute.xlu0 %3849  ;;  %v4045_v59 = vsel %vm4042_vm7, %v4043_v22, %v4044_v62 }
 0xeba   :  { %11299 = vst [vmem:[#allocation40_spill] sm:$0xff] %v8747_v44  ;;  %v6049_v46 = vmul.f32 -1.442695, %v8747_v44  ;;  %v8763_v60 = vadd.f32 %v8655_v30, %v3781_v54  ;;  %v3873_v29 = vmul.f32 %v3850_v0, %v8661_v55  ;;  %v8779_v55 = vrot.slane %v8691_v50, %v8741_v27 }
 0xebb   :  { %11300 = vst [vmem:[#allocation41_spill] sm:$0xff] %v8756_v33  ;;  %6681 = vpow2.f32 %v6051_v38  ;;  %v3852_v34 = vpop.permute.xlu1 %3851  ;;  %v6052_v14 = vmul.f32 -1.442695, %v8756_v33 }
 0xebc   :  { %11301 = vst [vmem:[#allocation45_spill] sm:$0xff] %v8763_v60  ;;  %6683 = vpow2.f32 %v6049_v46  ;;  %v6050_v53 = vmul.f32 -1.442695, %v8763_v60  ;;  %3897 = vst.msk [vmem:[#allocation5 + $0x10] sm:$0xff] %vm410_vm1, %v3873_v29  ;;  %v3874_v30 = vmul.f32 %v3852_v34, %v8666_v31  ;;  %v4009_v31 = vrot.slane %v3998_v18, 3 }
 0xebd   :  { %v4066_v41 = vmul.f32 %v8779_v55, %v8697_v47  ;;  %v3922_v18 = vmul.f32 %v8723_v43, %v8699_v17 }
 0xebe   :  { %6685 = vpow2.f32 %v6050_v53  ;;  %3898 = vst.msk [vmem:[#allocation5 + $0x18] sm:$0xff] %vm410_vm1, %v3874_v30  ;;  %v4011_v1 = vsel %vm4008_vm6, %v4009_v31, %v4010_v32  ;;  %v4100_v53 = vmul.f32 %v8795_v48, %v8697_v47  ;;  %v3820_v31 = vadd.f32 1.0, %v6680_v63 }
 0xebf   :  { %v3854_v10 = vpop.permute.xlu1 %3853  ;;  %6687 = vpow2.f32 %v6052_v14  ;;  %v4023_v46 = vadd.f32 %v4011_v1, %v3989_v13  ;;  %v4077_v34 = vrot.slane %v4066_v41, 5 }
 0xec0   :  { %v3875_v25 = vmul.f32 %v3854_v10, %v8658_v58  ;;  %v8804_v58 = vmul.f32 %v8779_v55, %v8699_v17 }
 0xec1   :  { %v4057_v63 = vadd.f32 %v4045_v59, %v4023_v46 }
 0xec2   :  { %3899 = vst.msk [vmem:[#allocation5 + $0x20] sm:$0xff] %vm410_vm1, %v3875_v25  ;;  %v4078_v14 = vrot.slane %v8804_v58, 5  ;;  %v4111_v58 = vrot.slane %v4100_v53, 6 }
 0xec3   :  { %v8806_v3 = vld [vmem:[#allocation5 + $0x10] sm:$0xff] }
 0xec4   :  { %v8813_v57 = vmul.f32 %v8695_v36, %v8806_v3  ;;  %v8817_v38 = vmul.f32 %v8706_v35, %v8806_v3  ;;  %v8821_v54 = vmul.f32 %v8730_v20, %v8806_v3  ;;  %v4079_v41 = vsel %vm4076_vm8, %v4077_v34, %v4078_v14 }
 0xec5   :  { %v6682_v0 = vpop.eup %6681  ;;  %v8863_v59 = vmul.f32 %v8779_v55, %v8806_v3  ;;  %v4134_v34 = vmul.f32 %v8835_v11, %v8699_v17 }
 0xec6   :  { %v6684_v29 = vpop.eup %6683  ;;  %v10834_v40 = vrot.slane %v8813_v57, 1  ;;  %v10833_v19 = vrot.slane %v8817_v38, 2  ;;  %v10831_v47 = vrot.slane %v8821_v54, 3  ;;  %v3823_v25 = vadd.f32 1.0, %v6682_v0 }
 0xec7   :  { %v3821_v30 = vadd.f32 1.0, %v6684_v29  ;;  %v4112_v0 = vrot.slane %v4101_v9, 6  ;;  %v4091_v29 = vadd.f32 %v4079_v41, %v4057_v63  ;;  %v8875_v9 = vrot.slane %v8859_v42, %v11288_v7 }
 0xec8   :  { %v6686_v56 = vpop.eup %6685  ;;  %v3945_v10 = vsel %vm3940_vm4, %v3942_v4, %v10834_v40  ;;  %v3979_v50 = vsel %vm3974_vm5, %v3976_v39, %v10833_v19  ;;  %v8851_v4 = vmul.f32 %v8738_v45, %v8806_v3  ;;  %v8942_v40 = vrot.slane %v8859_v42, %v8741_v27 }
 0xec9   :  { %6689 = vrcp.f32 %v3821_v30  ;;  %v3822_v13 = vadd.f32 1.0, %v6686_v56  ;;  %v3956_v22 = vadd.f32 %v3945_v10, %v3922_v18  ;;  %v6688_v1 = vpop.eup %6687  ;;  %v4013_v18 = vsel %vm4008_vm6, %v4010_v32, %v10831_v47  ;;  %11304 = vst [vmem:[#allocation49_spill] sm:$0xff] %v8875_v9 }
 0xeca   :  { %v3824_v39 = vadd.f32 1.0, %v6688_v1  ;;  %v10830_v32 = vrot.slane %v8851_v4, 4  ;;  %v4113_v53 = vsel %vm4110_vm9, %v4111_v58, %v4112_v0  ;;  %v8871_v30 = vrot.slane %v8859_v42, %v11294_v8  ;;  %11308 = vst [vmem:[#allocation46_spill] sm:$0xff] %v8942_v40 }
 0xecb   :  { %6691 = vrcp.f32 %v3822_v13  ;;  %v3990_v26 = vadd.f32 %v3979_v50, %v3956_v22  ;;  %v8879_v56 = vmul.f32 %v8795_v48, %v8806_v3  ;;  %v8883_v10 = vrot.slane %v8859_v42, %v11291_v51 }
 0xecc   :  { %6693 = vrcp.f32 %v3823_v25  ;;  %v10829_v25 = vrot.slane %v8863_v59, 5  ;;  %v4125_v22 = vadd.f32 %v4113_v53, %v4091_v29  ;;  %v8891_v1 = vmul.f32 %v8835_v11, %v8806_v3  ;;  %v8906_v29 = vld [vmem:[#allocation5 + $0x18] sm:$0xff] }
 0xecd   :  { %v4024_v46 = vadd.f32 %v4013_v18, %v3990_v26  ;;  %6695 = vrcp.f32 %v3820_v31  ;;  %11305 = vst [vmem:[#allocation71_spill] sm:$0xff] %v8883_v10  ;;  %v4047_v31 = vsel %vm4042_vm7, %v4044_v62, %v10830_v32  ;;  %v4143_v50 = vrot.slane %v4134_v34, 7 }
 0xece   :  { %6697 = vrcp.f32 %v3824_v39  ;;  %v4081_v41 = vsel %vm4076_vm8, %v4078_v14, %v10829_v25  ;;  %v10828_v26 = vrot.slane %v8879_v56, 6  ;;  %v4178_v62 = vmul.f32 %v8875_v9, %v8699_v17 }
 0xecf   :  { %v4058_v13 = vadd.f32 %v4047_v31, %v4024_v46  ;;  %v8902_v39 = vrot.slane %v8859_v42, %v8715_v61  ;;  %v4164_v46 = vmul.f32 %v8871_v30, %v8699_v17  ;;  %v10832_v34 = vrot.slane %v8891_v1, 7 }
 0xed0   :  { %v4115_v14 = vsel %vm4110_vm9, %v4112_v0, %v10828_v26  ;;  %v4155_v53 = vadd.f32 %v4143_v50, %v4125_v22  ;;  %v4211_v31 = vmul.f32 %v8883_v10, %v8699_v17  ;;  %v4188_v22 = vrot.slane %v4178_v62, 1 }
 0xed1   :  { %v4092_v58 = vadd.f32 %v4081_v41, %v4058_v13  ;;  %11306 = vst [vmem:[#allocation66_spill] sm:$0xff] %v8902_v39  ;;  %v8917_v41 = vrot.slane %v8859_v42, %v8718_v37  ;;  %v4145_v0 = vsel %vm4142_vm10, %v4143_v50, %v10832_v34  ;;  %v4244_v50 = vmul.f32 %v8902_v39, %v8699_v17 }
 0xed2   :  { %v4169_v32 = vadd.f32 %v4164_v46, %v4155_v53  ;;  %v4221_v47 = vrot.slane %v4211_v31, 2  ;;  %v4212_v19 = vmul.f32 %v8883_v10, %v8806_v3  ;;  %v9036_v33 = vmul.f32 %v8706_v35, %v8906_v29 }
 0xed3   :  { %v6690_v63 = vpop.eup %6689  ;;  %11307 = vst [vmem:[#allocation73_spill] sm:$0xff] %v8917_v41  ;;  %v4254_v16 = vrot.slane %v4244_v50, 3  ;;  %v8978_v52 = vmul.f32 %v8917_v41, %v8906_v29 }
 0xed4   :  { %3857 = vrot.lane.b32.xlu1 %v6690_v63, %s6781_s4  ;;  %v4126_v63 = vadd.f32 %v4115_v14, %v4092_v58  ;;  %v4165_v58 = vmul.f32 %v8871_v30, %v8806_v3  ;;  %v4179_v14 = vmul.f32 %v8875_v9, %v8806_v3  ;;  %v4222_v31 = vrot.slane %v4212_v19, 2 }
 0xed5   :  { %v6692_v18 = vpop.eup %6691 }
 0xed6   :  { %3859 = vrot.lane.b32.xlu0 %v6692_v18, %s6781_s4  ;;  %v6694_v13 = vpop.eup %6693  ;;  %v6407_v18 = vld [vmem:[%s10747_s14] sm:$0xff]   ;;  %v4156_v25 = vadd.f32 %v4145_v0, %v4126_v63  ;;  %v4189_v0 = vrot.slane %v4179_v14, 1  ;;  %v4223_v2 = vsel %vm3974_vm5, %v4221_v47, %v4222_v31 }
 0xed7   :  { %v6696_v26 = vpop.eup %6695  ;;  %6343 = vmatprep.subr.bf16.mxu1 %v6407_v18 }
 0xed8   :  { %3861 = vrot.lane.b32.xlu1 %v6694_v13, %s6781_s4  ;;  %v8932_v13 = vmul.f32 %v8875_v9, %v8906_v29  ;;  %v6698_v62 = vpop.eup %6697  ;;  %v4170_v63 = vadd.f32 %v4165_v58, %v4156_v25  ;;  %6344 = vmatpush3.bf16.msra.mxu1 %v6407_v18  ;;  %v4277_v25 = vmul.f32 %v8917_v41, %v8699_v17 }
 0xed9   :  { %v4190_v46 = vsel %vm3940_vm4, %v4188_v22, %v4189_v0  ;;  %v4245_v18 = vmul.f32 %v8902_v39, %v8806_v3  ;;  %v8965_v22 = vmul.f32 %v8902_v39, %v8906_v29 }
 0xeda   :  { %3855 = vrot.lane.b32.xlu0 %v6696_v26, %s6781_s4  ;;  %v10838_v34 = vrot.slane %v8932_v13, 1  ;;  %v8947_v26 = vmul.f32 %v8883_v10, %v8906_v29  ;;  %v4202_v58 = vadd.f32 %v4190_v46, %v4169_v32  ;;  %v4287_v47 = vrot.slane %v4277_v25, 4 }
 0xedb   :  { %v4255_v32 = vrot.slane %v4245_v18, 3  ;;  %v10842_v46 = vrot.slane %v8965_v22, 3  ;;  %v4311_v25 = vmul.f32 %v8942_v40, %v8806_v3 }
 0xedc   :  { %3863 = vrot.lane.b32.xlu1 %v6698_v62, %s6781_s4  ;;  %v4192_v53 = vsel %vm3940_vm4, %v4189_v0, %v10838_v34  ;;  %v10840_v62 = vrot.slane %v8947_v26, 2  ;;  %v4235_v0 = vadd.f32 %v4223_v2, %v4202_v58  ;;  %v4343_v58 = vmul.f32 %v8960_v28, %v8699_v17 }
 0xedd   :  { %v4203_v14 = vadd.f32 %v4192_v53, %v4170_v63  ;;  %v4310_v63 = vmul.f32 %v8942_v40, %v8699_v17  ;;  %v4278_v53 = vmul.f32 %v8917_v41, %v8806_v3  ;;  %v4256_v34 = vsel %vm4008_vm6, %v4254_v16, %v4255_v32 }
 0xede   :  { %v4225_v19 = vsel %vm3974_vm5, %v4222_v31, %v10840_v62  ;;  %v4258_v2 = vsel %vm4008_vm6, %v4255_v32, %v10842_v46  ;;  %v4268_v31 = vadd.f32 %v4256_v34, %v4235_v0  ;;  %v3907_v62 = vld [vmem:[%s10745_s12 + $0x10] sm:$0xff]  ;;  %v8998_v17 = vmul.f32 %v8942_v40, %v8906_v29 }
 0xedf   :  { %v4236_v50 = vadd.f32 %v4225_v19, %v4203_v14  ;;  %v4288_v18 = vrot.slane %v4278_v53, 4  ;;  %v10845_v19 = vrot.slane %v8978_v52, 4  ;;  %v4320_v16 = vrot.slane %v4310_v63, 5 }
 0xee0   :  { %11311 = vst [vmem:[#allocation50_spill] sm:$0xff] %v8998_v17  ;;  %v9002_v0 = vmul.f32 %v8695_v36, %v8906_v29  ;;  %v10849_v42 = vrot.slane %v8998_v17, 5  ;;  %v9011_v46 = vrot.slane %v3907_v62, %v11294_v8  ;;  %v9014_v15 = vrot.slane %v3907_v62, %v8715_v61 }
 0xee1   :  { %v4269_v14 = vadd.f32 %v4258_v2, %v4236_v50  ;;  %v4289_v34 = vsel %vm4042_vm7, %v4287_v47, %v4288_v18  ;;  %v4291_v32 = vsel %vm4042_vm7, %v4288_v18, %v10845_v19  ;;  %v4321_v50 = vrot.slane %v4311_v25, 5 }
 0xee2   :  { %11312 = vst [vmem:[#allocation51_spill] sm:$0xff] %v9002_v0  ;;  %v4301_v63 = vadd.f32 %v4289_v34, %v4268_v31  ;;  %v4344_v47 = vmul.f32 %v8960_v28, %v8806_v3  ;;  %v4353_v2 = vrot.slane %v4343_v58, 6  ;;  %11313 = vst [vmem:[#allocation47_spill] sm:$0xff] %v9011_v46  ;;  %v9019_v18 = vmul.f32 %v8960_v28, %v8906_v29 }
 0xee3   :  { %v4302_v53 = vadd.f32 %v4291_v32, %v4269_v14  ;;  %11314 = vst [vmem:[#allocation74_spill] sm:$0xff] %v9014_v15  ;;  %v4322_v24 = vsel %vm4076_vm8, %v4320_v16, %v4321_v50  ;;  %v9022_v31 = vrot.slane %v3907_v62, %v8718_v37  ;;  %v4324_v14 = vsel %vm4076_vm8, %v4321_v50, %v10849_v42 }
 0xee4   :  { %11315 = vst [vmem:[#allocation72_spill] sm:$0xff] %v9019_v18  ;;  %v4334_v58 = vadd.f32 %v4322_v24, %v4301_v63  ;;  %v4354_v25 = vrot.slane %v4344_v47, 6  ;;  %v10853_v19 = vrot.slane %v9019_v18, 6  ;;  %v4376_v16 = vmul.f32 %v8993_v21, %v8806_v3 }
 0xee5   :  { %11316 = vst [vmem:[#allocation35_spill] sm:$0xff] %v9022_v31  ;;  %v4335_v32 = vadd.f32 %v4324_v14, %v4302_v53  ;;  %v9032_v23 = vrot.slane %v3907_v62, %v11288_v7  ;;  %v9041_v24 = vmul.f32 %v8993_v21, %v8906_v29  ;;  %v9044_v63 = vrot.slane %v3907_v62, %v8741_v27 }
 0xee6   :  { %v4355_v12 = vsel %vm4110_vm9, %v4353_v2, %v4354_v25  ;;  %v4357_v50 = vsel %vm4110_vm9, %v4354_v25, %v10853_v19  ;;  %v4384_v47 = vrot.slane %v4376_v16, 7  ;;  %v9050_v14 = vrot.slane %v3907_v62, %v8771_v5  ;;  %v9055_v2 = vld [vmem:[#allocation5 + $0x20] sm:$0xff] }
 0xee7   :  { %11317 = vst [vmem:[#allocation14_spill] sm:$0xff] %v9032_v23  ;;  %11318 = vst [vmem:[#allocation13_spill] sm:$0xff] %v9041_v24  ;;  %v4367_v53 = vadd.f32 %v4355_v12, %v4334_v58  ;;  %v9053_v42 = vrot.slane %v3907_v62, %v8809_v6  ;;  %v4368_v34 = vadd.f32 %v4357_v50, %v4335_v32  ;;  %v10854_v49 = vrot.slane %v9041_v24, 7 }
 0xee8   :  { %11319 = vst [vmem:[#allocation28_spill] sm:$0xff] %v9044_v63  ;;  %11320 = vst [vmem:[#allocation29_spill] sm:$0xff] %v9050_v14  ;;  %v9059_v60 = vrot.slane %v3907_v62, %v11291_v51  ;;  %v11323_v44 = vrot.slane %v9002_v0, 1  ;;  %v11324_v25 = vrot.slane %v8813_v57, 1  ;;  %v4405_v16 = vmul.f32 %v9011_v46, %v8806_v3 }
 0xee9   :  { %11321 = vst [vmem:[#allocation52_spill] sm:$0xff] %v9053_v42  ;;  %v4396_v58 = vadd.f32 %v4384_v47, %v4367_v53  ;;  %v4386_v32 = vsel %vm4142_vm10, %v4384_v47, %v10854_v49  ;;  %v4419_v62 = vmul.f32 %v9032_v23, %v8806_v3  ;;  %v4420_v50 = vmul.f32 %v9032_v23, %v8906_v29 }
 0xeea   :  { %11322 = vst [vmem:[#allocation36_spill] sm:$0xff] %v9059_v60  ;;  %v3947_v12 = vsel %vm3940_vm4, %v11324_v25, %v11323_v44  ;;  %v9079_v44 = vld [vmem:[%s10745_s12 + $0x18] sm:$0x7f]  ;;  %v4397_v57 = vadd.f32 %v4386_v32, %v4368_v34  ;;  %v4406_v53 = vmul.f32 %v9011_v46, %v8906_v29  ;;  %v9085_v19 = vmul.f32 %v9032_v23, %v9055_v2 }
 0xeeb   :  { %v4410_v25 = vadd.f32 %v4405_v16, %v4396_v58  ;;  %v3923_v47 = vmul.f32 %v8723_v43, %v8806_v3  ;;  %v9091_v49 = vmul.f32 %v8730_v20, %v8906_v29  ;;  %v4429_v6 = vrot.slane %v4419_v62, 1 }
 0xeec   :  { %11325 = vst [vmem:[#allocation39_spill] sm:$0xff] %v9085_v19  ;;  %v4430_v24 = vrot.slane %v4420_v50, 1  ;;  %v4411_v18 = vadd.f32 %v4406_v53, %v4397_v57  ;;  %v10867_v34 = vrot.slane %v9085_v19, 1  ;;  %v4452_v32 = vmul.f32 %v9059_v60, %v8806_v3 }
 0xeed   :  { %v4453_v58 = vmul.f32 %v9059_v60, %v8906_v29  ;;  %v9100_v16 = vrot.slane %v9079_v44, %v11294_v8  ;;  %v3957_v23 = vadd.f32 %v3947_v12, %v3923_v47  ;;  %v9105_v62 = vmul.f32 %v9059_v60, %v9055_v2 }
 0xeee   :  { %v4431_v46 = vsel %vm3940_vm4, %v4429_v6, %v4430_v24  ;;  %v11328_v50 = vrot.slane %v9036_v33, 2  ;;  %v11329_v57 = vrot.slane %v8817_v38, 2  ;;  %v4433_v43 = vsel %vm3940_vm4, %v4430_v24, %v10867_v34 }
 0xeef   :  { %11326 = vst [vmem:[#allocation38_spill] sm:$0xff] %v9100_v16  ;;  %11327 = vst [vmem:[#allocation16_spill] sm:$0xff] %v9105_v62  ;;  %v4443_v17 = vadd.f32 %v4431_v46, %v4410_v25  ;;  %v4462_v8 = vrot.slane %v4452_v32, 2  ;;  %v4444_v0 = vadd.f32 %v4433_v43, %v4411_v18  ;;  %v4463_v12 = vrot.slane %v4453_v58, 2 }
 0xef0   :  { %v3981_v53 = vsel %vm3974_vm5, %v11329_v57, %v11328_v50  ;;  %v10869_v6 = vrot.slane %v9105_v62, 2  ;;  %v4485_v47 = vmul.f32 %v9014_v15, %v8806_v3  ;;  %v9121_v38 = vmul.f32 %v8738_v45, %v8906_v29 }
 0xef1   :  { %v4486_v50 = vmul.f32 %v9014_v15, %v8906_v29  ;;  %v9127_v46 = vmul.f32 %v9014_v15, %v9055_v2  ;;  %v4464_v43 = vsel %vm3974_vm5, %v4462_v8, %v4463_v12  ;;  %v4518_v25 = vmul.f32 %v9022_v31, %v8806_v3 }
 0xef2   :  { %v4466_v18 = vsel %vm3974_vm5, %v4463_v12, %v10869_v6  ;;  %v4495_v24 = vrot.slane %v4485_v47, 3  ;;  %v4476_v32 = vadd.f32 %v4464_v43, %v4443_v17  ;;  %v9138_v60 = vrot.slane %v9079_v44, %v11288_v7 }
 0xef3   :  { %11330 = vst [vmem:[#allocation30_spill] sm:$0xff] %v9127_v46  ;;  %v4477_v58 = vadd.f32 %v4466_v18, %v4444_v0  ;;  %v4496_v57 = vrot.slane %v4486_v50, 3  ;;  %v10871_v34 = vrot.slane %v9127_v46, 3  ;;  %v3991_v19 = vadd.f32 %v3981_v53, %v3957_v23 }
 0xef4   :  { %11331 = vst [vmem:[#allocation17_spill] sm:$0xff] %v9138_v60  ;;  %v4519_v8 = vmul.f32 %v9022_v31, %v8906_v29  ;;  %v9144_v12 = vmul.f32 %v9022_v31, %v9055_v2  ;;  %v4528_v0 = vrot.slane %v4518_v25, 4  ;;  %v4551_v50 = vmul.f32 %v9044_v63, %v8806_v3 }
 0xef5   :  { %v4497_v47 = vsel %vm4008_vm6, %v4495_v24, %v4496_v57  ;;  %v4499_v17 = vsel %vm4008_vm6, %v4496_v57, %v10871_v34  ;;  %v11333_v18 = vrot.slane %v9091_v49, 3  ;;  %v11334_v6 = vrot.slane %v8821_v54, 3 }
 0xef6   :  { %11332 = vst [vmem:[#allocation23_spill] sm:$0xff] %v9144_v12  ;;  %v4509_v7 = vadd.f32 %v4497_v47, %v4476_v32  ;;  %v4510_v43 = vadd.f32 %v4499_v17, %v4477_v58  ;;  %v4529_v23 = vrot.slane %v4519_v8, 4  ;;  %v10872_v53 = vrot.slane %v9144_v12, 4 }
 0xef7   :  { %v4015_v62 = vsel %vm4008_vm6, %v11334_v6, %v11333_v18  ;;  %v4552_v57 = vmul.f32 %v9044_v63, %v8906_v29  ;;  %v9163_v25 = vmul.f32 %v9044_v63, %v9055_v2  ;;  %v4561_v8 = vrot.slane %v4551_v50, 5 }
 0xef8   :  { %v4530_v32 = vsel %vm4042_vm7, %v4528_v0, %v4529_v23  ;;  %v4532_v58 = vsel %vm4042_vm7, %v4529_v23, %v10872_v53  ;;  %v4584_v54 = vmul.f32 %v9050_v14, %v8806_v3  ;;  %v4025_v34 = vadd.f32 %v4015_v62, %v3991_v19 }
 0xef9   :  { %11335 = vst [vmem:[#allocation20_spill] sm:$0xff] %v9163_v25  ;;  %v4542_v6 = vadd.f32 %v4530_v32, %v4509_v7  ;;  %v4543_v47 = vadd.f32 %v4532_v58, %v4510_v43  ;;  %v4562_v17 = vrot.slane %v4552_v57, 5  ;;  %v10873_v18 = vrot.slane %v9163_v25, 5 }
 0xefa   :  { %v9174_v24 = vmul.f32 %v8779_v55, %v8906_v29  ;;  %v4585_v0 = vmul.f32 %v9050_v14, %v8906_v29  ;;  %v9180_v23 = vmul.f32 %v9050_v14, %v9055_v2  ;;  %v4594_v7 = vrot.slane %v4584_v54, 6 }
 0xefb   :  { %v4563_v50 = vsel %vm4076_vm8, %v4561_v8, %v4562_v17  ;;  %v4565_v3 = vsel %vm4076_vm8, %v4562_v17, %v10873_v18  ;;  %v4617_v19 = vmul.f32 %v9053_v42, %v8906_v29  ;;  %v9191_v58 = vrot.slane %v9079_v44, %v8715_v61 }
 0xefc   :  { %11336 = vst [vmem:[#allocation53_spill] sm:$0xff] %v9180_v23  ;;  %v4575_v62 = vadd.f32 %v4563_v50, %v4542_v6  ;;  %v4576_v43 = vadd.f32 %v4565_v3, %v4543_v47  ;;  %v4595_v57 = vrot.slane %v4585_v0, 6  ;;  %v10876_v32 = vrot.slane %v9180_v23, 6 }
 0xefd   :  { %11337 = vst [vmem:[#allocation22_spill] sm:$0xff] %v9191_v58  ;;  %v9195_v8 = vrot.slane %v9079_v44, %v11291_v51  ;;  %v11339_v53 = vrot.slane %v9121_v38, 4  ;;  %v11340_v54 = vrot.slane %v8851_v4, 4  ;;  %v9204_v6 = vmul.f32 %v9053_v42, %v9055_v2 }
 0xefe   :  { %v9209_v61 = vmul.f32 %v8795_v48, %v8906_v29  ;;  %v4596_v0 = vsel %vm4110_vm9, %v4594_v7, %v4595_v57  ;;  %v4598_v51 = vsel %vm4110_vm9, %v4595_v57, %v10876_v32  ;;  %v4625_v3 = vrot.slane %v4617_v19, 7 }
 0xeff   :  { %11338 = vst [vmem:[#allocation21_spill] sm:$0xff] %v9195_v8  ;;  %v4049_v17 = vsel %vm4042_vm7, %v11340_v54, %v11339_v53  ;;  %11341 = vst [vmem:[#allocation77_spill] sm:$0xff] %v9204_v6  ;;  %v4608_v50 = vadd.f32 %v4596_v0, %v4575_v62  ;;  %v4609_v4 = vadd.f32 %v4598_v51, %v4576_v43  ;;  %v10875_v53 = vrot.slane %v9204_v6, 7 }
 0xf00   :  { %v4059_v54 = vadd.f32 %v4049_v17, %v4025_v34  ;;  %v4646_v18 = vmul.f32 %v9100_v16, %v8906_v29  ;;  %v4660_v47 = vmul.f32 %v9138_v60, %v8906_v29  ;;  %v9222_v25 = vmul.f32 %v9138_v60, %v9055_v2 }
 0xf01   :  { %v4627_v7 = vsel %vm4142_vm10, %v4625_v3, %v10875_v53  ;;  %v4637_v62 = vadd.f32 %v4625_v3, %v4608_v50  ;;  %v4693_v19 = vmul.f32 %v9195_v8, %v8906_v29  ;;  %v9231_v34 = vmul.f32 %v9195_v8, %v9055_v2 }
 0xf02   :  { %11342 = vst [vmem:[#allocation58_spill] sm:$0xff] %v9222_v25  ;;  %v9235_v43 = vrot.slane %v9079_v44, %v8718_v37  ;;  %v9237_v57 = vadd.f32 %v4627_v7, %v4609_v4  ;;  %v4670_v17 = vrot.slane %v4660_v47, 1  ;;  %v10881_v0 = vrot.slane %v9222_v25, 1 }
 0xf03   :  { %11343 = vst [vmem:[#allocation78_spill] sm:$0xff] %v9231_v34  ;;  %v11345_v51 = vrot.slane %v9174_v24, 5  ;;  %v11346_v50 = vrot.slane %v8863_v59, 5  ;;  %v10882_v53 = vrot.slane %v9209_v61, 6  ;;  %v9248_v32 = vmul.f32 %v8835_v11, %v8906_v29 }
 0xf04   :  { %11344 = vst [vmem:[#allocation68_spill] sm:$0xff] %v9235_v43  ;;  %v4651_v6 = vadd.f32 %v4646_v18, %v4637_v62  ;;  %v4672_v47 = vsel %vm3940_vm4, %v4670_v17, %v10881_v0  ;;  %v4703_v4 = vrot.slane %v4693_v19, 2  ;;  %v10879_v7 = vrot.slane %v9231_v34, 2  ;;  %v6410_v34 = vld [vmem:[%s10747_s14 + $0x18] sm:$0xff]  }
 0xf05   :  { %v4083_v3 = vsel %vm4076_vm8, %v11346_v50, %v11345_v51  ;;  %v9256_v59 = vrot.slane %v9079_v44, %v8741_v27  ;;  %v4726_v18 = vmul.f32 %v9191_v58, %v8906_v29  ;;  %v11349_v62 = vrot.slane %v8879_v56, 6 }
 0xf06   :  { %v4093_v37 = vadd.f32 %v4083_v3, %v4059_v54  ;;  %v4684_v23 = vadd.f32 %v4672_v47, %v4651_v6  ;;  %v4705_v51 = vsel %vm3974_vm5, %v4703_v4, %v10879_v7  ;;  %v9265_v54 = vmul.f32 %v9191_v58, %v9055_v2 }
 0xf07   :  { %11347 = vst [vmem:[#allocation82_spill] sm:$0xff] %v9256_v59  ;;  %v4117_v6 = vsel %vm4110_vm9, %v11349_v62, %v10882_v53  ;;  %v10885_v27 = vrot.slane %v9248_v32, 7  ;;  %v4759_v17 = vmul.f32 %v9235_v43, %v8906_v29  ;;  %v4736_v3 = vrot.slane %v4726_v18, 3 }
 0xf08   :  { %11348 = vst [vmem:[#allocation59_spill] sm:$0xff] %v9265_v54  ;;  %v4717_v19 = vadd.f32 %v4705_v51, %v4684_v23  ;;  %v4127_v50 = vadd.f32 %v4117_v6, %v4093_v37  ;;  %v10880_v47 = vrot.slane %v9265_v54, 3  ;;  %v9278_v4 = vmul.f32 %v9235_v43, %v9055_v2 }
 0xf09   :  { %v9282_v7 = vrot.slane %v9079_v44, %v8771_v5  ;;  %v4769_v56 = vrot.slane %v4759_v17, 4  ;;  %v4792_v37 = vmul.f32 %v9256_v59, %v8906_v29  ;;  %v9292_v18 = vmul.f32 %v9256_v59, %v9055_v2 }
 0xf0a   :  { %11350 = vst [vmem:[#allocation83_spill] sm:$0xff] %v9278_v4  ;;  %v4738_v23 = vsel %vm4008_vm6, %v4736_v3, %v10880_v47  ;;  %v10884_v51 = vrot.slane %v9278_v4, 4  ;;  %v11353_v62 = vrot.slane %v8891_v1, 7  ;;  %v9301_v44 = vmul.f32 %v8875_v9, %v9055_v2 }
 0xf0b   :  { %11351 = vst [vmem:[#allocation65_spill] sm:$0xff] %v9282_v7  ;;  %11352 = vst [vmem:[#allocation75_spill] sm:$0xff] %v9292_v18  ;;  %v4750_v6 = vadd.f32 %v4738_v23, %v4717_v19  ;;  %v4802_v0 = vrot.slane %v4792_v37, 5  ;;  %v10888_v53 = vrot.slane %v9292_v18, 5  ;;  %v4825_v54 = vmul.f32 %v9282_v7, %v8906_v29 }
 0xf0c   :  { %v4147_v5 = vsel %vm4142_vm10, %v11353_v62, %v10885_v27  ;;  %11354 = vst [vmem:[#allocation76_spill] sm:$0xff] %v9301_v44  ;;  %v4771_v3 = vsel %vm4042_vm7, %v4769_v56, %v10884_v51  ;;  %v4166_v1 = vmul.f32 %v8871_v30, %v8906_v29  ;;  %v9313_v62 = vmul.f32 %v9282_v7, %v9055_v2 }
 0xf0d   :  { %v4157_v17 = vadd.f32 %v4147_v5, %v4127_v50  ;;  %v4783_v47 = vadd.f32 %v4771_v3, %v4750_v6  ;;  %v10892_v19 = vrot.slane %v9301_v44, 1  ;;  %v9318_v50 = vmul.f32 %v8883_v10, %v9055_v2 }
 0xf0e   :  { %11355 = vst [vmem:[#allocation63_spill] sm:$0xff] %v9313_v62  ;;  %v4804_v56 = vsel %vm4076_vm8, %v4802_v0, %v10888_v53  ;;  %v4835_v5 = vrot.slane %v4825_v54, 6  ;;  %v10887_v6 = vrot.slane %v9313_v62, 6  ;;  %v11357_v51 = vrot.slane %v8932_v13, 1 }
 0xf0f   :  { %11356 = vst [vmem:[#allocation80_spill] sm:$0xff] %v9318_v50  ;;  %v4171_v23 = vadd.f32 %v4166_v1, %v4157_v17  ;;  %v4816_v37 = vadd.f32 %v4804_v56, %v4783_v47  ;;  %v10891_v18 = vrot.slane %v9318_v50, 2  ;;  %v9335_v0 = vmul.f32 %v8902_v39, %v9055_v2  ;;  %v11373_v50 = vld [vmem:[#allocation72_spill] sm:$0xff] }
 0xf10   :  { %v4837_v3 = vsel %vm4110_vm9, %v4835_v5, %v10887_v6  ;;  %v4194_v27 = vsel %vm3940_vm4, %v11357_v51, %v10892_v19  ;;  %v11359_v17 = vrot.slane %v8947_v26, 2  ;;  %v9346_v51 = vmul.f32 %v8917_v41, %v9055_v2  ;;  %v9376_v6 = vld [vmem:[#allocation5 + $0x40] sm:$0xff]  ;;  %v11368_v19 = vld [vmem:[#allocation50_spill] sm:$0xff] }
 0xf11   :  { %11358 = vst [vmem:[#allocation81_spill] sm:$0xff] %v9335_v0  ;;  %v4849_v54 = vadd.f32 %v4837_v3, %v4816_v37  ;;  %v4204_v47 = vadd.f32 %v4194_v27, %v4171_v23  ;;  %v10890_v13 = vrot.slane %v9335_v0, 3  ;;  %v3934_v5 = vmul.f32 %v8695_v36, %v9055_v2 }
 0xf12   :  { %v4227_v1 = vsel %vm3974_vm5, %v11359_v17, %v10891_v18  ;;  %11360 = vst [vmem:[#allocation62_spill] sm:$0xff] %v9346_v51  ;;  %v11361_v27 = vrot.slane %v8965_v22, 3  ;;  %v10889_v26 = vrot.slane %v9346_v51, 4  ;;  %v9358_v37 = vmul.f32 %v8942_v40, %v9055_v2 }
 0xf13   :  { %4855 = vst.msk [vmem:[#allocation4 - $0x1] sm:$0xfe] %vm4854_vm11, %v4849_v54  ;;  %v4237_v56 = vadd.f32 %v4227_v1, %v4204_v47  ;;  %v9362_v54 = vmul.f32 %v8960_v28, %v9055_v2  ;;  %v3948_v47 = vrot.slane %v3934_v5, 1  ;;  %v11364_v17 = vrot.slane %v8978_v52, 4  ;;  %v9378_v5 = vld [vmem:[#allocation5 + $0x48] sm:$0xff] }
 0xf14   :  { %v4260_v23 = vsel %vm4008_vm6, %v11361_v27, %v10890_v13  ;;  %11362 = vst [vmem:[#allocation55_spill] sm:$0xff] %v9358_v37  ;;  %v10897_v1 = vrot.slane %v9358_v37, 5  ;;  %v6408_v27 = vld [vmem:[%s10747_s14 + $0x8] sm:$0xff]   ;;  %v3968_v52 = vmul.f32 %v8706_v35, %v9055_v2  ;;  %v9388_v53 = vmul.f32 %v8993_v21, %v9055_v2  ;;  %v11378_v21 = vld [vmem:[#allocation13_spill] sm:$0xff] }
 0xf15   :  { %v4270_v3 = vadd.f32 %v4260_v23, %v4237_v56  ;;  %11363 = vst [vmem:[#allocation15_spill] sm:$0xff] %v9362_v54  ;;  %v4293_v22 = vsel %vm4042_vm7, %v11364_v17, %v10889_v26  ;;  %v6409_v56 = vld [vmem:[%s10747_s14 + $0x10] sm:$0xff]   ;;  %v9384_v17 = vmul.f32 %v8730_v20, %v9055_v2  ;;  %6345 = vmatprep.subr.bf16.mxu1 %v6408_v27  ;;  %v11369_v62 = vrot.slane %v11368_v19, 5 }
 0xf16   :  { %11365 = vst [vmem:[#allocation31_spill] sm:$0xff] %v9388_v53  ;;  %v9392_v26 = vmul.f32 %v8738_v45, %v9055_v2  ;;  %6346 = vmatpush3.bf16.msra.mxu1 %v6408_v27  ;;  %v4874_v25 = vmul.f32 %v9376_v6, %v8695_v36  ;;  %v9410_v27 = vmul.f32 %v9378_v5, %v8695_v36  ;;  %v11372_v0 = vrot.slane %v9362_v54, 6 }
 0xf17   :  { %v4303_v23 = vadd.f32 %v4293_v22, %v4270_v3  ;;  %v11366_v22 = vld [vmem:[#allocation51_spill] sm:$0xff]  ;;  %v4326_v4 = vsel %vm4076_vm8, %v11369_v62, %v10897_v1  ;;  %6347 = vmatprep.subr.bf16.mxu1 %v6409_v56  ;;  %v9418_v19 = vmul.f32 %v8795_v48, %v9055_v2  ;;  %v3982_v3 = vrot.slane %v3968_v52, 2 }
 0xf18   :  { %v11367_v13 = vrot.slane %v11366_v22, 1  ;;  %11370 = vst [vmem:[#allocation34_spill] sm:$0xff] %v9410_v27  ;;  %v11371_v22 = vld [vmem:[#allocation27_spill] sm:$0xff]  ;;  %v4016_v12 = vrot.slane %v9384_v17, 3  ;;  %v9425_v46 = vmul.f32 %v8835_v11, %v9055_v2  ;;  %v11374_v44 = vrot.slane %v11373_v50, 6 }
 0xf19   :  { %v4336_v62 = vadd.f32 %v4326_v4, %v4303_v23  ;;  %v3924_v1 = vmul.f32 %v11371_v22, %v8906_v29  ;;  %v4884_v29 = vrot.slane %v4874_v25, 1  ;;  %v4903_v17 = vmul.f32 %v9376_v6, %v8706_v35 }
 0xf1a   :  { %v3949_v18 = vsel %vm3940_vm4, %v11367_v13, %v3948_v47  ;;  %v9414_v13 = vmul.f32 %v8779_v55, %v9055_v2  ;;  %v4359_v4 = vsel %vm4110_vm9, %v11374_v44, %v11372_v0  ;;  %6348 = vmatpush3.bf16.msra.mxu1 %v6409_v56  ;;  %v9439_v37 = vmul.f32 %v9378_v5, %v8706_v35 }
 0xf1b   :  { %v3958_v23 = vadd.f32 %v3949_v18, %v3924_v1  ;;  %6349 = vmatprep.subr.bf16.mxu1 %v6410_v34  ;;  %v4369_v50 = vadd.f32 %v4359_v4, %v4336_v62  ;;  %v3925_v44 = vmul.f32 %v11371_v22, %v9055_v2  ;;  %v11375_v18 = vrot.slane %v9036_v33, 2  ;;  %v9457_v62 = vld [vmem:[#allocation5 + $0x30] sm:$0xff] }
 0xf1c   :  { %v11376_v0 = vrot.slane %v9091_v49, 3  ;;  %v11377_v52 = vrot.slane %v9388_v53, 7  ;;  %v11379_v51 = vrot.slane %v11378_v21, 7  ;;  %v4869_v33 = vmul.f32 %v9376_v6, %v11371_v22 }
 0xf1d   :  { %v3983_v25 = vsel %vm3974_vm5, %v11375_v18, %v3982_v3  ;;  %v3959_v4 = vadd.f32 %v3948_v47, %v3925_v44  ;;  %v4932_v49 = vmul.f32 %v9376_v6, %v8730_v20  ;;  %v11380_v18 = vrot.slane %v9410_v27, 1 }
 0xf1e   :  { %v4017_v1 = vsel %vm4008_vm6, %v11376_v0, %v4016_v12  ;;  %v4388_v54 = vsel %vm4142_vm10, %v11379_v51, %v11377_v52  ;;  %6350 = vmatpush3.bf16.msra.mxu1 %v6410_v34  ;;  %v3992_v35 = vadd.f32 %v3983_v25, %v3958_v23  ;;  %v4913_v56 = vrot.slane %v4903_v17, 2 }
 0xf1f   :  { %v4886_v0 = vsel %vm3940_vm4, %v4884_v29, %v11380_v18  ;;  %v9469_v51 = vmul.f32 %v9378_v5, %v8730_v20  ;;  %v11381_v34 = vrot.slane %v9392_v26, 4  ;;  %v11382_v47 = vrot.slane %v9121_v38, 4 }
 0xf20   :  { %v11383_v52 = vrot.slane %v9414_v13, 5  ;;  %v11384_v44 = vrot.slane %v9174_v24, 5  ;;  %v11385_v29 = vrot.slane %v9418_v19, 6  ;;  %v11386_v17 = vrot.slane %v9209_v61, 6  ;;  %v11390_v24 = vld [vmem:[#allocation14_spill] sm:$0xff] }
 0xf21   :  { %v4051_v23 = vsel %vm4042_vm7, %v11382_v47, %v11381_v34  ;;  %v4398_v21 = vadd.f32 %v4388_v54, %v4369_v50  ;;  %v11387_v53 = vrot.slane %v9425_v46, 7  ;;  %v11388_v27 = vrot.slane %v9248_v32, 7  ;;  %v11389_v34 = vld [vmem:[#allocation47_spill] sm:$0xff] }
 0xf22   :  { %v4085_v25 = vsel %vm4076_vm8, %v11384_v44, %v11383_v52  ;;  %v4119_v18 = vsel %vm4110_vm9, %v11386_v17, %v11385_v29  ;;  %v4407_v47 = vmul.f32 %v11389_v34, %v9055_v2  ;;  %v9497_v52 = vmul.f32 %v11390_v24, %v9457_v62  ;;  %v11392_v44 = vld [vmem:[#allocation36_spill] sm:$0xff] }
 0xf23   :  { %v9491_v38 = vsel %vm4142_vm10, %v11388_v27, %v11387_v53  ;;  %v9501_v61 = vmul.f32 %v11392_v44, %v9457_v62  ;;  %v3993_v29 = vadd.f32 %v3982_v3, %v3959_v4  ;;  %v4026_v54 = vadd.f32 %v4017_v1, %v3992_v35 }
 0xf24   :  { %11391 = vst [vmem:[#allocation33_spill] sm:$0xff] %v9497_v52  ;;  %v4898_v50 = vadd.f32 %v4886_v0, %v4869_v33  ;;  %v4961_v32 = vmul.f32 %v9376_v6, %v8738_v45  ;;  %v11394_v53 = vrot.slane %v9439_v37, 2  ;;  %v4942_v17 = vrot.slane %v4932_v49, 3  ;;  %v9537_v0 = vld [vmem:[#allocation5 + $0x38] sm:$0xff] }
 0xf25   :  { %11393 = vst [vmem:[#allocation32_spill] sm:$0xff] %v9501_v61  ;;  %v9511_v24 = vmul.f32 %v9378_v5, %v8738_v45  ;;  %v9513_v36 = vadd.f32 %v4407_v47, %v4398_v21  ;;  %v9517_v35 = vmul.f32 %v9014_v15, %v9457_v62  ;;  %v9521_v3 = vmul.f32 %v9022_v31, %v9457_v62 }
 0xf26   :  { %v4915_v27 = vsel %vm3974_vm5, %v4913_v56, %v11394_v53  ;;  %v9525_v1 = vmul.f32 %v9044_v63, %v9457_v62  ;;  %v9531_v33 = vmul.f32 %v9050_v14, %v9457_v62  ;;  %v9535_v49 = vmul.f32 %v9053_v42, %v9457_v62 }
 0xf27   :  { %11395 = vst [vmem:[#allocation37_spill] sm:$0xff] %v9511_v24  ;;  %11396 = vst [vmem:[#allocation79_spill] sm:$0xff] %v9513_v36  ;;  %v4027_v21 = vadd.f32 %v4016_v12, %v3993_v29  ;;  %v4060_v47 = vadd.f32 %v4051_v23, %v4026_v54  ;;  %v4927_v53 = vadd.f32 %v4915_v27, %v4898_v50  ;;  %v4971_v20 = vrot.slane %v4961_v32, 4 }
 0xf28   :  { %11397 = vst [vmem:[#allocation11_spill] sm:$0xff] %v9517_v35  ;;  %11398 = vst [vmem:[#allocation12_spill] sm:$0xff] %v9521_v3  ;;  %v11402_v63 = vrot.slane %v9469_v51, 3  ;;  %v10930_v4 = vrot.slane %v9511_v24, 4  ;;  %v4990_v61 = vmul.f32 %v9376_v6, %v8779_v55  ;;  %v9547_v14 = vmul.f32 %v9378_v5, %v8779_v55 }
 0xf29   :  { %11399 = vst [vmem:[#allocation9_spill] sm:$0xff] %v9525_v1  ;;  %11400 = vst [vmem:[#allocation10_spill] sm:$0xff] %v9531_v33  ;;  %v9554_v29 = vmul.f32 %v9138_v60, %v9457_v62  ;;  %v4647_v50 = vmul.f32 %v9100_v16, %v9055_v2  ;;  %v9562_v32 = vmul.f32 %v9138_v60, %v9537_v0  ;;  %v11405_v27 = vrot.slane %v9392_v26, 4 }
 0xf2a   :  { %11401 = vst [vmem:[#allocation51_spill] sm:$0xff] %v9535_v49  ;;  %v4944_v56 = vsel %vm4008_vm6, %v4942_v17, %v11402_v63  ;;  %11403 = vst [vmem:[#allocation50_spill] sm:$0xff] %v9547_v14  ;;  %v4094_v12 = vadd.f32 %v4085_v25, %v4060_v47  ;;  %v5019_v42 = vmul.f32 %v9376_v6, %v8795_v48  ;;  %v5000_v54 = vrot.slane %v4990_v61, 5 }
 0xf2b   :  { %11404 = vst [vmem:[#allocation72_spill] sm:$0xff] %v9562_v32  ;;  %v4061_v17 = vadd.f32 %v11405_v27, %v4027_v21  ;;  %v4956_v23 = vadd.f32 %v4944_v56, %v4927_v53  ;;  %v4973_v63 = vsel %vm4042_vm7, %v4971_v20, %v10930_v4  ;;  %v9574_v33 = vmul.f32 %v9378_v5, %v8795_v48 }
 0xf2c   :  { %v9579_v26 = vmul.f32 %v9195_v8, %v9457_v62  ;;  %v9583_v6 = vmul.f32 %v9195_v8, %v9537_v0  ;;  %v9587_v20 = vmul.f32 %v9191_v58, %v9457_v62  ;;  %v9591_v25 = vmul.f32 %v9191_v58, %v9537_v0 }
 0xf2d   :  { %11406 = vst [vmem:[#allocation13_spill] sm:$0xff] %v9574_v33  ;;  %v9595_v61 = vmul.f32 %v9235_v43, %v9457_v62  ;;  %v9599_v56 = vmul.f32 %v9235_v43, %v9537_v0  ;;  %v9603_v21 = vmul.f32 %v9256_v59, %v9537_v0  ;;  %v9607_v47 = vmul.f32 %v9256_v59, %v9457_v62 }
 0xf2e   :  { %11407 = vst [vmem:[#allocation47_spill] sm:$0xff] %v9583_v6  ;;  %11408 = vst [vmem:[#allocation84_spill] sm:$0xff] %v9591_v25  ;;  %v9611_v53 = vmul.f32 %v9282_v7, %v9537_v0  ;;  %v11412_v27 = vrot.slane %v9414_v13, 5  ;;  %v4985_v1 = vadd.f32 %v4973_v63, %v4956_v23  ;;  %v4128_v49 = vadd.f32 %v4119_v18, %v4094_v12 }
 0xf2f   :  { %11409 = vst [vmem:[#allocation85_spill] sm:$0xff] %v9599_v56  ;;  %11410 = vst [vmem:[#allocation86_spill] sm:$0xff] %v9603_v21  ;;  %v11413_v3 = vrot.slane %v9547_v14, 5  ;;  %v5029_v31 = vrot.slane %v5019_v42, 6  ;;  %v10944_v15 = vrot.slane %v9574_v33, 6  ;;  %v10943_v44 = vrot.slane %v9562_v32, 1 }
 0xf30   :  { %11411 = vst [vmem:[#allocation87_spill] sm:$0xff] %v9611_v53  ;;  %v4095_v4 = vadd.f32 %v11412_v27, %v4061_v17  ;;  %v10946_v36 = vrot.slane %v9579_v26, 2  ;;  %v10942_v52 = vrot.slane %v9583_v6, 2  ;;  %v9624_v24 = vmul.f32 %v9282_v7, %v9457_v62  ;;  %v11452_v32 = vld [vmem:[#allocation24_spill] sm:$0xff] }
 0xf31   :  { %v5002_v35 = vsel %vm4076_vm8, %v5000_v54, %v11413_v3  ;;  %v10945_v12 = vrot.slane %v9599_v56, 4  ;;  %v10949_v23 = vrot.slane %v9611_v53, 6  ;;  %v9634_v54 = vmul.f32 %v9378_v5, %v8835_v11 }
 0xf32   :  { %v5014_v63 = vadd.f32 %v5002_v35, %v4985_v1  ;;  %v10948_v17 = vrot.slane %v9607_v47, 5  ;;  %v11415_v27 = vrot.slane %v9418_v19, 6  ;;  %v4158_v18 = vadd.f32 %v9491_v38, %v4128_v49 }
 0xf33   :  { %11414 = vst [vmem:[#allocation88_spill] sm:$0xff] %v9634_v54  ;;  %v5031_v42 = vsel %vm4110_vm9, %v5029_v31, %v10944_v15  ;;  %v9644_v3 = vadd.f32 %v4647_v50, %v9237_v57  ;;  %v11416_v35 = vrot.slane %v9554_v29, 1  ;;  %v9658_v19 = vsel %vm3974_vm5, %v10946_v36, %v10942_v52  ;;  %v11426_v15 = vld [vmem:[#allocation40_spill] sm:$0xff] }
 0xf34   :  { %v4129_v13 = vadd.f32 %v11415_v27, %v4095_v4  ;;  %11418 = vst [vmem:[#allocation90_spill] sm:$0xff] %v9658_v19  ;;  %v10950_v38 = vrot.slane %v9624_v24, 6  ;;  %v11419_v57 = vrot.slane %v9591_v25, 3  ;;  %v11420_v4 = vrot.slane %v9587_v20, 3 }
 0xf35   :  { %v9651_v1 = vsel %vm3940_vm4, %v11416_v35, %v10943_v44  ;;  %v11422_v50 = vrot.slane %v9595_v61, 4  ;;  %v11424_v35 = vrot.slane %v9603_v21, 5  ;;  %v4167_v44 = vmul.f32 %v8871_v30, %v9055_v2  ;;  %v4867_v2 = vld [vmem:[#allocation5 + $0x70] sm:$0xff] }
 0xf36   :  { %11417 = vst [vmem:[#allocation89_spill] sm:$0xff] %v9651_v1  ;;  %v9666_v49 = vsel %vm4008_vm6, %v11420_v4, %v11419_v57  ;;  %v9690_v4 = vsel %vm4110_vm9, %v10950_v38, %v10949_v23  ;;  %v11428_v21 = vrot.slane %v9425_v46, 7  ;;  %v9709_v23 = vmul.f32 %v11389_v34, %v9457_v62 }
 0xf37   :  { %11421 = vst [vmem:[#allocation91_spill] sm:$0xff] %v9666_v49  ;;  %v9673_v27 = vsel %vm4042_vm7, %v11422_v50, %v10945_v12  ;;  %v9680_v52 = vsel %vm4076_vm8, %v10948_v17, %v11424_v35  ;;  %11427 = vst [vmem:[#allocation40_spill] sm:$0xff] %v9690_v4  ;;  %v5043_v50 = vadd.f32 %v5031_v42, %v5014_v63  ;;  %v10954_v12 = vrot.slane %v9634_v54, 7  ;;  %v11429_v42 = vld [vmem:[#allocation45_spill] sm:$0xff] }
 0xf38   :  { %11423 = vst [vmem:[#allocation92_spill] sm:$0xff] %v9673_v27  ;;  %11425 = vst [vmem:[#allocation93_spill] sm:$0xff] %v9680_v52  ;;  %v9695_v35 = vadd.f32 %v11428_v21, %v4129_v13  ;;  %v9697_v17 = vadd.f32 %v4167_v44, %v4158_v18  ;;  %v9713_v46 = vmul.f32 %v9378_v5, %v8875_v9 }
 0xf39   :  { %11430 = vst [vmem:[#allocation45_spill] sm:$0xff] %v9709_v23  ;;  %v9717_v44 = vmul.f32 %v9378_v5, %v8883_v10  ;;  %v9721_v13 = vmul.f32 %v9378_v5, %v8902_v39  ;;  %v9729_v18 = vmul.f32 %v9378_v5, %v8942_v40  ;;  %v5068_v53 = vadd.f32 %v10954_v12, %v5043_v50  ;;  %v11444_v50 = vld [vmem:[#allocation18_spill] sm:$0xff]  ;;  %v11473_v23 = vld [vmem:[#allocation80_spill] sm:$0xff] }
 0xf3a   :  { %11431 = vst [vmem:[#allocation94_spill] sm:$0xff] %v9713_v46  ;;  %v9740_v4 = vmul.f32 %v4867_v2, %v9138_v60  ;;  %v9743_v56 = vmul.f32 %v4867_v2, %v9195_v8  ;;  %v9747_v25 = vmul.f32 %v9100_v16, %v9457_v62  ;;  %v9762_v12 = vmul.f32 %v9100_v16, %v9537_v0 }
 0xf3b   :  { %11432 = vst [vmem:[#allocation95_spill] sm:$0xff] %v9717_v44  ;;  %11433 = vst [vmem:[#allocation96_spill] sm:$0xff] %v9721_v13  ;;  %v9782_v1 = vmul.f32 %v4867_v2, %v9282_v7  ;;  %v11474_v44 = vrot.slane %v11473_v23, 2  ;;  %v11482_v23 = vld [vmem:[#allocation55_spill] sm:$0xff] }
 0xf3c   :  { %11435 = vst [vmem:[#allocation98_spill] sm:$0xff] %v9729_v18  ;;  %11439 = vst [vmem:[#allocation100_spill] sm:$0xff] %v9743_v56 }
 0xf3d   :  { %11440 = vst [vmem:[#allocation101_spill] sm:$0xff] %v9747_v25  ;;  %11445 = vst [vmem:[#allocation18_spill] sm:$0xff] %v9762_v12 }
 0xf3e   :  { %11449 = vst [vmem:[#allocation106_spill] sm:$0xff] %v9782_v1 }
 0xf46   :  { %v3858_v31 = vpop.permute.xlu1 %3857 }
 0xf47   :  { %v3877_v57 = vmul.f32 %v3858_v31, %v11426_v15  ;;  %v9701_v15 = vmul.f32 %v9378_v5, %v11371_v22  ;;  %v5073_v31 = vmul.f32 %v9378_v5, %v8871_v30 }
 0xf48   :  { %v3860_v36 = vpop.permute.xlu0 %3859 }
 0xf49   :  { %3901 = vst.msk [vmem:[#allocation5 + $0x50] sm:$0xff] %vm410_vm1, %v3877_v57  ;;  %v3878_v63 = vmul.f32 %v3860_v36, %v11429_v42  ;;  %v9725_v36 = vmul.f32 %v9378_v5, %v8917_v41  ;;  %v9733_v57 = vmul.f32 %v9378_v5, %v8960_v28  ;;  %v11437_v42 = vld [vmem:[#allocation25_spill] sm:$0xff]  ;;  %v9750_v5 = vmul.f32 %v4867_v2, %v9191_v58 }
 0xf4a   :  { %v3862_v21 = vpop.permute.xlu1 %3861  ;;  %11438 = vst [vmem:[#allocation25_spill] sm:$0xff] %v9740_v4 }
 0xf4b   :  { %11434 = vst [vmem:[#allocation97_spill] sm:$0xff] %v9725_v36  ;;  %11436 = vst [vmem:[#allocation99_spill] sm:$0xff] %v9733_v57  ;;  %v3879_v38 = vmul.f32 %v3862_v21, %v11437_v42  ;;  %v9756_v21 = vmul.f32 %v4867_v2, %v9256_v59  ;;  %v11455_v57 = vld [vmem:[#allocation34_spill] sm:$0xff] }
 0xf4c   :  { %3902 = vst.msk [vmem:[#allocation5 + $0x58] sm:$0xff] %vm410_vm1, %v3878_v63  ;;  %v3856_v52 = vpop.permute.xlu0 %3855  ;;  %11441 = vst [vmem:[#allocation102_spill] sm:$0xff] %v9750_v5  ;;  %v9753_v63 = vmul.f32 %v4867_v2, %v9235_v43  ;;  %v11456_v18 = vrot.slane %v11455_v57, 1 }
 0xf4d   :  { %11443 = vst [vmem:[#allocation104_spill] sm:$0xff] %v9756_v21  ;;  %3903 = vst.msk [vmem:[#allocation5 + $0x60] sm:$0xff] %vm410_vm1, %v3879_v38  ;;  %v3876_v42 = vmul.f32 %v3856_v52, %v11444_v50  ;;  %v11446_v52 = vld [vmem:[#allocation41_spill] sm:$0xff]  ;;  %v9772_v50 = vadd.f32 %v5073_v31, %v5068_v53  ;;  %v11450_v53 = vld [vmem:[#allocation56_spill] sm:$0xff] }
 0xf4e   :  { %11442 = vst [vmem:[#allocation103_spill] sm:$0xff] %v9753_v63  ;;  %v3864_v6 = vpop.permute.xlu1 %3863  ;;  %v11470_v63 = vld [vmem:[#allocation14_spill] sm:$0xff] }
 0xf4f   :  { %3900 = vst.msk [vmem:[#allocation5 + $0x28] sm:$0xff] %vm410_vm1, %v3876_v42  ;;  %v3880_v38 = vmul.f32 %v3864_v6, %v11446_v52  ;;  %11447 = vst [vmem:[#allocation41_spill] sm:$0xff] %v9772_v50  ;;  %v11451_v42 = vld [vmem:[#allocation19_spill] sm:$0xff] }
 0xf50   :  { %v9776_v27 = vld [vmem:[#allocation5 + $0x50] sm:$0xff] }
 0xf51   :  { %11448 = vst [vmem:[#allocation105_spill] sm:$0xff] %v9776_v27  ;;  %3904 = vst.msk [vmem:[#allocation5 + $0x68] sm:$0xff] %vm410_vm1, %v3880_v38  ;;  %v9787_v6 = vmul.f32 %v9776_v27, %v11371_v22  ;;  %v9791_v31 = vmul.f32 %v9776_v27, %v11450_v53  ;;  %v9795_v52 = vmul.f32 %v9776_v27, %v11451_v42 }
 0xf52   :  { %v9799_v19 = vmul.f32 %v9776_v27, %v11452_v32  ;;  %v9805_v38 = vmul.f32 %v9776_v27, %v8738_v45  ;;  %v9809_v49 = vmul.f32 %v9776_v27, %v8779_v55  ;;  %v9813_v62 = vmul.f32 %v9776_v27, %v8795_v48  ;;  %v11512_v48 = vld [vmem:[#allocation11_spill] sm:$0xff] }
 0xf53   :  { %v9801_v2 = vld [vmem:[#allocation5 + $0x58] sm:$0xff]  ;;  %v9817_v0 = vmul.f32 %v9776_v27, %v8835_v11  ;;  %v10976_v1 = vrot.slane %v9791_v31, 1  ;;  %v11457_v36 = vrot.slane %v9795_v52, 2  ;;  %v11483_v27 = vrot.slane %v11482_v23, 5 }
 0xf54   :  { %11453 = vst [vmem:[#allocation107_spill] sm:$0xff] %v9813_v62  ;;  %v9821_v22 = vmul.f32 %v9801_v2, %v11450_v53  ;;  %v9826_v21 = vmul.f32 %v9801_v2, %v11451_v42  ;;  %v9831_v5 = vmul.f32 %v9801_v2, %v11452_v32  ;;  %v9836_v4 = vmul.f32 %v9801_v2, %v8738_v45  ;;  %v11505_v62 = vld [vmem:[#allocation16_spill] sm:$0xff] }
 0xf55   :  { %11454 = vst [vmem:[#allocation108_spill] sm:$0xff] %v9817_v0  ;;  %v4888_v42 = vsel %vm3940_vm4, %v11456_v18, %v10976_v1  ;;  %v11458_v32 = vrot.slane %v9439_v37, 2  ;;  %v11459_v57 = vrot.slane %v9799_v19, 3  ;;  %v11460_v18 = vrot.slane %v9469_v51, 3 }
 0xf56   :  { %v9853_v12 = vld [vmem:[#allocation5 + $0x28] sm:$0xff]  ;;  %v9856_v53 = vadd.f32 %v4888_v42, %v9701_v15  ;;  %v11461_v37 = vrot.slane %v9805_v38, 4 }
 0xf57   :  { %v9850_v56 = vsel %vm3974_vm5, %v11458_v32, %v11457_v36  ;;  %v9863_v1 = vsel %vm4008_vm6, %v11460_v18, %v11459_v57  ;;  %v11462_v32 = vld [vmem:[#allocation37_spill] sm:$0xff]  ;;  %v9875_v15 = vmul.f32 %v8875_v9, %v9853_v12  ;;  %v9879_v42 = vmul.f32 %v8883_v10, %v9853_v12 }
 0xf58   :  { %v11463_v36 = vrot.slane %v11462_v32, 4  ;;  %v9883_v51 = vmul.f32 %v8902_v39, %v9853_v12  ;;  %v9887_v57 = vmul.f32 %v8917_v41, %v9853_v12  ;;  %v9891_v18 = vmul.f32 %v8942_v40, %v9853_v12  ;;  %v11468_v32 = vld [vmem:[#allocation44_spill] sm:$0xff] }
 0xf59   :  { %v4422_v25 = vmul.f32 %v11470_v63, %v9853_v12  ;;  %v10993_v13 = vrot.slane %v9875_v15, 1  ;;  %v10996_v41 = vrot.slane %v9879_v42, 2 }
 0xf5a   :  { %v9871_v45 = vsel %vm4042_vm7, %v11463_v36, %v11461_v37  ;;  %11464 = vst [vmem:[#allocation34_spill] sm:$0xff] %v9883_v51  ;;  %11465 = vst [vmem:[#allocation37_spill] sm:$0xff] %v9887_v57  ;;  %v9895_v37 = vmul.f32 %v8960_v28, %v9853_v12  ;;  %v9899_v36 = vmul.f32 %v11468_v32, %v9853_v12  ;;  %v11471_v32 = vld [vmem:[#allocation76_spill] sm:$0xff]  ;;  %v11475_v39 = vrot.slane %v9883_v51, 3  ;;  %v11476_v28 = vld [vmem:[#allocation81_spill] sm:$0xff] }
 0xf5b   :  { %11466 = vst [vmem:[#allocation109_spill] sm:$0xff] %v9891_v18  ;;  %v4434_v10 = vrot.slane %v4422_v25, 1  ;;  %v11472_v46 = vrot.slane %v11471_v32, 1  ;;  %v9922_v40 = vsel %vm3974_vm5, %v11474_v44, %v10996_v41  ;;  %v11477_v9 = vrot.slane %v11476_v28, 3  ;;  %v11479_v32 = vld [vmem:[#allocation62_spill] sm:$0xff]  ;;  %v11486_v28 = vld [vmem:[#allocation15_spill] sm:$0xff] }
 0xf5c   :  { %11467 = vst [vmem:[#allocation110_spill] sm:$0xff] %v9895_v37  ;;  %11469 = vst [vmem:[#allocation111_spill] sm:$0xff] %v9899_v36  ;;  %v11478_v50 = vrot.slane %v9887_v57, 4  ;;  %v11480_v54 = vrot.slane %v11479_v32, 4  ;;  %v11485_v41 = vrot.slane %v9895_v37, 6  ;;  %v11487_v0 = vrot.slane %v11486_v28, 6 }
 0xf5d   :  { %v9915_v63 = vsel %vm3940_vm4, %v11472_v46, %v10993_v13  ;;  %v9929_v25 = vsel %vm4008_vm6, %v11477_v9, %v11475_v39  ;;  %v11481_v13 = vrot.slane %v9891_v18, 5  ;;  %v11489_v39 = vrot.slane %v9899_v36, 7  ;;  %v11490_v32 = vld [vmem:[#allocation31_spill] sm:$0xff]  ;;  %v11500_v36 = vld [vmem:[#allocation74_spill] sm:$0xff] }
 0xf5e   :  { %v9936_v46 = vsel %vm4042_vm7, %v11480_v54, %v11478_v50  ;;  %v9950_v9 = vsel %vm4110_vm9, %v11487_v0, %v11485_v41  ;;  %v11491_v11 = vrot.slane %v11490_v32, 7  ;;  %v11493_v50 = vld [vmem:[#allocation39_spill] sm:$0xff]  ;;  %v11499_v41 = vld [vmem:[#allocation36_spill] sm:$0xff]  ;;  %v4488_v32 = vmul.f32 %v11500_v36, %v9853_v12 }
 0xf5f   :  { %v9943_v44 = vsel %vm4076_vm8, %v11483_v27, %v11481_v13  ;;  %11488 = vst [vmem:[#allocation80_spill] sm:$0xff] %v9950_v9  ;;  %v11494_v18 = vrot.slane %v11493_v50, 1  ;;  %v11495_v27 = vld [vmem:[#allocation33_spill] sm:$0xff]  ;;  %v11498_v28 = vld [vmem:[#allocation79_spill] sm:$0xff]  ;;  %v4455_v0 = vmul.f32 %v11499_v41, %v9853_v12  ;;  %v11502_v50 = vld [vmem:[#allocation28_spill] sm:$0xff]  ;;  %v4662_v36 = vmul.f32 %v9138_v60, %v9853_v12 }
 0xf60   :  { %11484 = vst [vmem:[#allocation76_spill] sm:$0xff] %v9943_v44  ;;  %v9957_v54 = vsel %vm4142_vm10, %v11491_v11, %v11489_v39  ;;  %v11496_v13 = vrot.slane %v11495_v27, 1  ;;  %v11501_v11 = vld [vmem:[#allocation35_spill] sm:$0xff]  ;;  %v11513_v51 = vrot.slane %v11512_v48, 3 }
 0xf61   :  { %11492 = vst [vmem:[#allocation81_spill] sm:$0xff] %v9957_v54  ;;  %v4435_v23 = vsel %vm3940_vm4, %v11494_v18, %v4434_v10  ;;  %v4521_v39 = vmul.f32 %v11501_v11, %v9853_v12  ;;  %v4554_v54 = vmul.f32 %v11502_v50, %v9853_v12  ;;  %v11503_v18 = vld [vmem:[#allocation29_spill] sm:$0xff]  ;;  %v11506_v50 = vrot.slane %v11505_v62, 2 }
 0xf62   :  { %v9965_v37 = vsel %vm3940_vm4, %v4434_v10, %v11496_v13  ;;  %v4445_v33 = vadd.f32 %v4435_v23, %v11498_v28  ;;  %v4587_v27 = vmul.f32 %v11503_v18, %v9853_v12  ;;  %v11504_v10 = vld [vmem:[#allocation52_spill] sm:$0xff]  ;;  %v4500_v23 = vrot.slane %v4488_v32, 3 }
 0xf63   :  { %11497 = vst [vmem:[#allocation62_spill] sm:$0xff] %v9965_v37  ;;  %v4619_v13 = vmul.f32 %v11504_v10, %v9853_v12  ;;  %v4467_v37 = vrot.slane %v4455_v0, 2  ;;  %v4648_v28 = vmul.f32 %v9100_v16, %v9853_v12  ;;  %v4533_v41 = vrot.slane %v4521_v39, 4  ;;  %v11507_v18 = vld [vmem:[#allocation32_spill] sm:$0xff]  ;;  %v11510_v0 = vld [vmem:[#allocation30_spill] sm:$0xff] }
 0xf64   :  { %v4566_v9 = vrot.slane %v4554_v54, 5  ;;  %v4599_v11 = vrot.slane %v4587_v27, 6  ;;  %v11508_v44 = vrot.slane %v11507_v18, 2  ;;  %v11511_v32 = vrot.slane %v11510_v0, 3  ;;  %v11514_v27 = vld [vmem:[#allocation23_spill] sm:$0xff] }
 0xf65   :  { %v4628_v57 = vrot.slane %v4619_v13, 7  ;;  %v4468_v14 = vsel %vm3974_vm5, %v11506_v50, %v4467_v37  ;;  %v9998_v39 = vsel %vm4008_vm6, %v4500_v23, %v11513_v51  ;;  %v11515_v13 = vrot.slane %v11514_v27, 4  ;;  %v11516_v50 = vld [vmem:[#allocation12_spill] sm:$0xff]  ;;  %v11523_v51 = vld [vmem:[#allocation53_spill] sm:$0xff] }
 0xf66   :  { %v9990_v10 = vsel %vm3974_vm5, %v4467_v37, %v11508_v44  ;;  %v4501_v16 = vsel %vm4008_vm6, %v11511_v32, %v4500_v23  ;;  %v4478_v54 = vadd.f32 %v4468_v14, %v4445_v33  ;;  %v11517_v60 = vrot.slane %v11516_v50, 4  ;;  %v11519_v37 = vld [vmem:[#allocation20_spill] sm:$0xff]  ;;  %v11521_v32 = vld [vmem:[#allocation9_spill] sm:$0xff]  ;;  %v11525_v23 = vld [vmem:[#allocation10_spill] sm:$0xff] }
 0xf67   :  { %11509 = vst [vmem:[#allocation55_spill] sm:$0xff] %v9990_v10  ;;  %v4534_v62 = vsel %vm4042_vm7, %v11515_v13, %v4533_v41  ;;  %v11520_v44 = vrot.slane %v11519_v37, 5  ;;  %v11522_v10 = vrot.slane %v11521_v32, 5  ;;  %v11524_v14 = vrot.slane %v11523_v51, 6 }
 0xf68   :  { %v10006_v18 = vsel %vm4042_vm7, %v4533_v41, %v11517_v60  ;;  %v11526_v27 = vrot.slane %v11525_v23, 6  ;;  %v11528_v60 = vld [vmem:[#allocation77_spill] sm:$0xff]  ;;  %v4511_v50 = vadd.f32 %v4501_v16, %v4478_v54  ;;  %v4728_v51 = vmul.f32 %v9191_v58, %v9853_v12 }
 0xf69   :  { %11518 = vst [vmem:[#allocation15_spill] sm:$0xff] %v10006_v18  ;;  %v4567_v0 = vsel %vm4076_vm8, %v11520_v44, %v4566_v9  ;;  %v10014_v48 = vsel %vm4076_vm8, %v4566_v9, %v11522_v10  ;;  %v4600_v33 = vsel %vm4110_vm9, %v11524_v14, %v4599_v11  ;;  %v11529_v41 = vrot.slane %v11528_v60, 7  ;;  %v11530_v44 = vld [vmem:[#allocation51_spill] sm:$0xff] }
 0xf6a   :  { %v10022_v13 = vsel %vm4110_vm9, %v4599_v11, %v11526_v27  ;;  %v11531_v18 = vrot.slane %v11530_v44, 7  ;;  %v4673_v9 = vrot.slane %v4662_v36, 1  ;;  %v4695_v10 = vmul.f32 %v9195_v8, %v9853_v12  ;;  %v11533_v27 = vld [vmem:[#allocation58_spill] sm:$0xff] }
 0xf6b   :  { %11527 = vst [vmem:[#allocation31_spill] sm:$0xff] %v10022_v13  ;;  %v4629_v37 = vsel %vm4142_vm10, %v11529_v41, %v4628_v57  ;;  %v4761_v11 = vmul.f32 %v9235_v43, %v9853_v12  ;;  %v4794_v14 = vmul.f32 %v9256_v59, %v9853_v12  ;;  %v4827_v16 = vmul.f32 %v9282_v7, %v9853_v12  ;;  %v11536_v59 = vld [vmem:[#allocation78_spill] sm:$0xff] }
 0xf6c   :  { %v10030_v32 = vsel %vm4142_vm10, %v4628_v57, %v11531_v18  ;;  %v4544_v54 = vadd.f32 %v4534_v62, %v4511_v50  ;;  %v11534_v57 = vrot.slane %v11533_v27, 1  ;;  %v11535_v18 = vrot.slane %v9554_v29, 1  ;;  %v11539_v29 = vld [vmem:[#allocation59_spill] sm:$0xff] }
 0xf6d   :  { %11532 = vst [vmem:[#allocation39_spill] sm:$0xff] %v10030_v32  ;;  %v4706_v41 = vrot.slane %v4695_v10, 2  ;;  %v4739_v8 = vrot.slane %v4728_v51, 3  ;;  %v4772_v43 = vrot.slane %v4761_v11, 4  ;;  %v4805_v44 = vrot.slane %v4794_v14, 5  ;;  %v11542_v51 = vld [vmem:[#allocation83_spill] sm:$0xff] }
 0xf6e   :  { %v4674_v36 = vsel %vm3940_vm4, %v11534_v57, %v4673_v9  ;;  %v4676_v60 = vsel %vm3940_vm4, %v4673_v9, %v11535_v18  ;;  %v4577_v23 = vadd.f32 %v4567_v0, %v4544_v54  ;;  %v11537_v32 = vrot.slane %v11536_v59, 2  ;;  %v11545_v14 = vld [vmem:[#allocation75_spill] sm:$0xff] }
 0xf6f   :  { %v4685_v58 = vadd.f32 %v4674_v36, %v9644_v3  ;;  %v11538_v62 = vrot.slane %v9579_v26, 2  ;;  %v4838_v27 = vrot.slane %v4827_v16, 6  ;;  %v11540_v13 = vrot.slane %v11539_v29, 3  ;;  %v11548_v54 = vld [vmem:[#allocation63_spill] sm:$0xff] }
 0xf70   :  { %v4707_v7 = vsel %vm3974_vm5, %v11537_v32, %v4706_v41  ;;  %v11541_v3 = vrot.slane %v9587_v20, 3  ;;  %v11543_v0 = vrot.slane %v11542_v51, 4  ;;  %v4610_v11 = vadd.f32 %v4600_v33, %v4577_v23 }
 0xf71   :  { %v4709_v50 = vsel %vm3974_vm5, %v4706_v41, %v11538_v62  ;;  %v4718_v57 = vadd.f32 %v4707_v7, %v4685_v58  ;;  %v4740_v9 = vsel %vm4008_vm6, %v11540_v13, %v4739_v8  ;;  %v11544_v32 = vrot.slane %v9595_v61, 4 }
 0xf72   :  { %v4742_v10 = vsel %vm4008_vm6, %v4739_v8, %v11541_v3  ;;  %v4773_v59 = vsel %vm4042_vm7, %v11543_v0, %v4772_v43  ;;  %v11546_v16 = vrot.slane %v11545_v14, 5  ;;  %v11547_v7 = vrot.slane %v9607_v47, 5 }
 0xf73   :  { %v4775_v26 = vsel %vm4042_vm7, %v4772_v43, %v11544_v32  ;;  %v4751_v20 = vadd.f32 %v4740_v9, %v4718_v57  ;;  %v11549_v8 = vrot.slane %v11548_v54, 6  ;;  %v11550_v18 = vrot.slane %v9624_v24, 6 }
 0xf74   :  { %v4806_v58 = vsel %vm4076_vm8, %v11546_v16, %v4805_v44  ;;  %v4808_v13 = vsel %vm4076_vm8, %v4805_v44, %v11547_v7  ;;  %v4168_v43 = vmul.f32 %v8871_v30, %v9853_v12  ;;  %v4639_v61 = vadd.f32 %v4629_v37, %v4610_v11  ;;  %v11560_v7 = vld [vmem:[#allocation34_spill] sm:$0xff] }
 0xf75   :  { %v4839_v36 = vsel %vm4110_vm9, %v11549_v8, %v4838_v27  ;;  %v4841_v33 = vsel %vm4110_vm9, %v4838_v27, %v11550_v18  ;;  %v4205_v23 = vadd.f32 %v9915_v63, %v9697_v17  ;;  %v4408_v47 = vmul.f32 %v11389_v34, %v9853_v12 }
 0xf76   :  { %v11551_v44 = vrot.slane %v9821_v22, 1  ;;  %v11552_v41 = vrot.slane %v9791_v31, 1  ;;  %v4784_v57 = vadd.f32 %v4773_v59, %v4751_v20  ;;  %v4173_v24 = vadd.f32 %v4168_v43, %v9695_v35 }
 0xf77   :  { %v11553_v29 = vrot.slane %v9826_v21, 2  ;;  %v11554_v37 = vrot.slane %v9795_v52, 2  ;;  %v4653_v63 = vadd.f32 %v4648_v28, %v4639_v61  ;;  %v4238_v12 = vadd.f32 %v9922_v40, %v4205_v23 }
 0xf78   :  { %v4890_v62 = vsel %vm3940_vm4, %v11552_v41, %v11551_v44  ;;  %v4928_v9 = vadd.f32 %v9850_v56, %v9856_v53  ;;  %v11555_v31 = vrot.slane %v9831_v5, 3  ;;  %v11556_v3 = vrot.slane %v9799_v19, 3  ;;  %v11567_v44 = vld [vmem:[#allocation37_spill] sm:$0xff] }
 0xf79   :  { %v4900_v27 = vadd.f32 %v4890_v62, %v9787_v6  ;;  %v4919_v17 = vsel %vm3974_vm5, %v11554_v37, %v11553_v29  ;;  %v4817_v51 = vadd.f32 %v4806_v58, %v4784_v57  ;;  %v11557_v6 = vrot.slane %v9875_v15, 1 }
 0xf7a   :  { %v4948_v35 = vsel %vm4008_vm6, %v11556_v3, %v11555_v31  ;;  %v11036_v52 = vrot.slane %v9836_v4, 4  ;;  %v4686_v11 = vadd.f32 %v4676_v60, %v4653_v63  ;;  %v4271_v28 = vadd.f32 %v9929_v25, %v4238_v12  ;;  %v11570_v63 = vld [vmem:[#allocation13_spill] sm:$0xff] }
 0xf7b   :  { %v4206_v0 = vadd.f32 %v11557_v6, %v4173_v24  ;;  %v4929_v59 = vadd.f32 %v4919_v17, %v4900_v27  ;;  %v4957_v40 = vadd.f32 %v9863_v1, %v4928_v9  ;;  %v10112_v56 = vmul.f32 %v9801_v2, %v8779_v55  ;;  %v11572_v31 = vld [vmem:[#allocation109_spill] sm:$0xff] }
 0xf7c   :  { %v4850_v53 = vadd.f32 %v4839_v36, %v4817_v51  ;;  %v11558_v19 = vrot.slane %v9879_v42, 2  ;;  %v11559_v15 = vrot.slane %v9805_v38, 4  ;;  %v4719_v60 = vadd.f32 %v4709_v50, %v4686_v11  ;;  %v11562_v36 = vld [vmem:[#allocation42_spill] sm:$0xff]  ;;  %v11563_v50 = vld [vmem:[#allocation76_spill] sm:$0xff]  ;;  %v10159_v11 = vld [vmem:[%s10746_s13] ss:$0 sm:$0xff] }
 0xf7d   :  { %v4958_v14 = vadd.f32 %v4948_v35, %v4929_v59  ;;  %v4304_v25 = vadd.f32 %v9936_v46, %v4271_v28  ;;  %v4986_v1 = vadd.f32 %v9871_v45, %v4957_v40  ;;  %v5003_v58 = vrot.slane %v9809_v49, 5  ;;  %v11564_v46 = vld [vmem:[#allocation50_spill] sm:$0xff]  ;;  %v11566_v49 = vld [vmem:[#allocation107_spill] sm:$0xff]  ;;  %v11575_v28 = vld [vmem:[#allocation81_spill] sm:$0xff] }
 0xf7e   :  { %v4239_v32 = vadd.f32 %v11558_v19, %v4206_v0  ;;  %v4977_v16 = vsel %vm4042_vm7, %v11559_v15, %v11036_v52  ;;  %4856 = vst.msk [vmem:[#allocation4 + $0x7] sm:$0xff] %vm410_vm1, %v4850_v53  ;;  %v11561_v20 = vrot.slane %v11560_v7, 3  ;;  %v11033_v8 = vrot.slane %v10112_v56, 5  ;;  %v11574_v0 = vld [vmem:[#allocation43_spill] sm:$0xff]  ;;  %v11576_v19 = vld [vmem:[#allocation108_spill] sm:$0xff]  ;;  %v11577_v15 = vld [vmem:[#allocation110_spill] sm:$0xff] }
 0xf7f   :  { %v4987_v54 = vadd.f32 %v4977_v16, %v4958_v14  ;;  %v10130_v38 = vmul.f32 %v9801_v2, %v11562_v36  ;;  %v4752_v18 = vadd.f32 %v4742_v10, %v4719_v60  ;;  %v4337_v43 = vadd.f32 %v11563_v50, %v4304_v25  ;;  %v11569_v10 = vld [vmem:[#allocation80_spill] sm:$0xff]  ;;  %v10163_v14 = vld [vmem:[#allocation5 + $0x60] sm:$0xff] }
 0xf80   :  { %v4272_v42 = vadd.f32 %v11561_v20, %v4239_v32  ;;  %v11565_v61 = vrot.slane %v11564_v46, 5  ;;  %v5032_v23 = vrot.slane %v11566_v49, 6  ;;  %v11568_v41 = vrot.slane %v11567_v44, 4 }
 0xf81   :  { %v5006_v57 = vsel %vm4076_vm8, %v5003_v58, %v11033_v8  ;;  %v11030_v27 = vrot.slane %v10130_v38, 6  ;;  %v4785_v29 = vadd.f32 %v4775_v26, %v4752_v18  ;;  %v4370_v37 = vadd.f32 %v11569_v10, %v4337_v43  ;;  %v11582_v43 = vld [vmem:[#allocation49_spill] sm:$0xff] }
 0xf82   :  { %v5004_v45 = vsel %vm4076_vm8, %v11565_v61, %v5003_v58  ;;  %v4305_v62 = vadd.f32 %v11568_v41, %v4272_v42  ;;  %v5016_v17 = vadd.f32 %v5006_v57, %v4987_v54  ;;  %v11571_v12 = vrot.slane %v11570_v63, 6  ;;  %v11580_v54 = vld [vmem:[#allocation88_spill] sm:$0xff]  ;;  %v11586_v10 = vld [vmem:[#allocation45_spill] sm:$0xff] }
 0xf83   :  { %v5015_v24 = vadd.f32 %v5004_v45, %v4986_v1  ;;  %v11573_v3 = vrot.slane %v11572_v31, 5  ;;  %v5035_v51 = vsel %vm4110_vm9, %v5032_v23, %v11030_v27  ;;  %v10154_v59 = vmul.f32 %v9801_v2, %v11574_v0  ;;  %v11579_v1 = vld [vmem:[#allocation105_spill] sm:$0xff]  ;;  %v11583_v45 = vld [vmem:[#allocation111_spill] sm:$0xff] }
 0xf84   :  { %v5033_v9 = vsel %vm4110_vm9, %v11571_v12, %v5032_v23  ;;  %v4818_v26 = vadd.f32 %v4808_v13, %v4785_v29  ;;  %v4399_v40 = vadd.f32 %v11575_v28, %v4370_v37  ;;  %v5045_v53 = vadd.f32 %v5035_v51, %v5016_v17  ;;  %v11587_v12 = vld [vmem:[#allocation55_spill] sm:$0xff]  ;;  %v11588_v51 = vld [vmem:[#allocation33_spill] sm:$0xff]  ;;  %v11590_v28 = vld [vmem:[#allocation94_spill] sm:$0xff] }
 0xf85   :  { %v4338_v35 = vadd.f32 %v11573_v3, %v4305_v62  ;;  %v5044_v6 = vadd.f32 %v5033_v9, %v5015_v24  ;;  %v5057_v32 = vrot.slane %v11576_v19, 7  ;;  %v11578_v16 = vrot.slane %v11577_v15, 6  ;;  %v5680_v20 = vld [vmem:[#allocation4] sm:$0xff]  ;;  %v11592_v19 = vld [vmem:[#allocation71_spill] sm:$0xff] }
 0xf86   :  { %v11029_v25 = vrot.slane %v10154_v59, 7  ;;  %v5074_v13 = vmul.f32 %v11579_v1, %v8871_v30  ;;  %v5075_v58 = vmul.f32 %v9801_v2, %v8871_v30  ;;  %v4851_v7 = vadd.f32 %v4841_v33, %v4818_v26 }
 0xf87   :  { %v4371_v60 = vadd.f32 %v11578_v16, %v4338_v35  ;;  %v4413_v42 = vadd.f32 %v4408_v47, %v4399_v40  ;;  %v11581_v18 = vrot.slane %v11580_v54, 7  ;;  %v5084_v46 = vmul.f32 %v11579_v1, %v11582_v43  ;;  %v11585_v47 = vld [vmem:[#allocation62_spill] sm:$0xff] }
 0xf88   :  { %v10178_v61 = vadd.f32 %v10159_v11, %v5680_v20  ;;  %v11584_v49 = vrot.slane %v11583_v45, 7  ;;  %v5060_v44 = vsel %vm4142_vm10, %v5057_v32, %v11029_v25  ;;  %4857 = vst.msk [vmem:[#allocation4 + $0xf] sm:$0xff] %vm410_vm1, %v4851_v7  ;;  %v5085_v57 = vmul.f32 %v9801_v2, %v11582_v43  ;;  %v11594_v7 = vld [vmem:[#allocation32_spill] sm:$0xff] }
 0xf89   :  { %v5058_v50 = vsel %vm4142_vm10, %v11581_v18, %v5057_v32  ;;  %v4446_v41 = vadd.f32 %v11585_v47, %v4413_v42  ;;  %v5070_v62 = vadd.f32 %v5060_v44, %v5045_v53  ;;  %v10191_v24 = vmul.f32 %v10163_v14, %v11582_v43  ;;  %v11598_v47 = vld [vmem:[#allocation11_spill] sm:$0xff] }
 0xf8a   :  { %v4400_v23 = vadd.f32 %v11584_v49, %v4371_v60  ;;  %v5069_v33 = vadd.f32 %v5058_v50, %v5044_v6  ;;  %v6054_v29 = vmul.f32 -1.442695, %v10178_v61  ;;  %v5094_v63 = vrot.slane %v5084_v46, 1  ;;  %v11596_v46 = vld [vmem:[#allocation15_spill] sm:$0xff] }
 0xf8b   :  { %v4479_v9 = vadd.f32 %v11587_v12, %v4446_v41  ;;  %v5080_v31 = vadd.f32 %v5075_v58, %v5070_v62  ;;  %v5096_v3 = vrot.slane %v5085_v57, 1  ;;  %v11028_v35 = vrot.slane %v10191_v24, 1 }
 0xf8c   :  { %v4414_v37 = vadd.f32 %v11586_v10, %v4400_v23  ;;  %v5079_v17 = vadd.f32 %v5074_v13, %v5069_v33  ;;  %6699 = vpow2.f32 %v6054_v29  ;;  %v11589_v6 = vrot.slane %v11588_v51, 1  ;;  %v11593_v13 = vld [vmem:[#allocation41_spill] sm:$0xff]  ;;  %v11597_v23 = vld [vmem:[#allocation66_spill] sm:$0xff] }
 0xf8d   :  { %v11591_v40 = vrot.slane %v11590_v28, 1  ;;  %v5113_v32 = vmul.f32 %v11579_v1, %v11592_v19  ;;  %v4512_v15 = vadd.f32 %v9998_v39, %v4479_v9  ;;  %v5097_v16 = vsel %vm3940_vm4, %v5094_v63, %v5096_v3 }
 0xf8e   :  { %v4447_v26 = vadd.f32 %v11589_v6, %v4414_v37  ;;  %v5099_v60 = vsel %vm3940_vm4, %v5096_v3, %v11028_v35  ;;  %v11595_v20 = vrot.slane %v11594_v7, 2  ;;  %v5108_v54 = vadd.f32 %v5097_v16, %v5079_v17  ;;  %v11602_v3 = vld [vmem:[#allocation12_spill] sm:$0xff] }
 0xf8f   :  { %v5095_v53 = vsel %vm3940_vm4, %v11591_v40, %v5094_v63  ;;  %v5109_v18 = vadd.f32 %v5099_v60, %v5080_v31  ;;  %v5114_v50 = vmul.f32 %v9801_v2, %v11592_v19  ;;  %v4545_v45 = vadd.f32 %v11596_v46, %v4512_v15  ;;  %v5681_v33 = vld [vmem:[#allocation4 + $0x8] sm:$0xff]  ;;  %v11600_v63 = vld [vmem:[#allocation95_spill] sm:$0xff]  ;;  %v11605_v60 = vld [vmem:[#allocation9_spill] sm:$0xff] }
 0xf90   :  { %v5107_v58 = vadd.f32 %v5095_v53, %v11593_v13  ;;  %v4480_v42 = vadd.f32 %v11595_v20, %v4447_v26  ;;  %v10217_v39 = vmul.f32 %v10163_v14, %v11592_v19  ;;  %v5123_v49 = vrot.slane %v5113_v32, 2  ;;  %v11604_v32 = vld [vmem:[#allocation31_spill] sm:$0xff] }
 0xf91   :  { %v5142_v44 = vmul.f32 %v11579_v1, %v11597_v23  ;;  %v11599_v41 = vrot.slane %v11598_v47, 3  ;;  %v5125_v57 = vrot.slane %v5114_v50, 2  ;;  %v5143_v29 = vmul.f32 %v9801_v2, %v11597_v23 }
 0xf92   :  { %v10227_v10 = vmul.f32 %v10163_v14, %v11597_v23  ;;  %v10230_v37 = vadd.f32 %v10159_v11, %v5681_v33  ;;  %v4578_v17 = vadd.f32 %v10014_v48, %v4545_v45  ;;  %v11601_v12 = vrot.slane %v11600_v63, 2 }
 0xf93   :  { %v4513_v62 = vadd.f32 %v11599_v41, %v4480_v42  ;;  %v11027_v31 = vrot.slane %v10217_v39, 2  ;;  %v11603_v51 = vrot.slane %v11602_v3, 4  ;;  %v5126_v26 = vsel %vm3974_vm5, %v5123_v49, %v5125_v57  ;;  %v11607_v42 = vld [vmem:[#allocation96_spill] sm:$0xff]  ;;  %v11610_v41 = vld [vmem:[#allocation10_spill] sm:$0xff] }
 0xf94   :  { %v5124_v9 = vsel %vm3974_vm5, %v11601_v12, %v5123_v49  ;;  %v5152_v40 = vrot.slane %v5142_v44, 3  ;;  %v6055_v53 = vmul.f32 -1.442695, %v10230_v37  ;;  %v4611_v15 = vadd.f32 %v11604_v32, %v4578_v17  ;;  %v11612_v17 = vld [vmem:[#allocation73_spill] sm:$0xff] }
 0xf95   :  { %v4546_v6 = vadd.f32 %v11603_v51, %v4513_v62  ;;  %v5136_v28 = vadd.f32 %v5124_v9, %v5107_v58  ;;  %v5128_v48 = vsel %vm3974_vm5, %v5125_v57, %v11027_v31  ;;  %v5137_v16 = vadd.f32 %v5126_v26, %v5108_v54  ;;  %v11609_v58 = vld [vmem:[#allocation39_spill] sm:$0xff] }
 0xf96   :  { %v11606_v13 = vrot.slane %v11605_v60, 5  ;;  %v5138_v20 = vadd.f32 %v5128_v48, %v5109_v18  ;;  %v11608_v50 = vrot.slane %v11607_v42, 3  ;;  %v5154_v45 = vrot.slane %v5143_v29, 3  ;;  %v6700_v47 = vpop.eup %6699  ;;  %v11613_v29 = vld [vmem:[#allocation101_spill] sm:$0xff]  ;;  %v11618_v42 = vld [vmem:[#allocation18_spill] sm:$0xff] }
 0xf97   :  { %6701 = vpow2.f32 %v6055_v53  ;;  %v4640_v49 = vadd.f32 %v11609_v58, %v4611_v15  ;;  %v11026_v44 = vrot.slane %v10227_v10, 3  ;;  %v11611_v62 = vrot.slane %v11610_v41, 6  ;;  %v11616_v15 = vld [vmem:[#allocation89_spill] sm:$0xff] }
 0xf98   :  { %v4579_v7 = vadd.f32 %v11606_v13, %v4546_v6  ;;  %v5153_v46 = vsel %vm4008_vm6, %v11608_v50, %v5152_v40  ;;  %v5155_v54 = vsel %vm4008_vm6, %v5152_v40, %v5154_v45  ;;  %v5171_v18 = vmul.f32 %v11579_v1, %v11612_v17  ;;  %v11614_v6 = vld [vmem:[#allocation51_spill] sm:$0xff]  ;;  %v11617_v13 = vld [vmem:[#allocation46_spill] sm:$0xff] }
 0xf99   :  { %v5165_v33 = vadd.f32 %v5153_v46, %v5136_v28  ;;  %v5172_v63 = vmul.f32 %v9801_v2, %v11612_v17  ;;  %v5727_v12 = vadd.f32 1.0, %v6700_v47  ;;  %v4654_v9 = vadd.f32 %v11613_v29, %v4640_v49  ;;  %v11619_v46 = vld [vmem:[#allocation97_spill] sm:$0xff]  ;;  %v11621_v49 = vld [vmem:[#allocation90_spill] sm:$0xff] }
 0xf9a   :  { %v4612_v57 = vadd.f32 %v11611_v62, %v4579_v7  ;;  %v5157_v3 = vsel %vm4008_vm6, %v5154_v45, %v11026_v44  ;;  %v5166_v51 = vadd.f32 %v5155_v54, %v5137_v16  ;;  %v11615_v26 = vrot.slane %v11614_v6, 7  ;;  %v11622_v54 = vld [vmem:[#allocation72_spill] sm:$0xff] }
 0xf9b   :  { %v5167_v53 = vadd.f32 %v5157_v3, %v5138_v20  ;;  %v10267_v40 = vmul.f32 %v10163_v14, %v11612_v17  ;;  %v5181_v32 = vrot.slane %v5171_v18, 4  ;;  %6703 = vrcp.f32 %v5727_v12  ;;  %v11624_v3 = vld [vmem:[#allocation91_spill] sm:$0xff] }
 0xf9c   :  { %v4641_v28 = vadd.f32 %v11615_v26, %v4612_v57  ;;  %v4687_v48 = vadd.f32 %v11616_v15, %v4654_v9  ;;  %v5183_v60 = vrot.slane %v5172_v63, 4  ;;  %v5200_v7 = vmul.f32 %v11579_v1, %v11617_v13 }
 0xf9d   :  { %v11620_v16 = vrot.slane %v11619_v46, 4  ;;  %v11022_v20 = vrot.slane %v10267_v40, 4  ;;  %v5201_v58 = vmul.f32 %v9801_v2, %v11617_v13  ;;  %v10283_v57 = vmul.f32 %v10163_v14, %v11617_v13 }
 0xf9e   :  { %v4655_v50 = vadd.f32 %v11618_v42, %v4641_v28  ;;  %v4720_v47 = vadd.f32 %v11621_v49, %v4687_v48  ;;  %v5184_v41 = vsel %vm4042_vm7, %v5181_v32, %v5183_v60  ;;  %v11623_v18 = vrot.slane %v11622_v54, 1  ;;  %v11627_v42 = vld [vmem:[#allocation98_spill] sm:$0xff]  ;;  %v11631_v54 = vld [vmem:[#allocation84_spill] sm:$0xff] }
 0xf9f   :  { %v5182_v45 = vsel %vm4042_vm7, %v11620_v16, %v5181_v32  ;;  %v5186_v12 = vsel %vm4042_vm7, %v5183_v60, %v11022_v20  ;;  %v5195_v29 = vadd.f32 %v5184_v41, %v5166_v51  ;;  %v5210_v9 = vrot.slane %v5200_v7, 5  ;;  %v11625_v32 = vld [vmem:[#allocation47_spill] sm:$0xff]  ;;  %v11629_v16 = vld [vmem:[#allocation48_spill] sm:$0xff] }
 0xfa0   :  { %v5194_v62 = vadd.f32 %v5182_v45, %v5165_v33  ;;  %v4688_v63 = vadd.f32 %v11623_v18, %v4655_v50  ;;  %v4753_v6 = vadd.f32 %v11624_v3, %v4720_v47  ;;  %v5196_v26 = vadd.f32 %v5186_v12, %v5167_v53  ;;  %v11630_v7 = vld [vmem:[#allocation92_spill] sm:$0xff] }
 0xfa1   :  { %v5212_v28 = vrot.slane %v5201_v58, 5  ;;  %v11024_v33 = vrot.slane %v10283_v57, 5  ;;  %v11626_v15 = vrot.slane %v11625_v32, 2  ;;  %v11628_v46 = vrot.slane %v11627_v42, 5  ;;  %v6702_v60 = vpop.eup %6701  ;;  %v11633_v32 = vld [vmem:[#allocation93_spill] sm:$0xff] }
 0xfa2   :  { %v5229_v45 = vmul.f32 %v11579_v1, %v11629_v16  ;;  %v5230_v51 = vmul.f32 %v9801_v2, %v11629_v16  ;;  %v4786_v49 = vadd.f32 %v11630_v7, %v4753_v6  ;;  %v5728_v41 = vadd.f32 1.0, %v6702_v60  ;;  %v11638_v60 = vld [vmem:[#allocation99_spill] sm:$0xff] }
 0xfa3   :  { %v4721_v48 = vadd.f32 %v11626_v15, %v4688_v63  ;;  %v5211_v50 = vsel %vm4076_vm8, %v11628_v46, %v5210_v9  ;;  %v5213_v53 = vsel %vm4076_vm8, %v5210_v9, %v5212_v28  ;;  %v5215_v58 = vsel %vm4076_vm8, %v5212_v28, %v11024_v33  ;;  %v11634_v9 = vld [vmem:[#allocation85_spill] sm:$0xff]  ;;  %v11636_v28 = vld [vmem:[#allocation44_spill] sm:$0xff] }
 0xfa4   :  { %v5223_v47 = vadd.f32 %v5211_v50, %v5194_v62  ;;  %v11632_v18 = vrot.slane %v11631_v54, 3  ;;  %v5224_v12 = vadd.f32 %v5213_v53, %v5195_v29  ;;  %v5225_v3 = vadd.f32 %v5215_v58, %v5196_v26  ;;  %v11637_v26 = vld [vmem:[#allocation40_spill] sm:$0xff] }
 0xfa5   :  { %v4819_v15 = vadd.f32 %v11633_v32, %v4786_v49  ;;  %v10311_v42 = vmul.f32 %v10163_v14, %v11629_v16  ;;  %v5239_v6 = vrot.slane %v5229_v45, 6  ;;  %v5241_v46 = vrot.slane %v5230_v51, 6  ;;  %v6704_v29 = vpop.eup %6703 }
 0xfa6   :  { %v4754_v63 = vadd.f32 %v11632_v18, %v4721_v48  ;;  %6705 = vrcp.f32 %v5728_v41  ;;  %v11635_v7 = vrot.slane %v11634_v9, 4  ;;  %v5257_v62 = vmul.f32 %v11579_v1, %v11636_v28  ;;  %v11640_v41 = vld [vmem:[#allocation86_spill] sm:$0xff] }
 0xfa7   :  { %v5258_v48 = vmul.f32 %v9801_v2, %v11636_v28  ;;  %v4852_v50 = vadd.f32 %v11637_v26, %v4819_v15  ;;  %v11639_v49 = vrot.slane %v11638_v60, 6  ;;  %v5242_v45 = vsel %vm4110_vm9, %v5239_v6, %v5241_v46  ;;  %v10336_v26 = vld [vmem:[#allocation5 + $0x68] sm:$0xff] }
 0xfa8   :  { %v4787_v20 = vadd.f32 %v11635_v7, %v4754_v63  ;;  %v11023_v51 = vrot.slane %v10311_v42, 6  ;;  %v5751_v58 = vmul.f32 %v6704_v29, %v10178_v61  ;;  %v11641_v54 = vrot.slane %v11640_v41, 5  ;;  %v11642_v61 = vld [vmem:[#allocation87_spill] sm:$0xff] }
 0xfa9   :  { %v5240_v53 = vsel %vm4110_vm9, %v11639_v49, %v5239_v6  ;;  %v5253_v32 = vadd.f32 %v5242_v45, %v5224_v12  ;;  %4858 = vst.msk [vmem:[#allocation4 + $0x17] sm:$0xff] %vm410_vm1, %v4852_v50  ;;  %v10334_v9 = vmul.f32 %v10163_v14, %v11636_v28  ;;  %v5265_v6 = vrot.slane %v5257_v62, 7 }
 0xfaa   :  { %v4820_v18 = vadd.f32 %v11641_v54, %v4787_v20  ;;  %v5252_v63 = vadd.f32 %v5240_v53, %v5223_v47  ;;  %v5244_v15 = vsel %vm4110_vm9, %v5241_v46, %v11023_v51  ;;  %v5266_v7 = vrot.slane %v5258_v48, 7  ;;  %v11644_v53 = vld [vmem:[#allocation14_spill] sm:$0xff] }
 0xfab   :  { %v11643_v29 = vrot.slane %v11642_v61, 6  ;;  %v5254_v20 = vadd.f32 %v5244_v15, %v5225_v3  ;;  %v5282_v47 = vmul.f32 %v11579_v1, %v11389_v34  ;;  %v5283_v12 = vmul.f32 %v9801_v2, %v11389_v34  ;;  %v11646_v15 = vld [vmem:[#allocation36_spill] sm:$0xff] }
 0xfac   :  { %v5267_v46 = vsel %vm4142_vm10, %v5265_v6, %v5266_v7  ;;  %v11025_v50 = vrot.slane %v10334_v9, 7  ;;  %v5277_v49 = vadd.f32 %v5265_v6, %v5252_v63  ;;  %v5284_v62 = vmul.f32 %v10163_v14, %v11389_v34 }
 0xfad   :  { %v4853_v60 = vadd.f32 %v11643_v29, %v4820_v18  ;;  %v5278_v48 = vadd.f32 %v5267_v46, %v5253_v32  ;;  %v5292_v3 = vmul.f32 %v11579_v1, %v11644_v53  ;;  %v5293_v45 = vmul.f32 %v9801_v2, %v11644_v53 }
 0xfae   :  { %v5294_v41 = vmul.f32 %v10163_v14, %v11644_v53  ;;  %v5269_v54 = vsel %vm4142_vm10, %v5266_v7, %v11025_v50  ;;  %v5287_v18 = vadd.f32 %v5282_v47, %v5277_v49  ;;  %v10360_v63 = vmul.f32 %v10336_v26, %v11644_v53 }
 0xfaf   :  { %4860 = vst.msk [vmem:[#allocation4 + $0x1f] sm:$0x1] %vm4859_vm12, %v4853_v60  ;;  %v5321_v32 = vmul.f32 %v11579_v1, %v11646_v15  ;;  %v5279_v6 = vadd.f32 %v5269_v54, %v5254_v20  ;;  %v5288_v61 = vadd.f32 %v5283_v12, %v5278_v48  ;;  %v5302_v29 = vrot.slane %v5292_v3, 1 }
 0xfb0   :  { %11645 = vst [vmem:[#allocation79_spill] sm:$0xff] %v10360_v63  ;;  %v5303_v60 = vrot.slane %v5293_v45, 1  ;;  %v5305_v46 = vrot.slane %v5294_v41, 1  ;;  %v11032_v51 = vrot.slane %v10360_v63, 1  ;;  %v5322_v33 = vmul.f32 %v9801_v2, %v11646_v15  ;;  %v6706_v47 = vpop.eup %6705  ;;  %v5682_v49 = vld [vmem:[#allocation4 + $0x10] sm:$0xff] }
 0xfb1   :  { %v5323_v7 = vmul.f32 %v10163_v14, %v11646_v15  ;;  %v5289_v50 = vadd.f32 %v5284_v62, %v5279_v6  ;;  %v10372_v20 = vmul.f32 %v10336_v26, %v11646_v15  ;;  %v5331_v12 = vrot.slane %v5321_v32, 2 }
 0xfb2   :  { %v5304_v44 = vsel %vm3940_vm4, %v5302_v29, %v5303_v60  ;;  %v5752_v48 = vmul.f32 %v6706_v47, %v10230_v37  ;;  %v10376_v3 = vadd.f32 %v10159_v11, %v5682_v49  ;;  %v5306_v45 = vsel %vm3940_vm4, %v5303_v60, %v5305_v46  ;;  %v11648_v49 = vld [vmem:[#allocation74_spill] sm:$0xff] }
 0xfb3   :  { %11647 = vst [vmem:[#allocation16_spill] sm:$0xff] %v10372_v20  ;;  %v5308_v41 = vsel %vm3940_vm4, %v5305_v46, %v11032_v51  ;;  %v5316_v54 = vadd.f32 %v5304_v44, %v5287_v18  ;;  %v5317_v62 = vadd.f32 %v5306_v45, %v5288_v61  ;;  %v5332_v29 = vrot.slane %v5322_v33, 2 }
 0xfb4   :  { %v5318_v6 = vadd.f32 %v5308_v41, %v5289_v50  ;;  %v5759_v31 = vpack.c.bf16 %v5752_v48, %v5751_v58  ;;  %v6056_v25 = vmul.f32 -1.442695, %v10376_v3  ;;  %v5334_v32 = vrot.slane %v5323_v7, 2 }
 0xfb5   :  { %v11031_v37 = vrot.slane %v10372_v20, 2  ;;  %v5333_v60 = vsel %vm3974_vm5, %v5331_v12, %v5332_v29  ;;  %v5350_v27 = vmul.f32 %v11579_v1, %v11648_v49  ;;  %v5351_v44 = vmul.f32 %v9801_v2, %v11648_v49  ;;  %v11650_v12 = vld [vmem:[#allocation35_spill] sm:$0xff] }
 0xfb6   :  { %v5683_v35 = vld [vmem:[#allocation4 + $0x18] sm:$0xff]  ;;  %6351 = vmatprep.mubr.msk.bf16.mxu1 %vm410_vm1, %v5759_v31  ;;  %6707 = vpow2.f32 %v6056_v25  ;;  %v5335_v33 = vsel %vm3974_vm5, %v5332_v29, %v5334_v32  ;;  %v5345_v50 = vadd.f32 %v5333_v60, %v5316_v54  ;;  %v5352_v46 = vmul.f32 %v10163_v14, %v11648_v49 }
 0xfb7   :  { %v10385_v47 = vadd.f32 %v10159_v11, %v5683_v35  ;;  %v5337_v58 = vsel %vm3974_vm5, %v5334_v32, %v11031_v37  ;;  %v5346_v18 = vadd.f32 %v5335_v33, %v5317_v62  ;;  %v10402_v7 = vmul.f32 %v10336_v26, %v11648_v49 }
 0xfb8   :  { %v5347_v61 = vadd.f32 %v5337_v58, %v5318_v6  ;;  %v5360_v31 = vrot.slane %v5350_v27, 3  ;;  %v5361_v25 = vrot.slane %v5351_v44, 3  ;;  %v5379_v48 = vmul.f32 %v11579_v1, %v11650_v12 }
 0xfb9   :  { %v6057_v35 = vmul.f32 -1.442695, %v10385_v47  ;;  %11649 = vst [vmem:[#allocation30_spill] sm:$0xff] %v10402_v7  ;;  %v5363_v45 = vrot.slane %v5352_v46, 3  ;;  %v5380_v41 = vmul.f32 %v9801_v2, %v11650_v12  ;;  %v5381_v54 = vmul.f32 %v10163_v14, %v11650_v12 }
 0xfba   :  { %v5362_v62 = vsel %vm4008_vm6, %v5360_v31, %v5361_v25  ;;  %v11034_v6 = vrot.slane %v10402_v7, 3  ;;  %v10414_v29 = vmul.f32 %v10336_v26, %v11650_v12  ;;  %v5389_v27 = vrot.slane %v5379_v48, 4  ;;  %v11652_v31 = vld [vmem:[#allocation28_spill] sm:$0xff] }
 0xfbb   :  { %6709 = vpow2.f32 %v6057_v35  ;;  %v5364_v32 = vsel %vm4008_vm6, %v5361_v25, %v5363_v45  ;;  %v5374_v60 = vadd.f32 %v5362_v62, %v5345_v50  ;;  %v5390_v44 = vrot.slane %v5380_v41, 4 }
 0xfbc   :  { %11651 = vst [vmem:[#allocation23_spill] sm:$0xff] %v10414_v29  ;;  %v5392_v33 = vrot.slane %v5381_v54, 4  ;;  %v5366_v58 = vsel %vm4008_vm6, %v5363_v45, %v11034_v6  ;;  %v5375_v35 = vadd.f32 %v5364_v32, %v5346_v18  ;;  %v11035_v46 = vrot.slane %v10414_v29, 4 }
 0xfbd   :  { %v5408_v37 = vmul.f32 %v11579_v1, %v11652_v31  ;;  %v5376_v51 = vadd.f32 %v5366_v58, %v5347_v61  ;;  %v5391_v8 = vsel %vm4042_vm7, %v5389_v27, %v5390_v44  ;;  %v5409_v50 = vmul.f32 %v9801_v2, %v11652_v31  ;;  %v11654_v58 = vld [vmem:[#allocation29_spill] sm:$0xff] }
 0xfbe   :  { %v5393_v48 = vsel %vm4042_vm7, %v5390_v44, %v5392_v33  ;;  %v5395_v25 = vsel %vm4042_vm7, %v5392_v33, %v11035_v46  ;;  %v5403_v41 = vadd.f32 %v5391_v8, %v5374_v60  ;;  %v5410_v18 = vmul.f32 %v10163_v14, %v11652_v31 }
 0xfbf   :  { %v5404_v45 = vadd.f32 %v5393_v48, %v5375_v35  ;;  %v5405_v54 = vadd.f32 %v5395_v25, %v5376_v51  ;;  %v10434_v61 = vmul.f32 %v10336_v26, %v11652_v31  ;;  %v5418_v62 = vrot.slane %v5408_v37, 5 }
 0xfc0   :  { %v5419_v27 = vrot.slane %v5409_v50, 5  ;;  %v6708_v32 = vpop.eup %6707  ;;  %v5421_v44 = vrot.slane %v5410_v18, 5  ;;  %v5437_v6 = vmul.f32 %v11579_v1, %v11654_v58  ;;  %v5438_v33 = vmul.f32 %v9801_v2, %v11654_v58 }
 0xfc1   :  { %11653 = vst [vmem:[#allocation20_spill] sm:$0xff] %v10434_v61  ;;  %v5439_v8 = vmul.f32 %v10163_v14, %v11654_v58  ;;  %v5729_v60 = vadd.f32 1.0, %v6708_v32  ;;  %v11042_v35 = vrot.slane %v10434_v61, 5  ;;  %v10446_v37 = vmul.f32 %v10336_v26, %v11654_v58 }
 0xfc2   :  { %v5420_v51 = vsel %vm4076_vm8, %v5418_v62, %v5419_v27  ;;  %v5422_v48 = vsel %vm4076_vm8, %v5419_v27, %v5421_v44  ;;  %v5447_v25 = vrot.slane %v5437_v6, 6  ;;  %v5448_v1 = vrot.slane %v5438_v33, 6 }
 0xfc3   :  { %11655 = vst [vmem:[#allocation53_spill] sm:$0xff] %v10446_v37  ;;  %v5432_v50 = vadd.f32 %v5420_v51, %v5403_v41  ;;  %6711 = vrcp.f32 %v5729_v60  ;;  %v5424_v46 = vsel %vm4076_vm8, %v5421_v44, %v11042_v35  ;;  %v5433_v32 = vadd.f32 %v5422_v48, %v5404_v45  ;;  %v11656_v41 = vld [vmem:[#allocation52_spill] sm:$0xff] }
 0xfc4   :  { %v5450_v52 = vrot.slane %v5439_v8, 6  ;;  %v5434_v29 = vadd.f32 %v5424_v46, %v5405_v54  ;;  %v5449_v7 = vsel %vm4110_vm9, %v5447_v25, %v5448_v1  ;;  %v11041_v20 = vrot.slane %v10446_v37, 6 }
 0xfc5   :  { %v6710_v18 = vpop.eup %6709  ;;  %v5461_v27 = vadd.f32 %v5449_v7, %v5432_v50  ;;  %v5466_v6 = vmul.f32 %v9801_v2, %v11656_v41  ;;  %v5467_v33 = vmul.f32 %v10163_v14, %v11656_v41  ;;  %v10464_v46 = vmul.f32 %v10336_v26, %v11656_v41  ;;  %v11658_v7 = vld [vmem:[#allocation38_spill] sm:$0xff] }
 0xfc6   :  { %v5730_v62 = vadd.f32 1.0, %v6710_v18  ;;  %v5451_v58 = vsel %vm4110_vm9, %v5448_v1, %v5450_v52  ;;  %v5453_v45 = vsel %vm4110_vm9, %v5450_v52, %v11041_v20  ;;  %v5491_v51 = vmul.f32 %v9801_v2, %v11658_v7  ;;  %v11659_v52 = vld [vmem:[#allocation17_spill] sm:$0xff] }
 0xfc7   :  { %v5462_v44 = vadd.f32 %v5451_v58, %v5433_v32  ;;  %11657 = vst [vmem:[#allocation77_spill] sm:$0xff] %v10464_v46  ;;  %v5463_v54 = vadd.f32 %v5453_v45, %v5434_v29  ;;  %v5474_v8 = vrot.slane %v5466_v6, 7  ;;  %v5475_v60 = vrot.slane %v5467_v33, 7  ;;  %v11660_v45 = vld [vmem:[#allocation21_spill] sm:$0xff] }
 0xfc8   :  { %6713 = vrcp.f32 %v5730_v62  ;;  %v11050_v48 = vrot.slane %v10464_v46, 7  ;;  %v5492_v50 = vmul.f32 %v10163_v14, %v11658_v7  ;;  %v5493_v25 = vmul.f32 %v10336_v26, %v11658_v7 }
 0xfc9   :  { %v5501_v58 = vmul.f32 %v9801_v2, %v11659_v52  ;;  %v5476_v1 = vsel %vm4142_vm10, %v5474_v8, %v5475_v60  ;;  %v5486_v18 = vadd.f32 %v5474_v8, %v5461_v27  ;;  %v5502_v29 = vmul.f32 %v10163_v14, %v11659_v52 }
 0xfca   :  { %v5503_v32 = vmul.f32 %v10336_v26, %v11659_v52  ;;  %v5478_v62 = vsel %vm4142_vm10, %v5475_v60, %v11050_v48  ;;  %v5487_v6 = vadd.f32 %v5476_v1, %v5462_v44  ;;  %v5530_v20 = vmul.f32 %v9801_v2, %v11660_v45 }
 0xfcb   :  { %v5511_v33 = vrot.slane %v5501_v58, 1  ;;  %v5488_v35 = vadd.f32 %v5478_v62, %v5463_v54  ;;  %v5496_v37 = vadd.f32 %v5491_v51, %v5486_v18  ;;  %v5512_v7 = vrot.slane %v5502_v29, 1  ;;  %v11661_v58 = vld [vmem:[#allocation25_spill] sm:$0xff] }
 0xfcc   :  { %v5514_v61 = vrot.slane %v5503_v32, 1  ;;  %v5497_v27 = vadd.f32 %v5492_v50, %v5487_v6  ;;  %v5531_v8 = vmul.f32 %v10163_v14, %v11660_v45  ;;  %v5532_v52 = vmul.f32 %v10336_v26, %v11660_v45  ;;  %v11663_v6 = vld [vmem:[#allocation22_spill] sm:$0xff] }
 0xfcd   :  { %v5540_v41 = vrot.slane %v5530_v20, 2  ;;  %v6712_v46 = vpop.eup %6711  ;;  %v5498_v63 = vadd.f32 %v5493_v25, %v5488_v35  ;;  %v5513_v44 = vsel %vm3940_vm4, %v5511_v33, %v5512_v7  ;;  %v11662_v1 = vrot.slane %v11661_v58, 1 }
 0xfce   :  { %v5515_v60 = vsel %vm3940_vm4, %v5512_v7, %v5514_v61  ;;  %v5753_v51 = vmul.f32 %v6712_v46, %v10376_v3  ;;  %v5525_v50 = vadd.f32 %v5513_v44, %v5496_v37  ;;  %v5541_v29 = vrot.slane %v5531_v8, 2 }
 0xfcf   :  { %v5517_v54 = vsel %vm3940_vm4, %v5514_v61, %v11662_v1  ;;  %v5526_v18 = vadd.f32 %v5515_v60, %v5497_v27  ;;  %v5543_v62 = vrot.slane %v5532_v52, 2  ;;  %v5559_v20 = vmul.f32 %v9801_v2, %v11663_v6  ;;  %v11664_v61 = vld [vmem:[#allocation68_spill] sm:$0xff] }
 0xfd0   :  { %v5527_v32 = vadd.f32 %v5517_v54, %v5498_v63  ;;  %v5560_v35 = vmul.f32 %v10163_v14, %v11663_v6  ;;  %v5542_v7 = vsel %vm3974_vm5, %v5540_v41, %v5541_v29  ;;  %v5561_v33 = vmul.f32 %v10336_v26, %v11663_v6  ;;  %v11665_v52 = vld [vmem:[#allocation100_spill] sm:$0xff] }
 0xfd1   :  { %v5588_v3 = vmul.f32 %v9801_v2, %v11664_v61  ;;  %v5589_v37 = vmul.f32 %v10163_v14, %v11664_v61  ;;  %v5544_v46 = vsel %vm3974_vm5, %v5541_v29, %v5543_v62  ;;  %v11666_v27 = vrot.slane %v11665_v52, 2 }
 0xfd2   :  { %v6714_v25 = vpop.eup %6713  ;;  %v5554_v44 = vadd.f32 %v5542_v7, %v5525_v50  ;;  %v5555_v60 = vadd.f32 %v5544_v46, %v5526_v18  ;;  %v5569_v1 = vrot.slane %v5559_v20, 3  ;;  %v5570_v54 = vrot.slane %v5560_v35, 3  ;;  %v11668_v18 = vld [vmem:[#allocation102_spill] sm:$0xff]  ;;  %v11670_v46 = vld [vmem:[#allocation103_spill] sm:$0xff] }
 0xfd3   :  { %v5754_v63 = vmul.f32 %v6714_v25, %v10385_v47  ;;  %v5546_v8 = vsel %vm3974_vm5, %v5543_v62, %v11666_v27  ;;  %v5572_v58 = vrot.slane %v5561_v33, 3  ;;  %v5590_v6 = vmul.f32 %v10336_v26, %v11664_v61  ;;  %v11667_v25 = vld [vmem:[#allocation82_spill] sm:$0xff] }
 0xfd4   :  { %v5556_v41 = vadd.f32 %v5546_v8, %v5527_v32  ;;  %v5598_v45 = vrot.slane %v5588_v3, 4  ;;  %v5571_v31 = vsel %vm4008_vm6, %v5569_v1, %v5570_v54  ;;  %v5599_v47 = vrot.slane %v5589_v37, 4 }
 0xfd5   :  { %v5760_v48 = vpack.c.bf16 %v5754_v63, %v5753_v51  ;;  %v5617_v29 = vmul.f32 %v9801_v2, %v11667_v25  ;;  %v5618_v62 = vmul.f32 %v10163_v14, %v11667_v25  ;;  %v5573_v50 = vsel %vm4008_vm6, %v5570_v54, %v5572_v58 }
 0xfd6   :  { %v11669_v51 = vrot.slane %v11668_v18, 3  ;;  %v5583_v20 = vadd.f32 %v5571_v31, %v5554_v44  ;;  %v5601_v35 = vrot.slane %v5590_v6, 4  ;;  %v5584_v7 = vadd.f32 %v5573_v50, %v5555_v60  ;;  %v11672_v6 = vld [vmem:[#allocation65_spill] sm:$0xff]  ;;  %v11673_v50 = vld [vmem:[#allocation104_spill] sm:$0xff] }
 0xfd7   :  { %6352 = vmatmul.mubr.msk.bf16.vlgmr.msra.gmra.mrb[120].mxu1 %vm410_vm1, %v5760_v48  ;;  %v5600_v3 = vsel %vm4042_vm7, %v5598_v45, %v5599_v47  ;;  %v5619_v37 = vmul.f32 %v10336_v26, %v11667_v25  ;;  %v11671_v27 = vrot.slane %v11670_v46, 4  ;;  %v5627_v1 = vrot.slane %v5617_v29, 5  ;;  %v11678_v46 = vld [vmem:[#allocation27_spill] sm:$0xff] }
 0xfd8   :  { %v5575_v32 = vsel %vm4008_vm6, %v5572_v58, %v11669_v51  ;;  %v5602_v63 = vsel %vm4042_vm7, %v5599_v47, %v5601_v35  ;;  %v5612_v8 = vadd.f32 %v5600_v3, %v5583_v20  ;;  %v5628_v58 = vrot.slane %v5618_v62, 5 }
 0xfd9   :  { %v5585_v33 = vadd.f32 %v5575_v32, %v5556_v41  ;;  %v5604_v48 = vsel %vm4042_vm7, %v5601_v35, %v11671_v27  ;;  %v5613_v54 = vadd.f32 %v5602_v63, %v5584_v7  ;;  %v5630_v31 = vrot.slane %v5619_v37, 5  ;;  %v11675_v32 = vld [vmem:[#allocation106_spill] sm:$0xff]  ;;  %v11676_v63 = vld [vmem:[#allocation56_spill] sm:$0xff] }
 0xfda   :  { %v5646_v44 = vmul.f32 %v9801_v2, %v11672_v6  ;;  %v5647_v45 = vmul.f32 %v10163_v14, %v11672_v6  ;;  %v5648_v60 = vmul.f32 %v10336_v26, %v11672_v6  ;;  %v5629_v41 = vsel %vm4076_vm8, %v5627_v1, %v5628_v58 }
 0xfdb   :  { %v5614_v18 = vadd.f32 %v5604_v48, %v5585_v33  ;;  %v5631_v47 = vsel %vm4076_vm8, %v5628_v58, %v5630_v31  ;;  %v11674_v51 = vrot.slane %v11673_v50, 5  ;;  %v5661_v62 = vrot.slane %v11675_v32, 6  ;;  %v11677_v48 = vld [vmem:[#allocation19_spill] sm:$0xff] }
 0xfdc   :  { %v5641_v20 = vadd.f32 %v5629_v41, %v5612_v8  ;;  %v5642_v35 = vadd.f32 %v5631_v47, %v5613_v54  ;;  %v5656_v33 = vrot.slane %v5646_v44, 6  ;;  %v5657_v3 = vrot.slane %v5647_v45, 6  ;;  %v11680_v54 = vld [vmem:[#allocation26_spill] sm:$0xff] }
 0xfdd   :  { %v5633_v29 = vsel %vm4076_vm8, %v5630_v31, %v11674_v51  ;;  %v5659_v37 = vrot.slane %v5648_v60, 6  ;;  %v4878_v27 = vmul.f32 %v10163_v14, %v11676_v63  ;;  %v4907_v1 = vmul.f32 %v10163_v14, %v11677_v48  ;;  %v11679_v51 = vld [vmem:[#allocation24_spill] sm:$0xff] }
 0xfde   :  { %v5643_v7 = vadd.f32 %v5633_v29, %v5614_v18  ;;  %v4872_v58 = vmul.f32 %v9801_v2, %v11678_v46  ;;  %v4873_v31 = vmul.f32 %v10163_v14, %v11678_v46  ;;  %v4936_v8 = vmul.f32 %v10163_v14, %v11679_v51 }
 0xfdf   :  { %v4965_v18 = vmul.f32 %v10163_v14, %v11680_v54  ;;  %v5658_v44 = vsel %vm4110_vm9, %v5656_v33, %v5657_v3  ;;  %v5660_v45 = vsel %vm4110_vm9, %v5657_v3, %v5659_v37  ;;  %v5662_v60 = vsel %vm4110_vm9, %v5659_v37, %v5661_v62 }
 0xfe0   :  { %v4891_v41 = vrot.slane %v4878_v27, 1  ;;  %v5670_v47 = vadd.f32 %v5658_v44, %v5641_v20  ;;  %v5671_v2 = vadd.f32 %v5660_v45, %v5642_v35  ;;  %v5672_v29 = vadd.f32 %v5662_v60, %v5643_v7 }
 0xfe1   :  { %v4920_v63 = vrot.slane %v4907_v1, 2  ;;  %v11681_v46 = vrot.slane %v9821_v22, 1  ;;  %v4949_v50 = vrot.slane %v4936_v8, 3  ;;  %v4994_v33 = vmul.f32 %v10163_v14, %v8779_v55 }
 0xfe2   :  { %v4902_v51 = vadd.f32 %v4891_v41, %v4873_v31  ;;  %5675 = vst.msk [vmem:[#allocation4 + $0x1f] sm:$0xfe] %vm4854_vm11, %v5670_v47  ;;  %v11682_v20 = vrot.slane %v9826_v21, 2  ;;  %v4978_v22 = vrot.slane %v4965_v18, 4  ;;  %v5023_v37 = vmul.f32 %v10163_v14, %v11562_v36 }
 0xfe3   :  { %v4892_v48 = vsel %vm3940_vm4, %v11681_v46, %v4891_v41  ;;  %5676 = vst.msk [vmem:[#allocation4 + $0x27] sm:$0xff] %vm410_vm1, %v5671_v2  ;;  %5677 = vst.msk [vmem:[#allocation4 + $0x2f] sm:$0xff] %vm410_vm1, %v5672_v29  ;;  %v11683_v1 = vrot.slane %v9831_v5, 3  ;;  %v5007_v8 = vrot.slane %v4994_v33, 5  ;;  %v5051_v54 = vmul.f32 %v10163_v14, %v11574_v0 }
 0xfe4   :  { %v4901_v3 = vadd.f32 %v4892_v48, %v4872_v58  ;;  %v4921_v35 = vsel %vm3974_vm5, %v11682_v20, %v4920_v63  ;;  %v4931_v7 = vadd.f32 %v4920_v63, %v4902_v51  ;;  %v11684_v21 = vrot.slane %v9836_v4, 4 }
 0xfe5   :  { %v4950_v55 = vsel %vm4008_vm6, %v11683_v1, %v4949_v50  ;;  %v5036_v18 = vrot.slane %v5023_v37, 6  ;;  %v11685_v47 = vrot.slane %v10112_v56, 5  ;;  %v5087_v29 = vmul.f32 %v10336_v26, %v11582_v43 }
 0xfe6   :  { %v4930_v27 = vadd.f32 %v4921_v35, %v4901_v3  ;;  %v4960_v31 = vadd.f32 %v4949_v50, %v4931_v7  ;;  %v4979_v44 = vsel %vm4042_vm7, %v11684_v21, %v4978_v22  ;;  %v5061_v50 = vrot.slane %v5051_v54, 7 }
 0xfe7   :  { %v5008_v5 = vsel %vm4076_vm8, %v11685_v47, %v5007_v8  ;;  %v11686_v46 = vrot.slane %v10130_v38, 6  ;;  %v5116_v56 = vmul.f32 %v10336_v26, %v11592_v19  ;;  %v5077_v20 = vmul.f32 %v10336_v26, %v8871_v30 }
 0xfe8   :  { %v4959_v58 = vadd.f32 %v4950_v55, %v4930_v27  ;;  %v4989_v45 = vadd.f32 %v4978_v22, %v4960_v31  ;;  %v5100_v38 = vrot.slane %v5087_v29, 1  ;;  %v5145_v22 = vmul.f32 %v10336_v26, %v11597_v23 }
 0xfe9   :  { %v5037_v48 = vsel %vm4110_vm9, %v11686_v46, %v5036_v18  ;;  %v5076_v19 = vmul.f32 %v10163_v14, %v8871_v30  ;;  %v5129_v1 = vrot.slane %v5116_v56, 2  ;;  %v5174_v55 = vmul.f32 %v10336_v26, %v11612_v17 }
 0xfea   :  { %v4988_v60 = vadd.f32 %v4979_v44, %v4959_v58  ;;  %v5684_v41 = vld [vmem:[#allocation4 + $0x20] sm:$0xff]  ;;  %v5685_v36 = vld [vmem:[#allocation4 + $0x28] sm:$0xff]  ;;  %v5018_v2 = vadd.f32 %v5007_v8, %v4989_v45  ;;  %v11688_v8 = vrot.slane %v10191_v24, 1  ;;  %v5158_v58 = vrot.slane %v5145_v22, 3 }
 0xfeb   :  { %v10586_v0 = vadd.f32 %v10159_v11, %v5684_v41  ;;  %v10589_v4 = vadd.f32 %v10159_v11, %v5685_v36  ;;  %v11687_v11 = vrot.slane %v10154_v59, 7  ;;  %v5203_v59 = vmul.f32 %v10336_v26, %v11617_v13 }
 0xfec   :  { %v5017_v63 = vadd.f32 %v5008_v5, %v4988_v60  ;;  %v5047_v51 = vadd.f32 %v5036_v18, %v5018_v2  ;;  %v5101_v54 = vsel %vm3940_vm4, %v11688_v8, %v5100_v38  ;;  %v11689_v44 = vrot.slane %v10217_v39, 2 }
 0xfed   :  { %v6058_v33 = vmul.f32 -1.442695, %v10586_v0  ;;  %v6059_v3 = vmul.f32 -1.442695, %v10589_v4  ;;  %v5062_v35 = vsel %vm4142_vm10, %v11687_v11, %v5061_v50  ;;  %v5187_v45 = vrot.slane %v5174_v55, 4 }
 0xfee   :  { %v5046_v43 = vadd.f32 %v5037_v48, %v5017_v63  ;;  %v5072_v7 = vadd.f32 %v5061_v50, %v5047_v51  ;;  %v5130_v30 = vsel %vm3974_vm5, %v11689_v44, %v5129_v1  ;;  %v5232_v17 = vmul.f32 %v10336_v26, %v11629_v16 }
 0xfef   :  { %6715 = vpow2.f32 %v6058_v33  ;;  %v5216_v60 = vrot.slane %v5203_v59, 5  ;;  %v11690_v13 = vrot.slane %v10227_v10, 3  ;;  %v5260_v36 = vmul.f32 %v10336_v26, %v11636_v28  ;;  %v6754_v33 = vld [vmem:[#allocation5 + $0x70] sm:$0xff] }
 0xff0   :  { %v5071_v37 = vadd.f32 %v5062_v35, %v5046_v43  ;;  %6717 = vpow2.f32 %v6059_v3  ;;  %v5082_v27 = vadd.f32 %v5077_v20, %v5072_v7  ;;  %v11691_v39 = vrot.slane %v10267_v40, 4 }
 0xff1   :  { %v5159_v24 = vsel %vm4008_vm6, %v11690_v13, %v5158_v58  ;;  %v5245_v50 = vrot.slane %v5232_v17, 6  ;;  %v11692_v16 = vrot.slane %v10283_v57, 5  ;;  %v5270_v56 = vrot.slane %v5260_v36, 7 }
 0xff2   :  { %v5081_v31 = vadd.f32 %v5076_v19, %v5071_v37  ;;  %v5111_v23 = vadd.f32 %v5100_v38, %v5082_v27  ;;  %v5188_v5 = vsel %vm4042_vm7, %v11691_v39, %v5187_v45  ;;  %v5296_v28 = vmul.f32 %v6754_v33, %v11644_v53  ;;  %v11703_v39 = vld [vmem:[#allocation52_spill] sm:$0xff] }
 0xff3   :  { %v5217_v46 = vsel %vm4076_vm8, %v11692_v16, %v5216_v60  ;;  %v5286_v40 = vmul.f32 %v6754_v33, %v11389_v34  ;;  %v11693_v20 = vrot.slane %v10311_v42, 6  ;;  %v5325_v57 = vmul.f32 %v6754_v33, %v11646_v15  ;;  %v11695_v15 = vld [vmem:[#allocation28_spill] sm:$0xff] }
 0xff4   :  { %v5110_v21 = vadd.f32 %v5101_v54, %v5081_v31  ;;  %v5140_v14 = vadd.f32 %v5129_v1, %v5111_v23  ;;  %v11694_v38 = vrot.slane %v10334_v9, 7  ;;  %v5309_v53 = vrot.slane %v5296_v28, 1  ;;  %v11696_v54 = vld [vmem:[#allocation79_spill] sm:$0xff] }
 0xff5   :  { %v5246_v11 = vsel %vm4110_vm9, %v11693_v20, %v5245_v50  ;;  %v5354_v19 = vmul.f32 %v6754_v33, %v11648_v49  ;;  %v5285_v1 = vmul.f32 %v10336_v26, %v11389_v34  ;;  %v5383_v42 = vmul.f32 %v6754_v33, %v11650_v12  ;;  %v11698_v49 = vld [vmem:[#allocation29_spill] sm:$0xff]  ;;  %v4868_v12 = vld [vmem:[#allocation5 + $0x78] sm:$0xff] }
 0xff6   :  { %v5139_v18 = vadd.f32 %v5130_v30, %v5110_v21  ;;  %v5169_v41 = vadd.f32 %v5158_v58, %v5140_v14  ;;  %v5271_v22 = vsel %vm4142_vm10, %v11694_v38, %v5270_v56  ;;  %v5338_v31 = vrot.slane %v5325_v57, 2 }
 0xff7   :  { %v5412_v8 = vmul.f32 %v6754_v33, %v11695_v15  ;;  %v11697_v23 = vrot.slane %v11696_v54, 1  ;;  %v5367_v21 = vrot.slane %v5354_v19, 3  ;;  %v5396_v30 = vrot.slane %v5383_v42, 4  ;;  %v11713_v42 = vld [vmem:[#allocation22_spill] sm:$0xff]  ;;  %v11714_v15 = vld [vmem:[#allocation77_spill] sm:$0xff] }
 0xff8   :  { %v5168_v47 = vadd.f32 %v5159_v24, %v5139_v18  ;;  %v5198_v2 = vadd.f32 %v5187_v45, %v5169_v41  ;;  %v5441_v14 = vmul.f32 %v6754_v33, %v11698_v49  ;;  %v11699_v45 = vld [vmem:[#allocation16_spill] sm:$0xff]  ;;  %v11701_v24 = vld [vmem:[#allocation30_spill] sm:$0xff] }
 0xff9   :  { %v6716_v29 = vpop.eup %6715  ;;  %v5310_v9 = vsel %vm3940_vm4, %v11697_v23, %v5309_v53  ;;  %v11700_v17 = vrot.slane %v11699_v45, 2  ;;  %v11702_v41 = vrot.slane %v11701_v24, 3 }
 0xffa   :  { %v5197_v63 = vadd.f32 %v5188_v5, %v5168_v47  ;;  %v6718_v10 = vpop.eup %6717  ;;  %v5731_v48 = vadd.f32 1.0, %v6716_v29  ;;  %v5227_v51 = vadd.f32 %v5216_v60, %v5198_v2  ;;  %v5425_v60 = vrot.slane %v5412_v8, 5  ;;  %v11704_v29 = vld [vmem:[#allocation23_spill] sm:$0xff] }
 0xffb   :  { %v5732_v3 = vadd.f32 1.0, %v6718_v10  ;;  %v5339_v34 = vsel %vm3974_vm5, %v11700_v17, %v5338_v31  ;;  %v5368_v36 = vsel %vm4008_vm6, %v11702_v41, %v5367_v21  ;;  %v5469_v5 = vmul.f32 %v6754_v33, %v11703_v39  ;;  %v11719_v41 = vld [vmem:[#allocation102_spill] sm:$0xff] }
 0xffc   :  { %v5226_v43 = vadd.f32 %v5217_v46, %v5197_v63  ;;  %6719 = vrcp.f32 %v5731_v48  ;;  %v5256_v35 = vadd.f32 %v5245_v50, %v5227_v51  ;;  %v11705_v63 = vrot.slane %v11704_v29, 4 }
 0xffd   :  { %6721 = vrcp.f32 %v5732_v3  ;;  %v5454_v46 = vrot.slane %v5441_v14, 6  ;;  %v5479_v57 = vrot.slane %v5469_v5, 7  ;;  %v11715_v8 = vrot.slane %v11714_v15, 7  ;;  %v11725_v15 = vld [vmem:[#allocation64_spill] sm:$0xff] }
 0xffe   :  { %v5255_v7 = vadd.f32 %v5246_v11, %v5226_v43  ;;  %v5281_v37 = vadd.f32 %v5270_v56, %v5256_v35  ;;  %v5397_v16 = vsel %vm4042_vm7, %v11705_v63, %v5396_v30  ;;  %v11706_v56 = vld [vmem:[#allocation17_spill] sm:$0xff]  ;;  %v11707_v43 = vld [vmem:[#allocation20_spill] sm:$0xff]  ;;  %v5621_v17 = vmul.f32 %v4868_v12, %v11667_v25 }
 0xfff   :  { %v5505_v28 = vmul.f32 %v4868_v12, %v11706_v56  ;;  %v5480_v54 = vsel %vm4142_vm10, %v11715_v8, %v5479_v57 }
0x1000   :  { %v5280_v27 = vadd.f32 %v5271_v22, %v5255_v7  ;;  %v5291_v55 = vadd.f32 %v5286_v40, %v5281_v37  ;;  %v11708_v40 = vrot.slane %v11707_v43, 5  ;;  %v11709_v7 = vld [vmem:[#allocation21_spill] sm:$0xff]  ;;  %v11710_v37 = vld [vmem:[#allocation38_spill] sm:$0xff]  ;;  %v5634_v39 = vrot.slane %v5621_v17, 5 }
0x1001   :  { %v5534_v38 = vmul.f32 %v4868_v12, %v11709_v7 }
0x1002   :  { %v5290_v59 = vadd.f32 %v5285_v1, %v5280_v27  ;;  %v5320_v58 = vadd.f32 %v5309_v53, %v5291_v55  ;;  %v5426_v20 = vsel %vm4076_vm8, %v11708_v40, %v5425_v60  ;;  %v5495_v53 = vmul.f32 %v4868_v12, %v11710_v37 }
0x1003   :  { %v5518_v1 = vrot.slane %v5505_v28, 1  ;;  %v5563_v55 = vmul.f32 %v4868_v12, %v11713_v42 }
0x1004   :  { %v5319_v44 = vadd.f32 %v5310_v9, %v5290_v59  ;;  %v5349_v26 = vadd.f32 %v5338_v31, %v5320_v58  ;;  %v5494_v59 = vmul.f32 %v6754_v33, %v11710_v37  ;;  %v5547_v9 = vrot.slane %v5534_v38, 2 }
0x1005   :  { %v5592_v58 = vmul.f32 %v4868_v12, %v11664_v61  ;;  %v5576_v45 = vrot.slane %v5563_v55, 3  ;;  %v11718_v33 = vrot.slane %v11665_v52, 2 }
0x1006   :  { %v5348_v18 = vadd.f32 %v5339_v34, %v5319_v44  ;;  %v6720_v13 = vpop.eup %6719  ;;  %v5378_v47 = vadd.f32 %v5367_v21, %v5349_v26 }
0x1007   :  { %v6722_v2 = vpop.eup %6721  ;;  %v5755_v10 = vmul.f32 %v6720_v13, %v10586_v0  ;;  %v11711_v0 = vld [vmem:[#allocation53_spill] sm:$0xff]  ;;  %v5650_v13 = vmul.f32 %v4868_v12, %v11672_v6 }
0x1008   :  { %v5377_v50 = vadd.f32 %v5368_v36, %v5348_v18  ;;  %v5756_v48 = vmul.f32 %v6722_v2, %v10589_v4  ;;  %v5407_v51 = vadd.f32 %v5396_v30, %v5378_v47  ;;  %v11712_v4 = vrot.slane %v11711_v0, 6  ;;  %v11716_v30 = vld [vmem:[#allocation25_spill] sm:$0xff] }
0x1009   :  { %v11717_v49 = vrot.slane %v11716_v30, 1  ;;  %v5548_v18 = vsel %vm3974_vm5, %v11718_v33, %v5547_v9  ;;  %v11720_v36 = vrot.slane %v11719_v41, 3  ;;  %v5663_v63 = vrot.slane %v5650_v13, 6 }
0x100a   :  { %v5406_v3 = vadd.f32 %v5397_v16, %v5377_v50  ;;  %v5761_v11 = vpack.c.bf16 %v5756_v48, %v5755_v10  ;;  %v5436_v35 = vadd.f32 %v5425_v60, %v5407_v51  ;;  %v5455_v19 = vsel %vm4110_vm9, %v11712_v4, %v5454_v46  ;;  %v11721_v50 = vld [vmem:[#allocation103_spill] sm:$0xff] }
0x100b   :  { %v5519_v14 = vsel %vm3940_vm4, %v11717_v49, %v5518_v1  ;;  %v5605_v60 = vrot.slane %v5592_v58, 4  ;;  %v5577_v47 = vsel %vm4008_vm6, %v11720_v36, %v5576_v45  ;;  %v11722_v25 = vrot.slane %v11721_v50, 4  ;;  %v11728_v49 = vld [vmem:[#allocation61_spill] sm:$0xff] }
0x100c   :  { %v5435_v22 = vadd.f32 %v5426_v20, %v5406_v3  ;;  %6355 = vmatprep.mubr.msk.bf16.mxu1 %vm410_vm1, %v5761_v11  ;;  %v5465_v27 = vadd.f32 %v5454_v46, %v5436_v35  ;;  %v11723_v46 = vld [vmem:[#allocation104_spill] sm:$0xff]  ;;  %v5664_v51 = vsel %vm4110_vm9, %v5661_v62, %v5663_v63  ;;  %v6755_v20 = vld [vmem:[%s10746_s13] ss:$0 sm:$0xff] }
0x100d   :  { %v5606_v29 = vsel %vm4042_vm7, %v11722_v25, %v5605_v60  ;;  %v11724_v10 = vrot.slane %v11723_v46, 5 }
0x100e   :  { %v5464_v31 = vadd.f32 %v5455_v19, %v5435_v22  ;;  %v5490_v23 = vadd.f32 %v5479_v57, %v5465_v27  ;;  %v6062_v27 = vld [vmem:[%s10748_s15] ss:$0 sm:$0xff]  ;;  %s6783_s15 = smov [#allocation6]  }
0x100f   :  { %v5635_v6 = vsel %vm4076_vm8, %v11724_v10, %v5634_v39  ;;  %s5900_s27 = sshll.u32 %s6783_s15, 4  ;;  %s5901_s27 = int_to_ptr.vmem [resolvable:$true] %s5900_s27 }
0x1010   :  { %v5489_v21 = vadd.f32 %v5480_v54, %v5464_v31  ;;  %v5500_v44 = vadd.f32 %v5495_v53, %v5490_v23  ;;  %s6756_s10 = scalar_lea.vmem %s5901_s27, 1024  ;;  %p6761_p1 = scmp.lt.s32.totalorder %s5901_s27, %s5901_s27 }
0x1011   :  { %p6757_p0 = scmp.ne.s32.totalorder %s5901_s27, %s6756_s10  ;;  %p6762_p2 = scmp.lt.s32.totalorder %s6756_s10, %s6756_s10 }
0x1012   :  { %v5499_v34 = vadd.f32 %v5494_v59, %v5489_v21  ;;  %v5529_v26 = vadd.f32 %v5518_v1, %v5500_v44  ;;  %v11727_v44 = vld [vmem:[#allocation57_spill] sm:$0xff] }
0x1013   :  { %p6763_p3 = por %p6762_p2, %p6761_p1 }
0x1014   :  { %v5528_v24 = vadd.f32 %v5519_v14, %v5499_v34  ;;  %v5558_v61 = vadd.f32 %v5547_v9, %v5529_v26  ;;  %v11726_v9 = vld [vmem:[#allocation60_spill] sm:$0xff] }
0x1015   :  { %p6764_p4 = pnand %p6763_p3, %p6757_p0 }
0x1016   :  { %v5557_v5 = vadd.f32 %v5548_v18, %v5528_v24  ;;  %v5587_v2 = vadd.f32 %v5576_v45, %v5558_v61  ;;  %v11729_v18 = vld [vmem:[#allocation69_spill] sm:$0xff]  ;;  %v11730_v61 = vld [vmem:[#allocation67_spill] sm:$0xff] }
0x1018   :  { %v5586_v52 = vadd.f32 %v5577_v47, %v5557_v5  ;;  %v5616_v16 = vadd.f32 %v5605_v60, %v5587_v2  ;;  %v11731_v47 = vld [vmem:[#allocation70_spill] sm:$0xff] }
0x1019   :  { %v11732_v5 = vld [vmem:[#allocation54_spill] sm:$0xff] }
0x101a   :  { %v5615_v12 = vadd.f32 %v5606_v29, %v5586_v52  ;;  %v5645_v48 = vadd.f32 %v5634_v39, %v5616_v16 }
0x101c   :  { %v5644_v56 = vadd.f32 %v5635_v6, %v5615_v12  ;;  %v5674_v28 = vadd.f32 %v5663_v63, %v5645_v48 }
0x101e   :  { %v5673_v3 = vadd.f32 %v5664_v51, %v5644_v56  ;;  %5679 = vst.msk [vmem:[#allocation4 + $0x3f] sm:$0x1] %vm4859_vm12, %v5674_v28 }
0x1020   :  { %5678 = vst.msk [vmem:[#allocation4 + $0x37] sm:$0xff] %vm410_vm1, %v5673_v3 }
0x1027   :  { %v5686_v43 = vld [vmem:[#allocation4 + $0x30] sm:$0xff]  ;;  %v5687_v40 = vld [vmem:[#allocation4 + $0x38] sm:$0xff] }
0x1028   :  { %v5701_v11 = vadd.f32 %v6755_v20, %v5686_v43  ;;  %v5702_v35 = vadd.f32 %v6755_v20, %v5687_v40 }
0x102a   :  { %v6060_v57 = vmul.f32 -1.442695, %v5701_v11  ;;  %v6061_v7 = vmul.f32 -1.442695, %v5702_v35 }
0x102c   :  { %6723 = vpow2.f32 %v6060_v57 }
0x102d   :  { %6725 = vpow2.f32 %v6061_v7 }
0x1036   :  { %v6724_v32 = vpop.eup %6723 }
0x1037   :  { %v6726_v62 = vpop.eup %6725  ;;  %v5733_v38 = vadd.f32 1.0, %v6724_v32 }
0x1038   :  { %v5734_v22 = vadd.f32 1.0, %v6726_v62 }
0x1039   :  { %6727 = vrcp.f32 %v5733_v38 }
0x103a   :  { %6729 = vrcp.f32 %v5734_v22 }
0x1043   :  { %v6728_v37 = vpop.eup %6727 }
0x1044   :  { %v6730_v53 = vpop.eup %6729  ;;  %v5757_v0 = vmul.f32 %v6728_v37, %v5701_v11 }
0x1045   :  { %v5758_v4 = vmul.f32 %v6730_v53, %v5702_v35 }
0x1047   :  { %v5762_v19 = vpack.c.bf16 %v5758_v4, %v5757_v0 }
0x1049   :  { %6356 = vmatmul.mubr.msk.bf16.gmra.mrb[124].mxu1 %vm410_vm1, %v5762_v19 }
0x10aa   :  { %v6353_v1 = vpop.f32.mrb[120].mxu1 }
0x10ab   :  { %v5857_v42 = vadd.f32 %v6353_v1, %v6062_v27  ;;  %v5848_v55 = vpop.f32.mrb[121].mxu1 }
0x10ac   :  { %v5849_v31 = vadd.f32 %v6062_v27, %v5848_v55  ;;  %v6354_v59 = vpop.f32.mrb[122].mxu1 }
0x10ad   :  { %v5881_v8 = vadd.f32 %v5857_v42, %v11725_v15  ;;  %v5860_v54 = vadd.f32 %v6354_v59, %v6062_v27  ;;  %v5851_v23 = vpop.f32.mrb[123].mxu1 }
0x10ae   :  { %v5879_v58 = vadd.f32 %v5849_v31, %v11726_v9  ;;  %v5852_v21 = vadd.f32 %v6062_v27, %v5851_v23 }
0x10af   :  { %5889 = vst.msk [vmem:[#allocation6 + $0x10] sm:$0xff] %vm63_vm0, %v5881_v8  ;;  %v5882_v30 = vadd.f32 %v5860_v54, %v11727_v44 }
0x10b0   :  { %5887 = vst.msk [vmem:[#allocation6] sm:$0xff] %vm63_vm0, %v5879_v58  ;;  %v5880_v14 = vadd.f32 %v5852_v21, %v11728_v49 }
0x10b1   :  { %5890 = vst.msk [vmem:[#allocation6 + $0x18] sm:$0xff] %vm63_vm0, %v5882_v30 }
0x10b2   :  { %5888 = vst.msk [vmem:[#allocation6 + $0x8] sm:$0xff] %vm63_vm0, %v5880_v14 }
0x111c   :  { %v6357_v45 = vpop.f32.mrb[124].mxu1 }
0x111d   :  { %v5873_v17 = vadd.f32 %v6357_v45, %v6062_v27  ;;  %v5864_v34 = vpop.f32.mrb[125].mxu1 }
0x111e   :  { %v5865_v26 = vadd.f32 %v6062_v27, %v5864_v34  ;;  %v6358_v33 = vpop.f32.mrb[126].mxu1 }
0x111f   :  { %v5885_v60 = vadd.f32 %v5873_v17, %v11729_v18  ;;  %v5876_v13 = vadd.f32 %v6358_v33, %v6062_v27  ;;  %v5867_v24 = vpop.f32.mrb[127].mxu1 }
0x1120   :  { %v5883_v41 = vadd.f32 %v5865_v26, %v11730_v61  ;;  %v5868_v36 = vadd.f32 %v6062_v27, %v5867_v24 }
0x1121   :  { %5893 = vst.msk [vmem:[#allocation6 + $0x30] sm:$0xff] %vm63_vm0, %v5885_v60  ;;  %v5886_v39 = vadd.f32 %v5876_v13, %v11731_v47 }
0x1122   :  { %5891 = vst.msk [vmem:[#allocation6 + $0x20] sm:$0xff] %vm63_vm0, %v5883_v41  ;;  %v5884_v2 = vadd.f32 %v5868_v36, %v11732_v5 }
0x1123   :  { %5894 = vst.msk [vmem:[#allocation6 + $0x38] sm:$0xff] %vm63_vm0, %v5886_v39 }
0x1124   :  { %5892 = vst.msk [vmem:[#allocation6 + $0x28] sm:$0xff] %vm63_vm0, %v5884_v2 }
0x1125   :  { %6767 = shalt.err (!%p6764_p4)
}
0x1126   :  { %s6768_s30 = scalar_lea.hbm %s10749_s16, 1024 }
0x1127   :  { %p6769_p5 = scmp.ne.s32.totalorder %s10749_s16, %s6768_s30  ;;  %p6772_p6 = scmp.lt.u32.totalorder %s6768_s30, %s10749_s16 }
0x1129   :  { %p6774_p7 = pnand %p6772_p6, %p6769_p5 }
0x112b   :  { %6777 = shalt.err (!%p6774_p7)
}
0x112c   :  { %s6784_s0 = smov 128   ;;  %s6785_s5 = smov 8  }
0x112d   :  { %5906 = dma.vmem_to_hbm [thread:$0]  %s5901_s27, 1024, %s10749_s16, [#allocation7], %s6784_s0, %s6784_s0, %s6785_s5  }
0x112e   :  { %6778 = dma.done.wait [#allocation7], 1024  }
0x112f   :  { %6779 = vsyncadd [#allocation7], 4294966272 }
0x1130   :  { %5910 = vsyncpa [#allocation7], 1 }

</bundles_post_ra>
